<compile_context>
chip_gen: v7x
topology: tpu7x:2x2x1
jax: 0.10.0
libtpu: 0.0.40
codegen_flags: <defaults>
</compile_context>

<pallas_src>
import functools

import jax
import jax.numpy as jnp
from jax.experimental import pallas as pl
from jax.experimental.pallas import tpu as pltpu


COMPUTE_DTYPE = jnp.bfloat16  # MXU operand dtype (f32 accumulation everywhere)


# ----------------------------------------------------------------------------
# math helpers (shared by the kernel and the pure-JAX reference where noted)
# ----------------------------------------------------------------------------
def _layernorm(x, g, b, eps=1e-5):
    mu = jnp.mean(x, axis=-1, keepdims=True)
    var = jnp.mean(jnp.square(x - mu), axis=-1, keepdims=True)
    return (x - mu) * jax.lax.rsqrt(var + eps) * g + b


def _gelu_tanh(x):
    # tanh-approximate GELU: EUP tanh instead of a ~10-op VALU erf polynomial.
    c = 0.7978845608028654  # sqrt(2/pi)
    return 0.5 * x * (1.0 + jnp.tanh(c * (x + 0.044715 * x * x * x)))


def _geglu_ff(x_f32, w1, b1, w2, b2, inner):
    # FeedForward w/ GEGLU: proj -> (hidden, gate) -> hidden*gelu(gate) -> proj
    # matmul operands in bf16 (weights already bf16), accumulate in f32.
    p = jnp.dot(x_f32.astype(w1.dtype), w1, preferred_element_type=jnp.float32) + b1
    hid = p[:, :inner]
    gate = p[:, inner:]
    h = hid * _gelu_tanh(gate)
    return jnp.dot(h.astype(w2.dtype), w2, preferred_element_type=jnp.float32) + b2


# ----------------------------------------------------------------------------
# Pallas kernel: whole block forward for a tile of (block_n, num_frames, C)
# ----------------------------------------------------------------------------
def temporal_block_kernel(
    x_ref,
    nin_g, nin_b,
    fin_w1, fin_b1, fin_w2, fin_b2,
    n1_g, n1_b,
    wq, wk, wv, wo, bo,
    n3_g, n3_b,
    ff_w1, ff_b1, ff_w2, ff_b2,
    o_ref,
    *, num_heads, head_dim, ffin_inner, ff_inner,
):
    bn, F, C = x_ref.shape
    A = num_heads * head_dim
    R = bn * F

    x = x_ref[...].astype(jnp.float32).reshape(R, C)

    # --- norm_in + ff_in (GEGLU) + residual (is_res == True) ---
    h = _layernorm(x, nin_g[...], nin_b[...])
    h = _geglu_ff(h, fin_w1[...], fin_b1[...], fin_w2[...], fin_b2[...], ffin_inner) + x

    # --- norm1 + temporal self-attention (softmax over the `frames` axis) ---
    n = _layernorm(h, n1_g[...], n1_b[...]).astype(COMPUTE_DTYPE)
    q = jnp.dot(n, wq[...], preferred_element_type=jnp.float32).reshape(bn, F, A)
    k = jnp.dot(n, wk[...], preferred_element_type=jnp.float32).reshape(bn, F, A)
    v = jnp.dot(n, wv[...], preferred_element_type=jnp.float32).reshape(bn, F, A)

    scale = 1.0 / (head_dim ** 0.5)
    head_outs = []
    for hi in range(num_heads):  # small, unrolled; einsums use the proven leading-batch form
        sl = slice(hi * head_dim, (hi + 1) * head_dim)
        qh = q[:, :, sl].astype(COMPUTE_DTYPE)
        kh = k[:, :, sl].astype(COMPUTE_DTYPE)
        vh = v[:, :, sl].astype(COMPUTE_DTYPE)
        s = jnp.einsum("bqd,bkd->bqk", qh, kh,
                       preferred_element_type=jnp.float32) * scale
        s = s - jnp.max(s, axis=-1, keepdims=True)
        e = jnp.exp(s)
        p = e * pl.reciprocal(jnp.sum(e, axis=-1, keepdims=True), approx=True)
        head_outs.append(
            jnp.einsum("bqk,bkd->bqd", p.astype(COMPUTE_DTYPE), vh,
                       preferred_element_type=jnp.float32))
    attn = jnp.concatenate(head_outs, axis=-1).reshape(R, A)
    attn = jnp.dot(attn.astype(COMPUTE_DTYPE), wo[...],
                   preferred_element_type=jnp.float32) + bo[...]
    h = attn + h

    # --- norm3 + ff (GEGLU) + residual ---
    nf = _layernorm(h, n3_g[...], n3_b[...])
    h = _geglu_ff(nf, ff_w1[...], ff_b1[...], ff_w2[...], ff_b2[...], ff_inner) + h

    o_ref[...] = h.reshape(bn, F, C).astype(o_ref.dtype)


# ----------------------------------------------------------------------------
# wrapper: layout handling + pallas_call
# ----------------------------------------------------------------------------
_W_NAMES = [
    "nin_g", "nin_b",
    "fin_w1", "fin_b1", "fin_w2", "fin_b2",
    "n1_g", "n1_b",
    "wq", "wk", "wv", "wo", "bo",
    "n3_g", "n3_b",
    "ff_w1", "ff_b1", "ff_w2", "ff_b2",
]


def _pick_block_n(n_rows, target):
    """Largest divisor of n_rows that is <= target (keeps the grid exact, MXU rows big)."""
    target = max(1, min(target, n_rows))
    for d in range(target, 0, -1):
        if n_rows % d == 0:
            return d
    return 1


def temporal_basic_transformer_block(hidden_states, params, num_frames,
                                     num_heads, head_dim, block_n=256,
                                     vmem_limit_bytes=48 * 1024 * 1024):
    BF, S, C = hidden_states.shape
    F = num_frames
    B = BF // F
    N = B * S
    A = num_heads * head_dim
    bn = _pick_block_n(N, block_n)

    # (B*F, S, C) -> (B, F, S, C) -> (B, S, F, C) -> (B*S, F, C)
    x = hidden_states.reshape(B, F, S, C).transpose(0, 2, 1, 3).reshape(N, F, C)

    ffin_inner = params["fin_w2"].shape[0]
    ff_inner = params["ff_w2"].shape[0]
    ws = [params[n] for n in _W_NAMES]

    def w_spec(a):
        nd = a.ndim
        return pl.BlockSpec(a.shape, lambda i, _nd=nd: (0,) * _nd)

    kern = functools.partial(
        temporal_block_kernel,
        num_heads=num_heads, head_dim=head_dim,
        ffin_inner=ffin_inner, ff_inner=ff_inner,
    )

    # Advisory cost estimate so XLA schedules the surrounding reshapes around the call.
    rows = N * F
    flops = rows * (6 * C * ffin_inner + 6 * C * ff_inner + 8 * C * A + 4 * F * A)
    transcendentals = rows * (ffin_inner + ff_inner + F * num_heads)
    bytes_accessed = (2 * x.size * x.dtype.itemsize
                      + sum(int(w.size) * w.dtype.itemsize for w in ws))
    cost = pl.CostEstimate(flops=int(flops),
                           transcendentals=int(transcendentals),
                           bytes_accessed=int(bytes_accessed))

    out = pl.pallas_call(
        kern,
        out_shape=jax.ShapeDtypeStruct((N, F, C), hidden_states.dtype),
        grid=(N // bn,),
        in_specs=[pl.BlockSpec((bn, F, C), lambda i: (i, 0, 0))]
                 + [w_spec(a) for a in ws],
        out_specs=pl.BlockSpec((bn, F, C), lambda i: (i, 0, 0)),
        compiler_params=pltpu.CompilerParams(
            dimension_semantics=("parallel",),
            vmem_limit_bytes=vmem_limit_bytes),
        cost_estimate=cost,
    )(x, *ws)

    # (B*S, F, C) -> (B, S, F, C) -> (B, F, S, C) -> (B*F, S, C)
    return out.reshape(B, S, F, C).transpose(0, 2, 1, 3).reshape(B * F, S, C)


# ----------------------------------------------------------------------------
# pure-JAX reference (f32, exact erf GELU) mirroring the PyTorch module semantics
# ----------------------------------------------------------------------------
def reference_forward(hidden_states, params, num_frames, num_heads, head_dim):
    BF, S, C = hidden_states.shape
    F = num_frames
    B = BF // F
    A = num_heads * head_dim
    f32 = lambda a: a.astype(jnp.float32)
    ffin_inner = params["fin_w2"].shape[0]
    ff_inner = params["ff_w2"].shape[0]

    def gelu_exact(t):
        return 0.5 * t * (1.0 + jax.lax.erf(t * 0.7071067811865476))

    def geglu(h, w1, b1, w2, b2, inner):
        p = h @ f32(w1) + f32(b1)
        return (p[:, :inner] * gelu_exact(p[:, inner:])) @ f32(w2) + f32(b2)

    x3 = hidden_states.reshape(B, F, S, C).transpose(0, 2, 1, 3).reshape(B * S, F, C)
    x = f32(x3.reshape(B * S * F, C))

    h = _layernorm(x, f32(params["nin_g"]), f32(params["nin_b"]))
    h = geglu(h, params["fin_w1"], params["fin_b1"],
              params["fin_w2"], params["fin_b2"], ffin_inner) + x

    n = _layernorm(h, f32(params["n1_g"]), f32(params["n1_b"]))
    q = (n @ f32(params["wq"])).reshape(B * S, F, num_heads, head_dim)
    k = (n @ f32(params["wk"])).reshape(B * S, F, num_heads, head_dim)
    v = (n @ f32(params["wv"])).reshape(B * S, F, num_heads, head_dim)
    scale = 1.0 / (head_dim ** 0.5)
    s = jnp.einsum("bqhd,bkhd->bhqk", q, k) * scale
    a = jax.nn.softmax(s, axis=-1)
    o = jnp.einsum("bhqk,bkhd->bqhd", a, v).reshape(B * S * F, A)
    o = o @ f32(params["wo"]) + f32(params["bo"])
    h = o + h

    n = _layernorm(h, f32(params["n3_g"]), f32(params["n3_b"]))
    h = geglu(n, params["ff_w1"], params["ff_b1"],
              params["ff_w2"], params["ff_b2"], ff_inner) + h

    out = h.reshape(B, S, F, C).transpose(0, 2, 1, 3).reshape(B * F, S, C)
    return out.astype(hidden_states.dtype)


# ----------------------------------------------------------------------------
# deterministic parameter init (shapes from TemporalBasicTransformerBlock.__init__)
# ----------------------------------------------------------------------------
def init_params(key, dim, time_mix_inner_dim, num_heads, head_dim,
                wdtype=jnp.bfloat16):
    assert dim == time_mix_inner_dim  # is_res path
    T = time_mix_inner_dim
    A = num_heads * head_dim
    ffin_inner = 4 * dim     # FeedForward(dim, dim_out=T), GEGLU -> inner = 4*dim
    ff_inner = 4 * T         # FeedForward(T), GEGLU -> inner = 4*T

    keys = jax.random.split(key, 16)
    scale = 0.05

    def wmat(k, shape):
        return (jax.random.normal(k, shape, jnp.float32) * scale).astype(wdtype)

    def bias(k, shape):
        return jax.random.normal(k, shape, jnp.float32) * scale * 0.1

    params = {
        # norm_in (LayerNorm(dim))
        "nin_g": jnp.ones((1, dim), jnp.float32),
        "nin_b": jnp.zeros((1, dim), jnp.float32),
        # ff_in: GEGLU proj (dim -> 2*ffin_inner) + out proj (ffin_inner -> T)
        "fin_w1": wmat(keys[0], (dim, 2 * ffin_inner)),
        "fin_b1": bias(keys[1], (1, 2 * ffin_inner)),
        "fin_w2": wmat(keys[2], (ffin_inner, T)),
        "fin_b2": bias(keys[3], (1, T)),
        # norm1 (LayerNorm(T))
        "n1_g": jnp.ones((1, T), jnp.float32),
        "n1_b": jnp.zeros((1, T), jnp.float32),
        # attn1: to_q/k/v (T -> A, no bias), to_out (A -> T, bias)
        "wq": wmat(keys[4], (T, A)),
        "wk": wmat(keys[5], (T, A)),
        "wv": wmat(keys[6], (T, A)),
        "wo": wmat(keys[7], (A, T)),
        "bo": bias(keys[8], (1, T)),
        # norm3 (LayerNorm(T))
        "n3_g": jnp.ones((1, T), jnp.float32),
        "n3_b": jnp.zeros((1, T), jnp.float32),
        # ff: GEGLU proj (T -> 2*ff_inner) + out proj (ff_inner -> T)
        "ff_w1": wmat(keys[9], (T, 2 * ff_inner)),
        "ff_b1": bias(keys[10], (1, 2 * ff_inner)),
        "ff_w2": wmat(keys[11], (ff_inner, T)),
        "ff_b2": bias(keys[12], (1, T)),
    }
    return params


if __name__ == "__main__":
    # small config: dim == time_mix_inner_dim == 32, 2 heads of 16, 8 frames
    B, F, S, C = 2, 8, 16, 32
    num_heads, head_dim = 2, 16

    key = jax.random.PRNGKey(0)
    kx, kp = jax.random.split(key)
    hidden_states = jax.random.normal(kx, (B * F, S, C), jnp.float32)
    params = init_params(kp, dim=C, time_mix_inner_dim=C,
                         num_heads=num_heads, head_dim=head_dim)

    out = temporal_basic_transformer_block(
        hidden_states, params, num_frames=F,
        num_heads=num_heads, head_dim=head_dim, block_n=256)
    out = jax.block_until_ready(out)

    ref = reference_forward(hidden_states, params, F, num_heads, head_dim)
    assert out.shape == (B * F, S, C)
    max_err = float(jnp.max(jnp.abs(out - ref)))
    # kernel uses bf16 matmul operands + tanh-GELU + approx reciprocal -> loose tolerance
    assert jnp.allclose(out, ref, atol=2e-2, rtol=2e-2), max_err

    print("KERNEL_OK")
</pallas_src>

<mosaic_0001>
module attributes {stable_mosaic.version = 11 : i64} {
  func.func @temporal_block_kernel(%arg0: i32, %arg1: memref<32x8x32xf32, #tpu.memory_space<vmem>>, %arg2: memref<1x32xf32, #tpu.memory_space<vmem>>, %arg3: memref<1x32xf32, #tpu.memory_space<vmem>>, %arg4: memref<32x256xbf16, #tpu.memory_space<vmem>>, %arg5: memref<1x256xf32, #tpu.memory_space<vmem>>, %arg6: memref<128x32xbf16, #tpu.memory_space<vmem>>, %arg7: memref<1x32xf32, #tpu.memory_space<vmem>>, %arg8: memref<1x32xf32, #tpu.memory_space<vmem>>, %arg9: memref<1x32xf32, #tpu.memory_space<vmem>>, %arg10: memref<32x32xbf16, #tpu.memory_space<vmem>>, %arg11: memref<32x32xbf16, #tpu.memory_space<vmem>>, %arg12: memref<32x32xbf16, #tpu.memory_space<vmem>>, %arg13: memref<32x32xbf16, #tpu.memory_space<vmem>>, %arg14: memref<1x32xf32, #tpu.memory_space<vmem>>, %arg15: memref<1x32xf32, #tpu.memory_space<vmem>>, %arg16: memref<1x32xf32, #tpu.memory_space<vmem>>, %arg17: memref<32x256xbf16, #tpu.memory_space<vmem>>, %arg18: memref<1x256xf32, #tpu.memory_space<vmem>>, %arg19: memref<128x32xbf16, #tpu.memory_space<vmem>>, %arg20: memref<1x32xf32, #tpu.memory_space<vmem>>, %arg21: memref<32x8x32xf32, #tpu.memory_space<vmem>>) attributes {dimension_semantics = [#tpu.dimension_semantics<parallel>], iteration_bounds = array<i64: 1>, scalar_prefetch = 0 : i64, scratch_operands = 0 : i64, tpu.core_type = #tpu.core_type<tc>, window_params = [{transform_indices = @transform_0, window_bounds = array<i64: 32, 8, 32>}, {pipeline_mode = #tpu.pipeline_mode<synchronous>, transform_indices = @transform_1, window_bounds = array<i64: 1, 32>}, {pipeline_mode = #tpu.pipeline_mode<synchronous>, transform_indices = @transform_2, window_bounds = array<i64: 1, 32>}, {pipeline_mode = #tpu.pipeline_mode<synchronous>, transform_indices = @transform_3, window_bounds = array<i64: 32, 256>}, {pipeline_mode = #tpu.pipeline_mode<synchronous>, transform_indices = @transform_4, window_bounds = array<i64: 1, 256>}, {pipeline_mode = #tpu.pipeline_mode<synchronous>, transform_indices = @transform_5, window_bounds = array<i64: 128, 32>}, {pipeline_mode = #tpu.pipeline_mode<synchronous>, transform_indices = @transform_6, window_bounds = array<i64: 1, 32>}, {pipeline_mode = #tpu.pipeline_mode<synchronous>, transform_indices = @transform_7, window_bounds = array<i64: 1, 32>}, {pipeline_mode = #tpu.pipeline_mode<synchronous>, transform_indices = @transform_8, window_bounds = array<i64: 1, 32>}, {pipeline_mode = #tpu.pipeline_mode<synchronous>, transform_indices = @transform_9, window_bounds = array<i64: 32, 32>}, {pipeline_mode = #tpu.pipeline_mode<synchronous>, transform_indices = @transform_10, window_bounds = array<i64: 32, 32>}, {pipeline_mode = #tpu.pipeline_mode<synchronous>, transform_indices = @transform_11, window_bounds = array<i64: 32, 32>}, {pipeline_mode = #tpu.pipeline_mode<synchronous>, transform_indices = @transform_12, window_bounds = array<i64: 32, 32>}, {pipeline_mode = #tpu.pipeline_mode<synchronous>, transform_indices = @transform_13, window_bounds = array<i64: 1, 32>}, {pipeline_mode = #tpu.pipeline_mode<synchronous>, transform_indices = @transform_14, window_bounds = array<i64: 1, 32>}, {pipeline_mode = #tpu.pipeline_mode<synchronous>, transform_indices = @transform_15, window_bounds = array<i64: 1, 32>}, {pipeline_mode = #tpu.pipeline_mode<synchronous>, transform_indices = @transform_16, window_bounds = array<i64: 32, 256>}, {pipeline_mode = #tpu.pipeline_mode<synchronous>, transform_indices = @transform_17, window_bounds = array<i64: 1, 256>}, {pipeline_mode = #tpu.pipeline_mode<synchronous>, transform_indices = @transform_18, window_bounds = array<i64: 128, 32>}, {pipeline_mode = #tpu.pipeline_mode<synchronous>, transform_indices = @transform_19, window_bounds = array<i64: 1, 32>}, {transform_indices = @transform_20, window_bounds = array<i64: 32, 8, 32>}]} {
    %c0 = arith.constant 0 : index
    %c0_0 = arith.constant 0 : index
    %c0_1 = arith.constant 0 : index
    %0 = vector.load %arg1[%c0, %c0_0, %c0_1] : memref<32x8x32xf32, #tpu.memory_space<vmem>>, vector<32x8x32xf32>
    %1 = vector.shape_cast %0 : vector<32x8x32xf32> to vector<256x32xf32>
    %c0_2 = arith.constant 0 : index
    %c0_3 = arith.constant 0 : index
    %2 = vector.load %arg2[%c0_2, %c0_3] : memref<1x32xf32, #tpu.memory_space<vmem>>, vector<1x32xf32>
    %c0_4 = arith.constant 0 : index
    %c0_5 = arith.constant 0 : index
    %3 = vector.load %arg3[%c0_4, %c0_5] : memref<1x32xf32, #tpu.memory_space<vmem>>, vector<1x32xf32>
    %cst = arith.constant dense<0.000000e+00> : vector<256xf32>
    %4 = vector.multi_reduction <add>, %1, %cst [1] : vector<256x32xf32> to vector<256xf32>
    %5 = vector.shape_cast %4 : vector<256xf32> to vector<256x1xf32>
    %cst_6 = arith.constant 3.200000e+01 : f32
    %6 = vector.broadcast %cst_6 : f32 to vector<256x1xf32>
    %7 = arith.divf %5, %6 : vector<256x1xf32>
    %8 = vector.broadcast %7 : vector<256x1xf32> to vector<256x32xf32>
    %9 = arith.subf %1, %8 : vector<256x32xf32>
    %10 = arith.mulf %9, %9 : vector<256x32xf32>
    %cst_7 = arith.constant dense<0.000000e+00> : vector<256xf32>
    %11 = vector.multi_reduction <add>, %10, %cst_7 [1] : vector<256x32xf32> to vector<256xf32>
    %12 = vector.shape_cast %11 : vector<256xf32> to vector<256x1xf32>
    %cst_8 = arith.constant 3.200000e+01 : f32
    %13 = vector.broadcast %cst_8 : f32 to vector<256x1xf32>
    %14 = arith.divf %12, %13 : vector<256x1xf32>
    %15 = vector.broadcast %7 : vector<256x1xf32> to vector<256x32xf32>
    %16 = arith.subf %1, %15 : vector<256x32xf32>
    %cst_9 = arith.constant 9.99999974E-6 : f32
    %17 = vector.broadcast %cst_9 : f32 to vector<256x1xf32>
    %18 = arith.addf %14, %17 : vector<256x1xf32>
    %19 = math.rsqrt %18 : vector<256x1xf32>
    %20 = vector.broadcast %19 : vector<256x1xf32> to vector<256x32xf32>
    %21 = arith.mulf %16, %20 : vector<256x32xf32>
    %22 = vector.broadcast %2 : vector<1x32xf32> to vector<256x32xf32>
    %23 = arith.mulf %21, %22 : vector<256x32xf32>
    %24 = vector.broadcast %3 : vector<1x32xf32> to vector<256x32xf32>
    %25 = arith.addf %23, %24 : vector<256x32xf32>
    %c0_10 = arith.constant 0 : index
    %c0_11 = arith.constant 0 : index
    %26 = vector.load %arg4[%c0_10, %c0_11] : memref<32x256xbf16, #tpu.memory_space<vmem>>, vector<32x256xbf16>
    %c0_12 = arith.constant 0 : index
    %c0_13 = arith.constant 0 : index
    %27 = vector.load %arg5[%c0_12, %c0_13] : memref<1x256xf32, #tpu.memory_space<vmem>>, vector<1x256xf32>
    %c0_14 = arith.constant 0 : index
    %c0_15 = arith.constant 0 : index
    %28 = vector.load %arg6[%c0_14, %c0_15] : memref<128x32xbf16, #tpu.memory_space<vmem>>, vector<128x32xbf16>
    %c0_16 = arith.constant 0 : index
    %c0_17 = arith.constant 0 : index
    %29 = vector.load %arg7[%c0_16, %c0_17] : memref<1x32xf32, #tpu.memory_space<vmem>>, vector<1x32xf32>
    %30 = arith.truncf %25 : vector<256x32xf32> to vector<256x32xbf16>
    %cst_18 = arith.constant dense<0.000000e+00> : vector<256x256xf32>
    %31 = tpu.matmul %30, %26, %cst_18 {dimension_numbers = #tpu.dot_dimension_numbers<[1], [0], [0], [1], [0, 0, 1, 1], [], []>} : vector<256x32xbf16>, vector<32x256xbf16>, vector<256x256xf32> -> vector<256x256xf32>
    %32 = vector.broadcast %27 : vector<1x256xf32> to vector<256x256xf32>
    %33 = arith.addf %31, %32 : vector<256x256xf32>
    %34 = vector.extract_strided_slice %33 {offsets = [0, 0], sizes = [256, 128], strides = [1, 1]} : vector<256x256xf32> to vector<256x128xf32>
    %35 = vector.extract_strided_slice %33 {offsets = [0, 128], sizes = [256, 128], strides = [1, 1]} : vector<256x256xf32> to vector<256x128xf32>
    %cst_19 = arith.constant 5.000000e-01 : f32
    %36 = vector.broadcast %cst_19 : f32 to vector<256x128xf32>
    %37 = arith.mulf %36, %35 : vector<256x128xf32>
    %cst_20 = arith.constant 4.471500e-02 : f32
    %38 = vector.broadcast %cst_20 : f32 to vector<256x128xf32>
    %39 = arith.mulf %38, %35 : vector<256x128xf32>
    %40 = arith.mulf %39, %35 : vector<256x128xf32>
    %41 = arith.mulf %40, %35 : vector<256x128xf32>
    %42 = arith.addf %35, %41 : vector<256x128xf32>
    %cst_21 = arith.constant 0.797884583 : f32
    %43 = vector.broadcast %cst_21 : f32 to vector<256x128xf32>
    %44 = arith.mulf %43, %42 : vector<256x128xf32>
    %45 = math.tanh %44 : vector<256x128xf32>
    %cst_22 = arith.constant 1.000000e+00 : f32
    %46 = vector.broadcast %cst_22 : f32 to vector<256x128xf32>
    %47 = arith.addf %46, %45 : vector<256x128xf32>
    %48 = arith.mulf %37, %47 : vector<256x128xf32>
    %49 = arith.mulf %34, %48 : vector<256x128xf32>
    %50 = arith.truncf %49 : vector<256x128xf32> to vector<256x128xbf16>
    %cst_23 = arith.constant dense<0.000000e+00> : vector<256x32xf32>
    %51 = tpu.matmul %50, %28, %cst_23 {dimension_numbers = #tpu.dot_dimension_numbers<[1], [0], [0], [1], [0, 0, 1, 1], [], []>} : vector<256x128xbf16>, vector<128x32xbf16>, vector<256x32xf32> -> vector<256x32xf32>
    %52 = vector.broadcast %29 : vector<1x32xf32> to vector<256x32xf32>
    %53 = arith.addf %51, %52 : vector<256x32xf32>
    %54 = arith.addf %53, %1 : vector<256x32xf32>
    %c0_24 = arith.constant 0 : index
    %c0_25 = arith.constant 0 : index
    %55 = vector.load %arg8[%c0_24, %c0_25] : memref<1x32xf32, #tpu.memory_space<vmem>>, vector<1x32xf32>
    %c0_26 = arith.constant 0 : index
    %c0_27 = arith.constant 0 : index
    %56 = vector.load %arg9[%c0_26, %c0_27] : memref<1x32xf32, #tpu.memory_space<vmem>>, vector<1x32xf32>
    %cst_28 = arith.constant dense<0.000000e+00> : vector<256xf32>
    %57 = vector.multi_reduction <add>, %54, %cst_28 [1] : vector<256x32xf32> to vector<256xf32>
    %58 = vector.shape_cast %57 : vector<256xf32> to vector<256x1xf32>
    %cst_29 = arith.constant 3.200000e+01 : f32
    %59 = vector.broadcast %cst_29 : f32 to vector<256x1xf32>
    %60 = arith.divf %58, %59 : vector<256x1xf32>
    %61 = vector.broadcast %60 : vector<256x1xf32> to vector<256x32xf32>
    %62 = arith.subf %54, %61 : vector<256x32xf32>
    %63 = arith.mulf %62, %62 : vector<256x32xf32>
    %cst_30 = arith.constant dense<0.000000e+00> : vector<256xf32>
    %64 = vector.multi_reduction <add>, %63, %cst_30 [1] : vector<256x32xf32> to vector<256xf32>
    %65 = vector.shape_cast %64 : vector<256xf32> to vector<256x1xf32>
    %cst_31 = arith.constant 3.200000e+01 : f32
    %66 = vector.broadcast %cst_31 : f32 to vector<256x1xf32>
    %67 = arith.divf %65, %66 : vector<256x1xf32>
    %68 = vector.broadcast %60 : vector<256x1xf32> to vector<256x32xf32>
    %69 = arith.subf %54, %68 : vector<256x32xf32>
    %cst_32 = arith.constant 9.99999974E-6 : f32
    %70 = vector.broadcast %cst_32 : f32 to vector<256x1xf32>
    %71 = arith.addf %67, %70 : vector<256x1xf32>
    %72 = math.rsqrt %71 : vector<256x1xf32>
    %73 = vector.broadcast %72 : vector<256x1xf32> to vector<256x32xf32>
    %74 = arith.mulf %69, %73 : vector<256x32xf32>
    %75 = vector.broadcast %55 : vector<1x32xf32> to vector<256x32xf32>
    %76 = arith.mulf %74, %75 : vector<256x32xf32>
    %77 = vector.broadcast %56 : vector<1x32xf32> to vector<256x32xf32>
    %78 = arith.addf %76, %77 : vector<256x32xf32>
    %79 = arith.truncf %78 : vector<256x32xf32> to vector<256x32xbf16>
    %c0_33 = arith.constant 0 : index
    %c0_34 = arith.constant 0 : index
    %80 = vector.load %arg10[%c0_33, %c0_34] : memref<32x32xbf16, #tpu.memory_space<vmem>>, vector<32x32xbf16>
    %cst_35 = arith.constant dense<0.000000e+00> : vector<256x32xf32>
    %81 = tpu.matmul %79, %80, %cst_35 {dimension_numbers = #tpu.dot_dimension_numbers<[1], [0], [0], [1], [0, 0, 1, 1], [], []>} : vector<256x32xbf16>, vector<32x32xbf16>, vector<256x32xf32> -> vector<256x32xf32>
    %82 = vector.shape_cast %81 : vector<256x32xf32> to vector<32x8x32xf32>
    %c0_36 = arith.constant 0 : index
    %c0_37 = arith.constant 0 : index
    %83 = vector.load %arg11[%c0_36, %c0_37] : memref<32x32xbf16, #tpu.memory_space<vmem>>, vector<32x32xbf16>
    %cst_38 = arith.constant dense<0.000000e+00> : vector<256x32xf32>
    %84 = tpu.matmul %79, %83, %cst_38 {dimension_numbers = #tpu.dot_dimension_numbers<[1], [0], [0], [1], [0, 0, 1, 1], [], []>} : vector<256x32xbf16>, vector<32x32xbf16>, vector<256x32xf32> -> vector<256x32xf32>
    %85 = vector.shape_cast %84 : vector<256x32xf32> to vector<32x8x32xf32>
    %c0_39 = arith.constant 0 : index
    %c0_40 = arith.constant 0 : index
    %86 = vector.load %arg12[%c0_39, %c0_40] : memref<32x32xbf16, #tpu.memory_space<vmem>>, vector<32x32xbf16>
    %cst_41 = arith.constant dense<0.000000e+00> : vector<256x32xf32>
    %87 = tpu.matmul %79, %86, %cst_41 {dimension_numbers = #tpu.dot_dimension_numbers<[1], [0], [0], [1], [0, 0, 1, 1], [], []>} : vector<256x32xbf16>, vector<32x32xbf16>, vector<256x32xf32> -> vector<256x32xf32>
    %88 = vector.shape_cast %87 : vector<256x32xf32> to vector<32x8x32xf32>
    %89 = vector.extract_strided_slice %82 {offsets = [0, 0, 0], sizes = [32, 8, 16], strides = [1, 1, 1]} : vector<32x8x32xf32> to vector<32x8x16xf32>
    %90 = arith.truncf %89 : vector<32x8x16xf32> to vector<32x8x16xbf16>
    %91 = vector.extract_strided_slice %85 {offsets = [0, 0, 0], sizes = [32, 8, 16], strides = [1, 1, 1]} : vector<32x8x32xf32> to vector<32x8x16xf32>
    %92 = arith.truncf %91 : vector<32x8x16xf32> to vector<32x8x16xbf16>
    %93 = vector.extract_strided_slice %88 {offsets = [0, 0, 0], sizes = [32, 8, 16], strides = [1, 1, 1]} : vector<32x8x32xf32> to vector<32x8x16xf32>
    %94 = arith.truncf %93 : vector<32x8x16xf32> to vector<32x8x16xbf16>
    "tpu.trace_start"() <{level = 10 : i32, message = "bqd,bkd->bqk"}> : () -> ()
    %cst_42 = arith.constant dense<0.000000e+00> : vector<32x8x8xf32>
    %95 = tpu.matmul %90, %92, %cst_42 {dimension_numbers = #tpu.dot_dimension_numbers<[2], [2], [1], [1], [0, 0, 0, 1, 1, 1], [0], [0]>} : vector<32x8x16xbf16>, vector<32x8x16xbf16>, vector<32x8x8xf32> -> vector<32x8x8xf32>
    "tpu.trace_stop"() : () -> ()
    %cst_43 = arith.constant 2.500000e-01 : f32
    %96 = vector.broadcast %cst_43 : f32 to vector<32x8x8xf32>
    %97 = arith.mulf %95, %96 : vector<32x8x8xf32>
    %cst_44 = arith.constant dense<0xFF800000> : vector<32x8xf32>
    %98 = vector.multi_reduction <maximumf>, %97, %cst_44 [2] : vector<32x8x8xf32> to vector<32x8xf32>
    %99 = vector.shape_cast %98 : vector<32x8xf32> to vector<32x8x1xf32>
    %100 = vector.broadcast %99 : vector<32x8x1xf32> to vector<32x8x8xf32>
    %101 = arith.subf %97, %100 : vector<32x8x8xf32>
    %102 = math.exp %101 : vector<32x8x8xf32>
    %cst_45 = arith.constant dense<0.000000e+00> : vector<32x8xf32>
    %103 = vector.multi_reduction <add>, %102, %cst_45 [2] : vector<32x8x8xf32> to vector<32x8xf32>
    %104 = vector.shape_cast %103 : vector<32x8xf32> to vector<32x8x1xf32>
    %105 = tpu.reciprocal %104 {approx = true} : vector<32x8x1xf32> -> vector<32x8x1xf32>
    %106 = vector.broadcast %105 : vector<32x8x1xf32> to vector<32x8x8xf32>
    %107 = arith.mulf %102, %106 : vector<32x8x8xf32>
    %108 = arith.truncf %107 : vector<32x8x8xf32> to vector<32x8x8xbf16>
    "tpu.trace_start"() <{level = 10 : i32, message = "bqk,bkd->bqd"}> : () -> ()
    %cst_46 = arith.constant dense<0.000000e+00> : vector<32x8x16xf32>
    %109 = tpu.matmul %108, %94, %cst_46 {dimension_numbers = #tpu.dot_dimension_numbers<[2], [1], [1], [2], [0, 0, 0, 1, 1, 2], [0], [0]>} : vector<32x8x8xbf16>, vector<32x8x16xbf16>, vector<32x8x16xf32> -> vector<32x8x16xf32>
    "tpu.trace_stop"() : () -> ()
    %110 = vector.extract_strided_slice %82 {offsets = [0, 0, 16], sizes = [32, 8, 16], strides = [1, 1, 1]} : vector<32x8x32xf32> to vector<32x8x16xf32>
    %111 = arith.truncf %110 : vector<32x8x16xf32> to vector<32x8x16xbf16>
    %112 = vector.extract_strided_slice %85 {offsets = [0, 0, 16], sizes = [32, 8, 16], strides = [1, 1, 1]} : vector<32x8x32xf32> to vector<32x8x16xf32>
    %113 = arith.truncf %112 : vector<32x8x16xf32> to vector<32x8x16xbf16>
    %114 = vector.extract_strided_slice %88 {offsets = [0, 0, 16], sizes = [32, 8, 16], strides = [1, 1, 1]} : vector<32x8x32xf32> to vector<32x8x16xf32>
    %115 = arith.truncf %114 : vector<32x8x16xf32> to vector<32x8x16xbf16>
    "tpu.trace_start"() <{level = 10 : i32, message = "bqd,bkd->bqk"}> : () -> ()
    %cst_47 = arith.constant dense<0.000000e+00> : vector<32x8x8xf32>
    %116 = tpu.matmul %111, %113, %cst_47 {dimension_numbers = #tpu.dot_dimension_numbers<[2], [2], [1], [1], [0, 0, 0, 1, 1, 1], [0], [0]>} : vector<32x8x16xbf16>, vector<32x8x16xbf16>, vector<32x8x8xf32> -> vector<32x8x8xf32>
    "tpu.trace_stop"() : () -> ()
    %cst_48 = arith.constant 2.500000e-01 : f32
    %117 = vector.broadcast %cst_48 : f32 to vector<32x8x8xf32>
    %118 = arith.mulf %116, %117 : vector<32x8x8xf32>
    %cst_49 = arith.constant dense<0xFF800000> : vector<32x8xf32>
    %119 = vector.multi_reduction <maximumf>, %118, %cst_49 [2] : vector<32x8x8xf32> to vector<32x8xf32>
    %120 = vector.shape_cast %119 : vector<32x8xf32> to vector<32x8x1xf32>
    %121 = vector.broadcast %120 : vector<32x8x1xf32> to vector<32x8x8xf32>
    %122 = arith.subf %118, %121 : vector<32x8x8xf32>
    %123 = math.exp %122 : vector<32x8x8xf32>
    %cst_50 = arith.constant dense<0.000000e+00> : vector<32x8xf32>
    %124 = vector.multi_reduction <add>, %123, %cst_50 [2] : vector<32x8x8xf32> to vector<32x8xf32>
    %125 = vector.shape_cast %124 : vector<32x8xf32> to vector<32x8x1xf32>
    %126 = tpu.reciprocal %125 {approx = true} : vector<32x8x1xf32> -> vector<32x8x1xf32>
    %127 = vector.broadcast %126 : vector<32x8x1xf32> to vector<32x8x8xf32>
    %128 = arith.mulf %123, %127 : vector<32x8x8xf32>
    %129 = arith.truncf %128 : vector<32x8x8xf32> to vector<32x8x8xbf16>
    "tpu.trace_start"() <{level = 10 : i32, message = "bqk,bkd->bqd"}> : () -> ()
    %cst_51 = arith.constant dense<0.000000e+00> : vector<32x8x16xf32>
    %130 = tpu.matmul %129, %115, %cst_51 {dimension_numbers = #tpu.dot_dimension_numbers<[2], [1], [1], [2], [0, 0, 0, 1, 1, 2], [0], [0]>} : vector<32x8x8xbf16>, vector<32x8x16xbf16>, vector<32x8x16xf32> -> vector<32x8x16xf32>
    "tpu.trace_stop"() : () -> ()
    %131 = tpu.concatenate %109, %130 in 2 : vector<32x8x16xf32>, vector<32x8x16xf32> -> vector<32x8x32xf32>
    %132 = vector.shape_cast %131 : vector<32x8x32xf32> to vector<256x32xf32>
    %133 = arith.truncf %132 : vector<256x32xf32> to vector<256x32xbf16>
    %c0_52 = arith.constant 0 : index
    %c0_53 = arith.constant 0 : index
    %134 = vector.load %arg13[%c0_52, %c0_53] : memref<32x32xbf16, #tpu.memory_space<vmem>>, vector<32x32xbf16>
    %cst_54 = arith.constant dense<0.000000e+00> : vector<256x32xf32>
    %135 = tpu.matmul %133, %134, %cst_54 {dimension_numbers = #tpu.dot_dimension_numbers<[1], [0], [0], [1], [0, 0, 1, 1], [], []>} : vector<256x32xbf16>, vector<32x32xbf16>, vector<256x32xf32> -> vector<256x32xf32>
    %c0_55 = arith.constant 0 : index
    %c0_56 = arith.constant 0 : index
    %136 = vector.load %arg14[%c0_55, %c0_56] : memref<1x32xf32, #tpu.memory_space<vmem>>, vector<1x32xf32>
    %137 = vector.broadcast %136 : vector<1x32xf32> to vector<256x32xf32>
    %138 = arith.addf %135, %137 : vector<256x32xf32>
    %139 = arith.addf %138, %54 : vector<256x32xf32>
    %c0_57 = arith.constant 0 : index
    %c0_58 = arith.constant 0 : index
    %140 = vector.load %arg15[%c0_57, %c0_58] : memref<1x32xf32, #tpu.memory_space<vmem>>, vector<1x32xf32>
    %c0_59 = arith.constant 0 : index
    %c0_60 = arith.constant 0 : index
    %141 = vector.load %arg16[%c0_59, %c0_60] : memref<1x32xf32, #tpu.memory_space<vmem>>, vector<1x32xf32>
    %cst_61 = arith.constant dense<0.000000e+00> : vector<256xf32>
    %142 = vector.multi_reduction <add>, %139, %cst_61 [1] : vector<256x32xf32> to vector<256xf32>
    %143 = vector.shape_cast %142 : vector<256xf32> to vector<256x1xf32>
    %cst_62 = arith.constant 3.200000e+01 : f32
    %144 = vector.broadcast %cst_62 : f32 to vector<256x1xf32>
    %145 = arith.divf %143, %144 : vector<256x1xf32>
    %146 = vector.broadcast %145 : vector<256x1xf32> to vector<256x32xf32>
    %147 = arith.subf %139, %146 : vector<256x32xf32>
    %148 = arith.mulf %147, %147 : vector<256x32xf32>
    %cst_63 = arith.constant dense<0.000000e+00> : vector<256xf32>
    %149 = vector.multi_reduction <add>, %148, %cst_63 [1] : vector<256x32xf32> to vector<256xf32>
    %150 = vector.shape_cast %149 : vector<256xf32> to vector<256x1xf32>
    %cst_64 = arith.constant 3.200000e+01 : f32
    %151 = vector.broadcast %cst_64 : f32 to vector<256x1xf32>
    %152 = arith.divf %150, %151 : vector<256x1xf32>
    %153 = vector.broadcast %145 : vector<256x1xf32> to vector<256x32xf32>
    %154 = arith.subf %139, %153 : vector<256x32xf32>
    %cst_65 = arith.constant 9.99999974E-6 : f32
    %155 = vector.broadcast %cst_65 : f32 to vector<256x1xf32>
    %156 = arith.addf %152, %155 : vector<256x1xf32>
    %157 = math.rsqrt %156 : vector<256x1xf32>
    %158 = vector.broadcast %157 : vector<256x1xf32> to vector<256x32xf32>
    %159 = arith.mulf %154, %158 : vector<256x32xf32>
    %160 = vector.broadcast %140 : vector<1x32xf32> to vector<256x32xf32>
    %161 = arith.mulf %159, %160 : vector<256x32xf32>
    %162 = vector.broadcast %141 : vector<1x32xf32> to vector<256x32xf32>
    %163 = arith.addf %161, %162 : vector<256x32xf32>
    %c0_66 = arith.constant 0 : index
    %c0_67 = arith.constant 0 : index
    %164 = vector.load %arg17[%c0_66, %c0_67] : memref<32x256xbf16, #tpu.memory_space<vmem>>, vector<32x256xbf16>
    %c0_68 = arith.constant 0 : index
    %c0_69 = arith.constant 0 : index
    %165 = vector.load %arg18[%c0_68, %c0_69] : memref<1x256xf32, #tpu.memory_space<vmem>>, vector<1x256xf32>
    %c0_70 = arith.constant 0 : index
    %c0_71 = arith.constant 0 : index
    %166 = vector.load %arg19[%c0_70, %c0_71] : memref<128x32xbf16, #tpu.memory_space<vmem>>, vector<128x32xbf16>
    %c0_72 = arith.constant 0 : index
    %c0_73 = arith.constant 0 : index
    %167 = vector.load %arg20[%c0_72, %c0_73] : memref<1x32xf32, #tpu.memory_space<vmem>>, vector<1x32xf32>
    %168 = arith.truncf %163 : vector<256x32xf32> to vector<256x32xbf16>
    %cst_74 = arith.constant dense<0.000000e+00> : vector<256x256xf32>
    %169 = tpu.matmul %168, %164, %cst_74 {dimension_numbers = #tpu.dot_dimension_numbers<[1], [0], [0], [1], [0, 0, 1, 1], [], []>} : vector<256x32xbf16>, vector<32x256xbf16>, vector<256x256xf32> -> vector<256x256xf32>
    %170 = vector.broadcast %165 : vector<1x256xf32> to vector<256x256xf32>
    %171 = arith.addf %169, %170 : vector<256x256xf32>
    %172 = vector.extract_strided_slice %171 {offsets = [0, 0], sizes = [256, 128], strides = [1, 1]} : vector<256x256xf32> to vector<256x128xf32>
    %173 = vector.extract_strided_slice %171 {offsets = [0, 128], sizes = [256, 128], strides = [1, 1]} : vector<256x256xf32> to vector<256x128xf32>
    %cst_75 = arith.constant 5.000000e-01 : f32
    %174 = vector.broadcast %cst_75 : f32 to vector<256x128xf32>
    %175 = arith.mulf %174, %173 : vector<256x128xf32>
    %cst_76 = arith.constant 4.471500e-02 : f32
    %176 = vector.broadcast %cst_76 : f32 to vector<256x128xf32>
    %177 = arith.mulf %176, %173 : vector<256x128xf32>
    %178 = arith.mulf %177, %173 : vector<256x128xf32>
    %179 = arith.mulf %178, %173 : vector<256x128xf32>
    %180 = arith.addf %173, %179 : vector<256x128xf32>
    %cst_77 = arith.constant 0.797884583 : f32
    %181 = vector.broadcast %cst_77 : f32 to vector<256x128xf32>
    %182 = arith.mulf %181, %180 : vector<256x128xf32>
    %183 = math.tanh %182 : vector<256x128xf32>
    %cst_78 = arith.constant 1.000000e+00 : f32
    %184 = vector.broadcast %cst_78 : f32 to vector<256x128xf32>
    %185 = arith.addf %184, %183 : vector<256x128xf32>
    %186 = arith.mulf %175, %185 : vector<256x128xf32>
    %187 = arith.mulf %172, %186 : vector<256x128xf32>
    %188 = arith.truncf %187 : vector<256x128xf32> to vector<256x128xbf16>
    %cst_79 = arith.constant dense<0.000000e+00> : vector<256x32xf32>
    %189 = tpu.matmul %188, %166, %cst_79 {dimension_numbers = #tpu.dot_dimension_numbers<[1], [0], [0], [1], [0, 0, 1, 1], [], []>} : vector<256x128xbf16>, vector<128x32xbf16>, vector<256x32xf32> -> vector<256x32xf32>
    %190 = vector.broadcast %167 : vector<1x32xf32> to vector<256x32xf32>
    %191 = arith.addf %189, %190 : vector<256x32xf32>
    %192 = arith.addf %191, %139 : vector<256x32xf32>
    %193 = vector.shape_cast %192 : vector<256x32xf32> to vector<32x8x32xf32>
    %c0_80 = arith.constant 0 : index
    %c0_81 = arith.constant 0 : index
    %c0_82 = arith.constant 0 : index
    %194 = vector.load %arg21[%c0_80, %c0_81, %c0_82] : memref<32x8x32xf32, #tpu.memory_space<vmem>>, vector<32x8x32xf32>
    tpu.vector_store %arg21[%c0_80, %c0_81, %c0_82], %193 {strides = array<i32>} : memref<32x8x32xf32, #tpu.memory_space<vmem>>, vector<32x8x32xf32>,
    return
  }
  func.func @transform_0(%arg0: i32) -> (i32, i32, i32) {
    %c0_i32 = arith.constant 0 : i32
    %c0_i32_0 = arith.constant 0 : i32
    %c0_i32_1 = arith.constant 0 : i32
    return %arg0, %c0_i32, %c0_i32_0 : i32, i32, i32
  }
  func.func @transform_1(%arg0: i32) -> (i32, i32) {
    %c0_i32 = arith.constant 0 : i32
    %c0_i32_0 = arith.constant 0 : i32
    %c0_i32_1 = arith.constant 0 : i32
    return %c0_i32, %c0_i32_0 : i32, i32
  }
  func.func @transform_2(%arg0: i32) -> (i32, i32) {
    %c0_i32 = arith.constant 0 : i32
    %c0_i32_0 = arith.constant 0 : i32
    %c0_i32_1 = arith.constant 0 : i32
    return %c0_i32, %c0_i32_0 : i32, i32
  }
  func.func @transform_3(%arg0: i32) -> (i32, i32) {
    %c0_i32 = arith.constant 0 : i32
    %c0_i32_0 = arith.constant 0 : i32
    %c0_i32_1 = arith.constant 0 : i32
    return %c0_i32, %c0_i32_0 : i32, i32
  }
  func.func @transform_4(%arg0: i32) -> (i32, i32) {
    %c0_i32 = arith.constant 0 : i32
    %c0_i32_0 = arith.constant 0 : i32
    %c0_i32_1 = arith.constant 0 : i32
    return %c0_i32, %c0_i32_0 : i32, i32
  }
  func.func @transform_5(%arg0: i32) -> (i32, i32) {
    %c0_i32 = arith.constant 0 : i32
    %c0_i32_0 = arith.constant 0 : i32
    %c0_i32_1 = arith.constant 0 : i32
    return %c0_i32, %c0_i32_0 : i32, i32
  }
  func.func @transform_6(%arg0: i32) -> (i32, i32) {
    %c0_i32 = arith.constant 0 : i32
    %c0_i32_0 = arith.constant 0 : i32
    %c0_i32_1 = arith.constant 0 : i32
    return %c0_i32, %c0_i32_0 : i32, i32
  }
  func.func @transform_7(%arg0: i32) -> (i32, i32) {
    %c0_i32 = arith.constant 0 : i32
    %c0_i32_0 = arith.constant 0 : i32
    %c0_i32_1 = arith.constant 0 : i32
    return %c0_i32, %c0_i32_0 : i32, i32
  }
  func.func @transform_8(%arg0: i32) -> (i32, i32) {
    %c0_i32 = arith.constant 0 : i32
    %c0_i32_0 = arith.constant 0 : i32
    %c0_i32_1 = arith.constant 0 : i32
    return %c0_i32, %c0_i32_0 : i32, i32
  }
  func.func @transform_9(%arg0: i32) -> (i32, i32) {
    %c0_i32 = arith.constant 0 : i32
    %c0_i32_0 = arith.constant 0 : i32
    %c0_i32_1 = arith.constant 0 : i32
    return %c0_i32, %c0_i32_0 : i32, i32
  }
  func.func @transform_10(%arg0: i32) -> (i32, i32) {
    %c0_i32 = arith.constant 0 : i32
    %c0_i32_0 = arith.constant 0 : i32
    %c0_i32_1 = arith.constant 0 : i32
    return %c0_i32, %c0_i32_0 : i32, i32
  }
  func.func @transform_11(%arg0: i32) -> (i32, i32) {
    %c0_i32 = arith.constant 0 : i32
    %c0_i32_0 = arith.constant 0 : i32
    %c0_i32_1 = arith.constant 0 : i32
    return %c0_i32, %c0_i32_0 : i32, i32
  }
  func.func @transform_12(%arg0: i32) -> (i32, i32) {
    %c0_i32 = arith.constant 0 : i32
    %c0_i32_0 = arith.constant 0 : i32
    %c0_i32_1 = arith.constant 0 : i32
    return %c0_i32, %c0_i32_0 : i32, i32
  }
  func.func @transform_13(%arg0: i32) -> (i32, i32) {
    %c0_i32 = arith.constant 0 : i32
    %c0_i32_0 = arith.constant 0 : i32
    %c0_i32_1 = arith.constant 0 : i32
    return %c0_i32, %c0_i32_0 : i32, i32
  }
  func.func @transform_14(%arg0: i32) -> (i32, i32) {
    %c0_i32 = arith.constant 0 : i32
    %c0_i32_0 = arith.constant 0 : i32
    %c0_i32_1 = arith.constant 0 : i32
    return %c0_i32, %c0_i32_0 : i32, i32
  }
  func.func @transform_15(%arg0: i32) -> (i32, i32) {
    %c0_i32 = arith.constant 0 : i32
    %c0_i32_0 = arith.constant 0 : i32
    %c0_i32_1 = arith.constant 0 : i32
    return %c0_i32, %c0_i32_0 : i32, i32
  }
  func.func @transform_16(%arg0: i32) -> (i32, i32) {
    %c0_i32 = arith.constant 0 : i32
    %c0_i32_0 = arith.constant 0 : i32
    %c0_i32_1 = arith.constant 0 : i32
    return %c0_i32, %c0_i32_0 : i32, i32
  }
  func.func @transform_17(%arg0: i32) -> (i32, i32) {
    %c0_i32 = arith.constant 0 : i32
    %c0_i32_0 = arith.constant 0 : i32
    %c0_i32_1 = arith.constant 0 : i32
    return %c0_i32, %c0_i32_0 : i32, i32
  }
  func.func @transform_18(%arg0: i32) -> (i32, i32) {
    %c0_i32 = arith.constant 0 : i32
    %c0_i32_0 = arith.constant 0 : i32
    %c0_i32_1 = arith.constant 0 : i32
    return %c0_i32, %c0_i32_0 : i32, i32
  }
  func.func @transform_19(%arg0: i32) -> (i32, i32) {
    %c0_i32 = arith.constant 0 : i32
    %c0_i32_0 = arith.constant 0 : i32
    %c0_i32_1 = arith.constant 0 : i32
    return %c0_i32, %c0_i32_0 : i32, i32
  }
  func.func @transform_20(%arg0: i32) -> (i32, i32, i32) {
    %c0_i32 = arith.constant 0 : i32
    %c0_i32_0 = arith.constant 0 : i32
    %c0_i32_1 = arith.constant 0 : i32
    return %arg0, %c0_i32, %c0_i32_0 : i32, i32, i32
  }
}

</mosaic_0001>

<bundles_post_ra>
// kernel: tpu_custom_call.1
= control target key start
LH: loop header
LB: loop body
LE: loop exit
PB: predicated region body
PF: predicated region fallthrough
CT: control target
= control target key end

     0   :  { %s18763_s0 = inlined_call_operand.hbm [shape: f32[32,8,32], index: 0, kind: input, shape index: {}]   ;;  %s18764_s1 = inlined_call_operand.vmem [shape: f32[1,32], index: 1, kind: input, shape index: {}]   ;;  %s18765_s2 = inlined_call_operand.vmem [shape: f32[1,32], index: 2, kind: input, shape index: {}]   ;;  %s18766_s3 = inlined_call_operand.vmem [shape: bf16[32,256], index: 3, kind: input, shape index: {}]   ;;  %s18767_s4 = inlined_call_operand.vmem [shape: f32[1,256], index: 4, kind: input, shape index: {}]   ;;  %s18768_s5 = inlined_call_operand.vmem [shape: bf16[128,32], index: 5, kind: input, shape index: {}]   ;;  %s18769_s6 = inlined_call_operand.vmem [shape: f32[1,32], index: 6, kind: input, shape index: {}]   ;;  %s18770_s7 = inlined_call_operand.vmem [shape: f32[1,32], index: 7, kind: input, shape index: {}]   ;;  %s18771_s8 = inlined_call_operand.vmem [shape: f32[1,32], index: 8, kind: input, shape index: {}]   ;;  %s18772_s9 = inlined_call_operand.vmem [shape: bf16[32,32], index: 9, kind: input, shape index: {}]   ;;  %s18773_s10 = inlined_call_operand.vmem [shape: bf16[32,32], index: 10, kind: input, shape index: {}]   ;;  %s18774_s11 = inlined_call_operand.vmem [shape: bf16[32,32], index: 11, kind: input, shape index: {}]   ;;  %s18775_s12 = inlined_call_operand.vmem [shape: bf16[32,32], index: 12, kind: input, shape index: {}]   ;;  %s18776_s13 = inlined_call_operand.vmem [shape: f32[1,32], index: 13, kind: input, shape index: {}]   ;;  %s18777_s14 = inlined_call_operand.vmem [shape: f32[1,32], index: 14, kind: input, shape index: {}]   ;;  %s18778_s15 = inlined_call_operand.vmem [shape: f32[1,32], index: 15, kind: input, shape index: {}]   ;;  %s18779_s16 = inlined_call_operand.vmem [shape: bf16[32,256], index: 16, kind: input, shape index: {}]   ;;  %s18780_s17 = inlined_call_operand.vmem [shape: f32[1,256], index: 17, kind: input, shape index: {}]   ;;  %s18781_s18 = inlined_call_operand.vmem [shape: bf16[128,32], index: 18, kind: input, shape index: {}]   ;;  %s18782_s19 = inlined_call_operand.vmem [shape: f32[1,32], index: 19, kind: input, shape index: {}]   ;;  %s18783_s20 = inlined_call_operand.hbm [shape: f32[32,8,32], index: 20, kind: output, shape index: {}]  }
   0x1   :  { %18900 = sst [smem:[#allocation119_spill]] %s18763_s0 }
   0x2   :  { %18901 = sst [smem:[#allocation120_spill]] %s18764_s1 }
   0x3   :  { %18902 = sst [smem:[#allocation121_spill]] %s18765_s2 }
   0x4   :  { %18903 = sst [smem:[#allocation122_spill]] %s18766_s3 }
   0x5   :  { %18904 = sst [smem:[#allocation123_spill]] %s18767_s4 }
   0x6   :  { %25 = vsyncpa [#allocation3], 0 }
   0x7   :  { %26 = vsyncpa [#allocation4], 0  ;;  %s14004_s1 = smov [#allocation2]   ;;  %s18905_s2 = sld [smem:[#allocation119_spill]] }
   0x8   :  { %s32_s22 = sshll.u32 %s14004_s1, 4  ;;  %s33_s22 = int_to_ptr.vmem [resolvable:$true] %s32_s22 }
   0xd   :  { %s13956_s25 = scalar_lea.hbm %s18905_s2, 4096 }
   0xe   :  { %p13957_p0 = scmp.ne.s32.totalorder %s18905_s2, %s13956_s25  ;;  %p13960_p1 = scmp.lt.u32.totalorder %s13956_s25, %s18905_s2 }
  0x10   :  { %p13962_p2 = pnand %p13960_p1, %p13957_p0 }
  0x12   :  { %13965 = shalt.err (!%p13962_p2)
}
  0x13   :  { %s13966_s4 = scalar_lea.vmem %s33_s22, 4096  ;;  %p13971_p4 = scmp.lt.s32.totalorder %s33_s22, %s33_s22 }
  0x14   :  { %p13967_p3 = scmp.ne.s32.totalorder %s33_s22, %s13966_s4  ;;  %p13972_p5 = scmp.lt.s32.totalorder %s13966_s4, %s13966_s4 }
  0x16   :  { %p13973_p6 = por %p13972_p5, %p13971_p4 }
  0x18   :  { %p13974_p7 = pnand %p13973_p6, %p13967_p3 }
  0x1a   :  { %13977 = shalt.err (!%p13974_p7)
}
  0x1b   :  { %s14005_s29 = smov 128   ;;  %s14006_s30 = smov 8  }
  0x1c   :  { %38 = dma.hbm_to_vmem [thread:$0]  %s18905_s2, 4096, %s33_s22, [#allocation3], %s14005_s29, %s14005_s29, %s14006_s30  }
  0x1d   :  { %14000 = dma.done.wait [#allocation3], 4096  }
  0x1e   :  { %14001 = vsyncadd [#allocation3], 4294963200  ;;  %vm115_vm0 = vcmask 261120   ;;  %v81_v0 = vld [vmem:[#allocation2] sm:$0xff]  ;;  %v14133_v1 = vld [vmem:[#allocation2 + $0x8] sm:$0xff]  ;;  %s18906_s23 = sld [smem:[#allocation122_spill]] }
  0x1f   :  { %v83_v2 = vld [vmem:[#allocation2 + $0x10] sm:$0xff]  ;;  %v116_v3 = vsel %vm115_vm0, %v81_v0, 0.0  ;;  %v14137_v5 = vld [vmem:[#allocation2 + $0x18] sm:$0xff]  ;;  %v14139_v6 = vld [vmem:[#allocation2 + $0x20] sm:$0xff]  ;;  %v119_v8 = vsel %vm115_vm0, %v14133_v1, 0.0  ;;  %s18907_s0 = sld [smem:[#allocation120_spill]] }
  0x20   :  { %v122_v4 = vsel %vm115_vm0, %v83_v2, 0.0  ;;  %117 = vadd.xlane.f32.xlu0 %v116_v3  ;;  %v14141_v7 = vld [vmem:[#allocation2 + $0x28] sm:$0xff]  ;;  %v125_v9 = vsel %vm115_vm0, %v14137_v5, 0.0  ;;  %v14147_v10 = vld [vmem:[#allocation2 + $0x30] sm:$0xff]  ;;  %v14149_v11 = vld [vmem:[#allocation2 + $0x38] sm:$0xff]  ;;  %v128_v14 = vsel %vm115_vm0, %v14139_v6, 0.0 }
  0x21   :  { %123 = vadd.xlane.f32.xlu1 %v122_v4  ;;  %v14151_v12 = vld [vmem:[#allocation2 + $0x40] sm:$0xff]  ;;  %v14153_v13 = vld [vmem:[#allocation2 + $0x48] sm:$0xff]  ;;  %v131_v15 = vsel %vm115_vm0, %v14141_v7, 0.0  ;;  %v134_v16 = vsel %vm115_vm0, %v14147_v10, 0.0  ;;  %v137_v17 = vsel %vm115_vm0, %v14149_v11, 0.0  ;;  %v14167_v20 = vld [vmem:[#allocation2 + $0x50] sm:$0xff] }
  0x22   :  { %v140_v18 = vsel %vm115_vm0, %v14151_v12, 0.0  ;;  %v143_v19 = vsel %vm115_vm0, %v14153_v13, 0.0  ;;  %v14169_v21 = vld [vmem:[#allocation2 + $0x58] sm:$0xff]  ;;  %v146_v22 = vsel %vm115_vm0, %v14167_v20, 0.0  ;;  %v14173_v23 = vld [vmem:[#allocation2 + $0x60] sm:$0xff]  ;;  %v14175_v24 = vld [vmem:[#allocation2 + $0x68] sm:$0xff] }
  0x23   :  { %v149_v25 = vsel %vm115_vm0, %v14169_v21, 0.0  ;;  %v14179_v26 = vld [vmem:[#allocation2 + $0x70] sm:$0xff]  ;;  %v152_v27 = vsel %vm115_vm0, %v14173_v23, 0.0  ;;  %v155_v28 = vsel %vm115_vm0, %v14175_v24, 0.0  ;;  %v14185_v29 = vld [vmem:[#allocation2 + $0x78] sm:$0xff]  ;;  %v14191_v32 = vld [vmem:[#allocation2 + $0x80] sm:$0xff] }
  0x24   :  { %120 = vadd.xlane.f32.xlu0 %v119_v8  ;;  %v158_v30 = vsel %vm115_vm0, %v14179_v26, 0.0  ;;  %v161_v31 = vsel %vm115_vm0, %v14185_v29, 0.0  ;;  %v14193_v33 = vld [vmem:[#allocation2 + $0x88] sm:$0xff]  ;;  %v164_v34 = vsel %vm115_vm0, %v14191_v32, 0.0  ;;  %v14205_v47 = vld [vmem:[#allocation2 + $0x90] sm:$0xff]  ;;  %v14220_v54 = vld [vmem:[#allocation2 + $0x98] sm:$0xff] }
  0x25   :  { %126 = vadd.xlane.f32.xlu1 %v125_v9  ;;  %v167_v35 = vsel %vm115_vm0, %v14193_v33, 0.0  ;;  %v170_v51 = vsel %vm115_vm0, %v14205_v47, 0.0  ;;  %v173_v58 = vsel %vm115_vm0, %v14220_v54, 0.0  ;;  %v14228_v61 = vld [vmem:[#allocation2 + $0xa0] sm:$0xff]  ;;  %v14236_v3 = vld [vmem:[#allocation2 + $0xb0] sm:$0xff]  ;;  %v14238_v4 = vld [vmem:[#allocation2 + $0xa8] sm:$0xff] }
  0x26   :  { %v176_v63 = vsel %vm115_vm0, %v14228_v61, 0.0  ;;  %v182_v8 = vsel %vm115_vm0, %v14236_v3, 0.0  ;;  %s18908_s22 = sld [smem:[#allocation121_spill]]  ;;  %s18910_s3 = sld [smem:[#allocation123_spill]]  ;;  %vm14009_vm1 = vmmov 0   ;;  %vm2687_vm2 = vcmask 130048  }
  0x27   :  { %vm4580_vm3 = vcmask 1043456   ;;  %vm4192_vm4 = vcmask 64512  }
  0x28   :  { %129 = vadd.xlane.f32.xlu0 %v128_v14  ;;  %v179_v14 = vsel %vm115_vm0, %v14238_v4, 0.0 }
  0x29   :  { %132 = vadd.xlane.f32.xlu1 %v131_v15  ;;  %v14247_v15 = vld [vmem:[#allocation2 + $0xb8] sm:$0xff] }
  0x2c   :  { %135 = vadd.xlane.f32.xlu0 %v134_v16 }
  0x2d   :  { %138 = vadd.xlane.f32.xlu1 %v137_v17 }
  0x30   :  { %141 = vadd.xlane.f32.xlu0 %v140_v18  ;;  %v185_v18 = vsel %vm115_vm0, %v14247_v15, 0.0 }
  0x31   :  { %144 = vadd.xlane.f32.xlu1 %v143_v19 }
  0x34   :  { %147 = vadd.xlane.f32.xlu0 %v146_v22 }
  0x35   :  { %150 = vadd.xlane.f32.xlu1 %v149_v25 }
  0x38   :  { %153 = vadd.xlane.f32.xlu0 %v152_v27  ;;  %v14259_v27 = vld [vmem:[#allocation2 + $0xc0] sm:$0xff] }
  0x39   :  { %156 = vadd.xlane.f32.xlu1 %v155_v28 }
  0x3c   :  { %159 = vadd.xlane.f32.xlu0 %v158_v30  ;;  %v188_v30 = vsel %vm115_vm0, %v14259_v27, 0.0 }
  0x3d   :  { %162 = vadd.xlane.f32.xlu1 %v161_v31 }
  0x40   :  { %165 = vadd.xlane.f32.xlu0 %v164_v34 }
  0x41   :  { %168 = vadd.xlane.f32.xlu1 %v167_v35  ;;  %v14267_v35 = vld [vmem:[#allocation2 + $0xc8] sm:$0xff] }
  0xad   :  { %v118_v36 = vpop.xlane.xlu0 %117 }
  0xae   :  { %v124_v37 = vpop.xlane.xlu1 %123  ;;  %v213_v38 = vmul.f32 0.03125, %v118_v36 }
  0xaf   :  { %v215_v39 = vmul.f32 0.03125, %v124_v37 }
  0xb0   :  { %v14199_v40 = vsub.f32 %v81_v0, %v213_v38  ;;  %v191_v38 = vsel %vm115_vm0, %v14267_v35, 0.0 }
  0xb1   :  { %v121_v41 = vpop.xlane.xlu0 %120  ;;  %v14201_v44 = vsub.f32 %v83_v2, %v215_v39 }
  0xb2   :  { %v127_v42 = vpop.xlane.xlu1 %126  ;;  %v214_v43 = vmul.f32 0.03125, %v121_v41  ;;  %v277_v45 = vmul.f32 %v14199_v40, %v14199_v40 }
  0xb3   :  { %v216_v46 = vmul.f32 0.03125, %v127_v42  ;;  %v279_v53 = vmul.f32 %v14201_v44, %v14201_v44 }
  0xb4   :  { %v14208_v48 = vsub.f32 %v14133_v1, %v214_v43  ;;  %v309_v49 = vsel %vm115_vm0, %v277_v45, 0.0  ;;  %v14279_v43 = vld [vmem:[#allocation2 + $0xd0] sm:$0xff] }
  0xb5   :  { %310 = vadd.xlane.f32.xlu0 %v309_v49  ;;  %v14212_v50 = vsub.f32 %v14137_v5, %v216_v46  ;;  %v130_v55 = vpop.xlane.xlu0 %129  ;;  %v315_v57 = vsel %vm115_vm0, %v279_v53, 0.0  ;;  %v194_v46 = vsel %vm115_vm0, %v14279_v43, 0.0 }
  0xb6   :  { %v278_v52 = vmul.f32 %v14208_v48, %v14208_v48  ;;  %v217_v60 = vmul.f32 0.03125, %v130_v55  ;;  %v133_v62 = vpop.xlane.xlu1 %132 }
  0xb7   :  { %v280_v59 = vmul.f32 %v14212_v50, %v14212_v50  ;;  %v218_v2 = vmul.f32 0.03125, %v133_v62 }
  0xb8   :  { %v312_v56 = vsel %vm115_vm0, %v278_v52, 0.0  ;;  %v14234_v1 = vsub.f32 %v14139_v6, %v217_v60  ;;  %v14287_v52 = vld [vmem:[#allocation2 + $0xd8] sm:$0xff] }
  0xb9   :  { %171 = vadd.xlane.f32.xlu0 %v170_v51  ;;  %313 = vadd.xlane.f32.xlu1 %v312_v56  ;;  %v318_v0 = vsel %vm115_vm0, %v280_v59, 0.0  ;;  %v136_v5 = vpop.xlane.xlu0 %135  ;;  %v14243_v9 = vsub.f32 %v14141_v7, %v218_v2 }
  0xba   :  { %v281_v6 = vmul.f32 %v14234_v1, %v14234_v1  ;;  %v219_v16 = vmul.f32 0.03125, %v136_v5  ;;  %v139_v17 = vpop.xlane.xlu1 %138  ;;  %v13315_v5 = vld [vmem:[%s18906_s23 + $0x14] ss:$8 sps:$4 sm:$0xff]  }
  0xbb   :  { %v220_v22 = vmul.f32 0.03125, %v139_v17  ;;  %v282_v25 = vmul.f32 %v14243_v9, %v14243_v9  ;;  %v14319_v17 = vld [vmem:[#allocation2 + $0xe8] sm:$0xff] }
  0xbc   :  { %v321_v19 = vsel %vm115_vm0, %v281_v6, 0.0  ;;  %v14255_v7 = vsub.f32 %v14147_v10, %v219_v16 }
  0xbd   :  { %316 = vadd.xlane.f32.xlu0 %v315_v57  ;;  %174 = vadd.xlane.f32.xlu1 %v173_v58  ;;  %v142_v28 = vpop.xlane.xlu0 %141  ;;  %v14264_v31 = vsub.f32 %v14149_v11, %v220_v22  ;;  %v324_v34 = vsel %vm115_vm0, %v282_v25, 0.0  ;;  %v13312_v57 = vld [vmem:[%s18906_s23 + $0x4] ss:$8 sps:$4 sm:$0xff]   ;;  %v13314_v58 = vld [vmem:[%s18906_s23] ss:$8 sps:$4 sm:$0xff]   ;;  %v203_v22 = vsel %vm115_vm0, %v14319_v17, 0.0 }
  0xbe   :  { %v283_v10 = vmul.f32 %v14255_v7, %v14255_v7  ;;  %v221_v36 = vmul.f32 0.03125, %v142_v28  ;;  %v145_v37 = vpop.xlane.xlu1 %144  ;;  %726 = vmatprep.subr.bf16.mxu0 %v13312_v57 }
  0xbf   :  { %v222_v11 = vmul.f32 0.03125, %v145_v37  ;;  %v284_v42 = vmul.f32 %v14264_v31, %v14264_v31  ;;  %727 = vmatpush1.bf16.msra.mxu0 %v13314_v58  ;;  %v18788_v37 = vmov 0  }
  0xc0   :  { %v327_v39 = vsel %vm115_vm0, %v283_v10, 0.0  ;;  %v14275_v41 = vsub.f32 %v14151_v12, %v221_v36  ;;  %728 = vmatprep.subr.bf16.mxu0 %v13315_v5  ;;  %v14331_v10 = vld [vmem:[#allocation2 + $0xf0] sm:$0xff]  ;;  %758 = vmatprep.mubr.bf16.mxu0 %v18788_v37 }
  0xc1   :  { %177 = vadd.xlane.f32.xlu0 %v176_v63  ;;  %319 = vadd.xlane.f32.xlu1 %v318_v0  ;;  %v148_v45 = vpop.xlane.xlu0 %147  ;;  %v14284_v49 = vsub.f32 %v14153_v13, %v222_v11  ;;  %v330_v51 = vsel %vm115_vm0, %v284_v42, 0.0  ;;  %v197_v13 = vsel %vm115_vm0, %v14287_v52, 0.0  ;;  %v14305_v0 = vld [vmem:[#allocation2 + $0xe0] sm:$0xff]  ;;  %v206_v11 = vsel %vm115_vm0, %v14331_v10, 0.0 }
  0xc2   :  { %v285_v12 = vmul.f32 %v14275_v41, %v14275_v41  ;;  %v223_v53 = vmul.f32 0.03125, %v148_v45  ;;  %v151_v55 = vpop.xlane.xlu1 %150 }
  0xc3   :  { %v224_v62 = vmul.f32 0.03125, %v151_v55  ;;  %v286_v63 = vmul.f32 %v14284_v49, %v14284_v49 }
  0xc4   :  { %v333_v59 = vsel %vm115_vm0, %v285_v12, 0.0  ;;  %v14301_v60 = vsub.f32 %v14167_v20, %v223_v53 }
  0xc5   :  { %183 = vadd.xlane.f32.xlu0 %v182_v8  ;;  %180 = vadd.xlane.f32.xlu1 %v179_v14  ;;  %v154_v56 = vpop.xlane.xlu0 %153  ;;  %v200_v8 = vsel %vm115_vm0, %v14305_v0, 0.0  ;;  %v13317_v14 = vld [vmem:[%s18906_s23 + $0x10] ss:$8 sps:$4 sm:$0xff]   ;;  %v14316_v6 = vsub.f32 %v14169_v21, %v224_v62  ;;  %v336_v16 = vsel %vm115_vm0, %v286_v63, 0.0 }
  0xc6   :  { %v157_v2 = vpop.xlane.xlu1 %156  ;;  %729 = vmatpush1.bf16.msra.mxu0 %v13317_v14 }
  0xc7   :  { %v226_v25 = vmul.f32 0.03125, %v157_v2 }
  0xc9   :  { %186 = vadd.xlane.f32.xlu1 %v185_v18  ;;  %322 = vadd.xlane.f32.xlu0 %v321_v19  ;;  %v160_v20 = vpop.xlane.xlu0 %159  ;;  %v287_v18 = vmul.f32 %v14301_v60, %v14301_v60  ;;  %v225_v19 = vmul.f32 0.03125, %v154_v56 }
  0xca   :  { %v163_v28 = vpop.xlane.xlu1 %162  ;;  %v227_v36 = vmul.f32 0.03125, %v160_v20 }
  0xcb   :  { %v339_v21 = vsel %vm115_vm0, %v287_v18, 0.0 }
  0xcc   :  { %v14341_v45 = vsub.f32 %v14179_v26, %v227_v36 }
  0xcd   :  { %325 = vadd.xlane.f32.xlu1 %v324_v34  ;;  %189 = vadd.xlane.f32.xlu0 %v188_v30  ;;  %v14327_v30 = vsub.f32 %v14173_v23, %v225_v19  ;;  %v288_v34 = vmul.f32 %v14316_v6, %v14316_v6  ;;  %v228_v23 = vmul.f32 0.03125, %v163_v28 }
  0xce   :  { %v169_v53 = vpop.xlane.xlu1 %168  ;;  %v291_v58 = vmul.f32 %v14341_v45, %v14341_v45 }
  0xcf   :  { %v342_v42 = vsel %vm115_vm0, %v288_v34, 0.0 }
  0xd0   :  { %v351_v62 = vsel %vm115_vm0, %v291_v58, 0.0 }
  0xd1   :  { %192 = vadd.xlane.f32.xlu1 %v191_v38  ;;  %328 = vadd.xlane.f32.xlu0 %v327_v39  ;;  %v166_v38 = vpop.xlane.xlu0 %165  ;;  %v14335_v39 = vsub.f32 %v14175_v24, %v226_v25  ;;  %v14348_v24 = vsub.f32 %v14185_v29, %v228_v23 }
  0xd2   :  { %v229_v12 = vmul.f32 0.03125, %v166_v38 }
  0xd3   :  { %v290_v56 = vmul.f32 %v14335_v39, %v14335_v39  ;;  %v292_v63 = vmul.f32 %v14348_v24, %v14348_v24 }
  0xd4   :  { %v14356_v57 = vsub.f32 %v14191_v32, %v229_v12 }
  0xd5   :  { %331 = vadd.xlane.f32.xlu1 %v330_v51  ;;  %195 = vadd.xlane.f32.xlu0 %v194_v46  ;;  %v14343_v46 = vld [vmem:[#allocation2 + $0xf8] sm:$0xff]  ;;  %v289_v51 = vmul.f32 %v14327_v30, %v14327_v30  ;;  %v348_v29 = vsel %vm115_vm0, %v290_v56, 0.0  ;;  %v354_v2 = vsel %vm115_vm0, %v292_v63, 0.0 }
  0xd6   :  { %v209_v55 = vsel %vm115_vm0, %v14343_v46, 0.0  ;;  %v293_v32 = vmul.f32 %v14356_v57, %v14356_v57 }
  0xd7   :  { %v345_v26 = vsel %vm115_vm0, %v289_v51, 0.0 }
  0xd8   :  { %v357_v5 = vsel %vm115_vm0, %v293_v32, 0.0 }
  0xd9   :  { %198 = vadd.xlane.f32.xlu1 %v197_v13  ;;  %334 = vadd.xlane.f32.xlu0 %v333_v59  ;;  %v230_v13 = vmul.f32 0.03125, %v169_v53 }
  0xdb   :  { %v14362_v59 = vsub.f32 %v14193_v33, %v230_v13 }
  0xdd   :  { %337 = vadd.xlane.f32.xlu1 %v336_v16  ;;  %201 = vadd.xlane.f32.xlu0 %v200_v8  ;;  %v294_v8 = vmul.f32 %v14362_v59, %v14362_v59 }
  0xdf   :  { %v360_v33 = vsel %vm115_vm0, %v294_v8, 0.0 }
  0xe1   :  { %204 = vadd.xlane.f32.xlu1 %v203_v22  ;;  %340 = vadd.xlane.f32.xlu0 %v339_v21 }
  0xe5   :  { %343 = vadd.xlane.f32.xlu1 %v342_v42  ;;  %207 = vadd.xlane.f32.xlu0 %v206_v11 }
  0xe9   :  { %210 = vadd.xlane.f32.xlu1 %v209_v55  ;;  %346 = vadd.xlane.f32.xlu0 %v345_v26 }
  0xed   :  { %349 = vadd.xlane.f32.xlu1 %v348_v29  ;;  %352 = vadd.xlane.f32.xlu0 %v351_v62 }
  0xf1   :  { %355 = vadd.xlane.f32.xlu1 %v354_v2  ;;  %358 = vadd.xlane.f32.xlu0 %v357_v5 }
  0xf5   :  { %361 = vadd.xlane.f32.xlu1 %v360_v33  ;;  %v14395_v33 = vld [vmem:[%s18907_s0] ss:$0 sm:$0xff] }
 0x142   :  { %v311_v20 = vpop.xlane.xlu0 %310 }
 0x143   :  { %v405_v14 = vmul.f32 0.03125, %v311_v20 }
 0x145   :  { %v437_v16 = vadd.f32 1e-05, %v405_v14 }
 0x146   :  { %v314_v18 = vpop.xlane.xlu1 %313  ;;  %v172_v19 = vpop.xlane.xlu0 %171 }
 0x147   :  { %13348 = vrsqrt.f32 %v437_v16  ;;  %v406_v22 = vmul.f32 0.03125, %v314_v18  ;;  %v231_v25 = vmul.f32 0.03125, %v172_v19 }
 0x149   :  { %v438_v28 = vadd.f32 1e-05, %v406_v22  ;;  %v14375_v21 = vsub.f32 %v14205_v47, %v231_v25 }
 0x14a   :  { %v175_v34 = vpop.xlane.xlu1 %174  ;;  %v317_v36 = vpop.xlane.xlu0 %316 }
 0x14b   :  { %13350 = vrsqrt.f32 %v438_v28  ;;  %v232_v38 = vmul.f32 0.03125, %v175_v34  ;;  %v407_v11 = vmul.f32 0.03125, %v317_v36  ;;  %v295_v23 = vmul.f32 %v14375_v21, %v14375_v21 }
 0x14d   :  { %v14380_v42 = vsub.f32 %v14220_v54, %v232_v38  ;;  %v439_v51 = vadd.f32 1e-05, %v407_v11  ;;  %v363_v12 = vsel %vm115_vm0, %v295_v23, 0.0 }
 0x14e   :  { %v320_v53 = vpop.xlane.xlu1 %319  ;;  %364 = vadd.xlane.f32.xlu0 %v363_v12  ;;  %v178_v55 = vpop.xlane.xlu0 %177 }
 0x14f   :  { %13352 = vrsqrt.f32 %v439_v51  ;;  %v408_v47 = vmul.f32 0.03125, %v320_v53  ;;  %v233_v56 = vmul.f32 0.03125, %v178_v55  ;;  %v296_v26 = vmul.f32 %v14380_v42, %v14380_v42 }
 0x151   :  { %v13349_v13 = vpop.eup %13348  ;;  %v440_v58 = vadd.f32 1e-05, %v408_v47  ;;  %v14386_v29 = vsub.f32 %v14228_v61, %v233_v56  ;;  %v366_v54 = vsel %vm115_vm0, %v296_v26, 0.0 }
 0x152   :  { %367 = vadd.xlane.f32.xlu1 %v366_v54  ;;  %v181_v62 = vpop.xlane.xlu1 %180  ;;  %v184_v63 = vpop.xlane.xlu0 %183  ;;  %v501_v32 = vmul.f32 %v13349_v13, %v14199_v40 }
 0x153   :  { %13354 = vrsqrt.f32 %v440_v58  ;;  %v234_v2 = vmul.f32 0.03125, %v181_v62  ;;  %v235_v5 = vmul.f32 0.03125, %v184_v63  ;;  %v297_v8 = vmul.f32 %v14386_v29, %v14386_v29 }
 0x154   :  { %v539_v22 = vmul.f32 %v14395_v33, %v501_v32 }
 0x155   :  { %v13351_v61 = vpop.eup %13350  ;;  %v14398_v20 = vsub.f32 %v14238_v4, %v234_v2  ;;  %v14401_v14 = vsub.f32 %v14236_v3, %v235_v5  ;;  %v369_v40 = vsel %vm115_vm0, %v297_v8, 0.0  ;;  %v14413_v3 = vld [vmem:[%s18908_s22] ss:$0 sm:$0xff] }
 0x156   :  { %v187_v16 = vpop.xlane.xlu1 %186  ;;  %370 = vadd.xlane.f32.xlu0 %v369_v40  ;;  %v323_v18 = vpop.xlane.xlu0 %322  ;;  %v502_v19 = vmul.f32 %v13351_v61, %v14208_v48  ;;  %v577_v55 = vadd.f32 %v14413_v3, %v539_v22 }
 0x157   :  { %v236_v25 = vmul.f32 0.03125, %v187_v16  ;;  %v409_v28 = vmul.f32 0.03125, %v323_v18  ;;  %v298_v34 = vmul.f32 %v14398_v20, %v14398_v20  ;;  %v299_v4 = vmul.f32 %v14401_v14, %v14401_v14 }
 0x158   :  { %v540_v36 = vmul.f32 %v14395_v33, %v502_v19 }
 0x159   :  { %v13353_v38 = vpop.eup %13352  ;;  %v14417_v48 = vsub.f32 %v14247_v15, %v236_v25  ;;  %v441_v11 = vadd.f32 1e-05, %v409_v28  ;;  %v372_v23 = vsel %vm115_vm0, %v298_v34, 0.0  ;;  %v375_v51 = vsel %vm115_vm0, %v299_v4, 0.0 }
 0x15a   :  { %373 = vadd.xlane.f32.xlu1 %v372_v23  ;;  %v326_v12 = vpop.xlane.xlu1 %325  ;;  %376 = vadd.xlane.f32.xlu0 %v375_v51  ;;  %v190_v53 = vpop.xlane.xlu0 %189  ;;  %v578_v47 = vadd.f32 %v14413_v3, %v540_v36  ;;  %v503_v56 = vmul.f32 %v13353_v38, %v14201_v44 }
 0x15b   :  { %13356 = vrsqrt.f32 %v441_v11  ;;  %v410_v26 = vmul.f32 0.03125, %v326_v12  ;;  %v237_v13 = vmul.f32 0.03125, %v190_v53  ;;  %v300_v15 = vmul.f32 %v14417_v48, %v14417_v48 }
 0x15c   :  { %v631_v58 = vpack.c.bf16 %v578_v47, %v577_v55  ;;  %v541_v8 = vmul.f32 %v14395_v33, %v503_v56 }
 0x15d   :  { %v13355_v54 = vpop.eup %13354  ;;  %v442_v62 = vadd.f32 1e-05, %v410_v26  ;;  %v14427_v63 = vsub.f32 %v14259_v27, %v237_v13  ;;  %v378_v32 = vsel %vm115_vm0, %v300_v15, 0.0 }
 0x15e   :  { %379 = vadd.xlane.f32.xlu1 %v378_v32  ;;  %v193_v2 = vpop.xlane.xlu1 %192  ;;  %11580 = vmatmul.mubr.msk.bf16.vlgmr.msra.gmra.mrb[0].mxu0 %vm115_vm0, %v631_v58  ;;  %v329_v5 = vpop.xlane.xlu0 %328  ;;  %v504_v44 = vmul.f32 %v13355_v54, %v14212_v50  ;;  %v579_v28 = vadd.f32 %v14413_v3, %v541_v8 }
 0x15f   :  { %13358 = vrsqrt.f32 %v442_v62  ;;  %v238_v61 = vmul.f32 0.03125, %v193_v2  ;;  %v411_v40 = vmul.f32 0.03125, %v329_v5  ;;  %v301_v16 = vmul.f32 %v14427_v63, %v14427_v63  ;;  %768 = vmatprep.mubr.bf16.mxu0 %v18788_v37 }
 0x160   :  { %v542_v27 = vmul.f32 %v14395_v33, %v504_v44 }
 0x161   :  { %v14438_v18 = vsub.f32 %v14267_v35, %v238_v61  ;;  %v443_v19 = vadd.f32 1e-05, %v411_v40  ;;  %v381_v22 = vsel %vm115_vm0, %v301_v16, 0.0 }
 0x162   :  { %v332_v25 = vpop.xlane.xlu1 %331  ;;  %382 = vadd.xlane.f32.xlu0 %v381_v22  ;;  %v196_v50 = vpop.xlane.xlu0 %195  ;;  %v580_v34 = vadd.f32 %v14413_v3, %v542_v27 }
 0x163   :  { %13360 = vrsqrt.f32 %v443_v19  ;;  %v412_v4 = vmul.f32 0.03125, %v332_v25  ;;  %v239_v36 = vmul.f32 0.03125, %v196_v50  ;;  %v302_v38 = vmul.f32 %v14438_v18, %v14438_v18 }
 0x164   :  { %v632_v11 = vpack.c.bf16 %v580_v34, %v579_v28 }
 0x165   :  { %v13357_v23 = vpop.eup %13356  ;;  %v444_v35 = vadd.f32 1e-05, %v412_v4  ;;  %v14446_v51 = vsub.f32 %v14279_v43, %v239_v36  ;;  %v384_v12 = vsel %vm115_vm0, %v302_v38, 0.0 }
 0x166   :  { %385 = vadd.xlane.f32.xlu1 %v384_v12  ;;  %v199_v53 = vpop.xlane.xlu1 %198  ;;  %11581 = vmatmul.mubr.msk.bf16.gmra.mrb[4].mxu0 %vm115_vm0, %v632_v11  ;;  %v335_v55 = vpop.xlane.xlu0 %334  ;;  %v505_v47 = vmul.f32 %v13357_v23, %v14234_v1 }
 0x167   :  { %13362 = vrsqrt.f32 %v444_v35  ;;  %v240_v56 = vmul.f32 0.03125, %v199_v53  ;;  %v413_v26 = vmul.f32 0.03125, %v335_v55  ;;  %v303_v13 = vmul.f32 %v14446_v51, %v14446_v51  ;;  %778 = vmatprep.mubr.bf16.mxu0 %v18788_v37 }
 0x168   :  { %v543_v2 = vmul.f32 %v14395_v33, %v505_v47 }
 0x169   :  { %v13359_v15 = vpop.eup %13358  ;;  %v14455_v43 = vsub.f32 %v14287_v52, %v240_v56  ;;  %v445_v58 = vadd.f32 1e-05, %v413_v26  ;;  %v387_v54 = vsel %vm115_vm0, %v303_v13, 0.0 }
 0x16a   :  { %v338_v62 = vpop.xlane.xlu1 %337  ;;  %388 = vadd.xlane.f32.xlu0 %v387_v54  ;;  %v202_v32 = vpop.xlane.xlu0 %201  ;;  %v506_v1 = vmul.f32 %v13359_v15, %v14243_v9  ;;  %v581_v22 = vadd.f32 %v14413_v3, %v543_v2 }
 0x16b   :  { %13364 = vrsqrt.f32 %v445_v58  ;;  %v414_v5 = vmul.f32 0.03125, %v338_v62  ;;  %v241_v44 = vmul.f32 0.03125, %v202_v32  ;;  %v304_v8 = vmul.f32 %v14455_v43, %v14455_v43 }
 0x16c   :  { %v544_v61 = vmul.f32 %v14395_v33, %v506_v1 }
 0x16d   :  { %v13361_v52 = vpop.eup %13360  ;;  %v446_v40 = vadd.f32 1e-05, %v414_v5  ;;  %v14464_v16 = vsub.f32 %v14305_v0, %v241_v44  ;;  %v390_v27 = vsel %vm115_vm0, %v304_v8, 0.0 }
 0x16e   :  { %391 = vadd.xlane.f32.xlu1 %v390_v27  ;;  %v205_v19 = vpop.xlane.xlu1 %204  ;;  %v341_v9 = vpop.xlane.xlu0 %340  ;;  %v582_v25 = vadd.f32 %v14413_v3, %v544_v61  ;;  %v507_v50 = vmul.f32 %v13361_v52, %v14255_v7 }
 0x16f   :  { %13366 = vrsqrt.f32 %v446_v40  ;;  %v242_v28 = vmul.f32 0.03125, %v205_v19  ;;  %v415_v34 = vmul.f32 0.03125, %v341_v9  ;;  %v305_v4 = vmul.f32 %v14464_v16, %v14464_v16 }
 0x170   :  { %v633_v36 = vpack.c.bf16 %v582_v25, %v581_v22  ;;  %v545_v53 = vmul.f32 %v14395_v33, %v507_v50 }
 0x171   :  { %v13363_v0 = vpop.eup %13362  ;;  %v14473_v38 = vsub.f32 %v14319_v17, %v242_v28  ;;  %v447_v11 = vadd.f32 1e-05, %v415_v34  ;;  %v393_v23 = vsel %vm115_vm0, %v305_v4, 0.0 }
 0x172   :  { %v344_v35 = vpop.xlane.xlu1 %343  ;;  %11582 = vmatmul.mubr.msk.bf16.gmra.mrb[8].mxu0 %vm115_vm0, %v633_v36  ;;  %394 = vadd.xlane.f32.xlu0 %v393_v23  ;;  %v208_v12 = vpop.xlane.xlu0 %207  ;;  %v508_v7 = vmul.f32 %v13363_v0, %v14264_v31  ;;  %v583_v62 = vadd.f32 %v14413_v3, %v545_v53 }
 0x173   :  { %13368 = vrsqrt.f32 %v447_v11  ;;  %v416_v55 = vmul.f32 0.03125, %v344_v35  ;;  %v243_v47 = vmul.f32 0.03125, %v208_v12  ;;  %v306_v56 = vmul.f32 %v14473_v38, %v14473_v38  ;;  %788 = vmatprep.mubr.bf16.mxu0 %v18788_v37 }
 0x174   :  { %v546_v17 = vmul.f32 %v14395_v33, %v508_v7 }
 0x175   :  { %v13365_v26 = vpop.eup %13364  ;;  %v448_v13 = vadd.f32 1e-05, %v416_v55  ;;  %v14484_v15 = vsub.f32 %v14331_v10, %v243_v47  ;;  %v396_v58 = vsel %vm115_vm0, %v306_v56, 0.0 }
 0x176   :  { %397 = vadd.xlane.f32.xlu1 %v396_v58  ;;  %v211_v31 = vpop.xlane.xlu1 %210  ;;  %v347_v54 = vpop.xlane.xlu0 %346  ;;  %v584_v32 = vadd.f32 %v14413_v3, %v546_v17  ;;  %v509_v1 = vmul.f32 %v13365_v26, %v14275_v41 }
 0x177   :  { %13370 = vrsqrt.f32 %v448_v13  ;;  %v244_v2 = vmul.f32 0.03125, %v211_v31  ;;  %v417_v5 = vmul.f32 0.03125, %v347_v54  ;;  %v307_v44 = vmul.f32 %v14484_v15, %v14484_v15 }
 0x178   :  { %v634_v8 = vpack.c.bf16 %v584_v32, %v583_v62  ;;  %v547_v9 = vmul.f32 %v14395_v33, %v509_v1 }
 0x179   :  { %v13367_v10 = vpop.eup %13366  ;;  %v14493_v61 = vsub.f32 %v14343_v46, %v244_v2  ;;  %v449_v52 = vadd.f32 1e-05, %v417_v5  ;;  %v399_v40 = vsel %vm115_vm0, %v307_v44, 0.0 }
 0x17a   :  { %v350_v27 = vpop.xlane.xlu1 %349  ;;  %11583 = vmatmul.mubr.msk.bf16.gmra.mrb[12].mxu0 %vm115_vm0, %v634_v8  ;;  %400 = vadd.xlane.f32.xlu0 %v399_v40  ;;  %v353_v19 = vpop.xlane.xlu0 %352  ;;  %v510_v41 = vmul.f32 %v13367_v10, %v14284_v49  ;;  %v585_v11 = vadd.f32 %v14413_v3, %v547_v9 }
 0x17b   :  { %13372 = vrsqrt.f32 %v449_v52  ;;  %v418_v22 = vmul.f32 0.03125, %v350_v27  ;;  %v419_v25 = vmul.f32 0.03125, %v353_v19  ;;  %v308_v50 = vmul.f32 %v14493_v61, %v14493_v61  ;;  %798 = vmatprep.mubr.bf16.mxu0 %v18788_v37 }
 0x17c   :  { %v548_v46 = vmul.f32 %v14395_v33, %v510_v41 }
 0x17d   :  { %v13369_v28 = vpop.eup %13368  ;;  %v450_v34 = vadd.f32 1e-05, %v418_v22  ;;  %v451_v4 = vadd.f32 1e-05, %v419_v25  ;;  %v402_v36 = vsel %vm115_vm0, %v308_v50, 0.0 }
 0x17e   :  { %403 = vadd.xlane.f32.xlu1 %v402_v36  ;;  %v356_v0 = vpop.xlane.xlu1 %355  ;;  %v359_v49 = vpop.xlane.xlu0 %358  ;;  %v586_v23 = vadd.f32 %v14413_v3, %v548_v46  ;;  %v511_v35 = vmul.f32 %v13369_v28, %v14301_v60 }
 0x17f   :  { %13374 = vrsqrt.f32 %v450_v34  ;;  %v420_v12 = vmul.f32 0.03125, %v356_v0  ;;  %v421_v47 = vmul.f32 0.03125, %v359_v49 }
 0x180   :  { %v635_v7 = vpack.c.bf16 %v586_v23, %v585_v11  ;;  %13376 = vrsqrt.f32 %v451_v4  ;;  %v549_v26 = vmul.f32 %v14395_v33, %v511_v35  ;;  %v13320_v11 = vld [vmem:[%s18768_s5 + $0x10] sm:$0xff]   ;;  %v13321_v23 = vld [vmem:[%s18768_s5 + $0x18] sm:$0xff]   ;;  %v13322_v35 = vld [vmem:[%s18768_s5 + $0x20] sm:$0xff]  }
 0x181   :  { %v13371_v53 = vpop.eup %13370  ;;  %v452_v55 = vadd.f32 1e-05, %v420_v12  ;;  %v453_v31 = vadd.f32 1e-05, %v421_v47  ;;  %v13323_v12 = vld [vmem:[%s18768_s5 + $0x28] sm:$0xff]  }
 0x182   :  { %v362_v56 = vpop.xlane.xlu1 %361  ;;  %11584 = vmatmul.mubr.msk.bf16.gmra.mrb[16].mxu0 %vm115_vm0, %v635_v7  ;;  %v512_v17 = vmul.f32 %v13371_v53, %v14316_v6  ;;  %v587_v62 = vadd.f32 %v14413_v3, %v549_v26  ;;  %v13324_v7 = vld [vmem:[%s18768_s5 + $0x30] sm:$0xff]   ;;  %v13325_v53 = vld [vmem:[%s18768_s5 + $0x38] sm:$0xff]  }
 0x183   :  { %13378 = vrsqrt.f32 %v452_v55  ;;  %v422_v13 = vmul.f32 0.03125, %v362_v56  ;;  %808 = vmatprep.mubr.bf16.mxu0 %v18788_v37 }
 0x184   :  { %v550_v60 = vmul.f32 %v14395_v33, %v512_v17 }
 0x185   :  { %v13373_v58 = vpop.eup %13372  ;;  %v454_v54 = vadd.f32 1e-05, %v422_v13 }
 0x186   :  { %v588_v32 = vadd.f32 %v14413_v3, %v550_v60  ;;  %v513_v1 = vmul.f32 %v13373_v58, %v14327_v30 }
 0x187   :  { %13380 = vrsqrt.f32 %v454_v54 }
 0x188   :  { %v636_v2 = vpack.c.bf16 %v588_v32, %v587_v62  ;;  %13382 = vrsqrt.f32 %v453_v31  ;;  %v551_v44 = vmul.f32 %v14395_v33, %v513_v1 }
 0x189   :  { %v13375_v6 = vpop.eup %13374 }
 0x18a   :  { %11585 = vmatmul.mubr.msk.bf16.gmra.mrb[20].mxu0 %vm115_vm0, %v636_v2  ;;  %v514_v5 = vmul.f32 %v13375_v6, %v14335_v39  ;;  %v13377_v8 = vpop.eup %13376  ;;  %v589_v40 = vadd.f32 %v14413_v3, %v551_v44 }
 0x18b   :  { %818 = vmatprep.mubr.bf16.mxu0 %v18788_v37  ;;  %v515_v27 = vmul.f32 %v13377_v8, %v14341_v45 }
 0x18c   :  { %v552_v10 = vmul.f32 %v14395_v33, %v514_v5 }
 0x18d   :  { %v13379_v52 = vpop.eup %13378  ;;  %v553_v22 = vmul.f32 %v14395_v33, %v515_v27 }
 0x18e   :  { %v590_v30 = vadd.f32 %v14413_v3, %v552_v10  ;;  %v516_v19 = vmul.f32 %v13379_v52, %v14348_v24 }
 0x18f   :  { %v591_v28 = vadd.f32 %v14413_v3, %v553_v22 }
 0x190   :  { %v637_v41 = vpack.c.bf16 %v590_v30, %v589_v40  ;;  %v554_v9 = vmul.f32 %v14395_v33, %v516_v19 }
 0x191   :  { %v13381_v39 = vpop.eup %13380 }
 0x192   :  { %11586 = vmatmul.mubr.msk.bf16.gmra.mrb[24].mxu0 %vm115_vm0, %v637_v41  ;;  %v13383_v25 = vpop.eup %13382  ;;  %v592_v50 = vadd.f32 %v14413_v3, %v554_v9  ;;  %v518_v46 = vmul.f32 %v13381_v39, %v14362_v59  ;;  %v13319_v59 = vld [vmem:[%s18768_s5 + $0x8] sm:$0xff]  }
 0x193   :  { %828 = vmatprep.mubr.bf16.mxu0 %v18788_v37  ;;  %v517_v45 = vmul.f32 %v13383_v25, %v14356_v57  ;;  %v13318_v57 = vld [vmem:[%s18768_s5] sm:$0xff]  }
 0x194   :  { %v638_v24 = vpack.c.bf16 %v592_v50, %v591_v28  ;;  %v556_v34 = vmul.f32 %v14395_v33, %v518_v46  ;;  %12215 = vmatprep.subr.bf16.mxu1 %v13318_v57 }
 0x195   :  { %v555_v4 = vmul.f32 %v14395_v33, %v517_v45  ;;  %12216 = vmatpush3.bf16.msra.mxu1 %v13318_v57 }
 0x196   :  { %v594_v36 = vadd.f32 %v14413_v3, %v556_v34  ;;  %12217 = vmatprep.subr.bf16.mxu1 %v13319_v59 }
 0x197   :  { %v593_v0 = vadd.f32 %v14413_v3, %v555_v4 }
 0x199   :  { %v639_v49 = vpack.c.bf16 %v594_v36, %v593_v0  ;;  %12218 = vmatpush3.bf16.msra.mxu1 %v13319_v59 }
 0x19a   :  { %11587 = vmatmul.mubr.msk.bf16.gmra.mrb[28].mxu0 %vm115_vm0, %v638_v24  ;;  %12219 = vmatprep.subr.bf16.mxu1 %v13320_v11 }
 0x19b   :  { %838 = vmatprep.mubr.bf16.mxu0 %v18788_v37 }
 0x19d   :  { %12220 = vmatpush3.bf16.msra.mxu1 %v13320_v11 }
 0x19e   :  { %12221 = vmatprep.subr.bf16.mxu1 %v13321_v23 }
 0x1a1   :  { %12222 = vmatpush3.bf16.msra.mxu1 %v13321_v23 }
 0x1a2   :  { %11588 = vmatmul.mubr.msk.bf16.gmra.mrb[32].mxu0 %vm115_vm0, %v639_v49  ;;  %12223 = vmatprep.subr.bf16.mxu1 %v13322_v35 }
 0x1a3   :  { %848 = vmatprep.mubr.bf16.mxu0 %v18788_v37 }
 0x1a5   :  { %12224 = vmatpush3.bf16.msra.mxu1 %v13322_v35 }
 0x1a6   :  { %12225 = vmatprep.subr.bf16.mxu1 %v13323_v12 }
 0x1a9   :  { %12226 = vmatpush3.bf16.msra.mxu1 %v13323_v12 }
 0x1aa   :  { %12227 = vmatprep.subr.bf16.mxu1 %v13324_v7 }
 0x1ad   :  { %12228 = vmatpush3.bf16.msra.mxu1 %v13324_v7 }
 0x1ae   :  { %12229 = vmatprep.subr.bf16.mxu1 %v13325_v53 }
 0x1b1   :  { %12230 = vmatpush3.bf16.msra.mxu1 %v13325_v53 }
 0x1db   :  { %v365_v55 = vpop.xlane.xlu0 %364 }
 0x1dc   :  { %v423_v47 = vmul.f32 0.03125, %v365_v55 }
 0x1de   :  { %v455_v56 = vadd.f32 1e-05, %v423_v47 }
 0x1df   :  { %v368_v17 = vpop.xlane.xlu1 %367 }
 0x1e0   :  { %13384 = vrsqrt.f32 %v455_v56  ;;  %v424_v26 = vmul.f32 0.03125, %v368_v17 }
 0x1e2   :  { %v456_v13 = vadd.f32 1e-05, %v424_v26 }
 0x1e3   :  { %v371_v60 = vpop.xlane.xlu0 %370 }
 0x1e4   :  { %13386 = vrsqrt.f32 %v456_v13  ;;  %v425_v58 = vmul.f32 0.03125, %v371_v60 }
 0x1e6   :  { %v457_v31 = vadd.f32 1e-05, %v425_v58 }
 0x1e7   :  { %v374_v54 = vpop.xlane.xlu1 %373  ;;  %v377_v62 = vpop.xlane.xlu0 %376 }
 0x1e8   :  { %13388 = vrsqrt.f32 %v457_v31  ;;  %v426_v32 = vmul.f32 0.03125, %v374_v54  ;;  %v427_v1 = vmul.f32 0.03125, %v377_v62 }
 0x1ea   :  { %v13385_v2 = vpop.eup %13384  ;;  %v458_v6 = vadd.f32 1e-05, %v426_v32  ;;  %v459_v5 = vadd.f32 1e-05, %v427_v1 }
 0x1eb   :  { %v380_v44 = vpop.xlane.xlu1 %379  ;;  %v519_v8 = vmul.f32 %v13385_v2, %v14375_v21 }
 0x1ec   :  { %13390 = vrsqrt.f32 %v458_v6  ;;  %v428_v10 = vmul.f32 0.03125, %v380_v44 }
 0x1ed   :  { %13392 = vrsqrt.f32 %v459_v5  ;;  %v557_v19 = vmul.f32 %v14395_v33, %v519_v8 }
 0x1ee   :  { %v13387_v52 = vpop.eup %13386  ;;  %v460_v40 = vadd.f32 1e-05, %v428_v10 }
 0x1ef   :  { %v383_v30 = vpop.xlane.xlu0 %382  ;;  %v520_v27 = vmul.f32 %v13387_v52, %v14380_v42  ;;  %v595_v50 = vadd.f32 %v14413_v3, %v557_v19 }
 0x1f0   :  { %13394 = vrsqrt.f32 %v460_v40  ;;  %v429_v41 = vmul.f32 0.03125, %v383_v30 }
 0x1f1   :  { %v558_v9 = vmul.f32 %v14395_v33, %v520_v27 }
 0x1f2   :  { %v13389_v39 = vpop.eup %13388  ;;  %v461_v22 = vadd.f32 1e-05, %v429_v41 }
 0x1f3   :  { %v386_v25 = vpop.xlane.xlu1 %385  ;;  %v596_v21 = vadd.f32 %v14413_v3, %v558_v9  ;;  %v521_v46 = vmul.f32 %v13389_v39, %v14386_v29 }
 0x1f4   :  { %v430_v28 = vmul.f32 0.03125, %v386_v25  ;;  %13396 = vrsqrt.f32 %v461_v22 }
 0x1f5   :  { %v640_v45 = vpack.c.bf16 %v596_v21, %v595_v50  ;;  %v559_v36 = vmul.f32 %v14395_v33, %v521_v46 }
 0x1f6   :  { %v13391_v24 = vpop.eup %13390  ;;  %v462_v42 = vadd.f32 1e-05, %v430_v28 }
 0x1f7   :  { %11589 = vmatmul.mubr.msk.bf16.gmra.mrb[36].mxu0 %vm115_vm0, %v640_v45  ;;  %v389_v34 = vpop.xlane.xlu0 %388  ;;  %v522_v4 = vmul.f32 %v13391_v24, %v14398_v20  ;;  %v13393_v0 = vpop.eup %13392  ;;  %v597_v23 = vadd.f32 %v14413_v3, %v559_v36 }
 0x1f8   :  { %13398 = vrsqrt.f32 %v462_v42  ;;  %v431_v49 = vmul.f32 0.03125, %v389_v34  ;;  %858 = vmatprep.mubr.bf16.mxu0 %v18788_v37  ;;  %v523_v12 = vmul.f32 %v13393_v0, %v14401_v14 }
 0x1f9   :  { %v560_v57 = vmul.f32 %v14395_v33, %v522_v4 }
 0x1fa   :  { %v13395_v29 = vpop.eup %13394  ;;  %v463_v59 = vadd.f32 1e-05, %v431_v49  ;;  %v561_v17 = vmul.f32 %v14395_v33, %v523_v12  ;;  %v613_v12 = vld [vmem:[%s18910_s3] sm:$0x3]  ;;  %s14011_s3 = smov 16  }
 0x1fb   :  { %v392_v11 = vpop.xlane.xlu1 %391  ;;  %v598_v35 = vadd.f32 %v14413_v3, %v560_v57  ;;  %v524_v20 = vmul.f32 %v13395_v29, %v14417_v48 }
 0x1fc   :  { %v432_v7 = vmul.f32 0.03125, %v392_v11  ;;  %13400 = vrsqrt.f32 %v463_v59  ;;  %v599_v31 = vadd.f32 %v14413_v3, %v561_v17 }
 0x1fd   :  { %v641_v53 = vpack.c.bf16 %v598_v35, %v597_v23  ;;  %v562_v55 = vmul.f32 %v14395_v33, %v524_v20  ;;  %v648_v23 = vlaneseq }
 0x1fe   :  { %v464_v47 = vadd.f32 1e-05, %v432_v7  ;;  %v13397_v26 = vpop.eup %13396 }
 0x1ff   :  { %11590 = vmatmul.mubr.msk.bf16.gmra.mrb[40].mxu0 %vm115_vm0, %v641_v53  ;;  %v395_v56 = vpop.xlane.xlu0 %394  ;;  %v600_v14 = vadd.f32 %v14413_v3, %v562_v55  ;;  %v525_v54 = vmul.f32 %v13397_v26, %v14427_v63 }
 0x200   :  { %13402 = vrsqrt.f32 %v464_v47  ;;  %v433_v13 = vmul.f32 0.03125, %v395_v56  ;;  %868 = vmatprep.mubr.bf16.mxu0 %v18788_v37 }
 0x201   :  { %v642_v1 = vpack.c.bf16 %v600_v14, %v599_v31  ;;  %v563_v44 = vmul.f32 %v14395_v33, %v525_v54 }
 0x202   :  { %v13399_v60 = vpop.eup %13398  ;;  %v465_v48 = vadd.f32 1e-05, %v433_v13 }
 0x203   :  { %v398_v58 = vpop.xlane.xlu1 %397  ;;  %v526_v62 = vmul.f32 %v13399_v60, %v14438_v18  ;;  %v601_v30 = vadd.f32 %v14413_v3, %v563_v44 }
 0x204   :  { %v434_v32 = vmul.f32 0.03125, %v398_v58  ;;  %13404 = vrsqrt.f32 %v465_v48 }
 0x205   :  { %v564_v2 = vmul.f32 %v14395_v33, %v526_v62 }
 0x206   :  { %v466_v6 = vadd.f32 1e-05, %v434_v32  ;;  %v13401_v8 = vpop.eup %13400 }
 0x207   :  { %11591 = vmatmul.mubr.msk.bf16.gmra.mrb[44].mxu0 %vm115_vm0, %v642_v1  ;;  %v401_v5 = vpop.xlane.xlu0 %400  ;;  %v602_v63 = vadd.f32 %v14413_v3, %v564_v2  ;;  %v527_v27 = vmul.f32 %v13401_v8, %v14446_v51 }
 0x208   :  { %13406 = vrsqrt.f32 %v466_v6  ;;  %v435_v10 = vmul.f32 0.03125, %v401_v5  ;;  %878 = vmatprep.mubr.bf16.mxu0 %v18788_v37 }
 0x209   :  { %v643_v9 = vpack.c.bf16 %v602_v63, %v601_v30  ;;  %v565_v25 = vmul.f32 %v14395_v33, %v527_v27 }
 0x20a   :  { %v13403_v52 = vpop.eup %13402  ;;  %v467_v18 = vadd.f32 1e-05, %v435_v10 }
 0x20b   :  { %v404_v40 = vpop.xlane.xlu1 %403  ;;  %v528_v19 = vmul.f32 %v13403_v52, %v14455_v43  ;;  %v603_v51 = vadd.f32 %v14413_v3, %v565_v25 }
 0x20c   :  { %v436_v41 = vmul.f32 0.03125, %v404_v40  ;;  %13408 = vrsqrt.f32 %v467_v18 }
 0x20d   :  { %v566_v39 = vmul.f32 %v14395_v33, %v528_v19 }
 0x20e   :  { %v468_v22 = vadd.f32 1e-05, %v436_v41  ;;  %v13405_v50 = vpop.eup %13404 }
 0x20f   :  { %11592 = vmatmul.mubr.msk.bf16.gmra.mrb[48].mxu0 %vm115_vm0, %v643_v9  ;;  %v604_v21 = vadd.f32 %v14413_v3, %v566_v39  ;;  %v529_v43 = vmul.f32 %v13405_v50, %v14464_v16 }
 0x210   :  { %13410 = vrsqrt.f32 %v468_v22  ;;  %888 = vmatprep.mubr.bf16.mxu0 %v18788_v37 }
 0x211   :  { %v644_v45 = vpack.c.bf16 %v604_v21, %v603_v51  ;;  %v567_v42 = vmul.f32 %v14395_v33, %v529_v43 }
 0x212   :  { %v13407_v46 = vpop.eup %13406 }
 0x213   :  { %v530_v28 = vmul.f32 %v13407_v46, %v14473_v38  ;;  %v605_v0 = vadd.f32 %v14413_v3, %v567_v42 }
 0x215   :  { %v568_v24 = vmul.f32 %v14395_v33, %v530_v28 }
 0x216   :  { %v13409_v34 = vpop.eup %13408 }
 0x217   :  { %11593 = vmatmul.mubr.msk.bf16.gmra.mrb[52].mxu0 %vm115_vm0, %v644_v45  ;;  %v606_v4 = vadd.f32 %v14413_v3, %v568_v24  ;;  %v531_v49 = vmul.f32 %v13409_v34, %v14484_v15  ;;  %v14619_v15 = vshrl.u32 %v648_v23, 7 }
 0x218   :  { %898 = vmatprep.mubr.bf16.mxu0 %v18788_v37 }
 0x219   :  { %v645_v38 = vpack.c.bf16 %v606_v4, %v605_v0  ;;  %v569_v29 = vmul.f32 %v14395_v33, %v531_v49  ;;  %18909 = vst [vmem:[#allocation8_spill] sm:$0xff] %v14619_v15  ;;  %v18786_v30 = vsub.s32 0, %v14619_v15 }
 0x21a   :  { %v13411_v36 = vpop.eup %13410 }
 0x21b   :  { %v532_v16 = vmul.f32 %v13411_v36, %v14493_v61  ;;  %v607_v11 = vadd.f32 %v14413_v3, %v569_v29  ;;  %v18787_v61 = vsub.s32 1, %v14619_v15  ;;  %v14653_v50 = vrot.slane %v613_v12, %v18786_v30  ;;  %v13955_v30 = vld [vmem:[#allocation2 + $0xf8] sm:$0xff] }
 0x21d   :  { %v570_v57 = vmul.f32 %v14395_v33, %v532_v16  ;;  %v14627_v33 = vrot.slane %v613_v12, %v18787_v61 }
 0x21f   :  { %11594 = vmatmul.mubr.msk.bf16.gmra.mrb[56].mxu0 %vm115_vm0, %v645_v38  ;;  %v608_v59 = vadd.f32 %v14413_v3, %v570_v57 }
 0x220   :  { %908 = vmatprep.mubr.bf16.mxu0 %v18788_v37 }
 0x221   :  { %v646_v35 = vpack.c.bf16 %v608_v59, %v607_v11 }
 0x227   :  { %11595 = vmatmul.mubr.msk.bf16.gmra.mrb[60].mxu0 %vm115_vm0, %v646_v35 }
 0x231   :  { %v760_v20 = vpop.f32.mrb[0].mxu0 }
 0x232   :  { %v762_v7 = vpop.f32.mrb[1].mxu0  ;;  %v761_v4 = vadd.f32 %v760_v20, %v14653_v50 }
 0x233   :  { %v763_v3 = vadd.f32 %v762_v7, %v14627_v33  ;;  %v764_v53 = vpop.f32.mrb[2].mxu0 }
 0x234   :  { %v766_v55 = vpop.f32.mrb[3].mxu0  ;;  %v765_v29 = vadd.f32 %v764_v53, %v14653_v50 }
 0x235   :  { %v767_v47 = vadd.f32 %v766_v55, %v14627_v33  ;;  %v951_v56 = vmul.f32 0.044715, %v763_v3  ;;  %v919_v28 = vmul.f32 0.5, %v763_v3 }
 0x237   :  { %v952_v17 = vmul.f32 0.044715, %v767_v47  ;;  %v983_v26 = vmul.f32 %v951_v56, %v763_v3  ;;  %v920_v36 = vmul.f32 0.5, %v767_v47 }
 0x239   :  { %v14631_v13 = vpop.f32.mrb[4].mxu0  ;;  %v984_v14 = vmul.f32 %v952_v17, %v767_v47  ;;  %v1015_v60 = vmul.f32 %v983_v26, %v763_v3 }
 0x23a   :  { %v772_v48 = vpop.f32.mrb[5].mxu0 }
 0x23b   :  { %v773_v58 = vadd.f32 %v772_v48, %v14627_v33  ;;  %v14634_v31 = vpop.f32.mrb[6].mxu0  ;;  %v1016_v54 = vmul.f32 %v984_v14, %v767_v47  ;;  %v1047_v62 = vadd.f32 %v1015_v60, %v763_v3 }
 0x23c   :  { %v776_v32 = vpop.f32.mrb[7].mxu0 }
 0x23d   :  { %v953_v1 = vmul.f32 0.044715, %v773_v58  ;;  %v14637_v2 = vadd.f32 %v776_v32, %v14627_v33  ;;  %v1048_v6 = vadd.f32 %v1016_v54, %v767_v47  ;;  %v1079_v5 = vmul.f32 0.7978846, %v1047_v62 }
 0x23e   :  { %v921_v60 = vmul.f32 0.5, %v773_v58 }
 0x23f   :  { %v985_v44 = vmul.f32 %v953_v1, %v773_v58  ;;  %v954_v8 = vmul.f32 0.044715, %v14637_v2  ;;  %v1080_v10 = vmul.f32 0.7978846, %v1048_v6  ;;  %13412 = vtanh.f32 %v1079_v5 }
 0x240   :  { %v771_v6 = vadd.f32 %v14631_v13, %v14653_v50  ;;  %v922_v5 = vmul.f32 0.5, %v14637_v2 }
 0x241   :  { %v986_v63 = vmul.f32 %v954_v8, %v14637_v2  ;;  %13414 = vtanh.f32 %v1080_v10  ;;  %v1017_v52 = vmul.f32 %v985_v44, %v773_v58 }
 0x243   :  { %v1018_v18 = vmul.f32 %v986_v63, %v14637_v2  ;;  %v1049_v40 = vadd.f32 %v1017_v52, %v773_v58  ;;  %v775_v52 = vadd.f32 %v14634_v31, %v14653_v50 }
 0x245   :  { %v14643_v27 = vpop.f32.mrb[8].mxu0  ;;  %v1050_v19 = vadd.f32 %v1018_v18, %v14637_v2  ;;  %v1081_v41 = vmul.f32 0.7978846, %v1049_v40 }
 0x246   :  { %v782_v9 = vpop.f32.mrb[9].mxu0 }
 0x247   :  { %v14647_v39 = vadd.f32 %v782_v9, %v14627_v33  ;;  %v14649_v22 = vpop.f32.mrb[10].mxu0  ;;  %v1082_v25 = vmul.f32 0.7978846, %v1050_v19  ;;  %13416 = vtanh.f32 %v1081_v41 }
 0x248   :  { %v786_v21 = vpop.f32.mrb[11].mxu0 }
 0x249   :  { %v13413_v46 = vpop.eup %13412  ;;  %v955_v51 = vmul.f32 0.044715, %v14647_v39  ;;  %v14657_v43 = vadd.f32 %v786_v21, %v14627_v33  ;;  %13418 = vtanh.f32 %v1082_v25 }
 0x24a   :  { %v1143_v45 = vadd.f32 1.0, %v13413_v46 }
 0x24b   :  { %v13415_v24 = vpop.eup %13414  ;;  %v987_v42 = vmul.f32 %v955_v51, %v14647_v39  ;;  %v956_v34 = vmul.f32 0.044715, %v14657_v43 }
 0x24c   :  { %v1144_v0 = vadd.f32 1.0, %v13415_v24  ;;  %v1175_v49 = vmul.f32 %v1143_v45, %v919_v28 }
 0x24d   :  { %v988_v16 = vmul.f32 %v956_v34, %v14657_v43  ;;  %v14663_v38 = vpop.f32.mrb[12].mxu0  ;;  %v1019_v57 = vmul.f32 %v987_v42, %v14647_v39 }
 0x24e   :  { %v792_v59 = vpop.f32.mrb[13].mxu0  ;;  %v1176_v11 = vmul.f32 %v1144_v0, %v920_v36  ;;  %v1207_v23 = vmul.f32 %v1175_v49, %v761_v4 }
 0x24f   :  { %v14668_v35 = vadd.f32 %v792_v59, %v14627_v33  ;;  %v14670_v12 = vpop.f32.mrb[14].mxu0  ;;  %v1020_v20 = vmul.f32 %v988_v16, %v14657_v43  ;;  %v1051_v7 = vadd.f32 %v1019_v57, %v14647_v39  ;;  %v923_v57 = vmul.f32 0.5, %v14647_v39 }
 0x250   :  { %v796_v3 = vpop.f32.mrb[15].mxu0  ;;  %v1208_v55 = vmul.f32 %v1176_v11, %v765_v29 }
 0x251   :  { %v13417_v47 = vpop.eup %13416  ;;  %v957_v56 = vmul.f32 0.044715, %v14668_v35  ;;  %v14676_v17 = vadd.f32 %v796_v3, %v14627_v33  ;;  %v1052_v53 = vadd.f32 %v1020_v20, %v14657_v43  ;;  %v1083_v26 = vmul.f32 0.7978846, %v1051_v7 }
 0x252   :  { %v1239_v14 = vpack.c.bf16 %v1208_v55, %v1207_v23  ;;  %v1145_v48 = vadd.f32 1.0, %v13417_v47  ;;  %v781_v3 = vadd.f32 %v14643_v27, %v14653_v50  ;;  %v924_v47 = vmul.f32 0.5, %v14657_v43 }
 0x253   :  { %v13419_v54 = vpop.eup %13418  ;;  %v989_v62 = vmul.f32 %v957_v56, %v14668_v35  ;;  %v958_v32 = vmul.f32 0.044715, %v14676_v17  ;;  %v1084_v1 = vmul.f32 0.7978846, %v1052_v53  ;;  %13420 = vtanh.f32 %v1083_v26 }
 0x254   :  { %12231 = vmatprep.mubr.bf16.mxu1 %v1239_v14  ;;  %v1146_v44 = vadd.f32 1.0, %v13419_v54  ;;  %v1177_v8 = vmul.f32 %v1145_v48, %v921_v60  ;;  %v785_v48 = vadd.f32 %v14649_v22, %v14653_v50  ;;  %v925_v22 = vmul.f32 0.5, %v14668_v35 }
 0x255   :  { %v990_v10 = vmul.f32 %v958_v32, %v14676_v17  ;;  %v14685_v63 = vpop.f32.mrb[16].mxu0  ;;  %13422 = vtanh.f32 %v1084_v1  ;;  %v1021_v58 = vmul.f32 %v989_v62, %v14668_v35 }
 0x256   :  { %v802_v18 = vpop.f32.mrb[17].mxu0  ;;  %v1178_v40 = vmul.f32 %v1146_v44, %v922_v5  ;;  %v1209_v19 = vmul.f32 %v1177_v8, %v771_v6 }
 0x257   :  { %v14691_v13 = vadd.f32 %v802_v18, %v14627_v33  ;;  %v14693_v41 = vpop.f32.mrb[18].mxu0  ;;  %v1022_v2 = vmul.f32 %v990_v10, %v14676_v17  ;;  %v1053_v9 = vadd.f32 %v1021_v58, %v14668_v35 }
 0x258   :  { %v806_v25 = vpop.f32.mrb[19].mxu0  ;;  %v1210_v21 = vmul.f32 %v1178_v40, %v775_v52 }
 0x259   :  { %v959_v46 = vmul.f32 0.044715, %v14691_v13  ;;  %v14699_v51 = vadd.f32 %v806_v25, %v14627_v33  ;;  %v1054_v31 = vadd.f32 %v1022_v2, %v14676_v17  ;;  %v1085_v28 = vmul.f32 0.7978846, %v1053_v9 }
 0x25a   :  { %v1240_v45 = vpack.c.bf16 %v1210_v21, %v1209_v19  ;;  %v791_v25 = vadd.f32 %v14663_v38, %v14653_v50 }
 0x25b   :  { %v991_v24 = vmul.f32 %v959_v46, %v14691_v13  ;;  %v960_v42 = vmul.f32 0.044715, %v14699_v51  ;;  %v1086_v34 = vmul.f32 0.7978846, %v1054_v31  ;;  %13424 = vtanh.f32 %v1085_v28 }
 0x25c   :  { %12232 = vmatmul.mubr.bf16.vlgmr.msra.gmra.mrb[0].mxu1 %v1240_v45  ;;  %v926_v46 = vmul.f32 0.5, %v14676_v17 }
 0x25d   :  { %v13421_v4 = vpop.eup %13420  ;;  %v992_v36 = vmul.f32 %v960_v42, %v14699_v51  ;;  %v14705_v0 = vpop.f32.mrb[20].mxu0  ;;  %13426 = vtanh.f32 %v1086_v34  ;;  %v1023_v49 = vmul.f32 %v991_v24, %v14691_v13  ;;  %v795_v34 = vadd.f32 %v14670_v12, %v14653_v50 }
 0x25e   :  { %v812_v16 = vpop.f32.mrb[21].mxu0  ;;  %v1147_v29 = vadd.f32 1.0, %v13421_v4  ;;  %v927_v12 = vmul.f32 0.5, %v14691_v13 }
 0x25f   :  { %v13423_v59 = vpop.eup %13422  ;;  %v14710_v11 = vadd.f32 %v812_v16, %v14627_v33  ;;  %v14712_v23 = vpop.f32.mrb[22].mxu0  ;;  %v1024_v20 = vmul.f32 %v992_v36, %v14699_v51  ;;  %v1055_v7 = vadd.f32 %v1023_v49, %v14691_v13 }
 0x260   :  { %v816_v55 = vpop.f32.mrb[23].mxu0  ;;  %v1148_v56 = vadd.f32 1.0, %v13423_v59  ;;  %v1179_v53 = vmul.f32 %v1147_v29, %v923_v57 }
 0x261   :  { %v961_v39 = vmul.f32 0.044715, %v14710_v11  ;;  %v14721_v26 = vadd.f32 %v816_v55, %v14627_v33  ;;  %v1056_v14 = vadd.f32 %v1024_v20, %v14699_v51  ;;  %v1087_v60 = vmul.f32 0.7978846, %v1055_v7 }
 0x262   :  { %v1180_v54 = vmul.f32 %v1148_v56, %v924_v47  ;;  %v1211_v62 = vmul.f32 %v1179_v53, %v781_v3 }
 0x263   :  { %v993_v27 = vmul.f32 %v961_v39, %v14710_v11  ;;  %v962_v32 = vmul.f32 0.044715, %v14721_v26  ;;  %v1088_v43 = vmul.f32 0.7978846, %v1056_v14  ;;  %13428 = vtanh.f32 %v1087_v60 }
 0x264   :  { %v1212_v1 = vmul.f32 %v1180_v54, %v785_v48  ;;  %v801_v60 = vadd.f32 %v14685_v63, %v14653_v50  ;;  %v928_v54 = vmul.f32 0.5, %v14699_v51 }
 0x265   :  { %v13425_v6 = vpop.eup %13424  ;;  %v994_v5 = vmul.f32 %v962_v32, %v14721_v26  ;;  %v14729_v44 = vpop.f32.mrb[24].mxu0  ;;  %13430 = vtanh.f32 %v1088_v43  ;;  %v1025_v8 = vmul.f32 %v993_v27, %v14710_v11 }
 0x266   :  { %v822_v10 = vpop.f32.mrb[25].mxu0  ;;  %v1241_v58 = vpack.c.bf16 %v1212_v1, %v1211_v62  ;;  %v1149_v52 = vadd.f32 1.0, %v13425_v6  ;;  %v805_v6 = vadd.f32 %v14693_v41, %v14653_v50  ;;  %v929_v41 = vmul.f32 0.5, %v14710_v11 }
 0x267   :  { %v13427_v18 = vpop.eup %13426  ;;  %v14734_v40 = vadd.f32 %v822_v10, %v14627_v33  ;;  %v14736_v19 = vpop.f32.mrb[26].mxu0  ;;  %v1026_v2 = vmul.f32 %v994_v5, %v14721_v26  ;;  %v1057_v9 = vadd.f32 %v1025_v8, %v14710_v11 }
 0x268   :  { %v826_v21 = vpop.f32.mrb[27].mxu0  ;;  %12235 = vmatprep.mubr.bf16.mxu1 %v1241_v58  ;;  %v1150_v31 = vadd.f32 1.0, %v13427_v18  ;;  %v1181_v35 = vmul.f32 %v1149_v52, %v925_v22 }
 0x269   :  { %v963_v28 = vmul.f32 0.044715, %v14734_v40  ;;  %v14745_v45 = vadd.f32 %v826_v21, %v14627_v33  ;;  %v1058_v24 = vadd.f32 %v1026_v2, %v14721_v26  ;;  %v1089_v42 = vmul.f32 0.7978846, %v1057_v9 }
 0x26a   :  { %v1182_v4 = vmul.f32 %v1150_v31, %v926_v46  ;;  %v1213_v36 = vmul.f32 %v1181_v35, %v791_v25 }
 0x26b   :  { %v995_v38 = vmul.f32 %v963_v28, %v14734_v40  ;;  %v964_v49 = vmul.f32 0.044715, %v14745_v45  ;;  %v1090_v17 = vmul.f32 0.7978846, %v1058_v24  ;;  %13432 = vtanh.f32 %v1089_v42 }
 0x26c   :  { %v1214_v16 = vmul.f32 %v1182_v4, %v795_v34  ;;  %v811_v42 = vadd.f32 %v14705_v0, %v14653_v50  ;;  %v930_v4 = vmul.f32 0.5, %v14721_v26 }
 0x26d   :  { %v13429_v57 = vpop.eup %13428  ;;  %v996_v29 = vmul.f32 %v964_v49, %v14745_v45  ;;  %v14753_v59 = vpop.f32.mrb[28].mxu0  ;;  %13434 = vtanh.f32 %v1090_v17  ;;  %v1027_v20 = vmul.f32 %v995_v38, %v14734_v40 }
 0x26e   :  { %v832_v7 = vpop.f32.mrb[29].mxu0  ;;  %v1242_v3 = vpack.c.bf16 %v1214_v16, %v1213_v36  ;;  %v1151_v55 = vadd.f32 1.0, %v13429_v57  ;;  %v815_v57 = vadd.f32 %v14712_v23, %v14653_v50  ;;  %v821_v23 = vadd.f32 %v14729_v44, %v14653_v50 }
 0x26f   :  { %v13431_v47 = vpop.eup %13430  ;;  %v14758_v56 = vadd.f32 %v832_v7, %v14627_v33  ;;  %v14760_v53 = vpop.f32.mrb[30].mxu0  ;;  %v1028_v39 = vmul.f32 %v996_v29, %v14745_v45  ;;  %v1059_v14 = vadd.f32 %v1027_v20, %v14734_v40 }
 0x270   :  { %v836_v48 = vpop.f32.mrb[31].mxu0  ;;  %12236 = vmatmul.mubr.bf16.gmra.mrb[4].mxu1 %v1242_v3  ;;  %v1152_v62 = vadd.f32 1.0, %v13431_v47  ;;  %v1183_v13 = vmul.f32 %v1151_v55, %v927_v12 }
 0x271   :  { %v965_v27 = vmul.f32 0.044715, %v14758_v56  ;;  %v14769_v32 = vadd.f32 %v836_v48, %v14627_v33  ;;  %v1060_v43 = vadd.f32 %v1028_v39, %v14745_v45  ;;  %v1091_v1 = vmul.f32 0.7978846, %v1059_v14 }
 0x272   :  { %v1184_v5 = vmul.f32 %v1152_v62, %v928_v54  ;;  %v1215_v8 = vmul.f32 %v1183_v13, %v801_v60  ;;  %v931_v14 = vmul.f32 0.5, %v14734_v40  ;;  %v932_v13 = vmul.f32 0.5, %v14745_v45 }
 0x273   :  { %v997_v63 = vmul.f32 %v965_v27, %v14758_v56  ;;  %v966_v10 = vmul.f32 0.044715, %v14769_v32  ;;  %v1092_v51 = vmul.f32 0.7978846, %v1060_v43  ;;  %13436 = vtanh.f32 %v1091_v1 }
 0x274   :  { %v1216_v58 = vmul.f32 %v1184_v5, %v805_v6  ;;  %v825_v5 = vadd.f32 %v14736_v19, %v14653_v50  ;;  %v933_v44 = vmul.f32 0.5, %v14758_v56  ;;  %v831_v45 = vadd.f32 %v14753_v59, %v14653_v50 }
 0x275   :  { %v13433_v22 = vpop.eup %13432  ;;  %v998_v52 = vmul.f32 %v966_v10, %v14769_v32  ;;  %v14777_v18 = vpop.f32.mrb[32].mxu0  ;;  %13438 = vtanh.f32 %v1092_v51  ;;  %v1029_v2 = vmul.f32 %v997_v63, %v14758_v56 }
 0x276   :  { %v842_v9 = vpop.f32.mrb[33].mxu0  ;;  %v1243_v25 = vpack.c.bf16 %v1216_v58, %v1215_v8  ;;  %v1153_v21 = vadd.f32 1.0, %v13433_v22 }
 0x277   :  { %v13435_v46 = vpop.eup %13434  ;;  %v843_v31 = vadd.f32 %v842_v9, %v14627_v33  ;;  %v14782_v35 = vpop.f32.mrb[34].mxu0  ;;  %v1030_v28 = vmul.f32 %v998_v52, %v14769_v32  ;;  %v1061_v24 = vadd.f32 %v1029_v2, %v14758_v56  ;;  %v934_v2 = vmul.f32 0.5, %v14769_v32 }
 0x278   :  { %v846_v34 = vpop.f32.mrb[35].mxu0  ;;  %12239 = vmatprep.mubr.bf16.mxu1 %v1243_v25  ;;  %v1154_v36 = vadd.f32 1.0, %v13435_v46  ;;  %v1185_v38 = vmul.f32 %v1153_v21, %v929_v41  ;;  %v835_v25 = vadd.f32 %v14760_v53, %v14653_v50 }
 0x279   :  { %v967_v11 = vmul.f32 0.044715, %v843_v31  ;;  %v847_v49 = vadd.f32 %v846_v34, %v14627_v33  ;;  %v1062_v17 = vadd.f32 %v1030_v28, %v14769_v32  ;;  %v1093_v16 = vmul.f32 0.7978846, %v1061_v24 }
 0x27a   :  { %v1186_v29 = vmul.f32 %v1154_v36, %v930_v4  ;;  %v1217_v20 = vmul.f32 %v1185_v38, %v811_v42  ;;  %v935_v42 = vmul.f32 0.5, %v843_v31  ;;  %v841_v4 = vadd.f32 %v14777_v18, %v14653_v50 }
 0x27b   :  { %v999_v7 = vmul.f32 %v967_v11, %v843_v31  ;;  %v968_v3 = vmul.f32 0.044715, %v847_v49  ;;  %v1094_v0 = vmul.f32 0.7978846, %v1062_v17  ;;  %13440 = vtanh.f32 %v1093_v16 }
 0x27c   :  { %v1218_v12 = vmul.f32 %v1186_v29, %v815_v57  ;;  %v936_v59 = vmul.f32 0.5, %v847_v49  ;;  %v845_v38 = vadd.f32 %v14782_v35, %v14653_v50 }
 0x27d   :  { %v13437_v55 = vpop.eup %13436  ;;  %v1000_v26 = vmul.f32 %v968_v3, %v847_v49  ;;  %13442 = vtanh.f32 %v1094_v0  ;;  %v1031_v47 = vmul.f32 %v999_v7, %v843_v31 }
 0x27e   :  { %v1244_v39 = vpack.c.bf16 %v1218_v12, %v1217_v20  ;;  %v1155_v60 = vadd.f32 1.0, %v13437_v55 }
 0x27f   :  { %v13439_v48 = vpop.eup %13438  ;;  %v1032_v54 = vmul.f32 %v1000_v26, %v847_v49  ;;  %v1063_v62 = vadd.f32 %v1031_v47, %v843_v31 }
 0x280   :  { %12240 = vmatmul.mubr.bf16.gmra.mrb[8].mxu1 %v1244_v39  ;;  %v1156_v27 = vadd.f32 1.0, %v13439_v48  ;;  %v1187_v43 = vmul.f32 %v1155_v60, %v931_v14 }
 0x281   :  { %v1064_v1 = vadd.f32 %v1032_v54, %v847_v49  ;;  %v1095_v6 = vmul.f32 0.7978846, %v1063_v62 }
 0x282   :  { %v1188_v8 = vmul.f32 %v1156_v27, %v932_v13  ;;  %v1219_v63 = vmul.f32 %v1187_v43, %v821_v23 }
 0x283   :  { %v1096_v40 = vmul.f32 0.7978846, %v1064_v1  ;;  %13444 = vtanh.f32 %v1095_v6 }
 0x284   :  { %v1220_v10 = vmul.f32 %v1188_v8, %v825_v5 }
 0x285   :  { %v13441_v51 = vpop.eup %13440  ;;  %13446 = vtanh.f32 %v1096_v40 }
 0x286   :  { %v1245_v58 = vpack.c.bf16 %v1220_v10, %v1219_v63  ;;  %v1157_v22 = vadd.f32 1.0, %v13441_v51 }
 0x287   :  { %v13443_v52 = vpop.eup %13442 }
 0x288   :  { %12243 = vmatprep.mubr.bf16.mxu1 %v1245_v58  ;;  %v1158_v9 = vadd.f32 1.0, %v13443_v52  ;;  %v1189_v19 = vmul.f32 %v1157_v22, %v933_v44 }
 0x28a   :  { %v1190_v41 = vmul.f32 %v1158_v9, %v934_v2  ;;  %v1221_v21 = vmul.f32 %v1189_v19, %v831_v45 }
 0x28c   :  { %v1222_v46 = vmul.f32 %v1190_v41, %v835_v25 }
 0x28d   :  { %v13445_v28 = vpop.eup %13444 }
 0x28e   :  { %v1246_v24 = vpack.c.bf16 %v1222_v46, %v1221_v21  ;;  %v1159_v56 = vadd.f32 1.0, %v13445_v28 }
 0x28f   :  { %v13447_v34 = vpop.eup %13446 }
 0x290   :  { %12244 = vmatmul.mubr.bf16.gmra.mrb[12].mxu1 %v1246_v24  ;;  %v1160_v36 = vadd.f32 1.0, %v13447_v34  ;;  %v1191_v32 = vmul.f32 %v1159_v56, %v935_v42 }
 0x292   :  { %v1192_v11 = vmul.f32 %v1160_v36, %v936_v59  ;;  %v1223_v53 = vmul.f32 %v1191_v32, %v841_v4 }
 0x294   :  { %v1224_v17 = vmul.f32 %v1192_v11, %v845_v38 }
 0x296   :  { %v1247_v16 = vpack.c.bf16 %v1224_v17, %v1223_v53 }
 0x298   :  { %12247 = vmatprep.mubr.bf16.mxu1 %v1247_v16 }
 0x2ca   :  { %v850_v57 = vpop.f32.mrb[36].mxu0 }
 0x2cb   :  { %v852_v29 = vpop.f32.mrb[37].mxu0  ;;  %v851_v38 = vadd.f32 %v850_v57, %v14653_v50 }
 0x2cc   :  { %v853_v31 = vadd.f32 %v852_v29, %v14627_v33  ;;  %v14810_v20 = vpop.f32.mrb[38].mxu0 }
 0x2cd   :  { %v856_v7 = vpop.f32.mrb[39].mxu0 }
 0x2ce   :  { %v969_v18 = vmul.f32 0.044715, %v853_v31  ;;  %v857_v49 = vadd.f32 %v856_v7, %v14627_v33  ;;  %v937_v42 = vmul.f32 0.5, %v853_v31 }
 0x2d0   :  { %v1001_v3 = vmul.f32 %v969_v18, %v853_v31  ;;  %v970_v0 = vmul.f32 0.044715, %v857_v49  ;;  %v938_v53 = vmul.f32 0.5, %v857_v49 }
 0x2d2   :  { %v1002_v12 = vmul.f32 %v970_v0, %v857_v49  ;;  %v14813_v55 = vpop.f32.mrb[40].mxu0  ;;  %v1033_v35 = vmul.f32 %v1001_v3, %v853_v31  ;;  %v855_v3 = vadd.f32 %v14810_v20, %v14653_v50 }
 0x2d3   :  { %v862_v26 = vpop.f32.mrb[41].mxu0 }
 0x2d4   :  { %v14816_v47 = vadd.f32 %v862_v26, %v14627_v33  ;;  %v14818_v39 = vpop.f32.mrb[42].mxu0  ;;  %v1034_v14 = vmul.f32 %v1002_v12, %v857_v49  ;;  %v1065_v60 = vadd.f32 %v1033_v35, %v853_v31 }
 0x2d5   :  { %v866_v48 = vpop.f32.mrb[43].mxu0 }
 0x2d6   :  { %v971_v54 = vmul.f32 0.044715, %v14816_v47  ;;  %v14822_v62 = vadd.f32 %v866_v48, %v14627_v33  ;;  %v1066_v23 = vadd.f32 %v1034_v14, %v857_v49  ;;  %v1097_v13 = vmul.f32 0.7978846, %v1065_v60 }
 0x2d7   :  { %v939_v20 = vmul.f32 0.5, %v14816_v47 }
 0x2d8   :  { %v1003_v27 = vmul.f32 %v971_v54, %v14816_v47  ;;  %v972_v43 = vmul.f32 0.044715, %v14822_v62  ;;  %v1098_v1 = vmul.f32 0.7978846, %v1066_v23  ;;  %13448 = vtanh.f32 %v1097_v13 }
 0x2da   :  { %v1004_v6 = vmul.f32 %v972_v43, %v14822_v62  ;;  %v14827_v5 = vpop.f32.mrb[44].mxu0  ;;  %13450 = vtanh.f32 %v1098_v1  ;;  %v1035_v8 = vmul.f32 %v1003_v27, %v14816_v47 }
 0x2db   :  { %v872_v63 = vpop.f32.mrb[45].mxu0 }
 0x2dc   :  { %v14831_v40 = vadd.f32 %v872_v63, %v14627_v33  ;;  %v14833_v10 = vpop.f32.mrb[46].mxu0  ;;  %v1036_v51 = vmul.f32 %v1004_v6, %v14822_v62  ;;  %v1067_v58 = vadd.f32 %v1035_v8, %v14816_v47 }
 0x2dd   :  { %v876_v44 = vpop.f32.mrb[47].mxu0 }
 0x2de   :  { %v973_v22 = vmul.f32 0.044715, %v14831_v40  ;;  %v14839_v52 = vadd.f32 %v876_v44, %v14627_v33  ;;  %v1068_v45 = vadd.f32 %v1036_v51, %v14822_v62  ;;  %v1099_v2 = vmul.f32 0.7978846, %v1067_v58 }
 0x2df   :  { %v861_v51 = vadd.f32 %v14813_v55, %v14653_v50  ;;  %v940_v44 = vmul.f32 0.5, %v14822_v62 }
 0x2e0   :  { %v1005_v9 = vmul.f32 %v973_v22, %v14831_v40  ;;  %v974_v19 = vmul.f32 0.044715, %v14839_v52  ;;  %v1100_v25 = vmul.f32 0.7978846, %v1068_v45  ;;  %13452 = vtanh.f32 %v1099_v2 }
 0x2e2   :  { %v13449_v41 = vpop.eup %13448  ;;  %v1006_v21 = vmul.f32 %v974_v19, %v14839_v52  ;;  %v14845_v46 = vpop.f32.mrb[48].mxu0  ;;  %13454 = vtanh.f32 %v1100_v25  ;;  %v1037_v28 = vmul.f32 %v1005_v9, %v14831_v40  ;;  %v865_v25 = vadd.f32 %v14818_v39, %v14653_v50 }
 0x2e3   :  { %v882_v24 = vpop.f32.mrb[49].mxu0  ;;  %v1161_v56 = vadd.f32 1.0, %v13449_v41  ;;  %v941_v39 = vmul.f32 0.5, %v14831_v40 }
 0x2e4   :  { %v13451_v34 = vpop.eup %13450  ;;  %v14849_v4 = vadd.f32 %v882_v24, %v14627_v33  ;;  %v14851_v59 = vpop.f32.mrb[50].mxu0  ;;  %v1038_v36 = vmul.f32 %v1006_v21, %v14839_v52  ;;  %v1069_v32 = vadd.f32 %v1037_v28, %v14831_v40 }
 0x2e5   :  { %v886_v11 = vpop.f32.mrb[51].mxu0  ;;  %v1162_v17 = vadd.f32 1.0, %v13451_v34  ;;  %v1193_v16 = vmul.f32 %v1161_v56, %v937_v42 }
 0x2e6   :  { %v975_v29 = vmul.f32 0.044715, %v14849_v4  ;;  %v14858_v31 = vadd.f32 %v886_v11, %v14627_v33  ;;  %v1070_v7 = vadd.f32 %v1038_v36, %v14839_v52  ;;  %v1101_v18 = vmul.f32 0.7978846, %v1069_v32 }
 0x2e7   :  { %v1194_v0 = vmul.f32 %v1162_v17, %v938_v53  ;;  %v1225_v12 = vmul.f32 %v1193_v16, %v851_v38 }
 0x2e8   :  { %v1007_v35 = vmul.f32 %v975_v29, %v14849_v4  ;;  %v976_v57 = vmul.f32 0.044715, %v14858_v31  ;;  %v1102_v49 = vmul.f32 0.7978846, %v1070_v7  ;;  %13456 = vtanh.f32 %v1101_v18 }
 0x2e9   :  { %v1226_v26 = vmul.f32 %v1194_v0, %v855_v3  ;;  %v871_v18 = vadd.f32 %v14827_v5, %v14653_v50  ;;  %v942_v0 = vmul.f32 0.5, %v14839_v52 }
 0x2ea   :  { %v13453_v14 = vpop.eup %13452  ;;  %v1008_v60 = vmul.f32 %v976_v57, %v14858_v31  ;;  %v14866_v48 = vpop.f32.mrb[52].mxu0  ;;  %13458 = vtanh.f32 %v1102_v49  ;;  %v1039_v54 = vmul.f32 %v1007_v35, %v14849_v4 }
 0x2eb   :  { %v892_v23 = vpop.f32.mrb[53].mxu0  ;;  %v1248_v13 = vpack.c.bf16 %v1226_v26, %v1225_v12  ;;  %v1163_v27 = vadd.f32 1.0, %v13453_v14  ;;  %v875_v14 = vadd.f32 %v14833_v10, %v14653_v50  ;;  %v943_v10 = vmul.f32 0.5, %v14849_v4 }
 0x2ec   :  { %v13455_v43 = vpop.eup %13454  ;;  %v14871_v1 = vadd.f32 %v892_v23, %v14627_v33  ;;  %v14873_v6 = vpop.f32.mrb[54].mxu0  ;;  %v1040_v8 = vmul.f32 %v1008_v60, %v14858_v31  ;;  %v1071_v63 = vadd.f32 %v1039_v54, %v14849_v4 }
 0x2ed   :  { %v896_v58 = vpop.f32.mrb[55].mxu0  ;;  %12248 = vmatmul.mubr.bf16.gmra.mrb[16].mxu1 %v1248_v13  ;;  %v1164_v22 = vadd.f32 1.0, %v13455_v43  ;;  %v1195_v47 = vmul.f32 %v1163_v27, %v939_v20 }
 0x2ee   :  { %v977_v45 = vmul.f32 0.044715, %v14871_v1  ;;  %v14882_v2 = vadd.f32 %v896_v58, %v14627_v33  ;;  %v1072_v9 = vadd.f32 %v1040_v8, %v14858_v31  ;;  %v1103_v19 = vmul.f32 0.7978846, %v1071_v63 }
 0x2ef   :  { %v1196_v41 = vmul.f32 %v1164_v22, %v940_v44  ;;  %v1227_v21 = vmul.f32 %v1195_v47, %v861_v51 }
 0x2f0   :  { %v1009_v55 = vmul.f32 %v977_v45, %v14871_v1  ;;  %v978_v28 = vmul.f32 0.044715, %v14882_v2  ;;  %v1104_v62 = vmul.f32 0.7978846, %v1072_v9  ;;  %13460 = vtanh.f32 %v1103_v19 }
 0x2f1   :  { %v1228_v24 = vmul.f32 %v1196_v41, %v865_v25  ;;  %v881_v19 = vadd.f32 %v14845_v46, %v14653_v50  ;;  %v944_v41 = vmul.f32 0.5, %v14858_v31 }
 0x2f2   :  { %v13457_v42 = vpop.eup %13456  ;;  %v1010_v56 = vmul.f32 %v978_v28, %v14882_v2  ;;  %v14890_v34 = vpop.f32.mrb[56].mxu0  ;;  %13462 = vtanh.f32 %v1104_v62  ;;  %v1041_v36 = vmul.f32 %v1009_v55, %v14871_v1 }
 0x2f3   :  { %v902_v32 = vpop.f32.mrb[57].mxu0  ;;  %v1249_v38 = vpack.c.bf16 %v1228_v24, %v1227_v21  ;;  %v1165_v11 = vadd.f32 1.0, %v13457_v42  ;;  %v885_v42 = vadd.f32 %v14851_v59, %v14653_v50  ;;  %v891_v59 = vadd.f32 %v14866_v48, %v14653_v50 }
 0x2f4   :  { %v13459_v53 = vpop.eup %13458  ;;  %v14895_v17 = vadd.f32 %v902_v32, %v14627_v33  ;;  %v14897_v16 = vpop.f32.mrb[58].mxu0  ;;  %v1042_v29 = vmul.f32 %v1010_v56, %v14882_v2  ;;  %v1073_v7 = vadd.f32 %v1041_v36, %v14871_v1 }
 0x2f5   :  { %v906_v3 = vpop.f32.mrb[59].mxu0  ;;  %12251 = vmatprep.mubr.bf16.mxu1 %v1249_v38  ;;  %v1166_v12 = vadd.f32 1.0, %v13459_v53  ;;  %v1197_v40 = vmul.f32 %v1165_v11, %v941_v39 }
 0x2f6   :  { %v979_v35 = vmul.f32 0.044715, %v14895_v17  ;;  %v14906_v57 = vadd.f32 %v906_v3, %v14627_v33  ;;  %v1074_v49 = vadd.f32 %v1042_v29, %v14882_v2  ;;  %v1105_v26 = vmul.f32 0.7978846, %v1073_v7 }
 0x2f7   :  { %v1198_v60 = vmul.f32 %v1166_v12, %v942_v0  ;;  %v1229_v54 = vmul.f32 %v1197_v40, %v871_v18  ;;  %v946_v12 = vmul.f32 0.5, %v14882_v2  ;;  %v947_v48 = vmul.f32 0.5, %v14895_v17 }
 0x2f8   :  { %v1011_v5 = vmul.f32 %v979_v35, %v14895_v17  ;;  %v980_v23 = vmul.f32 0.044715, %v14906_v57  ;;  %v1106_v52 = vmul.f32 0.7978846, %v1074_v49  ;;  %13464 = vtanh.f32 %v1105_v26 }
 0x2f9   :  { %v1230_v13 = vmul.f32 %v1198_v60, %v875_v14  ;;  %v895_v14 = vadd.f32 %v14873_v6, %v14653_v50  ;;  %v901_v2 = vadd.f32 %v14890_v34, %v14653_v50 }
 0x2fa   :  { %v13461_v20 = vpop.eup %13460  ;;  %v1012_v27 = vmul.f32 %v980_v23, %v14906_v57  ;;  %v14914_v43 = vpop.f32.mrb[60].mxu0  ;;  %13466 = vtanh.f32 %v1106_v52  ;;  %v1043_v8 = vmul.f32 %v1011_v5, %v14895_v17 }
 0x2fb   :  { %v912_v63 = vpop.f32.mrb[61].mxu0  ;;  %v1250_v51 = vpack.c.bf16 %v1230_v13, %v1229_v54  ;;  %v1167_v58 = vadd.f32 1.0, %v13461_v20 }
 0x2fc   :  { %v13463_v44 = vpop.eup %13462  ;;  %v913_v22 = vadd.f32 %v912_v63, %v14627_v33  ;;  %v14919_v47 = vpop.f32.mrb[62].mxu0  ;;  %v1044_v45 = vmul.f32 %v1012_v27, %v14906_v57  ;;  %v1075_v9 = vadd.f32 %v1043_v8, %v14895_v17  ;;  %v948_v27 = vmul.f32 0.5, %v14906_v57 }
 0x2fd   :  { %v916_v25 = vpop.f32.mrb[63].mxu0  ;;  %12252 = vmatmul.mubr.bf16.gmra.mrb[20].mxu1 %v1250_v51  ;;  %v1168_v21 = vadd.f32 1.0, %v13463_v44  ;;  %v1199_v55 = vmul.f32 %v1167_v58, %v943_v10  ;;  %v905_v63 = vadd.f32 %v14897_v16, %v14653_v50 }
 0x2fe   :  { %v981_v4 = vmul.f32 0.044715, %v913_v22  ;;  %v917_v28 = vadd.f32 %v916_v25, %v14627_v33  ;;  %v1076_v62 = vadd.f32 %v1044_v45, %v14906_v57  ;;  %v1107_v24 = vmul.f32 0.7978846, %v1075_v9 }
 0x2ff   :  { %v1200_v56 = vmul.f32 %v1168_v21, %v944_v41  ;;  %v1231_v36 = vmul.f32 %v1199_v55, %v881_v19  ;;  %v945_v33 = vmul.f32 0.5, %v14871_v1  ;;  %v949_v9 = vmul.f32 0.5, %v913_v22 }
 0x300   :  { %v1013_v32 = vmul.f32 %v981_v4, %v913_v22  ;;  %v982_v38 = vmul.f32 0.044715, %v917_v28  ;;  %v1108_v46 = vmul.f32 0.7978846, %v1076_v62  ;;  %13468 = vtanh.f32 %v1107_v24 }
 0x301   :  { %v1232_v39 = vmul.f32 %v1200_v56, %v885_v42  ;;  %v911_v25 = vadd.f32 %v14914_v43, %v14653_v50  ;;  %v950_v34 = vmul.f32 0.5, %v917_v28  ;;  %v915_v21 = vadd.f32 %v14919_v47, %v14653_v50 }
 0x302   :  { %v13465_v11 = vpop.eup %13464  ;;  %v1014_v31 = vmul.f32 %v982_v38, %v917_v28  ;;  %13470 = vtanh.f32 %v1108_v46  ;;  %v1045_v53 = vmul.f32 %v1013_v32, %v913_v22  ;;  %v13924_v32 = vld [vmem:[#allocation2] sm:$0xff] }
 0x303   :  { %v1251_v29 = vpack.c.bf16 %v1232_v39, %v1231_v36  ;;  %v1169_v7 = vadd.f32 1.0, %v13465_v11  ;;  %v13925_v39 = vld [vmem:[#allocation2 + $0x8] sm:$0xff] }
 0x304   :  { %v13467_v18 = vpop.eup %13466  ;;  %v1046_v3 = vmul.f32 %v1014_v31, %v917_v28  ;;  %v1077_v0 = vadd.f32 %v1045_v53, %v913_v22  ;;  %v14949_v22 = vld [vmem:[%s18769_s6] ss:$0 sm:$0xff]  ;;  %v13926_v31 = vld [vmem:[#allocation2 + $0x10] sm:$0xff] }
 0x305   :  { %12255 = vmatprep.mubr.bf16.mxu1 %v1251_v29  ;;  %v1170_v40 = vadd.f32 1.0, %v13467_v18  ;;  %v1201_v35 = vmul.f32 %v1169_v7, %v945_v33  ;;  %v13927_v33 = vld [vmem:[#allocation2 + $0x18] sm:$0xff] }
 0x306   :  { %v1078_v49 = vadd.f32 %v1046_v3, %v917_v28  ;;  %v1109_v26 = vmul.f32 0.7978846, %v1077_v0 }
 0x307   :  { %v1202_v60 = vmul.f32 %v1170_v40, %v946_v12  ;;  %v1233_v54 = vmul.f32 %v1201_v35, %v891_v59 }
 0x308   :  { %v1110_v1 = vmul.f32 0.7978846, %v1078_v49  ;;  %13472 = vtanh.f32 %v1109_v26 }
 0x309   :  { %v1234_v5 = vmul.f32 %v1202_v60, %v895_v14  ;;  %v13928_v60 = vld [vmem:[#allocation2 + $0x20] sm:$0xff] }
 0x30a   :  { %v13469_v23 = vpop.eup %13468  ;;  %13474 = vtanh.f32 %v1110_v1 }
 0x30b   :  { %v1252_v52 = vpack.c.bf16 %v1234_v5, %v1233_v54  ;;  %v1171_v13 = vadd.f32 1.0, %v13469_v23  ;;  %v13929_v5 = vld [vmem:[#allocation2 + $0x28] sm:$0xff] }
 0x30c   :  { %v13471_v20 = vpop.eup %13470 }
 0x30d   :  { %12256 = vmatmul.mubr.bf16.gmra.mrb[24].mxu1 %v1252_v52  ;;  %v1172_v8 = vadd.f32 1.0, %v13471_v20  ;;  %v1203_v6 = vmul.f32 %v1171_v13, %v947_v48  ;;  %v13930_v52 = vld [vmem:[#allocation2 + $0x30] sm:$0xff]  ;;  %v13931_v20 = vld [vmem:[#allocation2 + $0x38] sm:$0xff] }
 0x30f   :  { %v1204_v51 = vmul.f32 %v1172_v8, %v948_v27  ;;  %v1235_v10 = vmul.f32 %v1203_v6, %v901_v2 }
 0x311   :  { %v1236_v58 = vmul.f32 %v1204_v51, %v905_v63 }
 0x312   :  { %v13473_v44 = vpop.eup %13472 }
 0x313   :  { %v1253_v45 = vpack.c.bf16 %v1236_v58, %v1235_v10  ;;  %v1173_v17 = vadd.f32 1.0, %v13473_v44 }
 0x314   :  { %v13475_v19 = vpop.eup %13474 }
 0x315   :  { %12259 = vmatprep.mubr.bf16.mxu1 %v1253_v45  ;;  %v1174_v41 = vadd.f32 1.0, %v13475_v19  ;;  %v1205_v57 = vmul.f32 %v1173_v17, %v949_v9  ;;  %v13932_v17 = vld [vmem:[#allocation2 + $0x40] sm:$0xff] }
 0x317   :  { %v1206_v55 = vmul.f32 %v1174_v41, %v950_v34  ;;  %v1237_v16 = vmul.f32 %v1205_v57, %v911_v25  ;;  %v13933_v34 = vld [vmem:[#allocation2 + $0x48] sm:$0xff]  ;;  %v13934_v57 = vld [vmem:[#allocation2 + $0x50] sm:$0xff] }
 0x319   :  { %v1238_v4 = vmul.f32 %v1206_v55, %v915_v21 }
 0x31b   :  { %v1254_v62 = vpack.c.bf16 %v1238_v4, %v1237_v16  ;;  %v13935_v16 = vld [vmem:[#allocation2 + $0x58] sm:$0xff] }
 0x31d   :  { %12260 = vmatmul.mubr.bf16.gmra.mrb[28].mxu1 %v1254_v62 }
 0x32f   :  { %v12233_v24 = vpop.f32.mrb[0].mxu1 }
 0x330   :  { %v1343_v42 = vpop.f32.mrb[1].mxu1  ;;  %v1352_v43 = vadd.f32 %v12233_v24, %v14949_v22 }
 0x331   :  { %v1344_v28 = vadd.f32 %v14949_v22, %v1343_v42  ;;  %v12234_v56 = vpop.f32.mrb[2].mxu1 }
 0x332   :  { %v1346_v36 = vpop.f32.mrb[3].mxu1  ;;  %v1355_v50 = vadd.f32 %v12234_v56, %v14949_v22  ;;  %v14961_v53 = vadd.f32 %v13926_v31, %v1352_v43 }
 0x333   :  { %v1347_v47 = vadd.f32 %v14949_v22, %v1346_v36  ;;  %v14955_v38 = vadd.f32 %v13924_v32, %v1344_v28 }
 0x334   :  { %18913 = vst [vmem:[#allocation11_spill] sm:$0xff] %v14961_v53  ;;  %v14965_v7 = vadd.f32 %v13927_v33, %v1355_v50  ;;  %v1510_v18 = vsel %vm115_vm0, %v14961_v53, 0.0 }
 0x335   :  { %18911 = vst [vmem:[#allocation9_spill] sm:$0xff] %v14955_v38  ;;  %v1504_v46 = vsel %vm115_vm0, %v14955_v38, 0.0  ;;  %v14959_v11 = vadd.f32 %v13925_v39, %v1347_v47 }
 0x336   :  { %1505 = vadd.xlane.f32.xlu0 %v1504_v46  ;;  %18914 = vst [vmem:[#allocation12_spill] sm:$0xff] %v14965_v7  ;;  %v1513_v3 = vsel %vm115_vm0, %v14965_v7, 0.0  ;;  %v13936_v46 = vld [vmem:[#allocation2 + $0x60] sm:$0xff] }
 0x337   :  { %18912 = vst [vmem:[#allocation10_spill] sm:$0xff] %v14959_v11  ;;  %v1507_v29 = vsel %vm115_vm0, %v14959_v11, 0.0 }
 0x338   :  { %1508 = vadd.xlane.f32.xlu1 %v1507_v29  ;;  %v13937_v29 = vld [vmem:[#allocation2 + $0x68] sm:$0xff] }
 0x33a   :  { %1511 = vadd.xlane.f32.xlu0 %v1510_v18  ;;  %v13938_v18 = vld [vmem:[#allocation2 + $0x70] sm:$0xff] }
 0x33c   :  { %1514 = vadd.xlane.f32.xlu1 %v1513_v3 }
 0x343   :  { %v12237_v0 = vpop.f32.mrb[4].mxu1 }
 0x344   :  { %v1359_v59 = vpop.f32.mrb[5].mxu1  ;;  %v1368_v12 = vadd.f32 %v12237_v0, %v14949_v22 }
 0x345   :  { %v1360_v40 = vadd.f32 %v14949_v22, %v1359_v59  ;;  %v12238_v35 = vpop.f32.mrb[6].mxu1  ;;  %v13939_v59 = vld [vmem:[#allocation2 + $0x78] sm:$0xff] }
 0x346   :  { %v1362_v49 = vpop.f32.mrb[7].mxu1  ;;  %v1371_v26 = vadd.f32 %v12238_v35, %v14949_v22  ;;  %v14981_v48 = vadd.f32 %v13930_v52, %v1368_v12 }
 0x347   :  { %v1363_v14 = vadd.f32 %v14949_v22, %v1362_v49  ;;  %v14975_v54 = vadd.f32 %v13928_v60, %v1360_v40  ;;  %v13326_v49 = vld [vmem:[%s18773_s10] sm:$0xff]  }
 0x348   :  { %18917 = vst [vmem:[#allocation15_spill] sm:$0xff] %v14981_v48  ;;  %v14985_v2 = vadd.f32 %v13931_v20, %v1371_v26  ;;  %v1522_v27 = vsel %vm115_vm0, %v14981_v48, 0.0  ;;  %12299 = vmatprep.subr.bf16.mxu0 %v13326_v49 }
 0x349   :  { %18915 = vst [vmem:[#allocation13_spill] sm:$0xff] %v14975_v54  ;;  %v1516_v1 = vsel %vm115_vm0, %v14975_v54, 0.0  ;;  %v14979_v23 = vadd.f32 %v13929_v5, %v1363_v14  ;;  %12300 = vmatpush3.bf16.msra.mxu0 %v13326_v49 }
 0x34a   :  { %1517 = vadd.xlane.f32.xlu0 %v1516_v1  ;;  %18918 = vst [vmem:[#allocation16_spill] sm:$0xff] %v14985_v2  ;;  %v1525_v8 = vsel %vm115_vm0, %v14985_v2, 0.0 }
 0x34b   :  { %18916 = vst [vmem:[#allocation14_spill] sm:$0xff] %v14979_v23  ;;  %v1519_v13 = vsel %vm115_vm0, %v14979_v23, 0.0 }
 0x34c   :  { %1520 = vadd.xlane.f32.xlu1 %v1519_v13 }
 0x34e   :  { %1523 = vadd.xlane.f32.xlu0 %v1522_v27  ;;  %v13940_v27 = vld [vmem:[#allocation2 + $0x90] sm:$0xff] }
 0x350   :  { %1526 = vadd.xlane.f32.xlu1 %v1525_v8 }
 0x353   :  { %v12241_v6 = vpop.f32.mrb[8].mxu1 }
 0x354   :  { %v1375_v63 = vpop.f32.mrb[9].mxu1  ;;  %v1384_v51 = vadd.f32 %v12241_v6, %v14949_v22 }
 0x355   :  { %v1376_v10 = vadd.f32 %v14949_v22, %v1375_v63  ;;  %v12242_v58 = vpop.f32.mrb[10].mxu1 }
 0x356   :  { %v1378_v44 = vpop.f32.mrb[11].mxu1  ;;  %v1387_v45 = vadd.f32 %v12242_v58, %v14949_v22  ;;  %v15001_v21 = vadd.f32 %v13934_v57, %v1384_v51  ;;  %v13941_v58 = vld [vmem:[#allocation2 + $0x98] sm:$0xff] }
 0x357   :  { %v1379_v9 = vadd.f32 %v14949_v22, %v1378_v44  ;;  %v14995_v19 = vadd.f32 %v13932_v17, %v1376_v10 }
 0x358   :  { %18921 = vst [vmem:[#allocation19_spill] sm:$0xff] %v15001_v21  ;;  %v15005_v4 = vadd.f32 %v13935_v16, %v1387_v45  ;;  %v1534_v62 = vsel %vm115_vm0, %v15001_v21, 0.0  ;;  %v13942_v45 = vld [vmem:[#allocation2 + $0x80] sm:$0xff] }
 0x359   :  { %18919 = vst [vmem:[#allocation17_spill] sm:$0xff] %v14995_v19  ;;  %v1528_v25 = vsel %vm115_vm0, %v14995_v19, 0.0  ;;  %v14999_v41 = vadd.f32 %v13933_v34, %v1379_v9 }
 0x35a   :  { %1529 = vadd.xlane.f32.xlu0 %v1528_v25  ;;  %18922 = vst [vmem:[#allocation20_spill] sm:$0xff] %v15005_v4  ;;  %v1537_v24 = vsel %vm115_vm0, %v15005_v4, 0.0 }
 0x35b   :  { %18920 = vst [vmem:[#allocation18_spill] sm:$0xff] %v14999_v41  ;;  %v1531_v55 = vsel %vm115_vm0, %v14999_v41, 0.0 }
 0x35c   :  { %1532 = vadd.xlane.f32.xlu1 %v1531_v55  ;;  %v13943_v55 = vld [vmem:[#allocation2 + $0x88] sm:$0xff] }
 0x35e   :  { %1535 = vadd.xlane.f32.xlu0 %v1534_v62 }
 0x360   :  { %1538 = vadd.xlane.f32.xlu1 %v1537_v24 }
 0x363   :  { %v12245_v42 = vpop.f32.mrb[12].mxu1 }
 0x364   :  { %v1391_v43 = vpop.f32.mrb[13].mxu1  ;;  %v1400_v28 = vadd.f32 %v12245_v42, %v14949_v22 }
 0x365   :  { %v1392_v56 = vadd.f32 %v14949_v22, %v1391_v43  ;;  %v12246_v36 = vpop.f32.mrb[14].mxu1 }
 0x366   :  { %v1394_v50 = vpop.f32.mrb[15].mxu1  ;;  %v1403_v47 = vadd.f32 %v12246_v36, %v14949_v22  ;;  %v15021_v3 = vadd.f32 %v13938_v18, %v1400_v28 }
 0x367   :  { %v1395_v32 = vadd.f32 %v14949_v22, %v1394_v50  ;;  %v15015_v39 = vadd.f32 %v13936_v46, %v1392_v56 }
 0x368   :  { %18925 = vst [vmem:[#allocation23_spill] sm:$0xff] %v15021_v3  ;;  %v15025_v12 = vadd.f32 %v13939_v59, %v1403_v47  ;;  %v1546_v40 = vsel %vm115_vm0, %v15021_v3, 0.0 }
 0x369   :  { %18923 = vst [vmem:[#allocation21_spill] sm:$0xff] %v15015_v39  ;;  %v1540_v31 = vsel %vm115_vm0, %v15015_v39, 0.0  ;;  %v15019_v33 = vadd.f32 %v13937_v29, %v1395_v32 }
 0x36a   :  { %1541 = vadd.xlane.f32.xlu0 %v1540_v31  ;;  %18926 = vst [vmem:[#allocation24_spill] sm:$0xff] %v15025_v12  ;;  %v1549_v35 = vsel %vm115_vm0, %v15025_v12, 0.0 }
 0x36b   :  { %18924 = vst [vmem:[#allocation22_spill] sm:$0xff] %v15019_v33  ;;  %v1543_v0 = vsel %vm115_vm0, %v15019_v33, 0.0 }
 0x36c   :  { %1544 = vadd.xlane.f32.xlu1 %v1543_v0 }
 0x36e   :  { %1547 = vadd.xlane.f32.xlu0 %v1546_v40 }
 0x370   :  { %1550 = vadd.xlane.f32.xlu1 %v1549_v35 }
 0x3c0   :  { %v12249_v26 = vpop.f32.mrb[16].mxu1 }
 0x3c1   :  { %v1416_v14 = vadd.f32 %v12249_v26, %v14949_v22  ;;  %v1407_v60 = vpop.f32.mrb[17].mxu1 }
 0x3c2   :  { %v1408_v1 = vadd.f32 %v14949_v22, %v1407_v60  ;;  %v12250_v5 = vpop.f32.mrb[18].mxu1 }
 0x3c3   :  { %v1419_v52 = vadd.f32 %v12250_v5, %v14949_v22  ;;  %v1410_v13 = vpop.f32.mrb[19].mxu1  ;;  %v1506_v20 = vpop.xlane.xlu0 %1505  ;;  %v15037_v8 = vadd.f32 %v13940_v27, %v1416_v14  ;;  %v13945_v27 = vld [vmem:[#allocation2 + $0xa8] sm:$0xff] }
 0x3c4   :  { %v1411_v6 = vadd.f32 %v14949_v22, %v1410_v13  ;;  %v1600_v63 = vmul.f32 0.03125, %v1506_v20  ;;  %v15044_v9 = vadd.f32 %v13942_v45, %v1408_v1  ;;  %v13947_v45 = vld [vmem:[#allocation2 + $0xb8] sm:$0xff] }
 0x3c5   :  { %18927 = vst [vmem:[#allocation25_spill] sm:$0xff] %v15037_v8  ;;  %v1509_v51 = vpop.xlane.xlu1 %1508  ;;  %v1558_v10 = vsel %vm115_vm0, %v15037_v8, 0.0  ;;  %v15042_v44 = vadd.f32 %v13941_v58, %v1419_v52  ;;  %v13944_v52 = vld [vmem:[#allocation2 + $0xa0] sm:$0xff] }
 0x3c6   :  { %18929 = vst [vmem:[#allocation27_spill] sm:$0xff] %v15044_v9  ;;  %v15047_v17 = vsub.f32 %v14955_v38, %v1600_v63  ;;  %v1601_v25 = vmul.f32 0.03125, %v1509_v51  ;;  %1559 = vadd.xlane.f32.xlu0 %v1558_v10  ;;  %v15051_v16 = vadd.f32 %v13943_v55, %v1411_v6  ;;  %v1552_v43 = vsel %vm115_vm0, %v15044_v9, 0.0  ;;  %v13946_v63 = vld [vmem:[#allocation2 + $0xb0] sm:$0xff] }
 0x3c7   :  { %18928 = vst [vmem:[#allocation26_spill] sm:$0xff] %v15042_v44  ;;  %v1512_v34 = vpop.xlane.xlu0 %1511  ;;  %v1561_v57 = vsel %vm115_vm0, %v15042_v44, 0.0 }
 0x3c8   :  { %18930 = vst [vmem:[#allocation28_spill] sm:$0xff] %v15051_v16  ;;  %v15054_v62 = vsub.f32 %v14959_v11, %v1601_v25  ;;  %v1602_v24 = vmul.f32 0.03125, %v1512_v34  ;;  %1562 = vadd.xlane.f32.xlu1 %v1561_v57  ;;  %v1664_v28 = vmul.f32 %v15047_v17, %v15047_v17  ;;  %v1555_v50 = vsel %vm115_vm0, %v15051_v16, 0.0 }
 0x3c9   :  { %v1515_v42 = vpop.xlane.xlu1 %1514 }
 0x3ca   :  { %v15061_v56 = vsub.f32 %v14961_v53, %v1602_v24  ;;  %v1603_v36 = vmul.f32 0.03125, %v1515_v42  ;;  %1553 = vadd.xlane.f32.xlu0 %v1552_v43  ;;  %v1665_v47 = vmul.f32 %v15054_v62, %v15054_v62  ;;  %v1696_v46 = vsel %vm115_vm0, %v1664_v28, 0.0 }
 0x3cc   :  { %v15068_v32 = vsub.f32 %v14965_v7, %v1603_v36  ;;  %1556 = vadd.xlane.f32.xlu1 %v1555_v50  ;;  %v1666_v31 = vmul.f32 %v15061_v56, %v15061_v56  ;;  %v1699_v29 = vsel %vm115_vm0, %v1665_v47, 0.0 }
 0x3ce   :  { %1697 = vadd.xlane.f32.xlu0 %v1696_v46  ;;  %v1667_v18 = vmul.f32 %v15068_v32, %v15068_v32  ;;  %v1702_v40 = vsel %vm115_vm0, %v1666_v31, 0.0 }
 0x3d0   :  { %1700 = vadd.xlane.f32.xlu1 %v1699_v29  ;;  %v12253_v0 = vpop.f32.mrb[20].mxu1  ;;  %v1705_v60 = vsel %vm115_vm0, %v1667_v18, 0.0 }
 0x3d1   :  { %v1423_v59 = vpop.f32.mrb[21].mxu1  ;;  %v1432_v35 = vadd.f32 %v12253_v0, %v14949_v22 }
 0x3d2   :  { %v1424_v49 = vadd.f32 %v14949_v22, %v1423_v59  ;;  %v12254_v26 = vpop.f32.mrb[22].mxu1  ;;  %1703 = vadd.xlane.f32.xlu0 %v1702_v40 }
 0x3d3   :  { %v1426_v14 = vpop.f32.mrb[23].mxu1  ;;  %v1435_v1 = vadd.f32 %v12254_v26, %v14949_v22  ;;  %v15088_v51 = vadd.f32 %v13946_v63, %v1432_v35  ;;  %v13948_v35 = vld [vmem:[#allocation2 + $0xc0] sm:$0xff] }
 0x3d4   :  { %v1427_v5 = vadd.f32 %v14949_v22, %v1426_v14  ;;  %1706 = vadd.xlane.f32.xlu1 %v1705_v60  ;;  %v15082_v13 = vadd.f32 %v13944_v52, %v1424_v49  ;;  %v13949_v60 = vld [vmem:[#allocation2 + $0xc8] sm:$0xff] }
 0x3d5   :  { %18933 = vst [vmem:[#allocation31_spill] sm:$0xff] %v15088_v51  ;;  %v15092_v25 = vadd.f32 %v13947_v45, %v1435_v1  ;;  %v1570_v57 = vsel %vm115_vm0, %v15088_v51, 0.0 }
 0x3d6   :  { %18931 = vst [vmem:[#allocation29_spill] sm:$0xff] %v15082_v13  ;;  %v1564_v20 = vsel %vm115_vm0, %v15082_v13, 0.0  ;;  %v15086_v6 = vadd.f32 %v13945_v27, %v1427_v5 }
 0x3d7   :  { %1565 = vadd.xlane.f32.xlu0 %v1564_v20  ;;  %v1518_v10 = vpop.xlane.xlu0 %1517  ;;  %18934 = vst [vmem:[#allocation32_spill] sm:$0xff] %v15092_v25  ;;  %v1573_v24 = vsel %vm115_vm0, %v15092_v25, 0.0 }
 0x3d8   :  { %18932 = vst [vmem:[#allocation30_spill] sm:$0xff] %v15086_v6  ;;  %v1567_v58 = vsel %vm115_vm0, %v15086_v6, 0.0  ;;  %v1604_v47 = vmul.f32 0.03125, %v1518_v10 }
 0x3d9   :  { %v1521_v34 = vpop.xlane.xlu1 %1520  ;;  %1568 = vadd.xlane.f32.xlu1 %v1567_v58 }
 0x3da   :  { %v1605_v0 = vmul.f32 0.03125, %v1521_v34  ;;  %v15109_v26 = vsub.f32 %v14975_v54, %v1604_v47 }
 0x3db   :  { %1571 = vadd.xlane.f32.xlu0 %v1570_v57  ;;  %v1524_v55 = vpop.xlane.xlu0 %1523 }
 0x3dc   :  { %v1606_v43 = vmul.f32 0.03125, %v1524_v55  ;;  %v15118_v20 = vsub.f32 %v14979_v23, %v1605_v0  ;;  %v1668_v34 = vmul.f32 %v15109_v26, %v15109_v26 }
 0x3dd   :  { %v1527_v42 = vpop.xlane.xlu1 %1526  ;;  %1574 = vadd.xlane.f32.xlu1 %v1573_v24 }
 0x3de   :  { %v1607_v28 = vmul.f32 0.03125, %v1527_v42  ;;  %v15099_v46 = vsub.f32 %v14981_v48, %v1606_v43  ;;  %v1669_v42 = vmul.f32 %v15118_v20, %v15118_v20  ;;  %v1708_v47 = vsel %vm115_vm0, %v1668_v34, 0.0 }
 0x3e0   :  { %v12257_v36 = vpop.f32.mrb[24].mxu1  ;;  %v15103_v59 = vsub.f32 %v14985_v2, %v1607_v28  ;;  %v1670_v5 = vmul.f32 %v15099_v46, %v15099_v46  ;;  %v13950_v28 = vld [vmem:[#allocation2 + $0xd0] sm:$0xff] }
 0x3e1   :  { %v1439_v50 = vpop.f32.mrb[25].mxu1  ;;  %v1448_v58 = vadd.f32 %v12257_v36, %v14949_v22 }
 0x3e2   :  { %v1440_v31 = vadd.f32 %v14949_v22, %v1439_v50  ;;  %v12258_v29 = vpop.f32.mrb[26].mxu1  ;;  %v1671_v63 = vmul.f32 %v15103_v59, %v15103_v59  ;;  %v1714_v45 = vsel %vm115_vm0, %v1670_v5, 0.0 }
 0x3e3   :  { %v1442_v18 = vpop.f32.mrb[27].mxu1  ;;  %v1451_v57 = vadd.f32 %v12258_v29, %v14949_v22  ;;  %v15132_v50 = vadd.f32 %v13950_v28, %v1448_v58  ;;  %v13329_v28 = vld [vmem:[%s18772_s9 + $0x8] sm:$0xff]  }
 0x3e4   :  { %v1443_v40 = vadd.f32 %v14949_v22, %v1442_v18  ;;  %v15106_v49 = vadd.f32 %v13948_v35, %v1440_v31  ;;  %v1717_v24 = vsel %vm115_vm0, %v1671_v63, 0.0  ;;  %v13951_v31 = vld [vmem:[#allocation2 + $0xd8] sm:$0xff]  ;;  %v13327_v35 = vld [vmem:[%s18772_s9] sm:$0xff]  }
 0x3e5   :  { %18937 = vst [vmem:[#allocation35_spill] sm:$0xff] %v15132_v50  ;;  %v15135_v18 = vadd.f32 %v13951_v31, %v1451_v57  ;;  %v1582_v58 = vsel %vm115_vm0, %v15132_v50, 0.0  ;;  %12263 = vmatprep.subr.bf16.mxu1 %v13327_v35 }
 0x3e6   :  { %18935 = vst [vmem:[#allocation33_spill] sm:$0xff] %v15106_v49  ;;  %v1576_v14 = vsel %vm115_vm0, %v15106_v49, 0.0  ;;  %v15113_v1 = vadd.f32 %v13949_v60, %v1443_v40  ;;  %v1711_v40 = vsel %vm115_vm0, %v1669_v42, 0.0  ;;  %12264 = vmatpush3.bf16.msra.mxu1 %v13327_v35 }
 0x3e7   :  { %1577 = vadd.xlane.f32.xlu0 %v1576_v14  ;;  %v1530_v52 = vpop.xlane.xlu0 %1529  ;;  %18938 = vst [vmem:[#allocation36_spill] sm:$0xff] %v15135_v18  ;;  %v1585_v34 = vsel %vm115_vm0, %v15135_v18, 0.0  ;;  %12265 = vmatprep.subr.bf16.mxu1 %v13329_v28 }
 0x3e8   :  { %18936 = vst [vmem:[#allocation34_spill] sm:$0xff] %v15113_v1  ;;  %v1579_v27 = vsel %vm115_vm0, %v15113_v1, 0.0  ;;  %v1608_v60 = vmul.f32 0.03125, %v1530_v52  ;;  %v13952_v52 = vld [vmem:[#allocation2 + $0xe0] sm:$0xff] }
 0x3e9   :  { %v1533_v10 = vpop.xlane.xlu1 %1532  ;;  %1580 = vadd.xlane.f32.xlu1 %v1579_v27 }
 0x3ea   :  { %v1609_v57 = vmul.f32 0.03125, %v1533_v10  ;;  %v13953_v10 = vld [vmem:[#allocation2 + $0xe8] sm:$0xff]  ;;  %12266 = vmatpush3.bf16.msra.mxu1 %v13329_v28 }
 0x3eb   :  { %1715 = vadd.xlane.f32.xlu0 %v1714_v45  ;;  %v1536_v55 = vpop.xlane.xlu0 %1535 }
 0x3ec   :  { %v1610_v36 = vmul.f32 0.03125, %v1536_v55  ;;  %v15171_v35 = vsub.f32 %v14999_v41, %v1609_v57 }
 0x3ed   :  { %v1539_v43 = vpop.xlane.xlu1 %1538  ;;  %1718 = vadd.xlane.f32.xlu1 %v1717_v24 }
 0x3ee   :  { %v1611_v29 = vmul.f32 0.03125, %v1539_v43  ;;  %v15142_v5 = vsub.f32 %v15001_v21, %v1610_v36  ;;  %v13328_v43 = vld [vmem:[%s18773_s10 + $0x8] sm:$0xff]   ;;  %v15162_v36 = vsub.f32 %v14995_v19, %v1608_v60  ;;  %v1673_v28 = vmul.f32 %v15171_v35, %v15171_v35 }
 0x3ef   :  { %1709 = vadd.xlane.f32.xlu0 %v1708_v47  ;;  %12301 = vmatprep.subr.bf16.mxu0 %v13328_v43 }
 0x3f0   :  { %v12261_v0 = vpop.f32.mrb[28].mxu1  ;;  %v15150_v55 = vsub.f32 %v15005_v4, %v1611_v29  ;;  %v1674_v29 = vmul.f32 %v15142_v5, %v15142_v5  ;;  %12302 = vmatpush3.bf16.msra.mxu0 %v13328_v43 }
 0x3f1   :  { %1712 = vadd.xlane.f32.xlu1 %v1711_v40  ;;  %v1455_v14 = vpop.f32.mrb[29].mxu1 }
 0x3f2   :  { %v1456_v27 = vadd.f32 %v14949_v22, %v1455_v14  ;;  %v12262_v63 = vpop.f32.mrb[30].mxu1  ;;  %v1675_v60 = vmul.f32 %v15150_v55, %v15150_v55 }
 0x3f3   :  { %v1458_v45 = vpop.f32.mrb[31].mxu1  ;;  %1583 = vadd.xlane.f32.xlu0 %v1582_v58  ;;  %v1464_v58 = vadd.f32 %v12261_v0, %v14949_v22 }
 0x3f4   :  { %v15152_v24 = vadd.f32 %v13952_v52, %v1456_v27  ;;  %v1459_v42 = vadd.f32 %v14949_v22, %v1458_v45  ;;  %v1672_v52 = vmul.f32 %v15162_v36, %v15162_v36 }
 0x3f5   :  { %1586 = vadd.xlane.f32.xlu1 %v1585_v34  ;;  %v1726_v34 = vsel %vm115_vm0, %v1674_v29, 0.0 }
 0x3f6   :  { %18939 = vst [vmem:[#allocation37_spill] sm:$0xff] %v15152_v24  ;;  %v15164_v47 = vadd.f32 %v13953_v10, %v1459_v42  ;;  %v1588_v31 = vsel %vm115_vm0, %v15152_v24, 0.0  ;;  %v1467_v42 = vadd.f32 %v12262_v63, %v14949_v22  ;;  %v1729_v10 = vsel %vm115_vm0, %v1675_v60, 0.0 }
 0x3f7   :  { %1589 = vadd.xlane.f32.xlu0 %v1588_v31  ;;  %v1542_v40 = vpop.xlane.xlu0 %1541 }
 0x3f8   :  { %18940 = vst [vmem:[#allocation38_spill] sm:$0xff] %v15164_v47  ;;  %v1591_v14 = vsel %vm115_vm0, %v15164_v47, 0.0  ;;  %v1612_v45 = vmul.f32 0.03125, %v1542_v40  ;;  %v15191_v22 = vadd.f32 %v13955_v30, %v1467_v42 }
 0x3f9   :  { %v1545_v27 = vpop.xlane.xlu1 %1544  ;;  %1592 = vadd.xlane.f32.xlu1 %v1591_v14  ;;  %v13954_v14 = vld [vmem:[#allocation2 + $0xf0] sm:$0xff] }
 0x3fa   :  { %v1613_v43 = vmul.f32 0.03125, %v1545_v27  ;;  %v15185_v0 = vadd.f32 %v13954_v14, %v1464_v58  ;;  %v15188_v29 = vsub.f32 %v15015_v39, %v1612_v45  ;;  %18942 = vst [vmem:[#allocation40_spill] sm:$0xff] %v15191_v22  ;;  %v1723_v27 = vsel %vm115_vm0, %v1673_v28, 0.0 }
 0x3fb   :  { %1727 = vadd.xlane.f32.xlu0 %v1726_v34  ;;  %v1548_v57 = vpop.xlane.xlu0 %1547  ;;  %v1720_v34 = vsel %vm115_vm0, %v1672_v52, 0.0 }
 0x3fc   :  { %18941 = vst [vmem:[#allocation39_spill] sm:$0xff] %v15185_v0  ;;  %v1614_v40 = vmul.f32 0.03125, %v1548_v57  ;;  %v15194_v63 = vsub.f32 %v15019_v33, %v1613_v43  ;;  %v1594_v45 = vsel %vm115_vm0, %v15185_v0, 0.0  ;;  %v1676_v52 = vmul.f32 %v15188_v29, %v15188_v29 }
 0x3fd   :  { %v1551_v31 = vpop.xlane.xlu1 %1550  ;;  %1730 = vadd.xlane.f32.xlu1 %v1729_v10  ;;  %v1597_v57 = vsel %vm115_vm0, %v15191_v22, 0.0 }
 0x3fe   :  { %v1615_v60 = vmul.f32 0.03125, %v1551_v31  ;;  %v15198_v58 = vsub.f32 %v15021_v3, %v1614_v40  ;;  %v1677_v42 = vmul.f32 %v15194_v63, %v15194_v63  ;;  %v1732_v43 = vsel %vm115_vm0, %v1676_v52, 0.0 }
 0x3ff   :  { %1721 = vadd.xlane.f32.xlu0 %v1720_v34 }
 0x400   :  { %v15205_v30 = vsub.f32 %v15025_v12, %v1615_v60  ;;  %v1678_v10 = vmul.f32 %v15198_v58, %v15198_v58  ;;  %v1735_v28 = vsel %vm115_vm0, %v1677_v42, 0.0 }
 0x401   :  { %1724 = vadd.xlane.f32.xlu1 %v1723_v27 }
 0x402   :  { %v1679_v31 = vmul.f32 %v15205_v30, %v15205_v30  ;;  %v1738_v14 = vsel %vm115_vm0, %v1678_v10, 0.0 }
 0x403   :  { %1595 = vadd.xlane.f32.xlu0 %v1594_v45 }
 0x404   :  { %v1741_v40 = vsel %vm115_vm0, %v1679_v31, 0.0 }
 0x405   :  { %1598 = vadd.xlane.f32.xlu1 %v1597_v57 }
 0x407   :  { %1733 = vadd.xlane.f32.xlu0 %v1732_v43 }
 0x409   :  { %1736 = vadd.xlane.f32.xlu1 %v1735_v28 }
 0x40b   :  { %1739 = vadd.xlane.f32.xlu0 %v1738_v14 }
 0x40d   :  { %1742 = vadd.xlane.f32.xlu1 %v1741_v40 }
 0x453   :  { %v1560_v34 = vpop.xlane.xlu0 %1559 }
 0x454   :  { %v1618_v60 = vmul.f32 0.03125, %v1560_v34 }
 0x455   :  { %v1563_v27 = vpop.xlane.xlu1 %1562 }
 0x456   :  { %v1619_v45 = vmul.f32 0.03125, %v1563_v27  ;;  %v15220_v43 = vsub.f32 %v15037_v8, %v1618_v60 }
 0x457   :  { %v1554_v52 = vpop.xlane.xlu0 %1553 }
 0x458   :  { %v1616_v57 = vmul.f32 0.03125, %v1554_v52  ;;  %v15226_v10 = vsub.f32 %v15042_v44, %v1619_v45  ;;  %v1682_v60 = vmul.f32 %v15220_v43, %v15220_v43 }
 0x459   :  { %v1557_v42 = vpop.xlane.xlu1 %1556 }
 0x45a   :  { %v15223_v61 = vsub.f32 %v15044_v9, %v1616_v57  ;;  %v1617_v28 = vmul.f32 0.03125, %v1557_v42 }
 0x45b   :  { %v1698_v14 = vpop.xlane.xlu0 %1697 }
 0x45c   :  { %v15229_v31 = vsub.f32 %v15051_v16, %v1617_v28  ;;  %v1792_v40 = vmul.f32 0.03125, %v1698_v14  ;;  %v1680_v34 = vmul.f32 %v15223_v61, %v15223_v61  ;;  %v1683_v28 = vmul.f32 %v15226_v10, %v15226_v10 }
 0x45d   :  { %v1701_v27 = vpop.xlane.xlu1 %1700 }
 0x45e   :  { %v1824_v52 = vadd.f32 1e-05, %v1792_v40  ;;  %v1793_v37 = vmul.f32 0.03125, %v1701_v27  ;;  %v1744_v57 = vsel %vm115_vm0, %v1680_v34, 0.0  ;;  %v1681_v45 = vmul.f32 %v15229_v31, %v15229_v31 }
 0x45f   :  { %1745 = vadd.xlane.f32.xlu0 %v1744_v57  ;;  %v1704_v42 = vpop.xlane.xlu0 %1703  ;;  %v1750_v34 = vsel %vm115_vm0, %v1682_v60, 0.0  ;;  %v1753_v9 = vsel %vm115_vm0, %v1683_v28, 0.0 }
 0x460   :  { %13476 = vrsqrt.f32 %v1824_v52  ;;  %v1825_v14 = vadd.f32 1e-05, %v1793_v37  ;;  %v1794_v15 = vmul.f32 0.03125, %v1704_v42  ;;  %v1747_v44 = vsel %vm115_vm0, %v1681_v45, 0.0 }
 0x461   :  { %v1707_v16 = vpop.xlane.xlu1 %1706  ;;  %1748 = vadd.xlane.f32.xlu1 %v1747_v44 }
 0x462   :  { %13478 = vrsqrt.f32 %v1825_v14  ;;  %v1826_v40 = vadd.f32 1e-05, %v1794_v15  ;;  %v1795_v27 = vmul.f32 0.03125, %v1707_v16 }
 0x463   :  { %1751 = vadd.xlane.f32.xlu0 %v1750_v34 }
 0x464   :  { %13480 = vrsqrt.f32 %v1826_v40  ;;  %v1827_v8 = vadd.f32 1e-05, %v1795_v27  ;;  %v1566_v57 = vpop.xlane.xlu0 %1565 }
 0x465   :  { %v1620_v12 = vmul.f32 0.03125, %v1566_v57  ;;  %1754 = vadd.xlane.f32.xlu1 %v1753_v9  ;;  %v15254_v9 = vld [vmem:[%s18770_s7] ss:$0 sm:$0xff] }
 0x466   :  { %13482 = vrsqrt.f32 %v1827_v8  ;;  %v1569_v37 = vpop.xlane.xlu1 %1568  ;;  %v15266_v57 = vld [vmem:[%s18771_s8] ss:$0 sm:$0xff] }
 0x467   :  { %v15244_v52 = vsub.f32 %v15082_v13, %v1620_v12  ;;  %v1621_v45 = vmul.f32 0.03125, %v1569_v37 }
 0x468   :  { %v1572_v44 = vpop.xlane.xlu0 %1571 }
 0x469   :  { %v15247_v15 = vsub.f32 %v15086_v6, %v1621_v45  ;;  %v1622_v16 = vmul.f32 0.03125, %v1572_v44  ;;  %v1684_v60 = vmul.f32 %v15244_v52, %v15244_v52 }
 0x46a   :  { %v13477_v42 = vpop.eup %13476  ;;  %v1575_v14 = vpop.xlane.xlu1 %1574 }
 0x46b   :  { %v15257_v8 = vsub.f32 %v15088_v51, %v1622_v16  ;;  %v1623_v12 = vmul.f32 0.03125, %v1575_v14  ;;  %v1756_v28 = vsel %vm115_vm0, %v1684_v60, 0.0  ;;  %v1685_v40 = vmul.f32 %v15247_v15, %v15247_v15 }
 0x46c   :  { %v13479_v27 = vpop.eup %13478  ;;  %1757 = vadd.xlane.f32.xlu0 %v1756_v28  ;;  %v1888_v34 = vmul.f32 %v13477_v42, %v15047_v17 }
 0x46d   :  { %v15269_v37 = vsub.f32 %v15092_v25, %v1623_v12  ;;  %v1759_v45 = vsel %vm115_vm0, %v1685_v40, 0.0  ;;  %v1686_v44 = vmul.f32 %v15257_v8, %v15257_v8  ;;  %v1889_v16 = vmul.f32 %v13479_v27, %v15054_v62 }
 0x46e   :  { %v13481_v60 = vpop.eup %13480  ;;  %1760 = vadd.xlane.f32.xlu1 %v1759_v45  ;;  %v1926_v14 = vmul.f32 %v15254_v9, %v1888_v34 }
 0x46f   :  { %v1890_v17 = vmul.f32 %v13481_v60, %v15061_v56  ;;  %v1762_v42 = vsel %vm115_vm0, %v1686_v44, 0.0  ;;  %v1687_v28 = vmul.f32 %v15269_v37, %v15269_v37  ;;  %v1927_v12 = vmul.f32 %v15254_v9, %v1889_v16 }
 0x470   :  { %v13483_v25 = vpop.eup %13482  ;;  %1763 = vadd.xlane.f32.xlu0 %v1762_v42  ;;  %v1964_v40 = vadd.f32 %v15266_v57, %v1926_v14 }
 0x471   :  { %v1928_v51 = vmul.f32 %v15254_v9, %v1890_v17  ;;  %v1891_v62 = vmul.f32 %v13483_v25, %v15068_v32  ;;  %v1765_v27 = vsel %vm115_vm0, %v1687_v28, 0.0  ;;  %v1965_v34 = vadd.f32 %v15266_v57, %v1927_v12 }
 0x472   :  { %1766 = vadd.xlane.f32.xlu1 %v1765_v27 }
 0x473   :  { %v1929_v56 = vmul.f32 %v15254_v9, %v1891_v62  ;;  %v15287_v45 = vpack.c.bf16 %v1965_v34, %v1964_v40  ;;  %v1966_v16 = vadd.f32 %v15266_v57, %v1928_v51 }
 0x474   :  { %v1578_v44 = vpop.xlane.xlu0 %1577 }
 0x475   :  { %v1967_v60 = vadd.f32 %v15266_v57, %v1929_v56  ;;  %v1624_v42 = vmul.f32 0.03125, %v1578_v44  ;;  %12267 = vmatprep.mubr.msk.bf16.mxu1 %vm115_vm0, %v15287_v45  ;;  %12303 = vmatprep.mubr.msk.bf16.mxu0 %vm115_vm0, %v15287_v45 }
 0x476   :  { %v1581_v32 = vpop.xlane.xlu1 %1580 }
 0x477   :  { %v15296_v25 = vsub.f32 %v15106_v49, %v1624_v42  ;;  %v1625_v14 = vmul.f32 0.03125, %v1581_v32  ;;  %v15298_v17 = vpack.c.bf16 %v1967_v60, %v1966_v16 }
 0x478   :  { %v1716_v28 = vpop.xlane.xlu0 %1715 }
 0x479   :  { %v15301_v12 = vsub.f32 %v15113_v1, %v1625_v14  ;;  %v1798_v51 = vmul.f32 0.03125, %v1716_v28  ;;  %12268 = vmatmul.mubr.msk.bf16.vlgmr.msra.gmra.mrb[32].mxu1 %vm115_vm0, %v15298_v17  ;;  %12304 = vmatmul.mubr.msk.bf16.vlgmr.msra.gmra.mrb[64].mxu0 %vm115_vm0, %v15298_v17  ;;  %v1688_v40 = vmul.f32 %v15296_v25, %v15296_v25 }
 0x47a   :  { %v1719_v62 = vpop.xlane.xlu1 %1718 }
 0x47b   :  { %v1830_v27 = vadd.f32 1e-05, %v1798_v51  ;;  %v1799_v34 = vmul.f32 0.03125, %v1719_v62  ;;  %v1768_v56 = vsel %vm115_vm0, %v1688_v40, 0.0  ;;  %v1689_v44 = vmul.f32 %v15301_v12, %v15301_v12 }
 0x47c   :  { %1769 = vadd.xlane.f32.xlu0 %v1768_v56  ;;  %v1710_v16 = vpop.xlane.xlu0 %1709 }
 0x47d   :  { %13484 = vrsqrt.f32 %v1830_v27  ;;  %v1831_v60 = vadd.f32 1e-05, %v1799_v34  ;;  %v1796_v42 = vmul.f32 0.03125, %v1710_v16  ;;  %v1771_v32 = vsel %vm115_vm0, %v1689_v44, 0.0 }
 0x47e   :  { %v1713_v14 = vpop.xlane.xlu1 %1712  ;;  %1772 = vadd.xlane.f32.xlu1 %v1771_v32 }
 0x47f   :  { %13486 = vrsqrt.f32 %v1831_v60  ;;  %v1828_v28 = vadd.f32 1e-05, %v1796_v42  ;;  %v1797_v1 = vmul.f32 0.03125, %v1713_v14 }
 0x480   :  { %v1584_v49 = vpop.xlane.xlu0 %1583 }
 0x481   :  { %13488 = vrsqrt.f32 %v1828_v28  ;;  %v1829_v51 = vadd.f32 1e-05, %v1797_v1  ;;  %v1626_v62 = vmul.f32 0.03125, %v1584_v49 }
 0x482   :  { %v1587_v40 = vpop.xlane.xlu1 %1586 }
 0x483   :  { %13490 = vrsqrt.f32 %v1829_v51  ;;  %v15314_v6 = vsub.f32 %v15132_v50, %v1626_v62  ;;  %v1627_v56 = vmul.f32 0.03125, %v1587_v40 }
 0x484   :  { %v1590_v27 = vpop.xlane.xlu0 %1589 }
 0x485   :  { %v15317_v34 = vsub.f32 %v15135_v18, %v1627_v56  ;;  %v1628_v44 = vmul.f32 0.03125, %v1590_v27  ;;  %v1690_v16 = vmul.f32 %v15314_v6, %v15314_v6 }
 0x486   :  { %v1593_v60 = vpop.xlane.xlu1 %1592 }
 0x487   :  { %v13485_v42 = vpop.eup %13484  ;;  %v15322_v32 = vsub.f32 %v15152_v24, %v1628_v44  ;;  %v1629_v49 = vmul.f32 0.03125, %v1593_v60  ;;  %v1774_v1 = vsel %vm115_vm0, %v1690_v16, 0.0  ;;  %v1691_v14 = vmul.f32 %v15317_v34, %v15317_v34 }
 0x488   :  { %1775 = vadd.xlane.f32.xlu0 %v1774_v1  ;;  %v1728_v28 = vpop.xlane.xlu0 %1727  ;;  %v1894_v60 = vmul.f32 %v13485_v42, %v15099_v46 }
 0x489   :  { %v13487_v51 = vpop.eup %13486  ;;  %v15328_v62 = vsub.f32 %v15164_v47, %v1629_v49  ;;  %v1802_v40 = vmul.f32 0.03125, %v1728_v28  ;;  %v1777_v56 = vsel %vm115_vm0, %v1691_v14, 0.0  ;;  %v1692_v27 = vmul.f32 %v15322_v32, %v15322_v32 }
 0x48a   :  { %1778 = vadd.xlane.f32.xlu1 %v1777_v56  ;;  %v1731_v44 = vpop.xlane.xlu1 %1730  ;;  %v1895_v16 = vmul.f32 %v13487_v51, %v15103_v59 }
 0x48b   :  { %v13489_v24 = vpop.eup %13488  ;;  %v1834_v18 = vadd.f32 1e-05, %v1802_v40  ;;  %v1803_v1 = vmul.f32 0.03125, %v1731_v44  ;;  %v1780_v50 = vsel %vm115_vm0, %v1692_v27, 0.0  ;;  %v1693_v49 = vmul.f32 %v15328_v62, %v15328_v62 }
 0x48c   :  { %1781 = vadd.xlane.f32.xlu0 %v1780_v50  ;;  %v1722_v28 = vpop.xlane.xlu0 %1721  ;;  %v1892_v14 = vmul.f32 %v13489_v24, %v15109_v26  ;;  %v1933_v46 = vmul.f32 %v15254_v9, %v1895_v16  ;;  %v1932_v27 = vmul.f32 %v15254_v9, %v1894_v60 }
 0x48d   :  { %v13491_v47 = vpop.eup %13490  ;;  %v1835_v13 = vadd.f32 1e-05, %v1803_v1  ;;  %v1800_v56 = vmul.f32 0.03125, %v1722_v28  ;;  %v1783_v33 = vsel %vm115_vm0, %v1693_v49, 0.0  ;;  %13492 = vrsqrt.f32 %v1834_v18 }
 0x48e   :  { %1784 = vadd.xlane.f32.xlu1 %v1783_v33  ;;  %v1725_v59 = vpop.xlane.xlu1 %1724  ;;  %v1893_v42 = vmul.f32 %v13491_v47, %v15118_v20  ;;  %v1930_v51 = vmul.f32 %v15254_v9, %v1892_v14  ;;  %v1971_v16 = vadd.f32 %v15266_v57, %v1933_v46  ;;  %v1970_v60 = vadd.f32 %v15266_v57, %v1932_v27 }
 0x48f   :  { %13494 = vrsqrt.f32 %v1835_v13  ;;  %v1832_v40 = vadd.f32 1e-05, %v1800_v56  ;;  %v1801_v50 = vmul.f32 0.03125, %v1725_v59 }
 0x490   :  { %v1596_v26 = vpop.xlane.xlu0 %1595  ;;  %v1931_v24 = vmul.f32 %v15254_v9, %v1893_v42  ;;  %v1968_v33 = vadd.f32 %v15266_v57, %v1930_v51  ;;  %v15357_v46 = vpack.c.bf16 %v1971_v16, %v1970_v60 }
 0x491   :  { %13496 = vrsqrt.f32 %v1832_v40  ;;  %v1833_v44 = vadd.f32 1e-05, %v1801_v50  ;;  %v1630_v1 = vmul.f32 0.03125, %v1596_v26 }
 0x492   :  { %v1599_v18 = vpop.xlane.xlu1 %1598  ;;  %v1969_v20 = vadd.f32 %v15266_v57, %v1931_v24 }
 0x493   :  { %13498 = vrsqrt.f32 %v1833_v44  ;;  %v15349_v13 = vsub.f32 %v15185_v0, %v1630_v1  ;;  %v1631_v47 = vmul.f32 0.03125, %v1599_v18 }
 0x494   :  { %v1734_v49 = vpop.xlane.xlu0 %1733  ;;  %v15352_v28 = vpack.c.bf16 %v1969_v20, %v1968_v33 }
 0x495   :  { %v15355_v14 = vsub.f32 %v15191_v22, %v1631_v47  ;;  %v1804_v56 = vmul.f32 0.03125, %v1734_v49  ;;  %v1694_v59 = vmul.f32 %v15349_v13, %v15349_v13 }
 0x496   :  { %v1737_v42 = vpop.xlane.xlu1 %1736  ;;  %12271 = vmatprep.mubr.msk.bf16.mxu1 %vm115_vm0, %v15352_v28  ;;  %12307 = vmatprep.mubr.msk.bf16.mxu0 %vm115_vm0, %v15352_v28 }
 0x497   :  { %v1836_v51 = vadd.f32 1e-05, %v1804_v56  ;;  %v1805_v40 = vmul.f32 0.03125, %v1737_v42  ;;  %12272 = vmatmul.mubr.msk.bf16.gmra.mrb[36].mxu1 %vm115_vm0, %v15357_v46  ;;  %12308 = vmatmul.mubr.msk.bf16.gmra.mrb[68].mxu0 %vm115_vm0, %v15357_v46  ;;  %v1786_v50 = vsel %vm115_vm0, %v1694_v59, 0.0  ;;  %v1695_v27 = vmul.f32 %v15355_v14, %v15355_v14  ;;  %v13493_v26 = vpop.eup %13492 }
 0x498   :  { %1787 = vadd.xlane.f32.xlu0 %v1786_v50  ;;  %v1740_v24 = vpop.xlane.xlu0 %1739  ;;  %v1898_v56 = vmul.f32 %v13493_v26, %v15142_v5 }
 0x499   :  { %v13495_v44 = vpop.eup %13494  ;;  %13500 = vrsqrt.f32 %v1836_v51  ;;  %v1837_v1 = vadd.f32 1e-05, %v1805_v40  ;;  %v1806_v16 = vmul.f32 0.03125, %v1740_v24  ;;  %v1789_v18 = vsel %vm115_vm0, %v1695_v27, 0.0 }
 0x49a   :  { %1790 = vadd.xlane.f32.xlu1 %v1789_v18  ;;  %v1743_v33 = vpop.xlane.xlu1 %1742  ;;  %v1899_v20 = vmul.f32 %v13495_v44, %v15150_v55  ;;  %v1936_v55 = vmul.f32 %v15254_v9, %v1898_v56 }
 0x49b   :  { %v13497_v47 = vpop.eup %13496  ;;  %13502 = vrsqrt.f32 %v1837_v1  ;;  %v1838_v60 = vadd.f32 1e-05, %v1806_v16  ;;  %v1807_v49 = vmul.f32 0.03125, %v1743_v33 }
 0x49c   :  { %v1896_v59 = vmul.f32 %v13497_v47, %v15162_v36  ;;  %v1937_v51 = vmul.f32 %v15254_v9, %v1899_v20  ;;  %v1974_v1 = vadd.f32 %v15266_v57, %v1936_v55 }
 0x49d   :  { %v13499_v42 = vpop.eup %13498  ;;  %13504 = vrsqrt.f32 %v1838_v60  ;;  %v1839_v50 = vadd.f32 1e-05, %v1807_v49 }
 0x49e   :  { %v1897_v40 = vmul.f32 %v13499_v42, %v15171_v35  ;;  %v1934_v27 = vmul.f32 %v15254_v9, %v1896_v59  ;;  %v1975_v44 = vadd.f32 %v15266_v57, %v1937_v51 }
 0x49f   :  { %13506 = vrsqrt.f32 %v1839_v50 }
 0x4a0   :  { %v1935_v24 = vmul.f32 %v15254_v9, %v1897_v40  ;;  %v1972_v5 = vadd.f32 %v15266_v57, %v1934_v27  ;;  %v15388_v33 = vpack.c.bf16 %v1975_v44, %v1974_v1  ;;  %v18829_v44 = vmov 0.0  }
 0x4a1   :  { %12371 = vmatprep.subr.bf16.mxu0 %v18829_v44 }
 0x4a2   :  { %v1973_v36 = vadd.f32 %v15266_v57, %v1935_v24  ;;  %v13331_v24 = vld [vmem:[%s18774_s11 + $0x8] sm:$0xff]  }
 0x4a3   :  { %v13501_v26 = vpop.eup %13500 }
 0x4a4   :  { %v15385_v16 = vpack.c.bf16 %v1973_v36, %v1972_v5  ;;  %v1900_v35 = vmul.f32 %v13501_v26, %v15188_v29 }
 0x4a5   :  { %v13503_v18 = vpop.eup %13502 }
 0x4a6   :  { %12275 = vmatprep.mubr.msk.bf16.mxu1 %vm115_vm0, %v15385_v16  ;;  %12311 = vmatprep.mubr.msk.bf16.mxu0 %vm115_vm0, %v15385_v16  ;;  %v1901_v20 = vmul.f32 %v13503_v18, %v15194_v63  ;;  %v1938_v47 = vmul.f32 %v15254_v9, %v1900_v35 }
 0x4a7   :  { %v13505_v60 = vpop.eup %13504  ;;  %12276 = vmatmul.mubr.msk.bf16.gmra.mrb[40].mxu1 %vm115_vm0, %v15388_v33  ;;  %12312 = vmatmul.mubr.msk.bf16.gmra.mrb[72].mxu0 %vm115_vm0, %v15388_v33 }
 0x4a8   :  { %v1939_v29 = vmul.f32 %v15254_v9, %v1901_v20  ;;  %v1902_v49 = vmul.f32 %v13505_v60, %v15198_v58  ;;  %v1976_v59 = vadd.f32 %v15266_v57, %v1938_v47 }
 0x4a9   :  { %v13507_v56 = vpop.eup %13506 }
 0x4aa   :  { %v1977_v42 = vadd.f32 %v15266_v57, %v1939_v29  ;;  %v1903_v63 = vmul.f32 %v13507_v56, %v15205_v30  ;;  %v1940_v50 = vmul.f32 %v15254_v9, %v1902_v49  ;;  %v13330_v30 = vld [vmem:[%s18774_s11] sm:$0xff]   ;;  %s14010_s11 = smov 112  }
 0x4ab   :  { %12335 = vmatprep.subr.bf16.mxu1 %v13330_v30 }
 0x4ac   :  { %v15406_v51 = vpack.c.bf16 %v1977_v42, %v1976_v59  ;;  %v1941_v40 = vmul.f32 %v15254_v9, %v1903_v63  ;;  %v1978_v58 = vadd.f32 %v15266_v57, %v1940_v50  ;;  %12336 = vmatpush3.bf16.msra.mxu1 %v13330_v30 }
 0x4ad   :  { %12337 = vmatprep.subr.bf16.mxu1 %v13331_v24 }
 0x4ae   :  { %12279 = vmatprep.mubr.msk.bf16.mxu1 %vm115_vm0, %v15406_v51  ;;  %12315 = vmatprep.mubr.msk.bf16.mxu0 %vm115_vm0, %v15406_v51  ;;  %v1979_v27 = vadd.f32 %v15266_v57, %v1941_v40 }
 0x4b0   :  { %v15415_v55 = vpack.c.bf16 %v1979_v27, %v1978_v58  ;;  %12338 = vmatpush3.bf16.msra.mxu1 %v13331_v24 }
 0x4b1   :  { %12395 = vmatprep.subr.bf16.mxu1 %v18829_v44 }
 0x4b2   :  { %12280 = vmatmul.mubr.msk.bf16.gmra.mrb[44].mxu1 %vm115_vm0, %v15415_v55  ;;  %12316 = vmatmul.mubr.msk.bf16.gmra.mrb[76].mxu0 %vm115_vm0, %v15415_v55 }
 0x4ec   :  { %v1746_v5 = vpop.xlane.xlu0 %1745 }
 0x4ed   :  { %v1808_v36 = vmul.f32 0.03125, %v1746_v5 }
 0x4ee   :  { %v1749_v26 = vpop.xlane.xlu1 %1748 }
 0x4ef   :  { %v1840_v1 = vadd.f32 1e-05, %v1808_v36  ;;  %v1809_v35 = vmul.f32 0.03125, %v1749_v26 }
 0x4f0   :  { %v1752_v18 = vpop.xlane.xlu0 %1751 }
 0x4f1   :  { %13508 = vrsqrt.f32 %v1840_v1  ;;  %v1841_v20 = vadd.f32 1e-05, %v1809_v35  ;;  %v1810_v47 = vmul.f32 0.03125, %v1752_v18 }
 0x4f2   :  { %v1755_v60 = vpop.xlane.xlu1 %1754 }
 0x4f3   :  { %13510 = vrsqrt.f32 %v1841_v20  ;;  %v1842_v29 = vadd.f32 1e-05, %v1810_v47  ;;  %v1811_v49 = vmul.f32 0.03125, %v1755_v60 }
 0x4f5   :  { %13512 = vrsqrt.f32 %v1842_v29  ;;  %v1843_v56 = vadd.f32 1e-05, %v1811_v49 }
 0x4f7   :  { %13514 = vrsqrt.f32 %v1843_v56 }
 0x4f9   :  { %v1758_v59 = vpop.xlane.xlu0 %1757 }
 0x4fa   :  { %v1812_v42 = vmul.f32 0.03125, %v1758_v59 }
 0x4fb   :  { %v13509_v63 = vpop.eup %13508  ;;  %v1761_v50 = vpop.xlane.xlu1 %1760 }
 0x4fc   :  { %v1844_v40 = vadd.f32 1e-05, %v1812_v42  ;;  %v1813_v58 = vmul.f32 0.03125, %v1761_v50  ;;  %v1904_v27 = vmul.f32 %v13509_v63, %v15223_v61 }
 0x4fd   :  { %v13511_v30 = vpop.eup %13510  ;;  %v1764_v24 = vpop.xlane.xlu0 %1763 }
 0x4fe   :  { %13516 = vrsqrt.f32 %v1844_v40  ;;  %v1845_v5 = vadd.f32 1e-05, %v1813_v58  ;;  %v1814_v36 = vmul.f32 0.03125, %v1764_v24  ;;  %v1905_v26 = vmul.f32 %v13511_v30, %v15229_v31 }
 0x4ff   :  { %v13513_v1 = vpop.eup %13512  ;;  %v1767_v35 = vpop.xlane.xlu1 %1766  ;;  %v1942_v18 = vmul.f32 %v15254_v9, %v1904_v27 }
 0x500   :  { %13518 = vrsqrt.f32 %v1845_v5  ;;  %v1846_v20 = vadd.f32 1e-05, %v1814_v36  ;;  %v1815_v47 = vmul.f32 0.03125, %v1767_v35  ;;  %v1943_v60 = vmul.f32 %v15254_v9, %v1905_v26 }
 0x501   :  { %v13515_v29 = vpop.eup %13514  ;;  %v1980_v49 = vadd.f32 %v15266_v57, %v1942_v18  ;;  %v1906_v61 = vmul.f32 %v13513_v1, %v15220_v43 }
 0x502   :  { %13520 = vrsqrt.f32 %v1846_v20  ;;  %v1847_v56 = vadd.f32 1e-05, %v1815_v47  ;;  %v1981_v59 = vadd.f32 %v15266_v57, %v1943_v60  ;;  %v1907_v31 = vmul.f32 %v13515_v29, %v15226_v10 }
 0x503   :  { %v1944_v42 = vmul.f32 %v15254_v9, %v1906_v61 }
 0x504   :  { %13522 = vrsqrt.f32 %v1847_v56  ;;  %v15438_v63 = vpack.c.bf16 %v1981_v59, %v1980_v49  ;;  %v1945_v50 = vmul.f32 %v15254_v9, %v1907_v31 }
 0x505   :  { %v1982_v43 = vadd.f32 %v15266_v57, %v1944_v42 }
 0x506   :  { %12283 = vmatprep.mubr.msk.bf16.mxu1 %vm115_vm0, %v15438_v63  ;;  %12319 = vmatprep.mubr.msk.bf16.mxu0 %vm115_vm0, %v15438_v63  ;;  %v1983_v40 = vadd.f32 %v15266_v57, %v1945_v50 }
 0x508   :  { %v13517_v58 = vpop.eup %13516  ;;  %v15447_v27 = vpack.c.bf16 %v1983_v40, %v1982_v43 }
 0x509   :  { %v1770_v10 = vpop.xlane.xlu0 %1769  ;;  %v1908_v30 = vmul.f32 %v13517_v58, %v15244_v52 }
 0x50a   :  { %v13519_v24 = vpop.eup %13518  ;;  %v1816_v5 = vmul.f32 0.03125, %v1770_v10  ;;  %12284 = vmatmul.mubr.msk.bf16.gmra.mrb[48].mxu1 %vm115_vm0, %v15447_v27  ;;  %12320 = vmatmul.mubr.msk.bf16.gmra.mrb[80].mxu0 %vm115_vm0, %v15447_v27 }
 0x50b   :  { %v1773_v36 = vpop.xlane.xlu1 %1772  ;;  %v1909_v26 = vmul.f32 %v13519_v24, %v15247_v15  ;;  %v1946_v1 = vmul.f32 %v15254_v9, %v1908_v30 }
 0x50c   :  { %v13521_v35 = vpop.eup %13520  ;;  %v1848_v18 = vadd.f32 1e-05, %v1816_v5  ;;  %v1817_v20 = vmul.f32 0.03125, %v1773_v36 }
 0x50d   :  { %v1947_v47 = vmul.f32 %v15254_v9, %v1909_v26  ;;  %v1910_v52 = vmul.f32 %v13521_v35, %v15257_v8  ;;  %v1984_v49 = vadd.f32 %v15266_v57, %v1946_v1 }
 0x50e   :  { %v13523_v60 = vpop.eup %13522  ;;  %13524 = vrsqrt.f32 %v1848_v18  ;;  %v1849_v29 = vadd.f32 1e-05, %v1817_v20 }
 0x50f   :  { %v1985_v61 = vadd.f32 %v15266_v57, %v1947_v47  ;;  %v1911_v56 = vmul.f32 %v13523_v60, %v15269_v37  ;;  %v1948_v15 = vmul.f32 %v15254_v9, %v1910_v52 }
 0x510   :  { %13526 = vrsqrt.f32 %v1849_v29 }
 0x511   :  { %v15462_v59 = vpack.c.bf16 %v1985_v61, %v1984_v49  ;;  %v1949_v31 = vmul.f32 %v15254_v9, %v1911_v56  ;;  %v1986_v8 = vadd.f32 %v15266_v57, %v1948_v15 }
 0x513   :  { %12287 = vmatprep.mubr.msk.bf16.mxu1 %vm115_vm0, %v15462_v59  ;;  %12323 = vmatprep.mubr.msk.bf16.mxu0 %vm115_vm0, %v15462_v59  ;;  %v1987_v42 = vadd.f32 %v15266_v57, %v1949_v31 }
 0x515   :  { %v1776_v50 = vpop.xlane.xlu0 %1775  ;;  %v15471_v43 = vpack.c.bf16 %v1987_v42, %v1986_v8 }
 0x516   :  { %v1818_v37 = vmul.f32 0.03125, %v1776_v50 }
 0x517   :  { %v1779_v40 = vpop.xlane.xlu1 %1778  ;;  %12288 = vmatmul.mubr.msk.bf16.gmra.mrb[52].mxu1 %vm115_vm0, %v15471_v43  ;;  %12324 = vmatmul.mubr.msk.bf16.gmra.mrb[84].mxu0 %vm115_vm0, %v15471_v43 }
 0x518   :  { %v13525_v58 = vpop.eup %13524  ;;  %v1850_v10 = vadd.f32 1e-05, %v1818_v37  ;;  %v1819_v30 = vmul.f32 0.03125, %v1779_v40 }
 0x519   :  { %v1782_v24 = vpop.xlane.xlu0 %1781  ;;  %v1912_v5 = vmul.f32 %v13525_v58, %v15296_v25 }
 0x51a   :  { %v13527_v36 = vpop.eup %13526  ;;  %13528 = vrsqrt.f32 %v1850_v10  ;;  %v1851_v26 = vadd.f32 1e-05, %v1819_v30  ;;  %v1820_v1 = vmul.f32 0.03125, %v1782_v24 }
 0x51b   :  { %v1785_v35 = vpop.xlane.xlu1 %1784  ;;  %v1913_v18 = vmul.f32 %v13527_v36, %v15301_v12  ;;  %v1950_v20 = vmul.f32 %v15254_v9, %v1912_v5 }
 0x51c   :  { %13530 = vrsqrt.f32 %v1851_v26  ;;  %v1852_v47 = vadd.f32 1e-05, %v1820_v1  ;;  %v1821_v52 = vmul.f32 0.03125, %v1785_v35 }
 0x51d   :  { %v1951_v60 = vmul.f32 %v15254_v9, %v1913_v18  ;;  %v1988_v49 = vadd.f32 %v15266_v57, %v1950_v20 }
 0x51e   :  { %13532 = vrsqrt.f32 %v1852_v47  ;;  %v1853_v29 = vadd.f32 1e-05, %v1821_v52 }
 0x51f   :  { %v1989_v25 = vadd.f32 %v15266_v57, %v1951_v60 }
 0x520   :  { %13534 = vrsqrt.f32 %v1853_v29 }
 0x521   :  { %v15483_v61 = vpack.c.bf16 %v1989_v25, %v1988_v49 }
 0x523   :  { %12291 = vmatprep.mubr.msk.bf16.mxu1 %vm115_vm0, %v15483_v61  ;;  %12327 = vmatprep.mubr.msk.bf16.mxu0 %vm115_vm0, %v15483_v61 }
 0x524   :  { %v13529_v12 = vpop.eup %13528 }
 0x525   :  { %v1788_v56 = vpop.xlane.xlu0 %1787  ;;  %v1914_v15 = vmul.f32 %v13529_v12, %v15314_v6 }
 0x526   :  { %v13531_v31 = vpop.eup %13530  ;;  %v1822_v8 = vmul.f32 0.03125, %v1788_v56 }
 0x527   :  { %v1791_v42 = vpop.xlane.xlu1 %1790  ;;  %v1915_v50 = vmul.f32 %v13531_v31, %v15317_v34  ;;  %v1952_v37 = vmul.f32 %v15254_v9, %v1914_v15 }
 0x528   :  { %v13533_v40 = vpop.eup %13532  ;;  %v1854_v58 = vadd.f32 1e-05, %v1822_v8  ;;  %v1823_v10 = vmul.f32 0.03125, %v1791_v42 }
 0x529   :  { %v1953_v30 = vmul.f32 %v15254_v9, %v1915_v50  ;;  %v1916_v24 = vmul.f32 %v13533_v40, %v15322_v32  ;;  %v1990_v26 = vadd.f32 %v15266_v57, %v1952_v37 }
 0x52a   :  { %v13535_v5 = vpop.eup %13534  ;;  %13536 = vrsqrt.f32 %v1854_v58  ;;  %v1855_v36 = vadd.f32 1e-05, %v1823_v10 }
 0x52b   :  { %v1991_v6 = vadd.f32 %v15266_v57, %v1953_v30  ;;  %v1917_v1 = vmul.f32 %v13535_v5, %v15328_v62  ;;  %v1954_v34 = vmul.f32 %v15254_v9, %v1916_v24 }
 0x52c   :  { %13538 = vrsqrt.f32 %v1855_v36 }
 0x52d   :  { %v15498_v35 = vpack.c.bf16 %v1991_v6, %v1990_v26  ;;  %v1955_v18 = vmul.f32 %v15254_v9, %v1917_v1  ;;  %v1992_v32 = vadd.f32 %v15266_v57, %v1954_v34 }
 0x52f   :  { %12292 = vmatmul.mubr.msk.bf16.gmra.mrb[56].mxu1 %vm115_vm0, %v15498_v35  ;;  %12328 = vmatmul.mubr.msk.bf16.gmra.mrb[88].mxu0 %vm115_vm0, %v15498_v35  ;;  %v1993_v20 = vadd.f32 %v15266_v57, %v1955_v18 }
 0x531   :  { %v15507_v47 = vpack.c.bf16 %v1993_v20, %v1992_v32 }
 0x533   :  { %12295 = vmatprep.mubr.msk.bf16.mxu1 %vm115_vm0, %v15507_v47  ;;  %12331 = vmatprep.mubr.msk.bf16.mxu0 %vm115_vm0, %v15507_v47 }
 0x534   :  { %v13537_v62 = vpop.eup %13536 }
 0x535   :  { %v1918_v52 = vmul.f32 %v13537_v62, %v15349_v13 }
 0x536   :  { %v13539_v60 = vpop.eup %13538 }
 0x537   :  { %v1919_v29 = vmul.f32 %v13539_v60, %v15355_v14  ;;  %v1956_v49 = vmul.f32 %v15254_v9, %v1918_v52 }
 0x539   :  { %v1957_v25 = vmul.f32 %v15254_v9, %v1919_v29  ;;  %v1994_v12 = vadd.f32 %v15266_v57, %v1956_v49 }
 0x53b   :  { %v1995_v56 = vadd.f32 %v15266_v57, %v1957_v25 }
 0x53d   :  { %v15519_v15 = vpack.c.bf16 %v1995_v56, %v1994_v12 }
 0x53f   :  { %12296 = vmatmul.mubr.msk.bf16.gmra.mrb[60].mxu1 %vm115_vm0, %v15519_v15  ;;  %12332 = vmatmul.mubr.msk.bf16.gmra.mrb[92].mxu0 %vm115_vm0, %v15519_v15 }
 0x540   :  { %12339 = vmatprep.mubr.msk.bf16.mxu1 %vm115_vm0, %v15287_v45  ;;  %12373 = vmatprep.mubr.msk.bf16.mxu0 %vm14009_vm1, %v18829_v44 }
 0x547   :  { %12340 = vmatmul.mubr.msk.bf16.vlgmr.msra.gmra.mrb[64].mxu1 %vm115_vm0, %v15298_v17 }
 0x548   :  { %12343 = vmatprep.mubr.msk.bf16.mxu1 %vm115_vm0, %v15352_v28 }
 0x54c   :  { %v12269_v9 = vpop.f32.mrb[32].mxu1  ;;  %v12305_v57 = vpop.f32.mrb[64].mxu0 }
 0x54d   :  { %v2110_v13 = vpop.f32.mrb[33].mxu1  ;;  %v2287_v14 = vpop.f32.mrb[65].mxu0  ;;  %v15574_v58 = vpack.c.bf16 %v12269_v9, %v12269_v9 }
 0x54e   :  { %v15533_v31 = vpack.c.bf16 %v2287_v14, %v2287_v14  ;;  %v12270_v8 = vpop.f32.mrb[34].mxu1  ;;  %v12306_v42 = vpop.f32.mrb[66].mxu0  ;;  %v15544_v37 = vpack.c.bf16 %v2110_v13, %v2110_v13 }
 0x54f   :  { %v2113_v45 = vpop.f32.mrb[35].mxu1  ;;  %v2290_v50 = vpop.f32.mrb[67].mxu0  ;;  %12344 = vmatmul.mubr.msk.bf16.gmra.mrb[68].mxu1 %vm115_vm0, %v15357_v46  ;;  %v15595_v34 = vpack.c.bf16 %v12270_v8, %v12270_v8 }
 0x550   :  { %12347 = vmatprep.mubr.msk.bf16.mxu1 %vm115_vm0, %v15385_v16  ;;  %v2692_v17 = vsel %vm2687_vm2, %v15533_v31, 0  ;;  %v15542_v28 = vpack.c.bf16 %v2290_v50, %v2290_v50  ;;  %18943 = vst [vmem:[#allocation41_spill] sm:$0xff] %v15544_v37  ;;  %v15557_v16 = vpack.c.bf16 %v12305_v57, %v12305_v57  ;;  %v15559_v40 = vpack.c.bf16 %v2113_v45, %v2113_v45 }
 0x551   :  { %12372 = vmatpush3.bf16.xpose.msra.mxu0 %v2692_v17  ;;  %18948 = vst [vmem:[#allocation46_spill] sm:$0xff] %v15595_v34 }
 0x552   :  { %12377 = vmatprep.subr.bf16.mxu0 %v18829_v44  ;;  %v2738_v46 = vsel %vm2687_vm2, %v15542_v28, 0  ;;  %18944 = vst [vmem:[#allocation42_spill] sm:$0xff] %v15559_v40 }
 0x557   :  { %12348 = vmatmul.mubr.msk.bf16.gmra.mrb[72].mxu1 %vm115_vm0, %v15388_v33  ;;  %v2784_v33 = vsel %vm2687_vm2, %v15557_v16, 0 }
 0x558   :  { %12351 = vmatprep.mubr.msk.bf16.mxu1 %vm115_vm0, %v15406_v51  ;;  %12374 = vmatmul.mubr.msk.bf16.vlgmr.msra.gmra.mrb[96].mxu0 %vm2687_vm2, %v15544_v37  ;;  %v15572_v51 = vpack.c.bf16 %v12306_v42, %v12306_v42 }
 0x559   :  { %12378 = vmatpush3.bf16.xpose.msra.mxu0 %v2738_v46  ;;  %12379 = vmatprep.mubr.msk.bf16.mxu0 %vm14009_vm1, %v18829_v44 }
 0x55a   :  { %12383 = vmatprep.subr.bf16.mxu0 %v18829_v44  ;;  %18945 = vst [vmem:[#allocation43_spill] sm:$0xff] %v15572_v51 }
 0x55f   :  { %12352 = vmatmul.mubr.msk.bf16.gmra.mrb[76].mxu1 %vm115_vm0, %v15415_v55  ;;  %v2830_v55 = vsel %vm2687_vm2, %v15572_v51, 0 }
 0x560   :  { %12355 = vmatprep.mubr.msk.bf16.mxu1 %vm115_vm0, %v15438_v63  ;;  %12380 = vmatmul.mubr.msk.bf16.vlgmr.msra.gmra.mrb[100].mxu0 %vm2687_vm2, %v15559_v40 }
 0x561   :  { %12384 = vmatpush3.bf16.xpose.msra.mxu0 %v2784_v33  ;;  %12385 = vmatprep.mubr.msk.bf16.mxu0 %vm14009_vm1, %v18829_v44 }
 0x562   :  { %12389 = vmatprep.subr.bf16.mxu0 %v18829_v44 }
 0x567   :  { %12356 = vmatmul.mubr.msk.bf16.gmra.mrb[80].mxu1 %vm115_vm0, %v15447_v27 }
 0x568   :  { %12359 = vmatprep.mubr.msk.bf16.mxu1 %vm115_vm0, %v15462_v59  ;;  %12386 = vmatmul.mubr.msk.bf16.vlgmr.msra.gmra.mrb[104].mxu0 %vm2687_vm2, %v15574_v58 }
 0x569   :  { %12390 = vmatpush3.bf16.xpose.msra.mxu0 %v2830_v55  ;;  %12391 = vmatprep.mubr.msk.bf16.mxu0 %vm14009_vm1, %v18829_v44 }
 0x56a   :  { %v15586_v63 = vpop.f32.mrb[36].mxu1  ;;  %v12309_v10 = vpop.f32.mrb[68].mxu0  ;;  %12401 = vmatprep.subr.bf16.mxu0 %v18829_v44 }
 0x56b   :  { %v2126_v30 = vpop.f32.mrb[37].mxu1  ;;  %v2303_v27 = vpop.f32.mrb[69].mxu0  ;;  %v15640_v9 = vpack.c.bf16 %v12309_v10, %v12309_v10 }
 0x56c   :  { %v15589_v24 = vpack.c.bf16 %v2303_v27, %v2303_v27  ;;  %v12274_v59 = vpop.f32.mrb[38].mxu1  ;;  %v12310_v5 = vpop.f32.mrb[70].mxu0  ;;  %v15643_v57 = vpack.c.bf16 %v2126_v30, %v2126_v30  ;;  %v15669_v27 = vpack.c.bf16 %v15586_v63, %v15586_v63 }
 0x56d   :  { %v2129_v36 = vpop.f32.mrb[39].mxu1  ;;  %v2306_v26 = vpop.f32.mrb[71].mxu0  ;;  %v15609_v32 = vpack.c.bf16 %v12310_v5, %v12310_v5  ;;  %v15628_v12 = vpack.c.bf16 %v12274_v59, %v12274_v59  ;;  %18953 = vst [vmem:[#allocation51_spill] sm:$0xff] %v15640_v9  ;;  %v2968_v46 = vsel %vm2687_vm2, %v15640_v9, 0 }
 0x56e   :  { %18946 = vst [vmem:[#allocation44_spill] sm:$0xff] %v15589_v24  ;;  %v15591_v6 = vpack.c.bf16 %v2306_v26, %v2306_v26  ;;  %v2876_v1 = vsel %vm2687_vm2, %v15589_v24, 0  ;;  %18954 = vst [vmem:[#allocation52_spill] sm:$0xff] %v15643_v57 }
 0x56f   :  { %12360 = vmatmul.mubr.msk.bf16.gmra.mrb[84].mxu1 %vm115_vm0, %v15471_v43  ;;  %18949 = vst [vmem:[#allocation47_spill] sm:$0xff] %v15609_v32  ;;  %v15611_v43 = vpack.c.bf16 %v2129_v36, %v2129_v36  ;;  %18952 = vst [vmem:[#allocation50_spill] sm:$0xff] %v15628_v12 }
 0x570   :  { %18947 = vst [vmem:[#allocation45_spill] sm:$0xff] %v15591_v6  ;;  %12396 = vmatpush3.bf16.xpose.msra.mxu1 %v2876_v1  ;;  %12363 = vmatprep.mubr.msk.bf16.mxu1 %vm115_vm0, %v15483_v61  ;;  %v2922_v18 = vsel %vm2687_vm2, %v15591_v6, 0  ;;  %v3014_v61 = vsel %vm2687_vm2, %v15609_v32, 0  ;;  %18958 = vst [vmem:[#allocation56_spill] sm:$0xff] %v15669_v27 }
 0x571   :  { %12392 = vmatmul.mubr.msk.bf16.vlgmr.msra.gmra.mrb[108].mxu0 %vm2687_vm2, %v15595_v34  ;;  %12407 = vmatprep.subr.bf16.mxu1 %v18829_v44  ;;  %18950 = vst [vmem:[#allocation48_spill] sm:$0xff] %v15611_v43 }
 0x572   :  { %12402 = vmatpush3.bf16.xpose.msra.mxu0 %v2922_v18  ;;  %12403 = vmatprep.mubr.msk.bf16.mxu0 %vm14009_vm1, %v18829_v44 }
 0x573   :  { %12413 = vmatprep.subr.bf16.mxu0 %v18829_v44 }
 0x577   :  { %12364 = vmatmul.mubr.msk.bf16.gmra.mrb[88].mxu1 %vm115_vm0, %v15498_v35 }
 0x578   :  { %12367 = vmatprep.mubr.msk.bf16.mxu1 %vm115_vm0, %v15507_v47 }
 0x579   :  { %12404 = vmatmul.mubr.msk.bf16.vlgmr.msra.gmra.mrb[112].mxu0 %vm2687_vm2, %v15611_v43 }
 0x57a   :  { %12414 = vmatpush3.bf16.xpose.msra.mxu0 %v3014_v61  ;;  %v15621_v20 = vpop.f32.mrb[40].mxu1  ;;  %v12313_v62 = vpop.f32.mrb[72].mxu0  ;;  %12415 = vmatprep.mubr.msk.bf16.mxu0 %vm14009_vm1, %v18829_v44 }
 0x57b   :  { %v2142_v52 = vpop.f32.mrb[41].mxu1  ;;  %v2319_v60 = vpop.f32.mrb[73].mxu0  ;;  %12425 = vmatprep.subr.bf16.mxu0 %v18829_v44  ;;  %v15688_v26 = vpack.c.bf16 %v12313_v62, %v12313_v62 }
 0x57c   :  { %v12278_v35 = vpop.f32.mrb[42].mxu1  ;;  %v12314_v29 = vpop.f32.mrb[74].mxu0  ;;  %v15664_v30 = vpack.c.bf16 %v2319_v60, %v2319_v60  ;;  %v15691_v1 = vpack.c.bf16 %v2142_v52, %v2142_v52 }
 0x57d   :  { %v2145_v47 = vpop.f32.mrb[43].mxu1  ;;  %v2322_v49 = vpop.f32.mrb[75].mxu0  ;;  %v15673_v5 = vpack.c.bf16 %v12278_v35, %v12278_v35  ;;  %18961 = vst [vmem:[#allocation59_spill] sm:$0xff] %v15688_v26  ;;  %v3152_v60 = vsel %vm2687_vm2, %v15688_v26, 0  ;;  %v15715_v35 = vpack.c.bf16 %v15621_v20, %v15621_v20 }
 0x57e   :  { %v15626_v25 = vpack.c.bf16 %v2322_v49, %v2322_v49  ;;  %v15649_v45 = vpack.c.bf16 %v2145_v47, %v2145_v47  ;;  %18957 = vst [vmem:[#allocation55_spill] sm:$0xff] %v15664_v30  ;;  %v3060_v36 = vsel %vm2687_vm2, %v15664_v30, 0  ;;  %18962 = vst [vmem:[#allocation60_spill] sm:$0xff] %v15691_v1 }
 0x57f   :  { %12368 = vmatmul.mubr.msk.bf16.gmra.mrb[92].mxu1 %vm115_vm0, %v15519_v15  ;;  %v15645_v15 = vpack.c.bf16 %v12314_v29, %v12314_v29  ;;  %18960 = vst [vmem:[#allocation58_spill] sm:$0xff] %v15673_v5  ;;  %18966 = vst [vmem:[#allocation64_spill] sm:$0xff] %v15715_v35 }
 0x580   :  { %18951 = vst [vmem:[#allocation49_spill] sm:$0xff] %v15626_v25  ;;  %v3106_v56 = vsel %vm2687_vm2, %v15626_v25, 0  ;;  %12397 = vmatprep.mubr.msk.bf16.mxu1 %vm14009_vm1, %v18829_v44  ;;  %18956 = vst [vmem:[#allocation54_spill] sm:$0xff] %v15649_v45 }
 0x581   :  { %12416 = vmatmul.mubr.msk.bf16.vlgmr.msra.gmra.mrb[116].mxu0 %vm2687_vm2, %v15628_v12  ;;  %18955 = vst [vmem:[#allocation53_spill] sm:$0xff] %v15645_v15  ;;  %v3198_v10 = vsel %vm2687_vm2, %v15645_v15, 0 }
 0x582   :  { %12426 = vmatpush3.bf16.xpose.msra.mxu0 %v3106_v56  ;;  %12427 = vmatprep.mubr.msk.bf16.mxu0 %vm14009_vm1, %v18829_v44 }
 0x583   :  { %12437 = vmatprep.subr.bf16.mxu0 %v18829_v44 }
 0x585   :  { %v15647_v13 = vpop.f32.mrb[44].mxu1  ;;  %v12317_v14 = vpop.f32.mrb[76].mxu0 }
 0x586   :  { %v2158_v8 = vpop.f32.mrb[45].mxu1  ;;  %v2335_v42 = vpop.f32.mrb[77].mxu0  ;;  %v15730_v20 = vpack.c.bf16 %v12317_v14, %v12317_v14 }
 0x587   :  { %v12282_v50 = vpop.f32.mrb[46].mxu1  ;;  %v12318_v17 = vpop.f32.mrb[78].mxu0  ;;  %12398 = vmatmul.mubr.msk.bf16.vlgmr.msra.gmra.mrb[96].mxu1 %vm2687_vm2, %v15643_v57  ;;  %v15710_v52 = vpack.c.bf16 %v2335_v42, %v2335_v42  ;;  %v15732_v49 = vpack.c.bf16 %v2158_v8, %v2158_v8  ;;  %v15743_v42 = vpack.c.bf16 %v15647_v13, %v15647_v13 }
 0x588   :  { %12408 = vmatpush3.bf16.xpose.msra.mxu1 %v2968_v46  ;;  %v2161_v33 = vpop.f32.mrb[47].mxu1  ;;  %v2338_v55 = vpop.f32.mrb[79].mxu0  ;;  %12409 = vmatprep.mubr.msk.bf16.mxu1 %vm14009_vm1, %v18829_v44  ;;  %v15693_v18 = vpack.c.bf16 %v12318_v17, %v12318_v17  ;;  %v15717_v29 = vpack.c.bf16 %v12282_v50, %v12282_v50  ;;  %18968 = vst [vmem:[#allocation66_spill] sm:$0xff] %v15730_v20  ;;  %v3336_v56 = vsel %vm2687_vm2, %v15730_v20, 0 }
 0x589   :  { %12428 = vmatmul.mubr.msk.bf16.vlgmr.msra.gmra.mrb[120].mxu0 %vm2687_vm2, %v15649_v45  ;;  %12419 = vmatprep.subr.bf16.mxu1 %v18829_v44  ;;  %v15671_v59 = vpack.c.bf16 %v2338_v55, %v2338_v55  ;;  %v15695_v61 = vpack.c.bf16 %v2161_v33, %v2161_v33  ;;  %18965 = vst [vmem:[#allocation63_spill] sm:$0xff] %v15710_v52  ;;  %v3244_v47 = vsel %vm2687_vm2, %v15710_v52, 0  ;;  %18969 = vst [vmem:[#allocation67_spill] sm:$0xff] %v15732_v49 }
 0x58a   :  { %12438 = vmatpush3.bf16.xpose.msra.mxu0 %v3198_v10  ;;  %12439 = vmatprep.mubr.msk.bf16.mxu0 %vm14009_vm1, %v18829_v44  ;;  %18963 = vst [vmem:[#allocation61_spill] sm:$0xff] %v15693_v18  ;;  %v3382_v62 = vsel %vm2687_vm2, %v15693_v18, 0  ;;  %18967 = vst [vmem:[#allocation65_spill] sm:$0xff] %v15717_v29 }
 0x58b   :  { %12449 = vmatprep.subr.bf16.mxu0 %v18829_v44  ;;  %18959 = vst [vmem:[#allocation57_spill] sm:$0xff] %v15671_v59  ;;  %v3290_v63 = vsel %vm2687_vm2, %v15671_v59, 0  ;;  %18964 = vst [vmem:[#allocation62_spill] sm:$0xff] %v15695_v61 }
 0x58c   :  { %18970 = vst [vmem:[#allocation68_spill] sm:$0xff] %v15743_v42 }
 0x58f   :  { %12410 = vmatmul.mubr.msk.bf16.vlgmr.msra.gmra.mrb[100].mxu1 %vm2687_vm2, %v15669_v27 }
 0x590   :  { %12420 = vmatpush3.bf16.xpose.msra.mxu1 %v3060_v36  ;;  %12421 = vmatprep.mubr.msk.bf16.mxu1 %vm14009_vm1, %v18829_v44 }
 0x591   :  { %12440 = vmatmul.mubr.msk.bf16.vlgmr.msra.gmra.mrb[124].mxu0 %vm2687_vm2, %v15673_v5  ;;  %12431 = vmatprep.subr.bf16.mxu1 %v18829_v44 }
 0x592   :  { %12450 = vmatpush3.bf16.xpose.msra.mxu0 %v3290_v63  ;;  %12451 = vmatprep.mubr.msk.bf16.mxu0 %vm14009_vm1, %v18829_v44 }
 0x593   :  { %12461 = vmatprep.subr.bf16.mxu0 %v18829_v44 }
 0x597   :  { %12422 = vmatmul.mubr.msk.bf16.vlgmr.msra.gmra.mrb[104].mxu1 %vm2687_vm2, %v15691_v1 }
 0x598   :  { %12432 = vmatpush3.bf16.xpose.msra.mxu1 %v3152_v60  ;;  %12433 = vmatprep.mubr.msk.bf16.mxu1 %vm14009_vm1, %v18829_v44 }
 0x599   :  { %12452 = vmatmul.mubr.msk.bf16.vlgmr.msra.gmra.mrb[128].mxu0 %vm2687_vm2, %v15695_v61  ;;  %12443 = vmatprep.subr.bf16.mxu1 %v18829_v44 }
 0x59a   :  { %12462 = vmatpush3.bf16.xpose.msra.mxu0 %v3382_v62  ;;  %12463 = vmatprep.mubr.msk.bf16.mxu0 %vm14009_vm1, %v18829_v44 }
 0x59b   :  { %12473 = vmatprep.subr.bf16.mxu0 %v18829_v44 }
 0x59f   :  { %12434 = vmatmul.mubr.msk.bf16.vlgmr.msra.gmra.mrb[108].mxu1 %vm2687_vm2, %v15715_v35 }
 0x5a0   :  { %12444 = vmatpush3.bf16.xpose.msra.mxu1 %v3244_v47  ;;  %12445 = vmatprep.mubr.msk.bf16.mxu1 %vm14009_vm1, %v18829_v44 }
 0x5a1   :  { %12464 = vmatmul.mubr.msk.bf16.vlgmr.msra.gmra.mrb[132].mxu0 %vm2687_vm2, %v15717_v29  ;;  %12455 = vmatprep.subr.bf16.mxu1 %v18829_v44 }
 0x5a2   :  { %12475 = vmatprep.mubr.msk.bf16.mxu0 %vm14009_vm1, %v18829_v44 }
 0x5a7   :  { %12446 = vmatmul.mubr.msk.bf16.vlgmr.msra.gmra.mrb[112].mxu1 %vm2687_vm2, %v15732_v49 }
 0x5a8   :  { %12456 = vmatpush3.bf16.xpose.msra.mxu1 %v3336_v56  ;;  %12457 = vmatprep.mubr.msk.bf16.mxu1 %vm14009_vm1, %v18829_v44 }
 0x5a9   :  { %12467 = vmatprep.subr.bf16.mxu1 %v18829_v44 }
 0x5af   :  { %12458 = vmatmul.mubr.msk.bf16.vlgmr.msra.gmra.mrb[116].mxu1 %vm2687_vm2, %v15743_v42 }
 0x5b0   :  { %12469 = vmatprep.mubr.msk.bf16.mxu1 %vm14009_vm1, %v18829_v44 }
 0x5dd   :  { %v12285_v14 = vpop.f32.mrb[48].mxu1  ;;  %v12321_v8 = vpop.f32.mrb[80].mxu0 }
 0x5de   :  { %v2174_v50 = vpop.f32.mrb[49].mxu1  ;;  %v2351_v17 = vpop.f32.mrb[81].mxu0  ;;  %v15758_v62 = vpack.c.bf16 %v12321_v8, %v12321_v8  ;;  %v15783_v39 = vpack.c.bf16 %v12285_v14, %v12285_v14 }
 0x5df   :  { %v15749_v46 = vpack.c.bf16 %v2351_v17, %v2351_v17  ;;  %v12286_v33 = vpop.f32.mrb[50].mxu1  ;;  %v12322_v55 = vpop.f32.mrb[82].mxu0  ;;  %v15761_v47 = vpack.c.bf16 %v2174_v50, %v2174_v50 }
 0x5e0   :  { %v2177_v10 = vpop.f32.mrb[51].mxu1  ;;  %v2354_v36 = vpop.f32.mrb[83].mxu0  ;;  %18973 = vst [vmem:[#allocation71_spill] sm:$0xff] %v15758_v62  ;;  %v15763_v56 = vpack.c.bf16 %v12322_v55, %v12322_v55  ;;  %18978 = vst [vmem:[#allocation76_spill] sm:$0xff] %v15783_v39  ;;  %v15787_v41 = vpack.c.bf16 %v12286_v33, %v12286_v33 }
 0x5e1   :  { %18971 = vst [vmem:[#allocation69_spill] sm:$0xff] %v15749_v46  ;;  %v15751_v63 = vpack.c.bf16 %v2354_v36, %v2354_v36  ;;  %v3428_v13 = vsel %vm2687_vm2, %v15749_v46, 0  ;;  %18974 = vst [vmem:[#allocation72_spill] sm:$0xff] %v15761_v47  ;;  %v15765_v17 = vpack.c.bf16 %v2177_v10, %v2177_v10  ;;  %v3520_v36 = vsel %vm2687_vm2, %v15758_v62, 0 }
 0x5e2   :  { %12468 = vmatpush3.bf16.xpose.msra.mxu1 %v3428_v13  ;;  %18975 = vst [vmem:[#allocation73_spill] sm:$0xff] %v15763_v56  ;;  %v3566_v50 = vsel %vm2687_vm2, %v15763_v56, 0  ;;  %18980 = vst [vmem:[#allocation78_spill] sm:$0xff] %v15787_v41 }
 0x5e3   :  { %18972 = vst [vmem:[#allocation70_spill] sm:$0xff] %v15751_v63  ;;  %v3474_v60 = vsel %vm2687_vm2, %v15751_v63, 0  ;;  %12479 = vmatprep.subr.bf16.mxu1 %v18829_v44  ;;  %18976 = vst [vmem:[#allocation74_spill] sm:$0xff] %v15765_v17 }
 0x5e4   :  { %12474 = vmatpush3.bf16.xpose.msra.mxu0 %v3474_v60 }
 0x5e5   :  { %12485 = vmatprep.subr.bf16.mxu0 %v18829_v44 }
 0x5e9   :  { %12470 = vmatmul.mubr.msk.bf16.vlgmr.msra.gmra.mrb[120].mxu1 %vm2687_vm2, %v15761_v47 }
 0x5ea   :  { %v12289_v13 = vpop.f32.mrb[52].mxu1  ;;  %v12325_v22 = vpop.f32.mrb[84].mxu0  ;;  %12480 = vmatpush3.bf16.xpose.msra.mxu1 %v3520_v36  ;;  %12481 = vmatprep.mubr.msk.bf16.mxu1 %vm14009_vm1, %v18829_v44 }
 0x5eb   :  { %v2190_v8 = vpop.f32.mrb[53].mxu1  ;;  %v2367_v60 = vpop.f32.mrb[85].mxu0  ;;  %12476 = vmatmul.mubr.msk.bf16.vlgmr.msra.gmra.mrb[136].mxu0 %vm2687_vm2, %v15765_v17  ;;  %12491 = vmatprep.subr.bf16.mxu1 %v18829_v44 }
 0x5ec   :  { %v12290_v55 = vpop.f32.mrb[54].mxu1  ;;  %v12326_v10 = vpop.f32.mrb[86].mxu0  ;;  %12486 = vmatpush3.bf16.xpose.msra.mxu0 %v3566_v50  ;;  %12487 = vmatprep.mubr.msk.bf16.mxu0 %vm14009_vm1, %v18829_v44  ;;  %v15780_v36 = vpack.c.bf16 %v2367_v60, %v2367_v60  ;;  %v15805_v33 = vpack.c.bf16 %v2190_v8, %v2190_v8 }
 0x5ed   :  { %v2193_v0 = vpop.f32.mrb[55].mxu1  ;;  %v2370_v3 = vpop.f32.mrb[87].mxu0  ;;  %12497 = vmatprep.subr.bf16.mxu0 %v18829_v44  ;;  %v15807_v60 = vpack.c.bf16 %v12326_v10, %v12326_v10 }
 0x5ee   :  { %18977 = vst [vmem:[#allocation75_spill] sm:$0xff] %v15780_v36  ;;  %v15785_v4 = vpack.c.bf16 %v2370_v3, %v2370_v3  ;;  %v3612_v50 = vsel %vm2687_vm2, %v15780_v36, 0  ;;  %v15802_v3 = vpack.c.bf16 %v12325_v22, %v12325_v22  ;;  %18982 = vst [vmem:[#allocation80_spill] sm:$0xff] %v15805_v33 }
 0x5ef   :  { %18983 = vst [vmem:[#allocation81_spill] sm:$0xff] %v15807_v60  ;;  %v3750_v22 = vsel %vm2687_vm2, %v15807_v60, 0 }
 0x5f0   :  { %18979 = vst [vmem:[#allocation77_spill] sm:$0xff] %v15785_v4  ;;  %v3658_v14 = vsel %vm2687_vm2, %v15785_v4, 0  ;;  %18981 = vst [vmem:[#allocation79_spill] sm:$0xff] %v15802_v3  ;;  %v3704_v21 = vsel %vm2687_vm2, %v15802_v3, 0 }
 0x5f1   :  { %12482 = vmatmul.mubr.msk.bf16.vlgmr.msra.gmra.mrb[124].mxu1 %vm2687_vm2, %v15783_v39 }
 0x5f2   :  { %12492 = vmatpush3.bf16.xpose.msra.mxu1 %v3612_v50  ;;  %12493 = vmatprep.mubr.msk.bf16.mxu1 %vm14009_vm1, %v18829_v44  ;;  %v15809_v50 = vpack.c.bf16 %v2193_v0, %v2193_v0  ;;  %v15825_v0 = vpack.c.bf16 %v12289_v13, %v12289_v13 }
 0x5f3   :  { %12488 = vmatmul.mubr.msk.bf16.vlgmr.msra.gmra.mrb[140].mxu0 %vm2687_vm2, %v15787_v41  ;;  %12503 = vmatprep.subr.bf16.mxu1 %v18829_v44 }
 0x5f4   :  { %12498 = vmatpush3.bf16.xpose.msra.mxu0 %v3658_v14  ;;  %12499 = vmatprep.mubr.msk.bf16.mxu0 %vm14009_vm1, %v18829_v44  ;;  %18984 = vst [vmem:[#allocation82_spill] sm:$0xff] %v15809_v50  ;;  %18985 = vst [vmem:[#allocation83_spill] sm:$0xff] %v15825_v0 }
 0x5f5   :  { %12509 = vmatprep.subr.bf16.mxu0 %v18829_v44 }
 0x5f9   :  { %12494 = vmatmul.mubr.msk.bf16.vlgmr.msra.gmra.mrb[128].mxu1 %vm2687_vm2, %v15805_v33 }
 0x5fa   :  { %12504 = vmatpush3.bf16.xpose.msra.mxu1 %v3704_v21  ;;  %12505 = vmatprep.mubr.msk.bf16.mxu1 %vm14009_vm1, %v18829_v44  ;;  %v15827_v21 = vpack.c.bf16 %v12290_v55, %v12290_v55 }
 0x5fb   :  { %12500 = vmatmul.mubr.msk.bf16.vlgmr.msra.gmra.mrb[144].mxu0 %vm2687_vm2, %v15809_v50  ;;  %12515 = vmatprep.subr.bf16.mxu1 %v18829_v44  ;;  %v18997_v50 = vmov 0.0  }
 0x5fc   :  { %12510 = vmatpush3.bf16.xpose.msra.mxu0 %v3750_v22  ;;  %12511 = vmatprep.mubr.msk.bf16.mxu0 %vm14009_vm1, %v18829_v44  ;;  %18986 = vst [vmem:[#allocation84_spill] sm:$0xff] %v15827_v21 }
 0x5fd   :  { %12521 = vmatprep.subr.bf16.mxu0 %v18829_v44 }
 0x601   :  { %12506 = vmatmul.mubr.msk.bf16.vlgmr.msra.gmra.mrb[132].mxu1 %vm2687_vm2, %v15825_v0 }
 0x602   :  { %v12293_v8 = vpop.f32.mrb[56].mxu1  ;;  %v12329_v10 = vpop.f32.mrb[88].mxu0  ;;  %12517 = vmatprep.mubr.msk.bf16.mxu1 %vm14009_vm1, %v18829_v44 }
 0x603   :  { %v2206_v14 = vpop.f32.mrb[57].mxu1  ;;  %v2383_v19 = vpop.f32.mrb[89].mxu0  ;;  %12512 = vmatmul.mubr.msk.bf16.vlgmr.msra.gmra.mrb[148].mxu0 %vm2687_vm2, %v15827_v21 }
 0x604   :  { %v15835_v22 = vpack.c.bf16 %v2383_v19, %v2383_v19  ;;  %v12294_v2 = vpop.f32.mrb[58].mxu1  ;;  %v12330_v13 = vpop.f32.mrb[90].mxu0  ;;  %12523 = vmatprep.mubr.msk.bf16.mxu0 %vm14009_vm1, %v18829_v44  ;;  %v15846_v19 = vpack.c.bf16 %v12329_v10, %v12329_v10  ;;  %v15849_v11 = vpack.c.bf16 %v2206_v14, %v2206_v14 }
 0x605   :  { %v2209_v55 = vpop.f32.mrb[59].mxu1  ;;  %v2386_v23 = vpop.f32.mrb[91].mxu0  ;;  %v15851_v53 = vpack.c.bf16 %v12330_v13, %v12330_v13  ;;  %v15873_v60 = vpack.c.bf16 %v12294_v2, %v12294_v2 }
 0x606   :  { %18987 = vst [vmem:[#allocation85_spill] sm:$0xff] %v15835_v22  ;;  %v15839_v48 = vpack.c.bf16 %v2386_v23, %v2386_v23  ;;  %v3796_v54 = vsel %vm2687_vm2, %v15835_v22, 0  ;;  %18989 = vst [vmem:[#allocation87_spill] sm:$0xff] %v15846_v19  ;;  %v15853_v23 = vpack.c.bf16 %v2209_v55, %v2209_v55 }
 0x607   :  { %12516 = vmatpush3.bf16.xpose.msra.mxu1 %v3796_v54  ;;  %18990 = vst [vmem:[#allocation88_spill] sm:$0xff] %v15849_v11  ;;  %18991 = vst [vmem:[#allocation89_spill] sm:$0xff] %v15851_v53  ;;  %v3888_v54 = vsel %vm2687_vm2, %v15846_v19, 0 }
 0x608   :  { %18988 = vst [vmem:[#allocation86_spill] sm:$0xff] %v15839_v48  ;;  %v3842_v7 = vsel %vm2687_vm2, %v15839_v48, 0  ;;  %12527 = vmatprep.subr.bf16.mxu1 %v18829_v44  ;;  %18992 = vst [vmem:[#allocation90_spill] sm:$0xff] %v15853_v23 }
 0x609   :  { %12522 = vmatpush3.bf16.xpose.msra.mxu0 %v3842_v7  ;;  %v3934_v7 = vsel %vm2687_vm2, %v15851_v53, 0  ;;  %18995 = vst [vmem:[#allocation93_spill] sm:$0xff] %v15873_v60 }
 0x60a   :  { %12533 = vmatprep.subr.bf16.mxu0 %v18829_v44 }
 0x60e   :  { %12518 = vmatmul.mubr.msk.bf16.vlgmr.msra.gmra.mrb[136].mxu1 %vm2687_vm2, %v15849_v11 }
 0x60f   :  { %12528 = vmatpush3.bf16.xpose.msra.mxu1 %v3888_v54  ;;  %12529 = vmatprep.mubr.msk.bf16.mxu1 %vm14009_vm1, %v18829_v44  ;;  %v15869_v54 = vpack.c.bf16 %v12293_v8, %v12293_v8 }
 0x610   :  { %12524 = vmatmul.mubr.msk.bf16.vlgmr.msra.gmra.mrb[152].mxu0 %vm2687_vm2, %v15853_v23  ;;  %12539 = vmatprep.subr.bf16.mxu1 %v18829_v44 }
 0x611   :  { %12534 = vmatpush3.bf16.xpose.msra.mxu0 %v3934_v7  ;;  %12535 = vmatprep.mubr.msk.bf16.mxu0 %vm14009_vm1, %v18829_v44  ;;  %18993 = vst [vmem:[#allocation91_spill] sm:$0xff] %v15869_v54 }
 0x612   :  { %v12297_v10 = vpop.f32.mrb[60].mxu1  ;;  %v12333_v14 = vpop.f32.mrb[92].mxu0  ;;  %12545 = vmatprep.subr.bf16.mxu0 %v18829_v44 }
 0x613   :  { %v2222_v13 = vpop.f32.mrb[61].mxu1  ;;  %v2399_v55 = vpop.f32.mrb[93].mxu0 }
 0x614   :  { %v15871_v38 = vpack.c.bf16 %v2399_v55, %v2399_v55  ;;  %v12298_v23 = vpop.f32.mrb[62].mxu1  ;;  %v12334_v48 = vpop.f32.mrb[94].mxu0  ;;  %v15895_v55 = vpack.c.bf16 %v2222_v13, %v2222_v13 }
 0x615   :  { %v2225_v21 = vpop.f32.mrb[63].mxu1  ;;  %v2402_v53 = vpop.f32.mrb[95].mxu0  ;;  %v15897_v4 = vpack.c.bf16 %v12334_v48, %v12334_v48 }
 0x616   :  { %18994 = vst [vmem:[#allocation92_spill] sm:$0xff] %v15871_v38  ;;  %v15875_v7 = vpack.c.bf16 %v2402_v53, %v2402_v53  ;;  %12530 = vmatmul.mubr.msk.bf16.vlgmr.msra.gmra.mrb[140].mxu1 %vm2687_vm2, %v15869_v54  ;;  %v3980_v44 = vsel %vm2687_vm2, %v15871_v38, 0  ;;  %v15890_v53 = vpack.c.bf16 %v12333_v14, %v12333_v14  ;;  %18999 = vst [vmem:[#allocation96_spill] sm:$0xff] %v15895_v55 }
 0x617   :  { %12540 = vmatpush3.bf16.xpose.msra.mxu1 %v3980_v44  ;;  %12541 = vmatprep.mubr.msk.bf16.mxu1 %vm14009_vm1, %v18997_v50  ;;  %19000 = vst [vmem:[#allocation97_spill] sm:$0xff] %v15897_v4  ;;  %v15901_v41 = vpack.c.bf16 %v2225_v21, %v2225_v21  ;;  %v4118_v48 = vsel %vm2687_vm2, %v15897_v4, 0 }
 0x618   :  { %18996 = vst [vmem:[#allocation94_spill] sm:$0xff] %v15875_v7  ;;  %12536 = vmatmul.mubr.msk.bf16.vlgmr.msra.gmra.mrb[156].mxu0 %vm2687_vm2, %v15873_v60  ;;  %v4026_v8 = vsel %vm2687_vm2, %v15875_v7, 0  ;;  %12551 = vmatprep.subr.bf16.mxu1 %v18997_v50  ;;  %18998 = vst [vmem:[#allocation95_spill] sm:$0xff] %v15890_v53  ;;  %v4072_v14 = vsel %vm2687_vm2, %v15890_v53, 0 }
 0x619   :  { %12546 = vmatpush3.bf16.xpose.msra.mxu0 %v4026_v8  ;;  %12547 = vmatprep.mubr.msk.bf16.mxu0 %vm14009_vm1, %v18997_v50  ;;  %19001 = vst [vmem:[#allocation98_spill] sm:$0xff] %v15901_v41 }
 0x61a   :  { %v15892_v2 = vpop.f32.mrb[64].mxu1  ;;  %12557 = vmatprep.subr.bf16.mxu0 %v18997_v50 }
 0x61b   :  { %v2464_v44 = vpop.f32.mrb[65].mxu1 }
 0x61c   :  { %v15899_v60 = vpop.f32.mrb[66].mxu1  ;;  %v15916_v21 = vpack.c.bf16 %v2464_v44, %v2464_v44 }
 0x61d   :  { %v2467_v7 = vpop.f32.mrb[67].mxu1 }
 0x61e   :  { %12542 = vmatmul.mubr.msk.bf16.vlgmr.msra.gmra.mrb[144].mxu1 %vm2687_vm2, %v15895_v55  ;;  %19002 = vst [vmem:[#allocation99_spill] sm:$0xff] %v15916_v21  ;;  %v4582_v44 = vsel %vm4580_vm3, %v15916_v21, 0 }
 0x61f   :  { %12552 = vmatpush3.bf16.xpose.msra.mxu1 %v4072_v14  ;;  %12553 = vmatprep.mubr.msk.bf16.mxu1 %vm14009_vm1, %v18997_v50  ;;  %v15923_v14 = vpack.c.bf16 %v12297_v10, %v12297_v10 }
 0x620   :  { %12548 = vmatmul.mubr.msk.bf16.vlgmr.msra.gmra.mrb[160].mxu0 %vm2687_vm2, %v15901_v41  ;;  %12563 = vmatprep.subr.bf16.mxu1 %v18997_v50  ;;  %v15925_v41 = vpack.c.bf16 %v2467_v7, %v2467_v7 }
 0x621   :  { %12558 = vmatpush3.bf16.xpose.msra.mxu0 %v4118_v48  ;;  %12559 = vmatprep.mubr.msk.bf16.mxu0 %vm14009_vm1, %v18997_v50  ;;  %19003 = vst [vmem:[#allocation100_spill] sm:$0xff] %v15923_v14  ;;  %v15931_v48 = vpack.c.bf16 %v12298_v23, %v12298_v23 }
 0x622   :  { %v15918_v13 = vpop.f32.mrb[68].mxu1  ;;  %12569 = vmatprep.subr.bf16.mxu0 %v18997_v50  ;;  %19004 = vst [vmem:[#allocation101_spill] sm:$0xff] %v15925_v41  ;;  %v4628_v10 = vsel %vm4580_vm3, %v15925_v41, 0 }
 0x623   :  { %v15921_v8 = vpop.f32.mrb[69].mxu1  ;;  %19005 = vst [vmem:[#allocation102_spill] sm:$0xff] %v15931_v48 }
 0x624   :  { %v15927_v4 = vpop.f32.mrb[70].mxu1 }
 0x625   :  { %v15929_v56 = vpop.f32.mrb[71].mxu1 }
 0x626   :  { %12554 = vmatmul.mubr.msk.bf16.vlgmr.msra.gmra.mrb[148].mxu1 %vm2687_vm2, %v15923_v14 }
 0x627   :  { %12564 = vmatpush3.bf16.msra.mxu1 %v4582_v44  ;;  %12565 = vmatprep.mubr.msk.bf16.mxu1 %vm14009_vm1, %v18997_v50 }
 0x628   :  { %12560 = vmatmul.mubr.msk.bf16.vlgmr.msra.gmra.mrb[164].mxu0 %vm2687_vm2, %v15931_v48  ;;  %12575 = vmatprep.subr.bf16.mxu1 %v18997_v50 }
 0x629   :  { %12570 = vmatpush3.bf16.msra.mxu0 %v4628_v10  ;;  %12571 = vmatprep.mubr.msk.bf16.mxu0 %vm14009_vm1, %v18997_v50 }
 0x62a   :  { %v15946_v23 = vpop.f32.mrb[72].mxu1  ;;  %12581 = vmatprep.subr.bf16.mxu0 %v18997_v50 }
 0x62b   :  { %v15949_v7 = vpop.f32.mrb[73].mxu1  ;;  %v2728_v44 = vpop.f32.mrb[96].mxu0 }
 0x62c   :  { %v15951_v17 = vmul.f32 0.25, %v2728_v44  ;;  %v15953_v48 = vpop.f32.mrb[74].mxu1  ;;  %v12375_v63 = vpop.f32.mrb[97].mxu0 }
 0x62d   :  { %v15955_v41 = vpop.f32.mrb[75].mxu1  ;;  %v2731_v29 = vpop.f32.mrb[98].mxu0 }
 0x62e   :  { %v12376_v10 = vpop.f32.mrb[99].mxu0  ;;  %v4193_v18 = vsel %vm4192_vm4, %v15951_v17, -inf }
 0x62f   :  { %4194 = vmax.xlane.f32.xlu0 %v4193_v18 }
 0x632   :  { %v15959_v21 = vpop.f32.mrb[76].mxu1 }
 0x633   :  { %v15961_v61 = vpop.f32.mrb[77].mxu1  ;;  %v2774_v14 = vpop.f32.mrb[100].mxu0 }
 0x634   :  { %v15963_v59 = vmul.f32 0.25, %v2774_v14  ;;  %v15965_v44 = vpop.f32.mrb[78].mxu1  ;;  %v12381_v53 = vpop.f32.mrb[101].mxu0 }
 0x635   :  { %v15967_v5 = vpop.f32.mrb[79].mxu1  ;;  %v2777_v63 = vpop.f32.mrb[102].mxu0 }
 0x636   :  { %v12382_v55 = vpop.f32.mrb[103].mxu0  ;;  %v4196_v29 = vsel %vm4192_vm4, %v15963_v59, -inf }
 0x637   :  { %4197 = vmax.xlane.f32.xlu1 %v4196_v29 }
 0x63a   :  { %v15971_v10 = vpop.f32.mrb[80].mxu1 }
 0x63b   :  { %19006 = vst [vmem:[#allocation103_spill] sm:$0xff] %v15971_v10  ;;  %v15973_v18 = vpop.f32.mrb[81].mxu1  ;;  %v2820_v15 = vpop.f32.mrb[104].mxu0 }
 0x63c   :  { %v15975_v38 = vmul.f32 0.25, %v2820_v15  ;;  %v15977_v14 = vpop.f32.mrb[82].mxu1  ;;  %v12387_v45 = vpop.f32.mrb[105].mxu0 }
 0x63d   :  { %19007 = vst [vmem:[#allocation104_spill] sm:$0xff] %v15977_v14  ;;  %v15979_v54 = vpop.f32.mrb[83].mxu1  ;;  %v2823_v53 = vpop.f32.mrb[106].mxu0 }
 0x63e   :  { %19008 = vst [vmem:[#allocation105_spill] sm:$0xff] %v15979_v54  ;;  %v12388_v25 = vpop.f32.mrb[107].mxu0  ;;  %v4199_v55 = vsel %vm4192_vm4, %v15975_v38, -inf }
 0x63f   :  { %4200 = vmax.xlane.f32.xlu0 %v4199_v55 }
 0x642   :  { %v15983_v63 = vpop.f32.mrb[84].mxu1 }
 0x643   :  { %19009 = vst [vmem:[#allocation106_spill] sm:$0xff] %v15983_v63  ;;  %v15985_v29 = vpop.f32.mrb[85].mxu1 }
 0x644   :  { %19010 = vst [vmem:[#allocation107_spill] sm:$0xff] %v15985_v29  ;;  %v2866_v19 = vpop.f32.mrb[108].mxu0  ;;  %v15987_v12 = vpop.f32.mrb[86].mxu1 }
 0x645   :  { %19011 = vst [vmem:[#allocation108_spill] sm:$0xff] %v15987_v12  ;;  %v15989_v15 = vmul.f32 0.25, %v2866_v19  ;;  %v12393_v11 = vpop.f32.mrb[109].mxu0  ;;  %v15991_v32 = vpop.f32.mrb[87].mxu1 }
 0x646   :  { %19012 = vst [vmem:[#allocation109_spill] sm:$0xff] %v15991_v32  ;;  %v2869_v45 = vpop.f32.mrb[110].mxu0 }
 0x647   :  { %v12394_v22 = vpop.f32.mrb[111].mxu0  ;;  %v4202_v25 = vsel %vm4192_vm4, %v15989_v15, -inf }
 0x648   :  { %4203 = vmax.xlane.f32.xlu1 %v4202_v25 }
 0x64a   :  { %v15995_v53 = vpop.f32.mrb[88].mxu1 }
 0x64b   :  { %19013 = vst [vmem:[#allocation110_spill] sm:$0xff] %v15995_v53  ;;  %v15997_v55 = vpop.f32.mrb[89].mxu1 }
 0x64c   :  { %19014 = vst [vmem:[#allocation111_spill] sm:$0xff] %v15997_v55  ;;  %v2958_v43 = vpop.f32.mrb[112].mxu0  ;;  %v15999_v0 = vpop.f32.mrb[90].mxu1 }
 0x64d   :  { %19015 = vst [vmem:[#allocation112_spill] sm:$0xff] %v15999_v0  ;;  %v16001_v6 = vmul.f32 0.25, %v2958_v43  ;;  %v12405_v19 = vpop.f32.mrb[113].mxu0  ;;  %v16003_v3 = vpop.f32.mrb[91].mxu1 }
 0x64e   :  { %19016 = vst [vmem:[#allocation113_spill] sm:$0xff] %v16003_v3  ;;  %v2961_v11 = vpop.f32.mrb[114].mxu0 }
 0x64f   :  { %v12406_v34 = vpop.f32.mrb[115].mxu0  ;;  %v4208_v22 = vsel %vm4192_vm4, %v16001_v6, -inf }
 0x650   :  { %4209 = vmax.xlane.f32.xlu1 %v4208_v22 }
 0x652   :  { %v16007_v45 = vpop.f32.mrb[92].mxu1 }
 0x653   :  { %19017 = vst [vmem:[#allocation114_spill] sm:$0xff] %v16007_v45  ;;  %v16009_v25 = vpop.f32.mrb[93].mxu1 }
 0x654   :  { %19018 = vst [vmem:[#allocation115_spill] sm:$0xff] %v16009_v25  ;;  %v3050_v53 = vpop.f32.mrb[116].mxu0  ;;  %v16011_v55 = vpop.f32.mrb[94].mxu1 }
 0x655   :  { %19019 = vst [vmem:[#allocation116_spill] sm:$0xff] %v16011_v55  ;;  %v16013_v33 = vmul.f32 0.25, %v3050_v53  ;;  %v12417_v43 = vpop.f32.mrb[117].mxu0  ;;  %v16015_v0 = vpop.f32.mrb[95].mxu1 }
 0x656   :  { %19020 = vst [vmem:[#allocation117_spill] sm:$0xff] %v16015_v0  ;;  %v3053_v19 = vpop.f32.mrb[118].mxu0 }
 0x657   :  { %v12418_v3 = vpop.f32.mrb[119].mxu0  ;;  %v4214_v34 = vsel %vm4192_vm4, %v16013_v33, -inf }
 0x658   :  { %4215 = vmax.xlane.f32.xlu1 %v4214_v34 }
 0x65a   :  { %v2912_v11 = vpop.f32.mrb[96].mxu1 }
 0x65b   :  { %v16019_v22 = vmul.f32 0.25, %v2912_v11  ;;  %v12399_v45 = vpop.f32.mrb[97].mxu1 }
 0x65c   :  { %v3142_v51 = vpop.f32.mrb[120].mxu0  ;;  %v2915_v25 = vpop.f32.mrb[98].mxu1 }
 0x65d   :  { %v16021_v12 = vmul.f32 0.25, %v3142_v51  ;;  %v12429_v55 = vpop.f32.mrb[121].mxu0  ;;  %v12400_v53 = vpop.f32.mrb[99].mxu1  ;;  %v4205_v43 = vsel %vm4192_vm4, %v16019_v22, -inf }
 0x65e   :  { %v3145_v0 = vpop.f32.mrb[122].mxu0  ;;  %4206 = vmax.xlane.f32.xlu0 %v4205_v43 }
 0x65f   :  { %v12430_v3 = vpop.f32.mrb[123].mxu0  ;;  %v4220_v19 = vsel %vm4192_vm4, %v16021_v12, -inf }
 0x660   :  { %4221 = vmax.xlane.f32.xlu1 %v4220_v19 }
 0x662   :  { %v3004_v34 = vpop.f32.mrb[100].mxu1 }
 0x663   :  { %v16027_v11 = vmul.f32 0.25, %v3004_v34  ;;  %v12411_v45 = vpop.f32.mrb[101].mxu1 }
 0x664   :  { %v3234_v36 = vpop.f32.mrb[124].mxu0  ;;  %v3007_v25 = vpop.f32.mrb[102].mxu1 }
 0x665   :  { %v16029_v51 = vmul.f32 0.25, %v3234_v36  ;;  %v12441_v55 = vpop.f32.mrb[125].mxu0  ;;  %v12412_v53 = vpop.f32.mrb[103].mxu1  ;;  %v4211_v40 = vsel %vm4192_vm4, %v16027_v11, -inf }
 0x666   :  { %v3237_v0 = vpop.f32.mrb[126].mxu0  ;;  %4212 = vmax.xlane.f32.xlu0 %v4211_v40 }
 0x667   :  { %v12442_v43 = vpop.f32.mrb[127].mxu0  ;;  %v4226_v3 = vsel %vm4192_vm4, %v16029_v51, -inf }
 0x668   :  { %4227 = vmax.xlane.f32.xlu1 %v4226_v3 }
 0x66a   :  { %v3096_v19 = vpop.f32.mrb[104].mxu1 }
 0x66b   :  { %v16035_v34 = vmul.f32 0.25, %v3096_v19  ;;  %v12423_v45 = vpop.f32.mrb[105].mxu1 }
 0x66c   :  { %v3326_v63 = vpop.f32.mrb[128].mxu0  ;;  %v3099_v25 = vpop.f32.mrb[106].mxu1 }
 0x66d   :  { %v16037_v36 = vmul.f32 0.25, %v3326_v63  ;;  %v12453_v55 = vpop.f32.mrb[129].mxu0  ;;  %v12424_v53 = vpop.f32.mrb[107].mxu1  ;;  %v4217_v39 = vsel %vm4192_vm4, %v16035_v34, -inf }
 0x66e   :  { %v3329_v0 = vpop.f32.mrb[130].mxu0  ;;  %4218 = vmax.xlane.f32.xlu0 %v4217_v39 }
 0x66f   :  { %v12454_v40 = vpop.f32.mrb[131].mxu0  ;;  %v4232_v43 = vsel %vm4192_vm4, %v16037_v36, -inf }
 0x670   :  { %4233 = vmax.xlane.f32.xlu1 %v4232_v43 }
 0x672   :  { %v3188_v3 = vpop.f32.mrb[108].mxu1 }
 0x673   :  { %v16043_v19 = vmul.f32 0.25, %v3188_v3  ;;  %v12435_v45 = vpop.f32.mrb[109].mxu1 }
 0x674   :  { %v3418_v32 = vpop.f32.mrb[132].mxu0  ;;  %v3191_v25 = vpop.f32.mrb[110].mxu1 }
 0x675   :  { %v16045_v63 = vmul.f32 0.25, %v3418_v32  ;;  %v12465_v55 = vpop.f32.mrb[133].mxu0  ;;  %v12436_v53 = vpop.f32.mrb[111].mxu1  ;;  %v4223_v62 = vsel %vm4192_vm4, %v16043_v19, -inf }
 0x676   :  { %v3421_v0 = vpop.f32.mrb[134].mxu0  ;;  %4224 = vmax.xlane.f32.xlu0 %v4223_v62 }
 0x677   :  { %v12466_v39 = vpop.f32.mrb[135].mxu0  ;;  %v4238_v40 = vsel %vm4192_vm4, %v16045_v63, -inf }
 0x678   :  { %4239 = vmax.xlane.f32.xlu1 %v4238_v40 }
 0x67a   :  { %v3280_v43 = vpop.f32.mrb[112].mxu1 }
 0x67b   :  { %v16051_v3 = vmul.f32 0.25, %v3280_v43  ;;  %v12447_v45 = vpop.f32.mrb[113].mxu1 }
 0x67c   :  { %v3283_v29 = vpop.f32.mrb[114].mxu1 }
 0x67d   :  { %v12448_v25 = vpop.f32.mrb[115].mxu1  ;;  %v4229_v32 = vsel %vm4192_vm4, %v16051_v3, -inf }
 0x67e   :  { %4230 = vmax.xlane.f32.xlu0 %v4229_v32 }
 0x682   :  { %v3372_v55 = vpop.f32.mrb[116].mxu1 }
 0x683   :  { %v16055_v53 = vmul.f32 0.25, %v3372_v55  ;;  %v12459_v0 = vpop.f32.mrb[117].mxu1 }
 0x684   :  { %v3375_v62 = vpop.f32.mrb[118].mxu1 }
 0x685   :  { %v12460_v39 = vpop.f32.mrb[119].mxu1  ;;  %v4235_v47 = vsel %vm4192_vm4, %v16055_v53, -inf }
 0x686   :  { %4236 = vmax.xlane.f32.xlu0 %v4235_v47 }
 0x6bc   :  { %v3464_v40 = vpop.f32.mrb[120].mxu1  ;;  %v4195_v47 = vpop.xlane.xlu0 %4194 }
 0x6bd   :  { %v16059_v43 = vmul.f32 0.25, %v3464_v40  ;;  %v12471_v45 = vpop.f32.mrb[121].mxu1 }
 0x6be   :  { %v3467_v29 = vpop.f32.mrb[122].mxu1  ;;  %v3510_v25 = vpop.f32.mrb[136].mxu0 }
 0x6bf   :  { %v16061_v14 = vmul.f32 0.25, %v3510_v25  ;;  %v12472_v46 = vpop.f32.mrb[123].mxu1  ;;  %v12477_v32 = vpop.f32.mrb[137].mxu0  ;;  %v4241_v55 = vsel %vm4192_vm4, %v16059_v43, -inf  ;;  %v4289_v29 = vsub.f32 %v15951_v17, %v4195_v47 }
 0x6c0   :  { %v3513_v0 = vpop.f32.mrb[138].mxu0  ;;  %4242 = vmax.xlane.f32.xlu0 %v4241_v55 }
 0x6c1   :  { %v12478_v62 = vpop.f32.mrb[139].mxu0  ;;  %v4244_v39 = vsel %vm4192_vm4, %v16061_v14, -inf }
 0x6c2   :  { %4245 = vmax.xlane.f32.xlu1 %v4244_v39 }
 0x6c4   :  { %v3556_v40 = vpop.f32.mrb[124].mxu1 }
 0x6c5   :  { %v16067_v10 = vmul.f32 0.25, %v3556_v40  ;;  %v12483_v45 = vpop.f32.mrb[125].mxu1  ;;  %v4321_v40 = vmul.f32 1.442695, %v4289_v29 }
 0x6c6   :  { %v3559_v25 = vpop.f32.mrb[126].mxu1  ;;  %v3602_v46 = vpop.f32.mrb[140].mxu0 }
 0x6c7   :  { %v16070_v32 = vmul.f32 0.25, %v3602_v46  ;;  %v12484_v42 = vpop.f32.mrb[127].mxu1  ;;  %v12489_v20 = vpop.f32.mrb[141].mxu0  ;;  %v4247_v55 = vsel %vm4192_vm4, %v16067_v10, -inf  ;;  %13540 = vpow2.f32 %v4321_v40 }
 0x6c8   :  { %v3605_v0 = vpop.f32.mrb[142].mxu0  ;;  %4248 = vmax.xlane.f32.xlu0 %v4247_v55 }
 0x6c9   :  { %v12490_v62 = vpop.f32.mrb[143].mxu0  ;;  %v4250_v39 = vsel %vm4192_vm4, %v16070_v32, -inf }
 0x6ca   :  { %4251 = vmax.xlane.f32.xlu1 %v4250_v39  ;;  %v4198_v39 = vpop.xlane.xlu1 %4197 }
 0x6cc   :  { %v3648_v45 = vpop.f32.mrb[128].mxu1  ;;  %v4201_v0 = vpop.xlane.xlu0 %4200 }
 0x6cd   :  { %v16076_v49 = vmul.f32 0.25, %v3648_v45  ;;  %v12495_v17 = vpop.f32.mrb[129].mxu1  ;;  %v4291_v40 = vsub.f32 %v15975_v38, %v4201_v0 }
 0x6ce   :  { %v3651_v47 = vpop.f32.mrb[130].mxu1  ;;  %v3694_v25 = vpop.f32.mrb[144].mxu0  ;;  %v4290_v17 = vsub.f32 %v15963_v59, %v4198_v39 }
 0x6cf   :  { %v16078_v42 = vmul.f32 0.25, %v3694_v25  ;;  %v12496_v20 = vpop.f32.mrb[131].mxu1  ;;  %v12501_v46 = vpop.f32.mrb[145].mxu0  ;;  %v4253_v55 = vsel %vm4192_vm4, %v16076_v49, -inf  ;;  %v4325_v35 = vmul.f32 1.442695, %v4291_v40 }
 0x6d0   :  { %v3697_v62 = vpop.f32.mrb[146].mxu0  ;;  %4254 = vmax.xlane.f32.xlu0 %v4253_v55  ;;  %v4323_v38 = vmul.f32 1.442695, %v4290_v17 }
 0x6d1   :  { %v12502_v52 = vpop.f32.mrb[147].mxu0  ;;  %v4256_v29 = vsel %vm4192_vm4, %v16078_v42, -inf  ;;  %v16092_v1 = vpop.eup %13540  ;;  %13542 = vpow2.f32 %v4325_v35 }
 0x6d2   :  { %4257 = vmax.xlane.f32.xlu1 %v4256_v29  ;;  %v4385_v39 = vsel %vm4192_vm4, %v16092_v1, 0.0  ;;  %13544 = vpow2.f32 %v4323_v38 }
 0x6d4   :  { %v3740_v45 = vpop.f32.mrb[132].mxu1 }
 0x6d5   :  { %v16086_v47 = vmul.f32 0.25, %v3740_v45  ;;  %v12507_v25 = vpop.f32.mrb[133].mxu1  ;;  %v4204_v45 = vpop.xlane.xlu1 %4203 }
 0x6d6   :  { %v3743_v20 = vpop.f32.mrb[134].mxu1  ;;  %v3786_v46 = vpop.f32.mrb[148].mxu0 }
 0x6d7   :  { %v16088_v26 = vmul.f32 0.25, %v3786_v46  ;;  %v12508_v55 = vpop.f32.mrb[135].mxu1  ;;  %v12513_v52 = vpop.f32.mrb[149].mxu0  ;;  %v4259_v62 = vsel %vm4192_vm4, %v16086_v47, -inf }
 0x6d8   :  { %v3789_v29 = vpop.f32.mrb[150].mxu0  ;;  %4260 = vmax.xlane.f32.xlu0 %v4259_v62 }
 0x6d9   :  { %v12514_v0 = vpop.f32.mrb[151].mxu0  ;;  %v4262_v59 = vsel %vm4192_vm4, %v16088_v26, -inf }
 0x6da   :  { %4263 = vmax.xlane.f32.xlu1 %v4262_v59  ;;  %v4292_v0 = vsub.f32 %v15989_v15, %v4204_v45 }
 0x6db   :  { %v16104_v35 = vpop.eup %13542 }
 0x6dc   :  { %4386 = vadd.xlane.f32.xlu0 %v4385_v39 }
 0x6e1   :  { %v3832_v40 = vpop.f32.mrb[136].mxu1 }
 0x6e2   :  { %v16098_v25 = vmul.f32 0.25, %v3832_v40  ;;  %v12519_v20 = vpop.f32.mrb[137].mxu1  ;;  %v16109_v40 = vpop.eup %13544 }
 0x6e3   :  { %v3835_v46 = vpop.f32.mrb[138].mxu1  ;;  %v3878_v55 = vpop.f32.mrb[152].mxu0  ;;  %v4391_v20 = vsel %vm4192_vm4, %v16104_v35, 0.0  ;;  %v4388_v15 = vsel %vm4192_vm4, %v16109_v40, 0.0 }
 0x6e4   :  { %v16100_v52 = vmul.f32 0.25, %v3878_v55  ;;  %v12520_v17 = vpop.f32.mrb[139].mxu1  ;;  %v12525_v62 = vpop.f32.mrb[153].mxu0  ;;  %v4265_v29 = vsel %vm4192_vm4, %v16098_v25, -inf  ;;  %v4327_v46 = vmul.f32 1.442695, %v4292_v0 }
 0x6e5   :  { %v3881_v59 = vpop.f32.mrb[154].mxu0  ;;  %4266 = vmax.xlane.f32.xlu0 %v4265_v29  ;;  %v4210_v17 = vpop.xlane.xlu1 %4209 }
 0x6e6   :  { %v12526_v38 = vpop.f32.mrb[155].mxu0  ;;  %v4268_v39 = vsel %vm4192_vm4, %v16100_v52, -inf  ;;  %13546 = vpow2.f32 %v4327_v46 }
 0x6e7   :  { %4269 = vmax.xlane.f32.xlu1 %v4268_v39 }
 0x6e9   :  { %4392 = vadd.xlane.f32.xlu0 %v4391_v20  ;;  %v3924_v55 = vpop.f32.mrb[140].mxu1  ;;  %v4294_v20 = vsub.f32 %v16001_v6, %v4210_v17 }
 0x6ea   :  { %v16113_v62 = vmul.f32 0.25, %v3924_v55  ;;  %v12531_v30 = vpop.f32.mrb[141].mxu1 }
 0x6eb   :  { %4389 = vadd.xlane.f32.xlu1 %v4388_v15  ;;  %v3970_v45 = vpop.f32.mrb[156].mxu0  ;;  %v4207_v29 = vpop.xlane.xlu0 %4206 }
 0x6ec   :  { %v16117_v59 = vmul.f32 0.25, %v3970_v45  ;;  %v4293_v38 = vsub.f32 %v16019_v22, %v4207_v29  ;;  %v3927_v39 = vpop.f32.mrb[142].mxu1  ;;  %v12537_v27 = vpop.f32.mrb[157].mxu0  ;;  %v4271_v0 = vsel %vm4192_vm4, %v16113_v62, -inf  ;;  %v4331_v22 = vmul.f32 1.442695, %v4294_v20 }
 0x6ed   :  { %v12532_v55 = vpop.f32.mrb[143].mxu1  ;;  %4272 = vmax.xlane.f32.xlu0 %v4271_v0  ;;  %v4216_v30 = vpop.xlane.xlu1 %4215 }
 0x6ee   :  { %v4329_v37 = vmul.f32 1.442695, %v4293_v38  ;;  %v3973_v9 = vpop.f32.mrb[158].mxu0  ;;  %v4274_v15 = vsel %vm4192_vm4, %v16117_v59, -inf  ;;  %v4296_v27 = vsub.f32 %v16013_v33, %v4216_v30 }
 0x6ef   :  { %v12538_v45 = vpop.f32.mrb[159].mxu0  ;;  %4275 = vmax.xlane.f32.xlu1 %v4274_v15 }
 0x6f0   :  { %13548 = vpow2.f32 %v4329_v37  ;;  %v4335_v0 = vmul.f32 1.442695, %v4296_v27 }
 0x6f1   :  { %v4016_v29 = vpop.f32.mrb[144].mxu1  ;;  %v4222_v39 = vpop.xlane.xlu1 %4221  ;;  %13550 = vpow2.f32 %v4331_v22 }
 0x6f2   :  { %v12543_v57 = vpop.f32.mrb[145].mxu1  ;;  %v4298_v55 = vsub.f32 %v16021_v12, %v4222_v39 }
 0x6f3   :  { %v4062_v46 = vpop.f32.mrb[160].mxu0  ;;  %v4213_v24 = vpop.xlane.xlu0 %4212 }
 0x6f4   :  { %v16126_v6 = vmul.f32 0.25, %v4062_v46  ;;  %v4295_v17 = vsub.f32 %v16027_v11, %v4213_v24  ;;  %v4019_v38 = vpop.f32.mrb[146].mxu1  ;;  %v12549_v9 = vpop.f32.mrb[161].mxu0  ;;  %v4339_v24 = vmul.f32 1.442695, %v4298_v55  ;;  %v16139_v46 = vmul.f32 0.25, %v4016_v29 }
 0x6f5   :  { %v12544_v15 = vpop.f32.mrb[147].mxu1  ;;  %v4228_v20 = vpop.xlane.xlu1 %4227 }
 0x6f6   :  { %v4333_v37 = vmul.f32 1.442695, %v4295_v17  ;;  %v4065_v45 = vpop.f32.mrb[162].mxu0  ;;  %v4280_v33 = vsel %vm4192_vm4, %v16126_v6, -inf  ;;  %v16132_v57 = vpop.eup %13546  ;;  %v4300_v11 = vsub.f32 %v16029_v51, %v4228_v20 }
 0x6f7   :  { %v12550_v30 = vpop.f32.mrb[163].mxu0  ;;  %4281 = vmax.xlane.f32.xlu1 %v4280_v33  ;;  %v4394_v39 = vsel %vm4192_vm4, %v16132_v57, 0.0 }
 0x6f8   :  { %13552 = vpow2.f32 %v4333_v37  ;;  %v4343_v37 = vmul.f32 1.442695, %v4300_v11 }
 0x6f9   :  { %13554 = vpow2.f32 %v4335_v0  ;;  %v4108_v22 = vpop.f32.mrb[148].mxu1 }
 0x6fa   :  { %v16135_v27 = vpop.eup %13548  ;;  %v12555_v12 = vpop.f32.mrb[149].mxu1  ;;  %13556 = vpow2.f32 %v4339_v24 }
 0x6fb   :  { %4395 = vadd.xlane.f32.xlu1 %v4394_v39  ;;  %v4154_v17 = vpop.f32.mrb[164].mxu0  ;;  %v4219_v38 = vpop.xlane.xlu0 %4218  ;;  %v4397_v9 = vsel %vm4192_vm4, %v16135_v27, 0.0 }
 0x6fc   :  { %v16143_v15 = vmul.f32 0.25, %v4154_v17  ;;  %v4297_v0 = vsub.f32 %v16035_v34, %v4219_v38  ;;  %v4111_v51 = vpop.f32.mrb[150].mxu1  ;;  %v12561_v55 = vpop.f32.mrb[165].mxu0  ;;  %4398 = vadd.xlane.f32.xlu0 %v4397_v9  ;;  %v4277_v34 = vsel %vm4192_vm4, %v16139_v46, -inf  ;;  %v16159_v9 = vmul.f32 0.25, %v4108_v22 }
 0x6fd   :  { %v4234_v20 = vpop.xlane.xlu1 %4233  ;;  %v12556_v45 = vpop.f32.mrb[151].mxu1 }
 0x6fe   :  { %19021 = vst [vmem:[#allocation118_spill] sm:$0xff] %v16143_v15  ;;  %v4337_v33 = vmul.f32 1.442695, %v4297_v0  ;;  %v4302_v29 = vsub.f32 %v16037_v36, %v4234_v20  ;;  %v4157_v30 = vpop.f32.mrb[166].mxu0  ;;  %v4286_v12 = vsel %vm4192_vm4, %v16143_v15, -inf  ;;  %v16149_v39 = vpop.eup %13550  ;;  %v4283_v22 = vsel %vm4192_vm4, %v16159_v9, -inf }
 0x6ff   :  { %v12562_v17 = vpop.f32.mrb[167].mxu0  ;;  %4287 = vmax.xlane.f32.xlu1 %v4286_v12  ;;  %v4400_v36 = vsel %vm4192_vm4, %v16149_v39, 0.0 }
 0x700   :  { %13558 = vpow2.f32 %v4337_v33  ;;  %4278 = vmax.xlane.f32.xlu0 %v4277_v34  ;;  %v4347_v24 = vmul.f32 1.442695, %v4302_v29 }
 0x701   :  { %13560 = vpow2.f32 %v4343_v37 }
 0x702   :  { %v16153_v11 = vpop.eup %13552  ;;  %13562 = vpow2.f32 %v4347_v24 }
 0x703   :  { %v16157_v38 = vpop.eup %13554  ;;  %4401 = vadd.xlane.f32.xlu1 %v4400_v36  ;;  %v4225_v0 = vpop.xlane.xlu0 %4224  ;;  %v4403_v51 = vsel %vm4192_vm4, %v16153_v11, 0.0 }
 0x704   :  { %v4299_v55 = vsub.f32 %v16043_v19, %v4225_v0  ;;  %4404 = vadd.xlane.f32.xlu0 %v4403_v51  ;;  %v4406_v33 = vsel %vm4192_vm4, %v16157_v38, 0.0  ;;  %v16167_v29 = vpop.eup %13556 }
 0x705   :  { %v4240_v37 = vpop.xlane.xlu1 %4239  ;;  %v4412_v19 = vsel %vm4192_vm4, %v16167_v29, 0.0 }
 0x706   :  { %v4341_v20 = vmul.f32 1.442695, %v4299_v55  ;;  %v4304_v45 = vsub.f32 %v16045_v63, %v4240_v37 }
 0x707   :  { %4407 = vadd.xlane.f32.xlu1 %v4406_v33 }
 0x708   :  { %13564 = vpow2.f32 %v4341_v20  ;;  %v4351_v30 = vmul.f32 1.442695, %v4304_v45  ;;  %4284 = vmax.xlane.f32.xlu0 %v4283_v22 }
 0x70a   :  { %v16171_v12 = vpop.eup %13558  ;;  %13566 = vpow2.f32 %v4351_v30 }
 0x70b   :  { %v16175_v17 = vpop.eup %13560  ;;  %4413 = vadd.xlane.f32.xlu1 %v4412_v19  ;;  %v4231_v63 = vpop.xlane.xlu0 %4230  ;;  %v4409_v34 = vsel %vm4192_vm4, %v16171_v12, 0.0 }
 0x70c   :  { %v4301_v24 = vsub.f32 %v16051_v3, %v4231_v63  ;;  %4410 = vadd.xlane.f32.xlu0 %v4409_v34  ;;  %v4418_v0 = vsel %vm4192_vm4, %v16175_v17, 0.0  ;;  %v16182_v51 = vpop.eup %13562 }
 0x70d   :  { %v4424_v37 = vsel %vm4192_vm4, %v16182_v51, 0.0 }
 0x70e   :  { %v4345_v36 = vmul.f32 1.442695, %v4301_v24 }
 0x70f   :  { %4419 = vadd.xlane.f32.xlu1 %v4418_v0 }
 0x710   :  { %13568 = vpow2.f32 %v4345_v36 }
 0x712   :  { %v16184_v55 = vpop.eup %13564 }
 0x713   :  { %4425 = vadd.xlane.f32.xlu1 %v4424_v37  ;;  %v4237_v20 = vpop.xlane.xlu0 %4236  ;;  %v4415_v45 = vsel %vm4192_vm4, %v16184_v55, 0.0 }
 0x714   :  { %v16190_v3 = vpop.eup %13566  ;;  %v4303_v33 = vsub.f32 %v16055_v53, %v4237_v20  ;;  %4416 = vadd.xlane.f32.xlu0 %v4415_v45 }
 0x715   :  { %v4430_v30 = vsel %vm4192_vm4, %v16190_v3, 0.0 }
 0x716   :  { %v4349_v22 = vmul.f32 1.442695, %v4303_v33 }
 0x717   :  { %4431 = vadd.xlane.f32.xlu1 %v4430_v30 }
 0x718   :  { %13570 = vpow2.f32 %v4349_v22 }
 0x71a   :  { %v16195_v19 = vpop.eup %13568 }
 0x71b   :  { %v4421_v63 = vsel %vm4192_vm4, %v16195_v19, 0.0 }
 0x71c   :  { %4422 = vadd.xlane.f32.xlu0 %v4421_v63 }
 0x722   :  { %v16199_v34 = vpop.eup %13570 }
 0x723   :  { %v4427_v24 = vsel %vm4192_vm4, %v16199_v34, 0.0 }
 0x724   :  { %4428 = vadd.xlane.f32.xlu0 %v4427_v24 }
 0x74d   :  { %v4243_v53 = vpop.xlane.xlu0 %4242 }
 0x74e   :  { %v4305_v36 = vsub.f32 %v16059_v43, %v4243_v53 }
 0x74f   :  { %v4246_v0 = vpop.xlane.xlu1 %4245 }
 0x750   :  { %v4353_v37 = vmul.f32 1.442695, %v4305_v36  ;;  %v4306_v20 = vsub.f32 %v16061_v14, %v4246_v0 }
 0x752   :  { %13572 = vpow2.f32 %v4353_v37  ;;  %v4355_v45 = vmul.f32 1.442695, %v4306_v20 }
 0x754   :  { %13574 = vpow2.f32 %v4355_v45 }
 0x755   :  { %v4249_v33 = vpop.xlane.xlu0 %4248 }
 0x756   :  { %v4307_v22 = vsub.f32 %v16067_v10, %v4249_v33 }
 0x757   :  { %v4252_v30 = vpop.xlane.xlu1 %4251 }
 0x758   :  { %v4357_v63 = vmul.f32 1.442695, %v4307_v22  ;;  %v4308_v15 = vsub.f32 %v16070_v32, %v4252_v30 }
 0x75a   :  { %13576 = vpow2.f32 %v4357_v63  ;;  %v4359_v54 = vmul.f32 1.442695, %v4308_v15 }
 0x75c   :  { %v16207_v24 = vpop.eup %13572  ;;  %13578 = vpow2.f32 %v4359_v54 }
 0x75d   :  { %v4255_v43 = vpop.xlane.xlu0 %4254  ;;  %v4433_v53 = vsel %vm4192_vm4, %v16207_v24, 0.0 }
 0x75e   :  { %v16211_v14 = vpop.eup %13574  ;;  %v4309_v36 = vsub.f32 %v16076_v49, %v4255_v43  ;;  %4434 = vadd.xlane.f32.xlu0 %v4433_v53 }
 0x75f   :  { %v4258_v0 = vpop.xlane.xlu1 %4257  ;;  %v4436_v10 = vsel %vm4192_vm4, %v16211_v14, 0.0 }
 0x760   :  { %v4361_v37 = vmul.f32 1.442695, %v4309_v36  ;;  %v4310_v32 = vsub.f32 %v16078_v42, %v4258_v0  ;;  %4437 = vadd.xlane.f32.xlu1 %v4436_v10 }
 0x762   :  { %13580 = vpow2.f32 %v4361_v37  ;;  %v4363_v15 = vmul.f32 1.442695, %v4310_v32 }
 0x764   :  { %v16217_v54 = vpop.eup %13576  ;;  %13582 = vpow2.f32 %v4363_v15 }
 0x765   :  { %v4261_v20 = vpop.xlane.xlu0 %4260  ;;  %v4439_v45 = vsel %vm4192_vm4, %v16217_v54, 0.0 }
 0x766   :  { %v16221_v33 = vpop.eup %13578  ;;  %v4311_v49 = vsub.f32 %v16086_v47, %v4261_v20  ;;  %4440 = vadd.xlane.f32.xlu0 %v4439_v45 }
 0x767   :  { %v4264_v22 = vpop.xlane.xlu1 %4263  ;;  %v4442_v30 = vsel %vm4192_vm4, %v16221_v33, 0.0 }
 0x768   :  { %v4365_v42 = vmul.f32 1.442695, %v4311_v49  ;;  %v4312_v63 = vsub.f32 %v16088_v26, %v4264_v22  ;;  %4443 = vadd.xlane.f32.xlu1 %v4442_v30 }
 0x769   :  { %v4387_v43 = vpop.xlane.xlu0 %4386 }
 0x76a   :  { %13584 = vpow2.f32 %v4365_v42  ;;  %v4367_v53 = vmul.f32 1.442695, %v4312_v63  ;;  %v16245_v42 = vpack.c.bf16 %v15892_v2, %v15892_v2 }
 0x76b   :  { %13586 = vrcp.f32 %v4387_v43 }
 0x76c   :  { %v16227_v36 = vpop.eup %13580  ;;  %13588 = vpow2.f32 %v4367_v53  ;;  %v4674_v2 = vsel %vm4580_vm3, %v16245_v42, 0 }
 0x76d   :  { %v4445_v0 = vsel %vm4192_vm4, %v16227_v36, 0.0 }
 0x76e   :  { %v16231_v47 = vpop.eup %13582  ;;  %4446 = vadd.xlane.f32.xlu0 %v4445_v0 }
 0x76f   :  { %v4448_v10 = vsel %vm4192_vm4, %v16231_v47, 0.0 }
 0x770   :  { %4449 = vadd.xlane.f32.xlu1 %v4448_v10 }
 0x772   :  { %v4267_v37 = vpop.xlane.xlu0 %4266 }
 0x773   :  { %v4313_v26 = vsub.f32 %v16098_v25, %v4267_v37 }
 0x774   :  { %v16236_v32 = vpop.eup %13584  ;;  %v4270_v15 = vpop.xlane.xlu1 %4269 }
 0x775   :  { %v13587_v20 = vpop.eup %13586  ;;  %v4369_v45 = vmul.f32 1.442695, %v4313_v26  ;;  %v4314_v49 = vsub.f32 %v16100_v52, %v4270_v15  ;;  %v4451_v22 = vsel %vm4192_vm4, %v16236_v32, 0.0 }
 0x776   :  { %v16241_v30 = vpop.eup %13588  ;;  %v4393_v63 = vpop.xlane.xlu0 %4392  ;;  %4452 = vadd.xlane.f32.xlu0 %v4451_v22  ;;  %v4513_v25 = vmul.f32 %v13587_v20, %v16092_v1 }
 0x777   :  { %13590 = vpow2.f32 %v4369_v45  ;;  %v4371_v43 = vmul.f32 1.442695, %v4314_v49  ;;  %v4454_v53 = vsel %vm4192_vm4, %v16241_v30, 0.0 }
 0x778   :  { %13592 = vrcp.f32 %v4393_v63  ;;  %v4390_v52 = vpop.xlane.xlu1 %4389  ;;  %4455 = vadd.xlane.f32.xlu1 %v4454_v53  ;;  %v4545_v0 = vpack.c.bf16 %v4513_v25, %v4513_v25 }
 0x779   :  { %13594 = vpow2.f32 %v4371_v43 }
 0x77a   :  { %13596 = vrcp.f32 %v4390_v52  ;;  %12566 = vmatmul.mubr.msk.bf16.vlgmr.msra.gmra.mrb[152].mxu1 %vm4192_vm4, %v4545_v0  ;;  %v4273_v10 = vpop.xlane.xlu0 %4272  ;;  %v16275_v52 = vpack.c.bf16 %v15899_v60, %v15899_v60 }
 0x77b   :  { %12576 = vmatpush3.bf16.msra.mxu1 %v4674_v2  ;;  %v4315_v1 = vsub.f32 %v16113_v62, %v4273_v10  ;;  %12577 = vmatprep.mubr.msk.bf16.mxu1 %vm14009_vm1, %v18997_v50  ;;  %v16266_v62 = vpack.c.bf16 %v15921_v8, %v15921_v8 }
 0x77c   :  { %v4276_v37 = vpop.xlane.xlu1 %4275  ;;  %12587 = vmatprep.subr.bf16.mxu1 %v18997_v50  ;;  %v4720_v60 = vsel %vm4580_vm3, %v16275_v52, 0 }
 0x77d   :  { %v4373_v26 = vmul.f32 1.442695, %v4315_v1  ;;  %v4316_v15 = vsub.f32 %v16117_v59, %v4276_v37  ;;  %v4766_v8 = vsel %vm4580_vm3, %v16266_v62, 0 }
 0x77f   :  { %13598 = vpow2.f32 %v4373_v26  ;;  %v4375_v20 = vmul.f32 1.442695, %v4316_v15 }
 0x781   :  { %v16258_v45 = vpop.eup %13590  ;;  %13600 = vpow2.f32 %v4375_v20 }
 0x782   :  { %v13593_v49 = vpop.eup %13592  ;;  %v4457_v22 = vsel %vm4192_vm4, %v16258_v45, 0.0 }
 0x783   :  { %v16262_v63 = vpop.eup %13594  ;;  %4458 = vadd.xlane.f32.xlu0 %v4457_v22  ;;  %v4515_v25 = vmul.f32 %v13593_v49, %v16104_v35 }
 0x784   :  { %v13597_v43 = vpop.eup %13596  ;;  %v16269_v59 = vpop.xlane.xlu1 %4281  ;;  %v4460_v53 = vsel %vm4192_vm4, %v16262_v63, 0.0 }
 0x785   :  { %4461 = vadd.xlane.f32.xlu1 %v4460_v53  ;;  %v4547_v0 = vpack.c.bf16 %v4515_v25, %v4515_v25  ;;  %v4514_v2 = vmul.f32 %v13597_v43, %v16109_v40 }
 0x787   :  { %12578 = vmatmul.mubr.msk.bf16.vlgmr.msra.gmra.mrb[156].mxu1 %vm4192_vm4, %v4547_v0  ;;  %v4546_v35 = vpack.c.bf16 %v4514_v2, %v4514_v2 }
 0x788   :  { %12588 = vmatpush3.bf16.msra.mxu1 %v4766_v8  ;;  %v4396_v10 = vpop.xlane.xlu1 %4395  ;;  %12589 = vmatprep.mubr.msk.bf16.mxu1 %vm14009_vm1, %v18997_v50 }
 0x789   :  { %v16283_v1 = vpop.eup %13598  ;;  %12572 = vmatmul.mubr.msk.bf16.vlgmr.msra.gmra.mrb[168].mxu0 %vm4192_vm4, %v4546_v35  ;;  %v4399_v37 = vpop.xlane.xlu0 %4398  ;;  %12599 = vmatprep.subr.bf16.mxu1 %v18997_v50  ;;  %13602 = vrcp.f32 %v4396_v10  ;;  %v16303_v35 = vpack.c.bf16 %v15929_v56, %v15929_v56 }
 0x78a   :  { %12582 = vmatpush3.bf16.msra.mxu0 %v4720_v60  ;;  %v4463_v40 = vsel %vm4192_vm4, %v16283_v1, 0.0  ;;  %12583 = vmatprep.mubr.msk.bf16.mxu0 %vm14009_vm1, %v18997_v50  ;;  %13604 = vrcp.f32 %v4399_v37  ;;  %v16308_v37 = vpack.c.bf16 %v15918_v13, %v15918_v13 }
 0x78b   :  { %v16293_v26 = vpop.eup %13600  ;;  %4464 = vadd.xlane.f32.xlu0 %v4463_v40  ;;  %12593 = vmatprep.subr.bf16.mxu0 %v18997_v50  ;;  %v4812_v56 = vsel %vm4580_vm3, %v16303_v35, 0 }
 0x78c   :  { %v16296_v15 = vpop.xlane.xlu1 %4287  ;;  %v4466_v20 = vsel %vm4192_vm4, %v16293_v26, 0.0  ;;  %v4858_v13 = vsel %vm4580_vm3, %v16308_v37, 0 }
 0x78d   :  { %4467 = vadd.xlane.f32.xlu1 %v4466_v20  ;;  %v4279_v49 = vpop.xlane.xlu0 %4278 }
 0x78e   :  { %v4317_v22 = vsub.f32 %v16139_v46, %v4279_v49 }
 0x790   :  { %v4377_v25 = vmul.f32 1.442695, %v4317_v22  ;;  %v4402_v43 = vpop.xlane.xlu1 %4401 }
 0x791   :  { %v4405_v53 = vpop.xlane.xlu0 %4404 }
 0x792   :  { %13606 = vpow2.f32 %v4377_v25 }
 0x793   :  { %13608 = vrcp.f32 %v4402_v43  ;;  %v13603_v0 = vpop.eup %13602 }
 0x794   :  { %13610 = vrcp.f32 %v4405_v53  ;;  %v4408_v2 = vpop.xlane.xlu1 %4407  ;;  %v13605_v8 = vpop.eup %13604  ;;  %v4516_v60 = vmul.f32 %v13603_v0, %v16132_v57  ;;  %v16330_v0 = vpack.c.bf16 %v15927_v4, %v15927_v4 }
 0x795   :  { %v4285_v10 = vpop.xlane.xlu0 %4284  ;;  %v4517_v40 = vmul.f32 %v13605_v8, %v16135_v27  ;;  %13612 = vrcp.f32 %v4408_v2  ;;  %v16337_v8 = vpack.c.bf16 %v15949_v7, %v15949_v7 }
 0x796   :  { %v4319_v46 = vsub.f32 %v16159_v9, %v4285_v10  ;;  %v4548_v20 = vpack.c.bf16 %v4516_v60, %v4516_v60  ;;  %v4904_v4 = vsel %vm4580_vm3, %v16330_v0, 0 }
 0x797   :  { %v4549_v22 = vpack.c.bf16 %v4517_v40, %v4517_v40 }
 0x798   :  { %v4381_v49 = vmul.f32 1.442695, %v4319_v46  ;;  %12584 = vmatmul.mubr.msk.bf16.vlgmr.msra.gmra.mrb[172].mxu0 %vm4192_vm4, %v4548_v20  ;;  %v4414_v27 = vpop.xlane.xlu1 %4413 }
 0x799   :  { %v4411_v25 = vpop.xlane.xlu0 %4410  ;;  %12594 = vmatpush3.bf16.msra.mxu0 %v4812_v56  ;;  %12590 = vmatmul.mubr.msk.bf16.vlgmr.msra.gmra.mrb[160].mxu1 %vm4192_vm4, %v4549_v22  ;;  %v16358_v56 = vpack.c.bf16 %v15955_v41, %v15955_v41 }
 0x79a   :  { %13614 = vpow2.f32 %v4381_v49  ;;  %12600 = vmatpush3.bf16.msra.mxu1 %v4858_v13  ;;  %12595 = vmatprep.mubr.msk.bf16.mxu0 %vm14009_vm1, %v18997_v50 }
 0x79b   :  { %13616 = vrcp.f32 %v4411_v25  ;;  %12605 = vmatprep.subr.bf16.mxu0 %v18997_v50  ;;  %12601 = vmatprep.mubr.msk.bf16.mxu1 %vm14009_vm1, %v18997_v50  ;;  %v4996_v41 = vsel %vm4580_vm3, %v16358_v56, 0 }
 0x79c   :  { %v16320_v57 = vpop.eup %13606  ;;  %12611 = vmatprep.subr.bf16.mxu1 %v18997_v50  ;;  %13618 = vrcp.f32 %v4414_v27 }
 0x79d   :  { %v13609_v9 = vpop.eup %13608  ;;  %v4469_v43 = vsel %vm4192_vm4, %v16320_v57, 0.0 }
 0x79e   :  { %v13611_v53 = vpop.eup %13610  ;;  %6106 = vrot.lane.b32.xlu1 %v15542_v28, %s14010_s11  ;;  %4470 = vadd.xlane.f32.xlu0 %v4469_v43  ;;  %v4518_v2 = vmul.f32 %v13609_v9, %v16149_v39  ;;  %v4950_v28 = vsel %vm4580_vm3, %v16337_v8, 0  ;;  %v4420_v39 = vpop.xlane.xlu1 %4419 }
 0x79f   :  { %v4519_v10 = vmul.f32 %v13611_v53, %v16153_v11  ;;  %v13613_v46 = vpop.eup %13612 }
 0x7a0   :  { %v4550_v60 = vpack.c.bf16 %v4518_v2, %v4518_v2  ;;  %v4520_v11 = vmul.f32 %v13613_v46, %v16157_v38  ;;  %v16364_v38 = vpack.c.bf16 %v15946_v23, %v15946_v23  ;;  %v4318_v23 = vsub.f32 %v16126_v6, %v16269_v59 }
 0x7a1   :  { %v4551_v40 = vpack.c.bf16 %v4519_v10, %v4519_v10  ;;  %v4417_v20 = vpop.xlane.xlu0 %4416  ;;  %v16383_v46 = vpack.c.bf16 %v15953_v48, %v15953_v48  ;;  %v16388_v6 = vpack.c.bf16 %v15961_v61, %v15961_v61 }
 0x7a2   :  { %12596 = vmatmul.mubr.msk.bf16.vlgmr.msra.gmra.mrb[176].mxu0 %vm4192_vm4, %v4550_v60  ;;  %13620 = vrcp.f32 %v4417_v20  ;;  %v4552_v13 = vpack.c.bf16 %v4520_v11, %v4520_v11  ;;  %v4426_v2 = vpop.xlane.xlu1 %4425 }
 0x7a3   :  { %12606 = vmatpush3.bf16.msra.mxu0 %v4904_v4  ;;  %12602 = vmatmul.mubr.msk.bf16.vlgmr.msra.gmra.mrb[164].mxu1 %vm4192_vm4, %v4551_v40  ;;  %13622 = vrcp.f32 %v4420_v39  ;;  %v5134_v48 = vsel %vm4580_vm3, %v16388_v6, 0 }
 0x7a4   :  { %v16346_v7 = vpop.eup %13614  ;;  %12612 = vmatpush3.bf16.msra.mxu1 %v4950_v28  ;;  %12607 = vmatprep.mubr.msk.bf16.mxu0 %vm14009_vm1, %v18997_v50 }
 0x7a5   :  { %v13617_v49 = vpop.eup %13616  ;;  %v4475_v22 = vsel %vm4192_vm4, %v16346_v7, 0.0  ;;  %12617 = vmatprep.subr.bf16.mxu0 %v18997_v50  ;;  %12613 = vmatprep.mubr.msk.bf16.mxu1 %vm14009_vm1, %v18997_v50 }
 0x7a6   :  { %4476 = vadd.xlane.f32.xlu0 %v4475_v22  ;;  %12623 = vmatprep.subr.bf16.mxu1 %v18997_v50  ;;  %v4521_v25 = vmul.f32 %v13617_v49, %v16171_v12  ;;  %v13619_v9 = vpop.eup %13618  ;;  %v5042_v12 = vsel %vm4580_vm3, %v16364_v38, 0  ;;  %v4432_v28 = vpop.xlane.xlu1 %4431  ;;  %v16405_v49 = vpack.c.bf16 %v15967_v5, %v15967_v5  ;;  %v16410_v22 = vpack.c.bf16 %v15959_v21, %v15959_v21 }
 0x7a7   :  { %v4522_v10 = vmul.f32 %v13619_v9, %v16167_v29  ;;  %v4379_v29 = vmul.f32 1.442695, %v4318_v23  ;;  %v19022_v23 = vld [vmem:[#allocation105_spill] sm:$0xff] }
 0x7a8   :  { %v4553_v27 = vpack.c.bf16 %v4521_v25, %v4521_v25  ;;  %v5226_v5 = vsel %vm4580_vm3, %v16410_v22, 0 }
 0x7a9   :  { %v4423_v43 = vpop.xlane.xlu0 %4422  ;;  %v4554_v40 = vpack.c.bf16 %v4522_v10, %v4522_v10 }
 0x7aa   :  { %12608 = vmatmul.mubr.msk.bf16.vlgmr.msra.gmra.mrb[180].mxu0 %vm4192_vm4, %v4552_v13  ;;  %13624 = vrcp.f32 %v4423_v43 }
 0x7ab   :  { %12618 = vmatpush3.bf16.msra.mxu0 %v4996_v41  ;;  %12614 = vmatmul.mubr.msk.bf16.vlgmr.msra.gmra.mrb[168].mxu1 %vm4192_vm4, %v4553_v27  ;;  %13626 = vrcp.f32 %v4426_v2  ;;  %v5180_v27 = vsel %vm4580_vm3, %v16405_v49, 0  ;;  %v16429_v41 = vpack.c.bf16 %v15965_v44, %v15965_v44  ;;  %v16456_v2 = vpack.c.bf16 %v19022_v23, %v19022_v23 }
 0x7ac   :  { %v13621_v53 = vpop.eup %13620  ;;  %12624 = vmatpush3.bf16.msra.mxu1 %v5042_v12  ;;  %12619 = vmatprep.mubr.msk.bf16.mxu0 %vm14009_vm1, %v18997_v50 }
 0x7ad   :  { %12629 = vmatprep.subr.bf16.mxu0 %v18997_v50  ;;  %12625 = vmatprep.mubr.msk.bf16.mxu1 %vm14009_vm1, %v18997_v50  ;;  %v4523_v60 = vmul.f32 %v13621_v53, %v16184_v55  ;;  %v13623_v20 = vpop.eup %13622  ;;  %v5088_v55 = vsel %vm4580_vm3, %v16383_v46, 0  ;;  %v5272_v44 = vsel %vm4580_vm3, %v16429_v41, 0 }
 0x7ae   :  { %12635 = vmatprep.subr.bf16.mxu1 %v18997_v50  ;;  %v4524_v39 = vmul.f32 %v13623_v20, %v16175_v17  ;;  %v19028_v20 = vld [vmem:[#allocation55_spill] sm:$0xff] }
 0x7af   :  { %v4555_v59 = vpack.c.bf16 %v4523_v60, %v4523_v60  ;;  %v19023_v60 = vld [vmem:[#allocation44_spill] sm:$0xff] }
 0x7b0   :  { %v4556_v17 = vpack.c.bf16 %v4524_v39, %v4524_v39 }
 0x7b1   :  { %v4429_v4 = vpop.xlane.xlu0 %4428 }
 0x7b2   :  { %12620 = vmatmul.mubr.msk.bf16.vlgmr.msra.gmra.mrb[184].mxu0 %vm4192_vm4, %v4554_v40  ;;  %13628 = vrcp.f32 %v4429_v4  ;;  %v19027_v40 = vld [vmem:[#allocation56_spill] sm:$0xff] }
 0x7b3   :  { %12630 = vmatpush3.bf16.msra.mxu0 %v5088_v55  ;;  %12626 = vmatmul.mubr.msk.bf16.vlgmr.msra.gmra.mrb[172].mxu1 %vm4192_vm4, %v4555_v59  ;;  %13630 = vpow2.f32 %v4379_v29  ;;  %v19025_v59 = vld [vmem:[#allocation51_spill] sm:$0xff]  ;;  %v19026_v29 = vld [vmem:[#allocation41_spill] sm:$0xff]  ;;  %v19029_v4 = vld [vmem:[#allocation60_spill] sm:$0xff] }
 0x7b4   :  { %v13625_v61 = vpop.eup %13624  ;;  %12636 = vmatpush3.bf16.msra.mxu1 %v5134_v48  ;;  %12631 = vmatprep.mubr.msk.bf16.mxu0 %vm14009_vm1, %v18997_v50  ;;  %13632 = vrcp.f32 %v4432_v28  ;;  %v19030_v55 = vld [vmem:[#allocation59_spill] sm:$0xff]  ;;  %v19031_v48 = vld [vmem:[#allocation118_spill] sm:$0xff]  ;;  %v19032_v28 = vld [vmem:[#allocation64_spill] sm:$0xff] }
 0x7b5   :  { %12641 = vmatprep.subr.bf16.mxu0 %v18997_v50  ;;  %12637 = vmatprep.mubr.msk.bf16.mxu1 %vm14009_vm1, %v18997_v50  ;;  %v4525_v11 = vmul.f32 %v13625_v61, %v16195_v19  ;;  %v13627_v13 = vpop.eup %13626  ;;  %v4320_v61 = vsub.f32 %v19031_v48, %v16296_v15 }
 0x7b6   :  { %12647 = vmatprep.subr.bf16.mxu1 %v18997_v50  ;;  %v4526_v21 = vmul.f32 %v13627_v13, %v16182_v51 }
 0x7b7   :  { %v4557_v25 = vpack.c.bf16 %v4525_v11, %v4525_v11  ;;  %v4383_v39 = vmul.f32 1.442695, %v4320_v61  ;;  %v19033_v11 = vld [vmem:[#allocation63_spill] sm:$0xff] }
 0x7b8   :  { %v4558_v12 = vpack.c.bf16 %v4526_v21, %v4526_v21  ;;  %v19042_v61 = vld [vmem:[#allocation71_spill] sm:$0xff] }
 0x7b9   :  { %13634 = vpow2.f32 %v4383_v39 }
 0x7ba   :  { %12632 = vmatmul.mubr.msk.bf16.vlgmr.msra.gmra.mrb[188].mxu0 %vm4192_vm4, %v4556_v17  ;;  %v19034_v17 = vld [vmem:[#allocation67_spill] sm:$0xff] }
 0x7bb   :  { %12642 = vmatpush3.bf16.msra.mxu0 %v5180_v27  ;;  %12638 = vmatmul.mubr.msk.bf16.vlgmr.msra.gmra.mrb[176].mxu1 %vm4192_vm4, %v4557_v25  ;;  %v19035_v27 = vld [vmem:[#allocation66_spill] sm:$0xff] }
 0x7bc   :  { %v13629_v19 = vpop.eup %13628  ;;  %12648 = vmatpush3.bf16.msra.mxu1 %v5226_v5  ;;  %6054 = vrot.lane.b32.xlu0 %v15533_v31, %s14010_s11  ;;  %v16436_v31 = vpack.c.bf16 %v15973_v18, %v15973_v18 }
 0x7bd   :  { %12643 = vmatprep.mubr.msk.bf16.mxu0 %vm14009_vm1, %v18997_v50  ;;  %12653 = vmatprep.subr.bf16.mxu0 %v18997_v50  ;;  %v4527_v9 = vmul.f32 %v13629_v19, %v16199_v34  ;;  %v16425_v43 = vpop.eup %13630  ;;  %v19036_v19 = vld [vmem:[#allocation68_spill] sm:$0xff] }
 0x7be   :  { %12649 = vmatprep.mubr.msk.bf16.mxu1 %vm14009_vm1, %v18997_v50  ;;  %12659 = vmatprep.subr.bf16.mxu1 %v18997_v50  ;;  %v13633_v34 = vpop.eup %13632  ;;  %v4472_v53 = vsel %vm4192_vm4, %v16425_v43, 0.0  ;;  %v5318_v18 = vsel %vm4580_vm3, %v16436_v31, 0 }
 0x7bf   :  { %v4559_v51 = vpack.c.bf16 %v4527_v9, %v4527_v9 }
 0x7c0   :  { %6158 = vrot.lane.b32.xlu0 %v15557_v16, %s14010_s11  ;;  %v4528_v16 = vmul.f32 %v13633_v34, %v16190_v3  ;;  %v19024_v3 = vld [vmem:[#allocation52_spill] sm:$0xff] }
 0x7c2   :  { %12644 = vmatmul.mubr.msk.bf16.vlgmr.msra.gmra.mrb[192].mxu0 %vm4192_vm4, %v4558_v12  ;;  %4473 = vadd.xlane.f32.xlu1 %v4472_v53  ;;  %v4560_v10 = vpack.c.bf16 %v4528_v16, %v4528_v16  ;;  %v19037_v12 = vld [vmem:[#allocation103_spill] sm:$0xff]  ;;  %v19039_v16 = vld [vmem:[#allocation104_spill] sm:$0xff] }
 0x7c3   :  { %12654 = vmatpush3.bf16.msra.mxu0 %v5272_v44  ;;  %12650 = vmatmul.mubr.msk.bf16.vlgmr.msra.gmra.mrb[180].mxu1 %vm4192_vm4, %v4559_v51  ;;  %v16493_v5 = vpop.eup %13634  ;;  %v16501_v34 = vpack.c.bf16 %v19037_v12, %v19037_v12  ;;  %v16508_v23 = vpack.c.bf16 %v19039_v16, %v19039_v16 }
 0x7c4   :  { %12660 = vmatpush3.bf16.msra.mxu1 %v5318_v18  ;;  %6155 = vrot.lane.b32.xlu0 %v15574_v58, %s14010_s11  ;;  %v5364_v58 = vsel %vm4580_vm3, %v16456_v2, 0  ;;  %v4478_v51 = vsel %vm4192_vm4, %v16493_v5, 0.0  ;;  %v19038_v18 = vld [vmem:[#allocation69_spill] sm:$0xff] }
 0x7c5   :  { %12655 = vmatprep.mubr.msk.bf16.mxu0 %vm14009_vm1, %v18997_v50  ;;  %12665 = vmatprep.subr.bf16.mxu0 %v18997_v50 }
 0x7c6   :  { %12661 = vmatprep.mubr.msk.bf16.mxu1 %vm14009_vm1, %v18997_v50  ;;  %12671 = vmatprep.subr.bf16.mxu1 %v18997_v50 }
 0x7c8   :  { %6262 = vrot.lane.b32.xlu0 %v19023_v60, %s14010_s11 }
 0x7ca   :  { %12656 = vmatmul.mubr.msk.bf16.vlgmr.msra.gmra.mrb[196].mxu0 %vm4192_vm4, %v4560_v10 }
 0x7cb   :  { %12666 = vmatpush3.bf16.msra.mxu0 %v5364_v58  ;;  %12667 = vmatprep.mubr.msk.bf16.mxu0 %vm14009_vm1, %v18997_v50  ;;  %v5410_v58 = vsel %vm4580_vm3, %v16501_v34, 0 }
 0x7cc   :  { %6259 = vrot.lane.b32.xlu0 %v19024_v3, %s14010_s11  ;;  %12677 = vmatprep.subr.bf16.mxu0 %v18997_v50 }
 0x7d0   :  { %6366 = vrot.lane.b32.xlu0 %v19025_v59, %s14010_s11 }
 0x7d3   :  { %6051 = vrot.lane.b32.xlu1 %v19026_v29, %s14010_s11 }
 0x7d4   :  { %6363 = vrot.lane.b32.xlu0 %v19027_v40, %s14010_s11  ;;  %v5456_v40 = vsel %vm4580_vm3, %v16508_v23, 0 }
 0x7d8   :  { %6470 = vrot.lane.b32.xlu0 %v19028_v20, %s14010_s11  ;;  %v19041_v20 = vld [vmem:[#allocation107_spill] sm:$0xff] }
 0x7dc   :  { %6467 = vrot.lane.b32.xlu0 %v19029_v4, %s14010_s11  ;;  %v16524_v4 = vpack.c.bf16 %v19041_v20, %v19041_v20 }
 0x7e0   :  { %6574 = vrot.lane.b32.xlu0 %v19030_v55, %s14010_s11 }
 0x7e4   :  { %6571 = vrot.lane.b32.xlu0 %v19032_v28, %s14010_s11  ;;  %v19043_v28 = vld [vmem:[#allocation109_spill] sm:$0xff] }
 0x7e5   :  { %v16534_v39 = vpack.c.bf16 %v19043_v28, %v19043_v28 }
 0x7e8   :  { %6678 = vrot.lane.b32.xlu0 %v19033_v11, %s14010_s11 }
 0x7eb   :  { %v4435_v25 = vpop.xlane.xlu0 %4434 }
 0x7ec   :  { %13636 = vrcp.f32 %v4435_v25  ;;  %6675 = vrot.lane.b32.xlu0 %v19034_v17, %s14010_s11 }
 0x7ed   :  { %v4438_v13 = vpop.xlane.xlu1 %4437 }
 0x7ee   :  { %13638 = vrcp.f32 %v4438_v13 }
 0x7f0   :  { %6782 = vrot.lane.b32.xlu0 %v19035_v27, %s14010_s11  ;;  %v19044_v27 = vld [vmem:[#allocation76_spill] sm:$0xff] }
 0x7f3   :  { %v4441_v15 = vpop.xlane.xlu0 %4440 }
 0x7f4   :  { %13640 = vrcp.f32 %v4441_v15  ;;  %6779 = vrot.lane.b32.xlu0 %v19036_v19, %s14010_s11  ;;  %v5548_v19 = vsel %vm4580_vm3, %v16534_v39, 0 }
 0x7f5   :  { %v4444_v21 = vpop.xlane.xlu1 %4443 }
 0x7f6   :  { %v13637_v9 = vpop.eup %13636  ;;  %13642 = vrcp.f32 %v4444_v21  ;;  %v19045_v21 = vld [vmem:[#allocation106_spill] sm:$0xff] }
 0x7f7   :  { %4479 = vadd.xlane.f32.xlu1 %v4478_v51  ;;  %v4529_v53 = vmul.f32 %v13637_v9, %v16207_v24  ;;  %v19040_v24 = vld [vmem:[#allocation72_spill] sm:$0xff]  ;;  %v16550_v9 = vpack.c.bf16 %v19045_v21, %v19045_v21  ;;  %v19058_v21 = vld [vmem:[#allocation85_spill] sm:$0xff] }
 0x7f8   :  { %v13639_v44 = vpop.eup %13638  ;;  %6886 = vrot.lane.b32.xlu0 %v19038_v18, %s14010_s11  ;;  %v19048_v18 = vld [vmem:[#allocation108_spill] sm:$0xff] }
 0x7f9   :  { %v4561_v10 = vpack.c.bf16 %v4529_v53, %v4529_v53  ;;  %v4530_v60 = vmul.f32 %v13639_v44, %v16211_v14  ;;  %v19046_v53 = vld [vmem:[#allocation42_spill] sm:$0xff]  ;;  %v19047_v44 = vld [vmem:[#allocation75_spill] sm:$0xff]  ;;  %v16562_v16 = vpack.c.bf16 %v19048_v18, %v19048_v18 }
 0x7fa   :  { %v19060_v18 = vld [vmem:[#allocation47_spill] sm:$0xff] }
 0x7fb   :  { %12662 = vmatmul.mubr.msk.bf16.vlgmr.msra.gmra.mrb[184].mxu1 %vm4192_vm4, %v4561_v10  ;;  %v4447_v3 = vpop.xlane.xlu0 %4446  ;;  %v4562_v59 = vpack.c.bf16 %v4530_v60, %v4530_v60 }
 0x7fc   :  { %12672 = vmatpush3.bf16.msra.mxu1 %v5410_v58  ;;  %13644 = vrcp.f32 %v4447_v3  ;;  %6883 = vrot.lane.b32.xlu0 %v19040_v24, %s14010_s11  ;;  %v19049_v3 = vld [vmem:[#allocation43_spill] sm:$0xff]  ;;  %v5640_v24 = vsel %vm4580_vm3, %v16562_v16, 0 }
 0x7fd   :  { %v4450_v29 = vpop.xlane.xlu1 %4449  ;;  %12668 = vmatmul.mubr.msk.bf16.vlgmr.msra.gmra.mrb[200].mxu0 %vm4192_vm4, %v4562_v59  ;;  %12673 = vmatprep.mubr.msk.bf16.mxu1 %vm14009_vm1, %v18997_v50  ;;  %v19050_v59 = vld [vmem:[#allocation80_spill] sm:$0xff] }
 0x7fe   :  { %v13641_v14 = vpop.eup %13640  ;;  %13646 = vrcp.f32 %v4450_v29  ;;  %12678 = vmatpush3.bf16.msra.mxu0 %v5456_v40  ;;  %12683 = vmatprep.subr.bf16.mxu1 %v18997_v50 }
 0x7ff   :  { %v4531_v55 = vmul.f32 %v13641_v14, %v16217_v54  ;;  %12679 = vmatprep.mubr.msk.bf16.mxu0 %vm14009_vm1, %v18997_v50  ;;  %12689 = vmatprep.subr.bf16.mxu0 %v18997_v50  ;;  %v5502_v54 = vsel %vm4580_vm3, %v16524_v4, 0 }
 0x800   :  { %v13643_v48 = vpop.eup %13642  ;;  %6990 = vrot.lane.b32.xlu0 %v19042_v61, %s14010_s11  ;;  %v19053_v61 = vld [vmem:[#allocation113_spill] sm:$0xff] }
 0x801   :  { %v4563_v11 = vpack.c.bf16 %v4531_v55, %v4531_v55  ;;  %v4532_v25 = vmul.f32 %v13643_v48, %v16221_v33  ;;  %v19052_v55 = vld [vmem:[#allocation46_spill] sm:$0xff]  ;;  %v16590_v28 = vpack.c.bf16 %v19053_v61, %v19053_v61  ;;  %v19066_v61 = vld [vmem:[#allocation49_spill] sm:$0xff] }
 0x803   :  { %12674 = vmatmul.mubr.msk.bf16.vlgmr.msra.gmra.mrb[188].mxu1 %vm4192_vm4, %v4563_v11  ;;  %v4453_v17 = vpop.xlane.xlu0 %4452  ;;  %v4564_v13 = vpack.c.bf16 %v4532_v25, %v4532_v25  ;;  %v19054_v11 = vld [vmem:[#allocation79_spill] sm:$0xff] }
 0x804   :  { %12684 = vmatpush3.bf16.msra.mxu1 %v5502_v54  ;;  %13648 = vrcp.f32 %v4453_v17  ;;  %6987 = vrot.lane.b32.xlu0 %v19044_v27, %s14010_s11  ;;  %v19055_v27 = vld [vmem:[#allocation45_spill] sm:$0xff] }
 0x805   :  { %v4456_v15 = vpop.xlane.xlu1 %4455  ;;  %12680 = vmatmul.mubr.msk.bf16.vlgmr.msra.gmra.mrb[204].mxu0 %vm4192_vm4, %v4564_v13  ;;  %12685 = vmatprep.mubr.msk.bf16.mxu1 %vm14009_vm1, %v18997_v50 }
 0x806   :  { %v13645_v33 = vpop.eup %13644  ;;  %13650 = vrcp.f32 %v4456_v15  ;;  %12690 = vmatpush3.bf16.msra.mxu0 %v5548_v19  ;;  %12695 = vmatprep.subr.bf16.mxu1 %v18997_v50  ;;  %v19056_v15 = vld [vmem:[#allocation83_spill] sm:$0xff]  ;;  %v19057_v19 = vld [vmem:[#allocation48_spill] sm:$0xff] }
 0x807   :  { %v4533_v51 = vmul.f32 %v13645_v33, %v16227_v36  ;;  %12691 = vmatprep.mubr.msk.bf16.mxu0 %vm14009_vm1, %v18997_v50  ;;  %12701 = vmatprep.subr.bf16.mxu0 %v18997_v50  ;;  %v5594_v36 = vsel %vm4580_vm3, %v16550_v9, 0 }
 0x808   :  { %v13647_v12 = vpop.eup %13646  ;;  %6103 = vrot.lane.b32.xlu1 %v19046_v53, %s14010_s11  ;;  %7094 = vrot.lane.b32.xlu0 %v19047_v44, %s14010_s11  ;;  %v19059_v53 = vld [vmem:[#allocation110_spill] sm:$0xff] }
 0x809   :  { %v4565_v10 = vpack.c.bf16 %v4533_v51, %v4533_v51  ;;  %v4534_v60 = vmul.f32 %v13647_v12, %v16231_v47  ;;  %v19051_v47 = vld [vmem:[#allocation111_spill] sm:$0xff]  ;;  %v16617_v44 = vpack.c.bf16 %v19059_v53, %v19059_v53 }
 0x80a   :  { %v16579_v40 = vpack.c.bf16 %v19051_v47, %v19051_v47  ;;  %v19074_v53 = vld [vmem:[#allocation95_spill] sm:$0xff] }
 0x80b   :  { %12686 = vmatmul.mubr.msk.bf16.vlgmr.msra.gmra.mrb[192].mxu1 %vm4192_vm4, %v4565_v10  ;;  %v4566_v58 = vpack.c.bf16 %v4534_v60, %v4534_v60  ;;  %v5778_v47 = vsel %vm4580_vm3, %v16617_v44, 0 }
 0x80c   :  { %12696 = vmatpush3.bf16.msra.mxu1 %v5594_v36  ;;  %6210 = vrot.lane.b32.xlu1 %v19049_v3, %s14010_s11  ;;  %v5686_v17 = vsel %vm4580_vm3, %v16579_v40, 0  ;;  %v19061_v36 = vld [vmem:[#allocation88_spill] sm:$0xff] }
 0x80d   :  { %7091 = vrot.lane.b32.xlu0 %v19050_v59, %s14010_s11  ;;  %12692 = vmatmul.mubr.msk.bf16.vlgmr.msra.gmra.mrb[208].mxu0 %vm4192_vm4, %v4566_v58  ;;  %v19062_v58 = vld [vmem:[#allocation112_spill] sm:$0xff] }
 0x80e   :  { %v13649_v29 = vpop.eup %13648  ;;  %12702 = vmatpush3.bf16.msra.mxu0 %v5640_v24  ;;  %12697 = vmatprep.mubr.msk.bf16.mxu1 %vm14009_vm1, %v18997_v50  ;;  %v16626_v3 = vpack.c.bf16 %v19062_v58, %v19062_v58  ;;  %v19077_v58 = vld [vmem:[#allocation114_spill] sm:$0xff] }
 0x80f   :  { %12707 = vmatprep.subr.bf16.mxu1 %v18997_v50  ;;  %v4535_v14 = vmul.f32 %v13649_v29, %v16236_v32  ;;  %12703 = vmatprep.mubr.msk.bf16.mxu0 %vm14009_vm1, %v18997_v50  ;;  %v19063_v29 = vld [vmem:[#allocation50_spill] sm:$0xff] }
 0x810   :  { %v13651_v20 = vpop.eup %13650  ;;  %6207 = vrot.lane.b32.xlu1 %v19052_v55, %s14010_s11  ;;  %v4459_v48 = vpop.xlane.xlu0 %4458  ;;  %12713 = vmatprep.subr.bf16.mxu0 %v18997_v50  ;;  %v19065_v55 = vld [vmem:[#allocation115_spill] sm:$0xff] }
 0x811   :  { %7198 = vrot.lane.b32.xlu0 %v19054_v11, %s14010_s11  ;;  %13652 = vrcp.f32 %v4459_v48  ;;  %v4567_v25 = vpack.c.bf16 %v4535_v14, %v4535_v14  ;;  %v4536_v32 = vmul.f32 %v13651_v20, %v16241_v30  ;;  %v5732_v30 = vsel %vm4580_vm3, %v16590_v28, 0  ;;  %v19064_v14 = vld [vmem:[#allocation87_spill] sm:$0xff] }
 0x812   :  { %v4462_v54 = vpop.xlane.xlu1 %4461  ;;  %v5824_v20 = vsel %vm4580_vm3, %v16626_v3, 0  ;;  %v16644_v48 = vpack.c.bf16 %v19065_v55, %v19065_v55  ;;  %v19080_v55 = vld [vmem:[#allocation61_spill] sm:$0xff] }
 0x813   :  { %13654 = vrcp.f32 %v4462_v54  ;;  %12698 = vmatmul.mubr.msk.bf16.vlgmr.msra.gmra.mrb[196].mxu1 %vm4192_vm4, %v4567_v25  ;;  %v4568_v13 = vpack.c.bf16 %v4536_v32, %v4536_v32  ;;  %v19067_v32 = vld [vmem:[#allocation91_spill] sm:$0xff]  ;;  %v19068_v54 = vld [vmem:[#allocation117_spill] sm:$0xff] }
 0x814   :  { %12708 = vmatpush3.bf16.msra.mxu1 %v5686_v17  ;;  %6314 = vrot.lane.b32.xlu1 %v19055_v27, %s14010_s11  ;;  %v16656_v17 = vpack.c.bf16 %v19068_v54, %v19068_v54 }
 0x815   :  { %7195 = vrot.lane.b32.xlu0 %v19056_v15, %s14010_s11  ;;  %12704 = vmatmul.mubr.msk.bf16.vlgmr.msra.gmra.mrb[212].mxu0 %vm4192_vm4, %v4568_v13  ;;  %v19069_v15 = vld [vmem:[#allocation54_spill] sm:$0xff] }
 0x816   :  { %12714 = vmatpush3.bf16.msra.mxu0 %v5732_v30  ;;  %12709 = vmatprep.mubr.msk.bf16.mxu1 %vm14009_vm1, %v18997_v50 }
 0x817   :  { %12719 = vmatprep.subr.bf16.mxu1 %v18997_v50  ;;  %12715 = vmatprep.mubr.msk.bf16.mxu0 %vm14009_vm1, %v18997_v50 }
 0x818   :  { %6311 = vrot.lane.b32.xlu1 %v19057_v19, %s14010_s11  ;;  %v4465_v33 = vpop.xlane.xlu0 %4464  ;;  %12725 = vmatprep.subr.bf16.mxu0 %v18997_v50  ;;  %v19070_v19 = vld [vmem:[#allocation92_spill] sm:$0xff] }
 0x819   :  { %7302 = vrot.lane.b32.xlu0 %v19058_v21, %s14010_s11  ;;  %13656 = vrcp.f32 %v4465_v33  ;;  %v5916_v33 = vsel %vm4580_vm3, %v16656_v17, 0  ;;  %v19071_v21 = vld [vmem:[#allocation53_spill] sm:$0xff] }
 0x81a   :  { %v4468_v51 = vpop.xlane.xlu1 %4467 }
 0x81b   :  { %v13653_v12 = vpop.eup %13652  ;;  %13658 = vrcp.f32 %v4468_v51  ;;  %v19072_v51 = vld [vmem:[#allocation96_spill] sm:$0xff] }
 0x81c   :  { %6418 = vrot.lane.b32.xlu1 %v19060_v18, %s14010_s11  ;;  %v4537_v10 = vmul.f32 %v13653_v12, %v16258_v45  ;;  %v19073_v12 = vld [vmem:[#allocation58_spill] sm:$0xff] }
 0x81d   :  { %v13655_v60 = vpop.eup %13654  ;;  %7299 = vrot.lane.b32.xlu0 %v19061_v36, %s14010_s11 }
 0x81e   :  { %v4569_v59 = vpack.c.bf16 %v4537_v10, %v4537_v10  ;;  %v4538_v24 = vmul.f32 %v13655_v60, %v16262_v63  ;;  %v19075_v10 = vld [vmem:[#allocation57_spill] sm:$0xff]  ;;  %v19076_v60 = vld [vmem:[#allocation100_spill] sm:$0xff] }
 0x820   :  { %6415 = vrot.lane.b32.xlu1 %v19063_v29, %s14010_s11  ;;  %12710 = vmatmul.mubr.msk.bf16.vlgmr.msra.gmra.mrb[200].mxu1 %vm4192_vm4, %v4569_v59  ;;  %v4570_v45 = vpack.c.bf16 %v4538_v24, %v4538_v24  ;;  %v16689_v59 = vpack.c.bf16 %v19077_v58, %v19077_v58 }
 0x821   :  { %7406 = vrot.lane.b32.xlu0 %v19064_v14, %s14010_s11  ;;  %12720 = vmatpush3.bf16.msra.mxu1 %v5778_v47  ;;  %v19078_v47 = vld [vmem:[#allocation62_spill] sm:$0xff] }
 0x822   :  { %12716 = vmatmul.mubr.msk.bf16.vlgmr.msra.gmra.mrb[216].mxu0 %vm4192_vm4, %v4570_v45  ;;  %12721 = vmatprep.mubr.msk.bf16.mxu1 %vm14009_vm1, %v18997_v50  ;;  %v19079_v45 = vld [vmem:[#allocation99_spill] sm:$0xff] }
 0x823   :  { %v13657_v63 = vpop.eup %13656  ;;  %12726 = vmatpush3.bf16.msra.mxu0 %v5824_v20  ;;  %12731 = vmatprep.subr.bf16.mxu1 %v18997_v50  ;;  %v5962_v20 = vsel %vm4580_vm3, %v16689_v59, 0 }
 0x824   :  { %6522 = vrot.lane.b32.xlu1 %v19066_v61, %s14010_s11  ;;  %v4539_v11 = vmul.f32 %v13657_v63, %v16283_v1  ;;  %12727 = vmatprep.mubr.msk.bf16.mxu0 %vm14009_vm1, %v18997_v50  ;;  %v5870_v1 = vsel %vm4580_vm3, %v16644_v48, 0 }
 0x825   :  { %v13659_v25 = vpop.eup %13658  ;;  %7403 = vrot.lane.b32.xlu0 %v19067_v32, %s14010_s11  ;;  %12737 = vmatprep.subr.bf16.mxu0 %v18997_v50 }
 0x826   :  { %v4571_v13 = vpack.c.bf16 %v4539_v11, %v4539_v11  ;;  %v4540_v27 = vmul.f32 %v13659_v25, %v16293_v26  ;;  %v19081_v25 = vld [vmem:[#allocation65_spill] sm:$0xff] }
 0x828   :  { %6519 = vrot.lane.b32.xlu1 %v19069_v15, %s14010_s11  ;;  %12722 = vmatmul.mubr.msk.bf16.vlgmr.msra.gmra.mrb[204].mxu1 %vm4192_vm4, %v4571_v13  ;;  %v4572_v30 = vpack.c.bf16 %v4540_v27, %v4540_v27  ;;  %v19082_v13 = vld [vmem:[#allocation70_spill] sm:$0xff]  ;;  %v16724_v27 = vpop.permute.xlu1 %6106 }
 0x829   :  { %7510 = vrot.lane.b32.xlu0 %v19070_v19, %s14010_s11  ;;  %12732 = vmatpush3.bf16.msra.mxu1 %v5870_v1  ;;  %v19084_v1 = vld [vmem:[#allocation73_spill] sm:$0xff] }
 0x82a   :  { %12728 = vmatmul.mubr.msk.bf16.vlgmr.msra.gmra.mrb[220].mxu0 %vm4192_vm4, %v4572_v30  ;;  %12733 = vmatprep.mubr.msk.bf16.mxu1 %vm14009_vm1, %v18997_v50 }
 0x82b   :  { %12738 = vmatpush3.bf16.msra.mxu0 %v5916_v33  ;;  %v4471_v26 = vpop.xlane.xlu0 %4470  ;;  %12743 = vmatprep.subr.bf16.mxu1 %v18997_v50 }
 0x82c   :  { %13660 = vrcp.f32 %v4471_v26  ;;  %6626 = vrot.lane.b32.xlu1 %v19071_v21, %s14010_s11  ;;  %12739 = vmatprep.mubr.msk.bf16.mxu0 %vm14009_vm1, %v18997_v50 }
 0x82d   :  { %7507 = vrot.lane.b32.xlu0 %v19072_v51, %s14010_s11  ;;  %12749 = vmatprep.subr.bf16.mxu0 %v18997_v50  ;;  %v19086_v51 = vld [vmem:[#allocation78_spill] sm:$0xff] }
 0x830   :  { %6623 = vrot.lane.b32.xlu1 %v19073_v12, %s14010_s11 }
 0x831   :  { %7614 = vrot.lane.b32.xlu0 %v19074_v53, %s14010_s11 }
 0x833   :  { %v4477_v18 = vpop.xlane.xlu0 %4476 }
 0x834   :  { %13662 = vrcp.f32 %v4477_v18  ;;  %6730 = vrot.lane.b32.xlu1 %v19075_v10, %s14010_s11 }
 0x835   :  { %7611 = vrot.lane.b32.xlu0 %v19076_v60, %s14010_s11 }
 0x836   :  { %v13661_v36 = vpop.eup %13660 }
 0x837   :  { %v6055_v24 = vpop.permute.xlu0 %6054  ;;  %v4541_v29 = vmul.f32 %v13661_v36, %v16320_v57  ;;  %v19090_v36 = vld [vmem:[#allocation116_spill] sm:$0xff] }
 0x838   :  { %6727 = vrot.lane.b32.xlu1 %v19078_v47, %s14010_s11  ;;  %v16753_v58 = vpack.c.bf16 %v19090_v36, %v19090_v36 }
 0x839   :  { %8131 = vrot.lane.b32.xlu0 %v19079_v45, %s14010_s11  ;;  %v4573_v14 = vpack.c.bf16 %v4541_v29, %v4541_v29 }
 0x83b   :  { %12734 = vmatmul.mubr.msk.bf16.vlgmr.msra.gmra.mrb[208].mxu1 %vm4192_vm4, %v4573_v14  ;;  %v6159_v63 = vpop.permute.xlu0 %6158  ;;  %v19092_v14 = vld [vmem:[#allocation81_spill] sm:$0xff] }
 0x83c   :  { %12744 = vmatpush3.bf16.msra.mxu1 %v5962_v20  ;;  %6834 = vrot.lane.b32.xlu1 %v19080_v55, %s14010_s11  ;;  %v6164_v12 = vsel %vm2687_vm2, %v6159_v63, 0 }
 0x83d   :  { %8229 = vrot.lane.b32.xlu0 %v16245_v42, %s14010_s11  ;;  %12745 = vmatprep.mubr.msk.bf16.mxu1 %vm14009_vm1, %v18997_v50  ;;  %v6060_v42 = vsel %vm2687_vm2, %v6055_v24, 0 }
 0x83e   :  { %v13663_v57 = vpop.eup %13662  ;;  %12755 = vmatprep.subr.bf16.mxu1 %v18997_v50 }
 0x83f   :  { %v6156_v61 = vpop.permute.xlu0 %6155  ;;  %v4543_v11 = vmul.f32 %v13663_v57, %v16346_v7 }
 0x840   :  { %6831 = vrot.lane.b32.xlu1 %v19081_v25, %s14010_s11  ;;  %v19093_v25 = vld [vmem:[#allocation84_spill] sm:$0xff] }
 0x841   :  { %8327 = vrot.lane.b32.xlu0 %v16266_v62, %s14010_s11  ;;  %v4575_v32 = vpack.c.bf16 %v4543_v11, %v4543_v11  ;;  %v19083_v62 = vld [vmem:[#allocation74_spill] sm:$0xff] }
 0x843   :  { %12746 = vmatmul.mubr.msk.bf16.vlgmr.msra.gmra.mrb[212].mxu1 %vm4192_vm4, %v4575_v32  ;;  %v6263_v54 = vpop.permute.xlu0 %6262 }
 0x844   :  { %6938 = vrot.lane.b32.xlu1 %v19082_v13, %s14010_s11  ;;  %12757 = vmatprep.mubr.msk.bf16.mxu1 %vm14009_vm1, %v18997_v50  ;;  %v6268_v29 = vsel %vm2687_vm2, %v6263_v54, 0  ;;  %v19094_v54 = vld [vmem:[#allocation86_spill] sm:$0xff] }
 0x845   :  { %8425 = vrot.lane.b32.xlu0 %v16308_v37, %s14010_s11  ;;  %12756 = vmatpush3.bf16.xpose.msra.mxu1 %v6060_v42  ;;  %v19095_v42 = vld [vmem:[#allocation90_spill] sm:$0xff] }
 0x846   :  { %12767 = vmatprep.subr.bf16.mxu1 %v18997_v50 }
 0x847   :  { %v6260_v7 = vpop.permute.xlu0 %6259 }
 0x848   :  { %6935 = vrot.lane.b32.xlu1 %v19083_v62, %s14010_s11 }
 0x849   :  { %8523 = vrot.lane.b32.xlu0 %v16337_v8, %s14010_s11 }
 0x84b   :  { %v6367_v15 = vpop.permute.xlu0 %6366 }
 0x84c   :  { %7042 = vrot.lane.b32.xlu1 %v19084_v1, %s14010_s11 }
 0x84d   :  { %8621 = vrot.lane.b32.xlu0 %v16364_v38, %s14010_s11  ;;  %v16730_v37 = vpop.f32.mrb[152].mxu1  ;;  %v19087_v38 = vld [vmem:[#allocation77_spill] sm:$0xff] }
 0x84e   :  { %19085 = vst [vmem:[#allocation105_spill] sm:$0xff] %v16730_v37  ;;  %v12567_v30 = vpop.f32.mrb[153].mxu1 }
 0x84f   :  { %v4621_v19 = vpop.f32.mrb[154].mxu1  ;;  %v4474_v33 = vpop.xlane.xlu1 %4473 }
 0x850   :  { %13664 = vrcp.f32 %v4474_v33  ;;  %v6364_v26 = vpop.permute.xlu0 %6363  ;;  %v12568_v21 = vpop.f32.mrb[155].mxu1  ;;  %7039 = vrot.lane.b32.xlu1 %v19086_v51, %s14010_s11 }
 0x851   :  { %8719 = vrot.lane.b32.xlu0 %v16388_v6, %s14010_s11  ;;  %v19088_v6 = vld [vmem:[#allocation82_spill] sm:$0xff] }
 0x853   :  { %v6052_v8 = vpop.permute.xlu1 %6051 }
 0x854   :  { %v6471_v53 = vpop.permute.xlu0 %6470  ;;  %7146 = vrot.lane.b32.xlu1 %v19087_v38, %s14010_s11  ;;  %12758 = vmatmul.mubr.msk.bf16.vlgmr.msra.gmra.mrb[216].mxu1 %vm2687_vm2, %v6052_v8  ;;  %v19100_v38 = vld [vmem:[#allocation94_spill] sm:$0xff] }
 0x855   :  { %8817 = vrot.lane.b32.xlu0 %v16410_v22, %s14010_s11  ;;  %12768 = vmatpush3.bf16.xpose.msra.mxu1 %v6164_v12  ;;  %v6476_v13 = vsel %vm2687_vm2, %v6471_v53, 0  ;;  %v19099_v12 = vld [vmem:[#allocation93_spill] sm:$0xff] }
 0x856   :  { %12769 = vmatprep.mubr.msk.bf16.mxu1 %vm14009_vm1, %v18997_v50  ;;  %12779 = vmatprep.subr.bf16.mxu1 %v18997_v50 }
 0x858   :  { %v6468_v18 = vpop.permute.xlu0 %6467  ;;  %7143 = vrot.lane.b32.xlu1 %v19088_v6, %s14010_s11 }
 0x859   :  { %8915 = vrot.lane.b32.xlu0 %v16436_v31, %s14010_s11 }
 0x85a   :  { %v13665_v10 = vpop.eup %13664  ;;  %v16749_v60 = vpop.f32.mrb[156].mxu1 }
 0x85b   :  { %19089 = vst [vmem:[#allocation44_spill] sm:$0xff] %v16749_v60  ;;  %v12579_v22 = vpop.f32.mrb[157].mxu1  ;;  %v4542_v24 = vmul.f32 %v13665_v10, %v16425_v43 }
 0x85c   :  { %v16757_v47 = vpop.f32.mrb[168].mxu0  ;;  %v6575_v45 = vpop.permute.xlu0 %6574  ;;  %7250 = vrot.lane.b32.xlu1 %v19092_v14, %s14010_s11  ;;  %12770 = vmatmul.mubr.msk.bf16.vlgmr.msra.gmra.mrb[220].mxu1 %vm2687_vm2, %v6156_v61  ;;  %v6008_v61 = vsel %vm4580_vm3, %v16753_v58, 0  ;;  %v19103_v14 = vld [vmem:[#allocation98_spill] sm:$0xff] }
 0x85d   :  { %19091 = vst [vmem:[#allocation52_spill] sm:$0xff] %v16757_v47  ;;  %v4713_v31 = vpop.f32.mrb[158].mxu1  ;;  %v12573_v20 = vpop.f32.mrb[169].mxu0  ;;  %9013 = vrot.lane.b32.xlu0 %v16501_v34, %s14010_s11  ;;  %12780 = vmatpush3.bf16.xpose.msra.mxu1 %v6268_v29  ;;  %v4574_v63 = vpack.c.bf16 %v4542_v24, %v4542_v24  ;;  %v6372_v34 = vsel %vm2687_vm2, %v6367_v15, 0 }
 0x85e   :  { %v12580_v55 = vpop.f32.mrb[159].mxu1  ;;  %v4667_v57 = vpop.f32.mrb[170].mxu0  ;;  %12781 = vmatprep.mubr.msk.bf16.mxu1 %vm14009_vm1, %v18997_v50  ;;  %12791 = vmatprep.subr.bf16.mxu1 %v18997_v50 }
 0x85f   :  { %v12574_v43 = vpop.f32.mrb[171].mxu0  ;;  %12740 = vmatmul.mubr.msk.bf16.vlgmr.msra.gmra.mrb[224].mxu0 %vm4192_vm4, %v4574_v63  ;;  %v19104_v63 = vld [vmem:[#allocation97_spill] sm:$0xff] }
 0x860   :  { %v6572_v11 = vpop.permute.xlu0 %6571  ;;  %12750 = vmatpush3.bf16.msra.mxu0 %v6008_v61  ;;  %7247 = vrot.lane.b32.xlu1 %v19093_v25, %s14010_s11 }
 0x861   :  { %9111 = vrot.lane.b32.xlu0 %v16524_v4, %s14010_s11  ;;  %12751 = vmatprep.mubr.msk.bf16.mxu0 %vm14009_vm1, %v18997_v50 }
 0x862   :  { %12761 = vmatprep.subr.bf16.mxu0 %v18997_v50 }
 0x864   :  { %v6679_v32 = vpop.permute.xlu0 %6678  ;;  %7354 = vrot.lane.b32.xlu1 %v19094_v54, %s14010_s11  ;;  %12782 = vmatmul.mubr.msk.bf16.vlgmr.msra.gmra.mrb[224].mxu1 %vm2687_vm2, %v6260_v7  ;;  %v19097_v7 = vld [vmem:[#allocation89_spill] sm:$0xff] }
 0x865   :  { %9209 = vrot.lane.b32.xlu0 %v16550_v9, %s14010_s11  ;;  %12792 = vmatpush3.bf16.xpose.msra.mxu1 %v6372_v34  ;;  %v6684_v20 = vsel %vm2687_vm2, %v6679_v32, 0 }
 0x866   :  { %12793 = vmatprep.mubr.msk.bf16.mxu1 %vm14009_vm1, %v18997_v50  ;;  %12803 = vmatprep.subr.bf16.mxu1 %v18997_v50 }
 0x868   :  { %v6676_v4 = vpop.permute.xlu0 %6675  ;;  %7351 = vrot.lane.b32.xlu1 %v19095_v42, %s14010_s11  ;;  %v19107_v42 = vld [vmem:[#allocation102_spill] sm:$0xff] }
 0x86b   :  { %v16789_v62 = vpop.f32.mrb[172].mxu0 }
 0x86c   :  { %19096 = vst [vmem:[#allocation51_spill] sm:$0xff] %v16789_v62  ;;  %v6783_v15 = vpop.permute.xlu0 %6782  ;;  %7458 = vrot.lane.b32.xlu1 %v19097_v7, %s14010_s11  ;;  %12794 = vmatmul.mubr.msk.bf16.vlgmr.msra.gmra.mrb[228].mxu1 %vm2687_vm2, %v6364_v26  ;;  %v12585_v9 = vpop.f32.mrb[173].mxu0  ;;  %v6580_v26 = vsel %vm2687_vm2, %v6575_v45, 0 }
 0x86d   :  { %v16794_v1 = vpop.f32.mrb[160].mxu1  ;;  %12804 = vmatpush3.bf16.xpose.msra.mxu1 %v6476_v13  ;;  %12805 = vmatprep.mubr.msk.bf16.mxu1 %vm14009_vm1, %v18997_v50  ;;  %v4759_v30 = vpop.f32.mrb[174].mxu0  ;;  %v6788_v7 = vsel %vm2687_vm2, %v6783_v15, 0 }
 0x86e   :  { %19098 = vst [vmem:[#allocation41_spill] sm:$0xff] %v16794_v1  ;;  %v12591_v19 = vpop.f32.mrb[161].mxu1  ;;  %12815 = vmatprep.subr.bf16.mxu1 %v18997_v50  ;;  %v12586_v33 = vpop.f32.mrb[175].mxu0  ;;  %v19108_v30 = vld [vmem:[#allocation101_spill] sm:$0xff] }
 0x86f   :  { %v4805_v21 = vpop.f32.mrb[162].mxu1 }
 0x870   :  { %v6780_v51 = vpop.permute.xlu0 %6779  ;;  %v12592_v8 = vpop.f32.mrb[163].mxu1  ;;  %7455 = vrot.lane.b32.xlu1 %v19099_v12, %s14010_s11 }
 0x874   :  { %v6887_v53 = vpop.permute.xlu0 %6886  ;;  %7562 = vrot.lane.b32.xlu1 %v19100_v38, %s14010_s11  ;;  %12806 = vmatmul.mubr.msk.bf16.vlgmr.msra.gmra.mrb[232].mxu1 %vm2687_vm2, %v6468_v18 }
 0x875   :  { %v16805_v6 = vpop.f32.mrb[176].mxu0  ;;  %12816 = vmatpush3.bf16.xpose.msra.mxu1 %v6580_v26  ;;  %12817 = vmatprep.mubr.msk.bf16.mxu1 %vm14009_vm1, %v18997_v50 }
 0x876   :  { %19101 = vst [vmem:[#allocation56_spill] sm:$0xff] %v16805_v6  ;;  %v12597_v10 = vpop.f32.mrb[177].mxu0  ;;  %v16809_v36 = vpop.f32.mrb[164].mxu1  ;;  %12827 = vmatprep.subr.bf16.mxu1 %v18997_v50 }
 0x877   :  { %19102 = vst [vmem:[#allocation55_spill] sm:$0xff] %v16809_v36  ;;  %v4851_v22 = vpop.f32.mrb[178].mxu0  ;;  %v12603_v24 = vpop.f32.mrb[165].mxu1 }
 0x878   :  { %v12598_v29 = vpop.f32.mrb[179].mxu0  ;;  %v4897_v45 = vpop.f32.mrb[166].mxu1  ;;  %7559 = vrot.lane.b32.xlu1 %v19103_v14, %s14010_s11  ;;  %v6892_v24 = vsel %vm2687_vm2, %v6887_v53, 0 }
 0x879   :  { %v16814_v31 = vpop.permute.xlu0 %6883  ;;  %v12604_v18 = vpop.f32.mrb[167].mxu1 }
 0x87c   :  { %7666 = vrot.lane.b32.xlu1 %v19104_v63, %s14010_s11  ;;  %12818 = vmatmul.mubr.msk.bf16.vlgmr.msra.gmra.mrb[236].mxu1 %vm2687_vm2, %v6572_v11 }
 0x87d   :  { %v16820_v55 = vpop.f32.mrb[180].mxu0  ;;  %v6991_v57 = vpop.permute.xlu0 %6990  ;;  %12828 = vmatpush3.bf16.xpose.msra.mxu1 %v6684_v20  ;;  %12829 = vmatprep.mubr.msk.bf16.mxu1 %vm14009_vm1, %v18997_v50 }
 0x87e   :  { %19105 = vst [vmem:[#allocation60_spill] sm:$0xff] %v16820_v55  ;;  %v12609_v43 = vpop.f32.mrb[181].mxu0  ;;  %v16824_v61 = vpop.f32.mrb[168].mxu1  ;;  %12839 = vmatprep.subr.bf16.mxu1 %v18997_v50 }
 0x87f   :  { %19106 = vst [vmem:[#allocation59_spill] sm:$0xff] %v16824_v61  ;;  %v4943_v25 = vpop.f32.mrb[182].mxu0  ;;  %v12615_v34 = vpop.f32.mrb[169].mxu1 }
 0x880   :  { %v12610_v32 = vpop.f32.mrb[183].mxu0  ;;  %v4989_v54 = vpop.f32.mrb[170].mxu1  ;;  %7663 = vrot.lane.b32.xlu1 %v19107_v42, %s14010_s11  ;;  %v6112_v42 = vsel %vm2687_vm2, %v16724_v27, 0 }
 0x881   :  { %v16829_v11 = vpop.permute.xlu0 %6987  ;;  %v12616_v13 = vpop.f32.mrb[171].mxu1 }
 0x882   :  { %v6996_v13 = vsel %vm2687_vm2, %v6991_v57, 0 }
 0x884   :  { %v4480_v9 = vpop.xlane.xlu1 %4479  ;;  %8180 = vrot.lane.b32.xlu1 %v19108_v30, %s14010_s11  ;;  %12830 = vmatmul.mubr.msk.bf16.vlgmr.msra.gmra.mrb[240].mxu1 %vm2687_vm2, %v6676_v4 }
 0x885   :  { %v16835_v19 = vpop.f32.mrb[184].mxu0  ;;  %v16837_v33 = vpop.permute.xlu0 %7094  ;;  %13666 = vrcp.f32 %v4480_v9  ;;  %12840 = vmatpush3.bf16.xpose.msra.mxu1 %v6788_v7  ;;  %12841 = vmatprep.mubr.msk.bf16.mxu1 %vm14009_vm1, %v18997_v50 }
 0x886   :  { %19109 = vst [vmem:[#allocation118_spill] sm:$0xff] %v16835_v19  ;;  %v12621_v21 = vpop.f32.mrb[185].mxu0  ;;  %v16841_v8 = vpop.f32.mrb[172].mxu1  ;;  %12851 = vmatprep.subr.bf16.mxu1 %v18997_v50 }
 0x887   :  { %19110 = vst [vmem:[#allocation64_spill] sm:$0xff] %v16841_v8  ;;  %v5035_v15 = vpop.f32.mrb[186].mxu0  ;;  %v12627_v12 = vpop.f32.mrb[173].mxu1 }
 0x888   :  { %v12622_v26 = vpop.f32.mrb[187].mxu0  ;;  %v5081_v38 = vpop.f32.mrb[174].mxu1  ;;  %8278 = vrot.lane.b32.xlu1 %v16275_v52, %s14010_s11 }
 0x889   :  { %v16846_v4 = vpop.permute.xlu0 %7091  ;;  %v12628_v10 = vpop.f32.mrb[175].mxu1  ;;  %v7100_v26 = vsel %vm2687_vm2, %v16837_v33, 0 }
 0x88a   :  { %v6104_v22 = vpop.permute.xlu1 %6103 }
 0x88c   :  { %8376 = vrot.lane.b32.xlu1 %v16303_v35, %s14010_s11  ;;  %12842 = vmatmul.mubr.msk.bf16.vlgmr.msra.gmra.mrb[244].mxu1 %vm2687_vm2, %v6780_v51 }
 0x88d   :  { %v16852_v29 = vpop.f32.mrb[188].mxu0  ;;  %v16854_v45 = vpop.permute.xlu0 %7198  ;;  %12852 = vmatpush3.bf16.xpose.msra.mxu1 %v6892_v24  ;;  %12853 = vmatprep.mubr.msk.bf16.mxu1 %vm14009_vm1, %v18997_v50 }
 0x88e   :  { %19111 = vst [vmem:[#allocation63_spill] sm:$0xff] %v16852_v29  ;;  %v6211_v52 = vpop.permute.xlu1 %6210  ;;  %v12633_v14 = vpop.f32.mrb[189].mxu0  ;;  %12863 = vmatprep.subr.bf16.mxu1 %v18997_v50 }
 0x88f   :  { %v13667_v18 = vpop.eup %13666  ;;  %v16859_v20 = vpop.f32.mrb[176].mxu1  ;;  %v6216_v12 = vsel %vm2687_vm2, %v6211_v52, 0  ;;  %v7204_v52 = vsel %vm2687_vm2, %v16854_v45, 0 }
 0x890   :  { %19112 = vst [vmem:[#allocation67_spill] sm:$0xff] %v16859_v20  ;;  %v5127_v53 = vpop.f32.mrb[190].mxu0  ;;  %v12639_v63 = vpop.f32.mrb[177].mxu1  ;;  %8474 = vrot.lane.b32.xlu1 %v16330_v0, %s14010_s11  ;;  %v4544_v51 = vmul.f32 %v13667_v18, %v16493_v5 }
 0x891   :  { %v12634_v35 = vpop.f32.mrb[191].mxu0  ;;  %v5173_v43 = vpop.f32.mrb[178].mxu1 }
 0x892   :  { %v12640_v25 = vpop.f32.mrb[179].mxu1  ;;  %v6208_v34 = vpop.permute.xlu1 %6207  ;;  %v4576_v32 = vpack.c.bf16 %v4544_v51, %v4544_v51 }
 0x893   :  { %v16864_v54 = vpop.permute.xlu0 %7195 }
 0x894   :  { %8572 = vrot.lane.b32.xlu1 %v16358_v56, %s14010_s11  ;;  %12752 = vmatmul.mubr.msk.bf16.vlgmr.msra.gmra.mrb[228].mxu0 %vm4192_vm4, %v4576_v32 }
 0x895   :  { %v16872_v7 = vpop.f32.mrb[192].mxu0  ;;  %12762 = vmatpush3.bf16.xpose.msra.mxu0 %v6112_v42  ;;  %12854 = vmatmul.mubr.msk.bf16.vlgmr.msra.gmra.mrb[248].mxu1 %vm2687_vm2, %v16814_v31 }
 0x896   :  { %19113 = vst [vmem:[#allocation66_spill] sm:$0xff] %v16872_v7  ;;  %v6315_v0 = vpop.permute.xlu1 %6314  ;;  %v12645_v5 = vpop.f32.mrb[193].mxu0  ;;  %12864 = vmatpush3.bf16.xpose.msra.mxu1 %v6996_v13  ;;  %12865 = vmatprep.mubr.msk.bf16.mxu1 %vm14009_vm1, %v18997_v50 }
 0x897   :  { %v16878_v27 = vpop.f32.mrb[180].mxu1  ;;  %v5219_v9 = vpop.f32.mrb[194].mxu0  ;;  %12875 = vmatprep.subr.bf16.mxu1 %v18997_v50  ;;  %12763 = vmatprep.mubr.msk.bf16.mxu0 %vm14009_vm1, %v18997_v50 }
 0x898   :  { %19114 = vst [vmem:[#allocation68_spill] sm:$0xff] %v16878_v27  ;;  %v12651_v56 = vpop.f32.mrb[181].mxu1  ;;  %v12646_v57 = vpop.f32.mrb[195].mxu0  ;;  %8670 = vrot.lane.b32.xlu1 %v16383_v46, %s14010_s11  ;;  %12773 = vmatprep.subr.bf16.mxu0 %v18997_v50 }
 0x899   :  { %v7303_v31 = vpop.permute.xlu0 %7302  ;;  %v5265_v30 = vpop.f32.mrb[182].mxu1 }
 0x89a   :  { %v12652_v21 = vpop.f32.mrb[183].mxu1  ;;  %v6312_v15 = vpop.permute.xlu1 %6311  ;;  %v7308_v45 = vsel %vm2687_vm2, %v7303_v31, 0 }
 0x89c   :  { %8768 = vrot.lane.b32.xlu1 %v16405_v49, %s14010_s11  ;;  %12764 = vmatmul.mubr.msk.bf16.vlgmr.msra.gmra.mrb[232].mxu0 %vm2687_vm2, %v6104_v22  ;;  %v6320_v22 = vsel %vm2687_vm2, %v6315_v0, 0 }
 0x89d   :  { %v16892_v38 = vpop.f32.mrb[196].mxu0  ;;  %12774 = vmatpush3.bf16.xpose.msra.mxu0 %v6216_v12  ;;  %12866 = vmatmul.mubr.msk.bf16.vlgmr.msra.gmra.mrb[252].mxu1 %vm2687_vm2, %v16829_v11  ;;  %v7300_v49 = vpop.permute.xlu0 %7299 }
 0x89e   :  { %19115 = vst [vmem:[#allocation103_spill] sm:$0xff] %v16892_v38  ;;  %v6419_v46 = vpop.permute.xlu1 %6418  ;;  %v12657_v10 = vpop.f32.mrb[197].mxu0  ;;  %12876 = vmatpush3.bf16.xpose.msra.mxu1 %v7100_v26  ;;  %12877 = vmatprep.mubr.msk.bf16.mxu1 %vm14009_vm1, %v18997_v50 }
 0x89f   :  { %v5311_v24 = vpop.f32.mrb[198].mxu0  ;;  %12887 = vmatprep.subr.bf16.mxu1 %v18997_v50  ;;  %12775 = vmatprep.mubr.msk.bf16.mxu0 %vm14009_vm1, %v18997_v50 }
 0x8a0   :  { %v12658_v33 = vpop.f32.mrb[199].mxu0  ;;  %8866 = vrot.lane.b32.xlu1 %v16429_v41, %s14010_s11  ;;  %12785 = vmatprep.subr.bf16.mxu0 %v18997_v50 }
 0x8a1   :  { %v7407_v14 = vpop.permute.xlu0 %7406 }
 0x8a2   :  { %v6416_v11 = vpop.permute.xlu1 %6415  ;;  %v7412_v35 = vsel %vm2687_vm2, %v7407_v14, 0 }
 0x8a4   :  { %8964 = vrot.lane.b32.xlu1 %v16456_v2, %s14010_s11  ;;  %12776 = vmatmul.mubr.msk.bf16.vlgmr.msra.gmra.mrb[236].mxu0 %vm2687_vm2, %v6208_v34  ;;  %v6424_v2 = vsel %vm2687_vm2, %v6419_v46, 0 }
 0x8a5   :  { %12786 = vmatpush3.bf16.xpose.msra.mxu0 %v6320_v22  ;;  %12878 = vmatmul.mubr.msk.bf16.vlgmr.msra.gmra.mrb[0].mxu1 %vm2687_vm2, %v16846_v4  ;;  %v7404_v4 = vpop.permute.xlu0 %7403 }
 0x8a6   :  { %v6523_v18 = vpop.permute.xlu1 %6522  ;;  %12888 = vmatpush3.bf16.xpose.msra.mxu1 %v7204_v52  ;;  %12889 = vmatprep.mubr.msk.bf16.mxu1 %vm14009_vm1, %v18997_v50 }
 0x8a7   :  { %12899 = vmatprep.subr.bf16.mxu1 %v18997_v50  ;;  %12787 = vmatprep.mubr.msk.bf16.mxu0 %vm14009_vm1, %v18997_v50  ;;  %v6528_v63 = vsel %vm2687_vm2, %v6523_v18, 0 }
 0x8a8   :  { %9062 = vrot.lane.b32.xlu1 %v16508_v23, %s14010_s11  ;;  %12797 = vmatprep.subr.bf16.mxu0 %v18997_v50 }
 0x8a9   :  { %v7511_v23 = vpop.permute.xlu0 %7510 }
 0x8aa   :  { %v6520_v41 = vpop.permute.xlu1 %6519  ;;  %v7516_v34 = vsel %vm2687_vm2, %v7511_v23, 0 }
 0x8ac   :  { %9160 = vrot.lane.b32.xlu1 %v16534_v39, %s14010_s11  ;;  %12788 = vmatmul.mubr.msk.bf16.vlgmr.msra.gmra.mrb[240].mxu0 %vm2687_vm2, %v6312_v15 }
 0x8ad   :  { %12798 = vmatpush3.bf16.xpose.msra.mxu0 %v6424_v2  ;;  %12890 = vmatmul.mubr.msk.bf16.vlgmr.msra.gmra.mrb[4].mxu1 %vm2687_vm2, %v16864_v54 }
 0x8ae   :  { %v6627_v53 = vpop.permute.xlu1 %6626  ;;  %12900 = vmatpush3.bf16.xpose.msra.mxu1 %v7308_v45  ;;  %12901 = vmatprep.mubr.msk.bf16.mxu1 %vm14009_vm1, %v18997_v50 }
 0x8af   :  { %12911 = vmatprep.subr.bf16.mxu1 %v18997_v50  ;;  %12799 = vmatprep.mubr.msk.bf16.mxu0 %vm14009_vm1, %v18997_v50  ;;  %v6632_v25 = vsel %vm2687_vm2, %v6627_v53, 0 }
 0x8b0   :  { %9258 = vrot.lane.b32.xlu1 %v16562_v16, %s14010_s11  ;;  %12809 = vmatprep.subr.bf16.mxu0 %v18997_v50  ;;  %v7508_v16 = vpop.permute.xlu0 %7507 }
 0x8b2   :  { %v6624_v39 = vpop.permute.xlu1 %6623 }
 0x8b4   :  { %12800 = vmatmul.mubr.msk.bf16.vlgmr.msra.gmra.mrb[244].mxu0 %vm2687_vm2, %v6416_v11  ;;  %v7615_v32 = vpop.permute.xlu0 %7614 }
 0x8b5   :  { %12810 = vmatpush3.bf16.xpose.msra.mxu0 %v6528_v63  ;;  %12902 = vmatmul.mubr.msk.bf16.vlgmr.msra.gmra.mrb[8].mxu1 %vm2687_vm2, %v7300_v49  ;;  %v7620_v5 = vsel %vm2687_vm2, %v7615_v32, 0 }
 0x8b6   :  { %v6731_v51 = vpop.permute.xlu1 %6730  ;;  %12912 = vmatpush3.bf16.xpose.msra.mxu1 %v7412_v35  ;;  %12913 = vmatprep.mubr.msk.bf16.mxu1 %vm14009_vm1, %v18997_v50 }
 0x8b7   :  { %12923 = vmatprep.subr.bf16.mxu1 %v18997_v50  ;;  %12811 = vmatprep.mubr.msk.bf16.mxu0 %vm14009_vm1, %v18997_v50  ;;  %v6736_v0 = vsel %vm2687_vm2, %v6731_v51, 0 }
 0x8b8   :  { %12821 = vmatprep.subr.bf16.mxu0 %v18997_v50  ;;  %v7612_v13 = vpop.permute.xlu0 %7611 }
 0x8ba   :  { %v6728_v43 = vpop.permute.xlu1 %6727 }
 0x8bc   :  { %12812 = vmatmul.mubr.msk.bf16.vlgmr.msra.gmra.mrb[248].mxu0 %vm2687_vm2, %v6520_v41  ;;  %v8132_v56 = vpop.permute.xlu0 %8131 }
 0x8bd   :  { %12822 = vmatpush3.bf16.xpose.msra.mxu0 %v6632_v25  ;;  %12914 = vmatmul.mubr.msk.bf16.vlgmr.msra.gmra.mrb[12].mxu1 %vm2687_vm2, %v7404_v4  ;;  %v8137_v30 = vsel %vm4580_vm3, %v8132_v56, 0 }
 0x8be   :  { %v6835_v54 = vpop.permute.xlu1 %6834  ;;  %12924 = vmatpush3.bf16.xpose.msra.mxu1 %v7516_v34  ;;  %12925 = vmatprep.mubr.msk.bf16.mxu1 %vm14009_vm1, %v18997_v50 }
 0x8bf   :  { %12935 = vmatprep.subr.bf16.mxu1 %v18997_v50  ;;  %12823 = vmatprep.mubr.msk.bf16.mxu0 %vm14009_vm1, %v18997_v50  ;;  %v6840_v31 = vsel %vm2687_vm2, %v6835_v54, 0 }
 0x8c0   :  { %12833 = vmatprep.subr.bf16.mxu0 %v18997_v50 }
 0x8c2   :  { %v6832_v42 = vpop.permute.xlu1 %6831 }
 0x8c4   :  { %12824 = vmatmul.mubr.msk.bf16.vlgmr.msra.gmra.mrb[252].mxu0 %vm2687_vm2, %v6624_v39 }
 0x8c5   :  { %12834 = vmatpush3.bf16.xpose.msra.mxu0 %v6736_v0  ;;  %12926 = vmatmul.mubr.msk.bf16.vlgmr.msra.gmra.mrb[16].mxu1 %vm2687_vm2, %v7508_v16 }
 0x8c6   :  { %v6939_v9 = vpop.permute.xlu1 %6938  ;;  %12936 = vmatpush3.bf16.xpose.msra.mxu1 %v7620_v5  ;;  %12937 = vmatprep.mubr.msk.bf16.mxu1 %vm14009_vm1, %v18997_v50 }
 0x8c7   :  { %12947 = vmatprep.subr.bf16.mxu1 %v18997_v50  ;;  %12835 = vmatprep.mubr.msk.bf16.mxu0 %vm14009_vm1, %v18997_v50  ;;  %v6944_v11 = vsel %vm2687_vm2, %v6939_v9, 0 }
 0x8c8   :  { %12845 = vmatprep.subr.bf16.mxu0 %v18997_v50 }
 0x8ca   :  { %v6936_v57 = vpop.permute.xlu1 %6935 }
 0x8cc   :  { %12836 = vmatmul.mubr.msk.bf16.vlgmr.msra.gmra.mrb[0].mxu0 %vm2687_vm2, %v6728_v43 }
 0x8cd   :  { %12846 = vmatpush3.bf16.xpose.msra.mxu0 %v6840_v31  ;;  %12938 = vmatmul.mubr.msk.bf16.vlgmr.msra.gmra.mrb[20].mxu1 %vm2687_vm2, %v7612_v13 }
 0x8ce   :  { %v7043_v21 = vpop.permute.xlu1 %7042  ;;  %12948 = vmatpush3.bf16.msra.mxu1 %v8137_v30  ;;  %v16969_v15 = vpop.f32.mrb[184].mxu1  ;;  %12847 = vmatprep.mubr.msk.bf16.mxu0 %vm14009_vm1, %v18997_v50 }
 0x8cf   :  { %19116 = vst [vmem:[#allocation69_spill] sm:$0xff] %v16969_v15  ;;  %v12663_v12 = vpop.f32.mrb[185].mxu1  ;;  %12857 = vmatprep.subr.bf16.mxu0 %v18997_v50  ;;  %12949 = vmatprep.mubr.msk.bf16.mxu1 %vm14009_vm1, %v18997_v50  ;;  %v7048_v39 = vsel %vm2687_vm2, %v7043_v21, 0 }
 0x8d0   :  { %v5357_v26 = vpop.f32.mrb[186].mxu1  ;;  %v16976_v46 = vpop.f32.mrb[200].mxu0  ;;  %12959 = vmatprep.subr.bf16.mxu1 %v18997_v50 }
 0x8d1   :  { %19117 = vst [vmem:[#allocation104_spill] sm:$0xff] %v16976_v46  ;;  %v12664_v10 = vpop.f32.mrb[187].mxu1  ;;  %v12669_v49 = vpop.f32.mrb[201].mxu0 }
 0x8d2   :  { %v7040_v24 = vpop.permute.xlu1 %7039  ;;  %v5403_v33 = vpop.f32.mrb[202].mxu0 }
 0x8d3   :  { %v12670_v22 = vpop.f32.mrb[203].mxu0 }
 0x8d4   :  { %12848 = vmatmul.mubr.msk.bf16.vlgmr.msra.gmra.mrb[4].mxu0 %vm2687_vm2, %v6832_v42 }
 0x8d5   :  { %12858 = vmatpush3.bf16.xpose.msra.mxu0 %v6944_v11  ;;  %12859 = vmatprep.mubr.msk.bf16.mxu0 %vm14009_vm1, %v18997_v50 }
 0x8d6   :  { %v7147_v52 = vpop.permute.xlu1 %7146  ;;  %v16983_v14 = vpop.f32.mrb[188].mxu1  ;;  %12869 = vmatprep.subr.bf16.mxu0 %v18997_v50 }
 0x8d7   :  { %19118 = vst [vmem:[#allocation72_spill] sm:$0xff] %v16983_v14  ;;  %v12675_v18 = vpop.f32.mrb[189].mxu1  ;;  %v7152_v13 = vsel %vm2687_vm2, %v7147_v52, 0 }
 0x8d8   :  { %v5449_v41 = vpop.f32.mrb[190].mxu1  ;;  %v16986_v2 = vpop.f32.mrb[204].mxu0 }
 0x8d9   :  { %19119 = vst [vmem:[#allocation107_spill] sm:$0xff] %v16986_v2  ;;  %v12676_v4 = vpop.f32.mrb[191].mxu1  ;;  %v12681_v53 = vpop.f32.mrb[205].mxu0 }
 0x8da   :  { %v7144_v45 = vpop.permute.xlu1 %7143  ;;  %v5495_v23 = vpop.f32.mrb[206].mxu0 }
 0x8db   :  { %v12682_v63 = vpop.f32.mrb[207].mxu0 }
 0x8dc   :  { %12860 = vmatmul.mubr.msk.bf16.vlgmr.msra.gmra.mrb[8].mxu0 %vm2687_vm2, %v6936_v57 }
 0x8dd   :  { %12870 = vmatpush3.bf16.xpose.msra.mxu0 %v7048_v39  ;;  %12871 = vmatprep.mubr.msk.bf16.mxu0 %vm14009_vm1, %v18997_v50 }
 0x8de   :  { %v7251_v35 = vpop.permute.xlu1 %7250  ;;  %v16992_v51 = vpop.f32.mrb[192].mxu1  ;;  %12881 = vmatprep.subr.bf16.mxu0 %v18997_v50 }
 0x8df   :  { %19120 = vst [vmem:[#allocation71_spill] sm:$0xff] %v16992_v51  ;;  %v12687_v16 = vpop.f32.mrb[193].mxu1 }
 0x8e0   :  { %v5541_v43 = vpop.f32.mrb[194].mxu1  ;;  %v16995_v25 = vpop.f32.mrb[208].mxu0 }
 0x8e1   :  { %19121 = vst [vmem:[#allocation109_spill] sm:$0xff] %v16995_v25  ;;  %v12688_v34 = vpop.f32.mrb[195].mxu1  ;;  %v12693_v54 = vpop.f32.mrb[209].mxu0 }
 0x8e2   :  { %v7248_v32 = vpop.permute.xlu1 %7247  ;;  %v5587_v42 = vpop.f32.mrb[210].mxu0 }
 0x8e3   :  { %v12694_v0 = vpop.f32.mrb[211].mxu0 }
 0x8e4   :  { %12872 = vmatmul.mubr.msk.bf16.vlgmr.msra.gmra.mrb[12].mxu0 %vm2687_vm2, %v7040_v24  ;;  %v7256_v24 = vsel %vm2687_vm2, %v7251_v35, 0 }
 0x8e5   :  { %12882 = vmatpush3.bf16.xpose.msra.mxu0 %v7152_v13  ;;  %12883 = vmatprep.mubr.msk.bf16.mxu0 %vm14009_vm1, %v18997_v50 }
 0x8e6   :  { %v7355_v5 = vpop.permute.xlu1 %7354  ;;  %v17001_v9 = vpop.f32.mrb[196].mxu1  ;;  %12893 = vmatprep.subr.bf16.mxu0 %v18997_v50 }
 0x8e7   :  { %19122 = vst [vmem:[#allocation76_spill] sm:$0xff] %v17001_v9  ;;  %v12699_v56 = vpop.f32.mrb[197].mxu1  ;;  %v7360_v22 = vsel %vm2687_vm2, %v7355_v5, 0 }
 0x8e8   :  { %v5633_v57 = vpop.f32.mrb[198].mxu1  ;;  %v17004_v31 = vpop.f32.mrb[212].mxu0 }
 0x8e9   :  { %19123 = vst [vmem:[#allocation106_spill] sm:$0xff] %v17004_v31  ;;  %v12700_v30 = vpop.f32.mrb[199].mxu1  ;;  %v12705_v21 = vpop.f32.mrb[213].mxu0 }
 0x8ea   :  { %v7352_v12 = vpop.permute.xlu1 %7351  ;;  %v5679_v26 = vpop.f32.mrb[214].mxu0 }
 0x8eb   :  { %v12706_v10 = vpop.f32.mrb[215].mxu0 }
 0x8ec   :  { %12884 = vmatmul.mubr.msk.bf16.vlgmr.msra.gmra.mrb[16].mxu0 %vm2687_vm2, %v7144_v45 }
 0x8ed   :  { %12894 = vmatpush3.bf16.xpose.msra.mxu0 %v7256_v24  ;;  %12895 = vmatprep.mubr.msk.bf16.mxu0 %vm14009_vm1, %v18997_v50 }
 0x8ee   :  { %v7459_v49 = vpop.permute.xlu1 %7458  ;;  %12905 = vmatprep.subr.bf16.mxu0 %v18997_v50 }
 0x8ef   :  { %v7464_v35 = vsel %vm2687_vm2, %v7459_v49, 0 }
 0x8f2   :  { %v7456_v33 = vpop.permute.xlu1 %7455 }
 0x8f3   :  { %v17011_v11 = vpop.f32.mrb[200].mxu1 }
 0x8f4   :  { %19124 = vst [vmem:[#allocation42_spill] sm:$0xff] %v17011_v11  ;;  %v12711_v52 = vpop.f32.mrb[201].mxu1  ;;  %12896 = vmatmul.mubr.msk.bf16.vlgmr.msra.gmra.mrb[20].mxu0 %vm2687_vm2, %v7248_v32 }
 0x8f5   :  { %12906 = vmatpush3.bf16.xpose.msra.mxu0 %v7360_v22  ;;  %v5725_v18 = vpop.f32.mrb[202].mxu1  ;;  %v17015_v41 = vpop.f32.mrb[216].mxu0  ;;  %12907 = vmatprep.mubr.msk.bf16.mxu0 %vm14009_vm1, %v18997_v50 }
 0x8f6   :  { %19125 = vst [vmem:[#allocation75_spill] sm:$0xff] %v17015_v41  ;;  %v12712_v4 = vpop.f32.mrb[203].mxu1  ;;  %12917 = vmatprep.subr.bf16.mxu0 %v18997_v50  ;;  %v12717_v45 = vpop.f32.mrb[217].mxu0 }
 0x8f7   :  { %v5771_v53 = vpop.f32.mrb[218].mxu0  ;;  %v7563_v23 = vpop.permute.xlu1 %7562 }
 0x8f8   :  { %v12718_v39 = vpop.f32.mrb[219].mxu0  ;;  %v7568_v5 = vsel %vm2687_vm2, %v7563_v23, 0 }
 0x8fb   :  { %v17020_v63 = vpop.f32.mrb[204].mxu1  ;;  %v7560_v54 = vpop.permute.xlu1 %7559 }
 0x8fc   :  { %19126 = vst [vmem:[#allocation108_spill] sm:$0xff] %v17020_v63  ;;  %v12723_v16 = vpop.f32.mrb[205].mxu1  ;;  %12908 = vmatmul.mubr.msk.bf16.vlgmr.msra.gmra.mrb[24].mxu0 %vm2687_vm2, %v7352_v12 }
 0x8fd   :  { %12918 = vmatpush3.bf16.xpose.msra.mxu0 %v7464_v35  ;;  %v5817_v43 = vpop.f32.mrb[206].mxu1  ;;  %v17024_v34 = vpop.f32.mrb[220].mxu0  ;;  %12919 = vmatprep.mubr.msk.bf16.mxu0 %vm14009_vm1, %v18997_v50 }
 0x8fe   :  { %19127 = vst [vmem:[#allocation43_spill] sm:$0xff] %v17024_v34  ;;  %v12724_v32 = vpop.f32.mrb[207].mxu1  ;;  %12929 = vmatprep.subr.bf16.mxu0 %v18997_v50  ;;  %v12729_v42 = vpop.f32.mrb[221].mxu0 }
 0x8ff   :  { %v5863_v13 = vpop.f32.mrb[222].mxu0  ;;  %v7667_v56 = vpop.permute.xlu1 %7666 }
 0x900   :  { %v12730_v0 = vpop.f32.mrb[223].mxu0  ;;  %v7672_v30 = vsel %vm2687_vm2, %v7667_v56, 0 }
 0x903   :  { %v7664_v57 = vpop.permute.xlu1 %7663 }
 0x904   :  { %12920 = vmatmul.mubr.msk.bf16.vlgmr.msra.gmra.mrb[28].mxu0 %vm2687_vm2, %v7456_v33 }
 0x905   :  { %12930 = vmatpush3.bf16.xpose.msra.mxu0 %v7568_v5  ;;  %12931 = vmatprep.mubr.msk.bf16.mxu0 %vm14009_vm1, %v18997_v50 }
 0x906   :  { %12941 = vmatprep.subr.bf16.mxu0 %v18997_v50 }
 0x907   :  { %v8181_v10 = vpop.permute.xlu1 %8180 }
 0x908   :  { %v8186_v49 = vsel %vm4580_vm3, %v8181_v10, 0 }
 0x90c   :  { %12932 = vmatmul.mubr.msk.bf16.vlgmr.msra.gmra.mrb[32].mxu0 %vm2687_vm2, %v7560_v54 }
 0x90d   :  { %12942 = vmatpush3.bf16.xpose.msra.mxu0 %v7672_v30  ;;  %12943 = vmatprep.mubr.msk.bf16.mxu0 %vm14009_vm1, %v18997_v50 }
 0x90e   :  { %v17038_v21 = vpop.f32.mrb[208].mxu1  ;;  %12953 = vmatprep.subr.bf16.mxu0 %v18997_v50 }
 0x90f   :  { %19128 = vst [vmem:[#allocation80_spill] sm:$0xff] %v17038_v21  ;;  %v12735_v12 = vpop.f32.mrb[209].mxu1 }
 0x910   :  { %v5909_v26 = vpop.f32.mrb[210].mxu1 }
 0x911   :  { %v12736_v24 = vpop.f32.mrb[211].mxu1 }
 0x914   :  { %12944 = vmatmul.mubr.msk.bf16.vlgmr.msra.gmra.mrb[36].mxu0 %vm2687_vm2, %v7664_v57 }
 0x915   :  { %12954 = vmatpush3.bf16.msra.mxu0 %v8186_v49  ;;  %12955 = vmatprep.mubr.msk.bf16.mxu0 %vm14009_vm1, %v18997_v50 }
 0x916   :  { %v17045_v33 = vpop.f32.mrb[212].mxu1  ;;  %12965 = vmatprep.subr.bf16.mxu0 %v18997_v50 }
 0x917   :  { %19129 = vst [vmem:[#allocation111_spill] sm:$0xff] %v17045_v33  ;;  %v12747_v22 = vpop.f32.mrb[213].mxu1 }
 0x918   :  { %v6001_v52 = vpop.f32.mrb[214].mxu1 }
 0x919   :  { %v12748_v18 = vpop.f32.mrb[215].mxu1 }
 0x927   :  { %v6096_v4 = vpop.f32.mrb[216].mxu1 }
 0x928   :  { %v17048_v45 = vmul.f32 0.25, %v6096_v4  ;;  %v12759_v53 = vpop.f32.mrb[217].mxu1 }
 0x929   :  { %v6099_v23 = vpop.f32.mrb[218].mxu1 }
 0x92a   :  { %v12760_v39 = vpop.f32.mrb[219].mxu1  ;;  %v7746_v35 = vsel %vm4192_vm4, %v17048_v45, -inf }
 0x92b   :  { %7747 = vmax.xlane.f32.xlu0 %v7746_v35 }
 0x92f   :  { %v6200_v16 = vpop.f32.mrb[220].mxu1 }
 0x930   :  { %v17052_v43 = vmul.f32 0.25, %v6200_v16  ;;  %v12771_v32 = vpop.f32.mrb[221].mxu1 }
 0x931   :  { %v6203_v54 = vpop.f32.mrb[222].mxu1 }
 0x932   :  { %v17054_v42 = vpop.f32.mrb[224].mxu0  ;;  %v7752_v13 = vsel %vm4192_vm4, %v17052_v43, -inf  ;;  %v12772_v0 = vpop.f32.mrb[223].mxu1 }
 0x933   :  { %19130 = vst [vmem:[#allocation46_spill] sm:$0xff] %v17054_v42  ;;  %7753 = vmax.xlane.f32.xlu0 %v7752_v13  ;;  %v12741_v5 = vpop.f32.mrb[225].mxu0 }
 0x934   :  { %v5955_v56 = vpop.f32.mrb[226].mxu0 }
 0x935   :  { %v12742_v57 = vpop.f32.mrb[227].mxu0 }
 0x937   :  { %v6304_v30 = vpop.f32.mrb[224].mxu1 }
 0x938   :  { %v12783_v12 = vpop.f32.mrb[225].mxu1 }
 0x939   :  { %v6307_v26 = vpop.f32.mrb[226].mxu1 }
 0x93a   :  { %v12784_v10 = vpop.f32.mrb[227].mxu1 }
 0x93f   :  { %v6408_v24 = vpop.f32.mrb[228].mxu1 }
 0x940   :  { %v12795_v49 = vpop.f32.mrb[229].mxu1 }
 0x941   :  { %v6411_v22 = vpop.f32.mrb[230].mxu1 }
 0x942   :  { %v12796_v52 = vpop.f32.mrb[231].mxu1 }
 0x947   :  { %v6512_v18 = vpop.f32.mrb[232].mxu1 }
 0x948   :  { %v12807_v4 = vpop.f32.mrb[233].mxu1 }
 0x949   :  { %v6515_v53 = vpop.f32.mrb[234].mxu1 }
 0x94a   :  { %v12808_v23 = vpop.f32.mrb[235].mxu1 }
 0x94f   :  { %v6616_v39 = vpop.f32.mrb[236].mxu1 }
 0x950   :  { %v12819_v35 = vpop.f32.mrb[237].mxu1 }
 0x951   :  { %v6619_v16 = vpop.f32.mrb[238].mxu1 }
 0x952   :  { %v12820_v32 = vpop.f32.mrb[239].mxu1 }
 0x957   :  { %v17058_v54 = vpop.f32.mrb[240].mxu1 }
 0x958   :  { %v12831_v13 = vpop.f32.mrb[241].mxu1  ;;  %v17101_v42 = vmul.f32 0.25, %v17058_v54 }
 0x959   :  { %v6723_v0 = vpop.f32.mrb[242].mxu1 }
 0x95a   :  { %v12832_v5 = vpop.f32.mrb[243].mxu1 }
 0x95f   :  { %v17060_v56 = vpop.f32.mrb[244].mxu1 }
 0x960   :  { %v12843_v57 = vpop.f32.mrb[245].mxu1 }
 0x961   :  { %v6827_v12 = vpop.f32.mrb[246].mxu1 }
 0x962   :  { %v12844_v26 = vpop.f32.mrb[247].mxu1 }
 0x967   :  { %v17062_v10 = vpop.f32.mrb[228].mxu0 }
 0x968   :  { %19131 = vst [vmem:[#allocation113_spill] sm:$0xff] %v17062_v10  ;;  %v17064_v49 = vpop.f32.mrb[248].mxu1  ;;  %v12753_v22 = vpop.f32.mrb[229].mxu0 }
 0x969   :  { %v12855_v52 = vpop.f32.mrb[249].mxu1  ;;  %v6047_v4 = vpop.f32.mrb[230].mxu0 }
 0x96a   :  { %v6931_v53 = vpop.f32.mrb[250].mxu1  ;;  %v12754_v23 = vpop.f32.mrb[231].mxu0 }
 0x96b   :  { %v12856_v35 = vpop.f32.mrb[251].mxu1 }
 0x96f   :  { %v6148_v16 = vpop.f32.mrb[232].mxu0 }
 0x970   :  { %v17066_v32 = vmul.f32 0.25, %v6148_v16  ;;  %v17068_v13 = vpop.f32.mrb[252].mxu1  ;;  %v12765_v0 = vpop.f32.mrb[233].mxu0  ;;  %v17076_v16 = vmul.f32 0.25, %v6304_v30 }
 0x971   :  { %v12867_v5 = vpop.f32.mrb[253].mxu1  ;;  %v6151_v57 = vpop.f32.mrb[234].mxu0 }
 0x972   :  { %v7035_v12 = vpop.f32.mrb[254].mxu1  ;;  %v12766_v26 = vpop.f32.mrb[235].mxu0  ;;  %v7749_v33 = vsel %vm4192_vm4, %v17066_v32, -inf }
 0x973   :  { %v12868_v10 = vpop.f32.mrb[255].mxu1  ;;  %7750 = vmax.xlane.f32.xlu1 %v7749_v33  ;;  %v17080_v26 = vmul.f32 0.25, %v6408_v24  ;;  %v7758_v33 = vsel %vm4192_vm4, %v17076_v16, -inf }
 0x975   :  { %v7764_v24 = vsel %vm4192_vm4, %v17080_v26, -inf }
 0x977   :  { %v6252_v22 = vpop.f32.mrb[236].mxu0 }
 0x978   :  { %v17072_v52 = vmul.f32 0.25, %v6252_v22  ;;  %v17074_v4 = vpop.f32.mrb[0].mxu1  ;;  %v12777_v53 = vpop.f32.mrb[237].mxu0 }
 0x979   :  { %v12879_v23 = vpop.f32.mrb[1].mxu1  ;;  %v6255_v35 = vpop.f32.mrb[238].mxu0 }
 0x97a   :  { %v7139_v0 = vpop.f32.mrb[2].mxu1  ;;  %v12778_v5 = vpop.f32.mrb[239].mxu0  ;;  %v7755_v57 = vsel %vm4192_vm4, %v17072_v52, -inf }
 0x97b   :  { %v12880_v12 = vpop.f32.mrb[3].mxu1  ;;  %7756 = vmax.xlane.f32.xlu0 %v7755_v57  ;;  %v17088_v0 = vmul.f32 0.25, %v6512_v18 }
 0x97f   :  { %7759 = vmax.xlane.f32.xlu0 %v7758_v33  ;;  %v6356_v10 = vpop.f32.mrb[240].mxu0  ;;  %v17094_v33 = vmul.f32 0.25, %v6616_v39 }
 0x980   :  { %v17084_v22 = vpop.f32.mrb[4].mxu1  ;;  %v17086_v53 = vmul.f32 0.25, %v6356_v10  ;;  %v12789_v30 = vpop.f32.mrb[241].mxu0  ;;  %v7770_v10 = vsel %vm4192_vm4, %v17088_v0, -inf }
 0x981   :  { %v12891_v23 = vpop.f32.mrb[5].mxu1  ;;  %v6359_v35 = vpop.f32.mrb[242].mxu0  ;;  %v7776_v39 = vsel %vm4192_vm4, %v17094_v33, -inf }
 0x982   :  { %v7243_v5 = vpop.f32.mrb[6].mxu1  ;;  %v12790_v21 = vpop.f32.mrb[243].mxu0  ;;  %v7761_v57 = vsel %vm4192_vm4, %v17086_v53, -inf }
 0x983   :  { %v12892_v12 = vpop.f32.mrb[7].mxu1  ;;  %7765 = vmax.xlane.f32.xlu0 %v7764_v24  ;;  %7762 = vmax.xlane.f32.xlu1 %v7761_v57 }
 0x987   :  { %7771 = vmax.xlane.f32.xlu0 %v7770_v10  ;;  %v6460_v30 = vpop.f32.mrb[244].mxu0  ;;  %v17108_v10 = vmul.f32 0.25, %v17060_v56 }
 0x988   :  { %v7344_v18 = vpop.f32.mrb[8].mxu1  ;;  %v17098_v23 = vmul.f32 0.25, %v6460_v30  ;;  %v12801_v21 = vpop.f32.mrb[245].mxu0  ;;  %v7782_v30 = vsel %vm4192_vm4, %v17101_v42, -inf }
 0x989   :  { %v12903_v35 = vpop.f32.mrb[9].mxu1  ;;  %v6463_v5 = vpop.f32.mrb[246].mxu0  ;;  %v7788_v56 = vsel %vm4192_vm4, %v17108_v10, -inf }
 0x98a   :  { %v7347_v63 = vpop.f32.mrb[10].mxu1  ;;  %v12802_v12 = vpop.f32.mrb[247].mxu0  ;;  %v7767_v24 = vsel %vm4192_vm4, %v17098_v23, -inf }
 0x98b   :  { %v12904_v57 = vpop.f32.mrb[11].mxu1  ;;  %7777 = vmax.xlane.f32.xlu0 %v7776_v39  ;;  %7768 = vmax.xlane.f32.xlu1 %v7767_v24  ;;  %v17112_v21 = vpop.permute.xlu0 %8229 }
 0x98c   :  { %v17117_v57 = vmul.f32 0.25, %v17064_v49 }
 0x98f   :  { %7783 = vmax.xlane.f32.xlu0 %v7782_v30  ;;  %v6564_v63 = vpop.f32.mrb[248].mxu0  ;;  %v17124_v30 = vmul.f32 0.25, %v17068_v13 }
 0x990   :  { %v7448_v54 = vpop.f32.mrb[12].mxu1  ;;  %v17114_v35 = vmul.f32 0.25, %v6564_v63  ;;  %v12813_v5 = vpop.f32.mrb[249].mxu0 }
 0x991   :  { %v12915_v12 = vpop.f32.mrb[13].mxu1  ;;  %v6567_v34 = vpop.f32.mrb[250].mxu0  ;;  %v7800_v13 = vsel %vm4192_vm4, %v17124_v30, -inf }
 0x992   :  { %v7451_v39 = vpop.f32.mrb[14].mxu1  ;;  %v12814_v24 = vpop.f32.mrb[251].mxu0  ;;  %v7773_v11 = vsel %vm4192_vm4, %v17114_v35, -inf  ;;  %v7794_v34 = vsel %vm4192_vm4, %v17117_v57, -inf }
 0x993   :  { %v12916_v41 = vpop.f32.mrb[15].mxu1  ;;  %7789 = vmax.xlane.f32.xlu0 %v7788_v56  ;;  %7774 = vmax.xlane.f32.xlu1 %v7773_v11  ;;  %v17128_v63 = vpop.permute.xlu0 %8327 }
 0x994   :  { %v17133_v41 = vmul.f32 0.25, %v17074_v4 }
 0x997   :  { %7795 = vmax.xlane.f32.xlu0 %v7794_v34  ;;  %v6668_v49 = vpop.f32.mrb[252].mxu0  ;;  %v17140_v34 = vmul.f32 0.25, %v17084_v22 }
 0x998   :  { %v7552_v5 = vpop.f32.mrb[16].mxu1  ;;  %v17130_v12 = vmul.f32 0.25, %v6668_v49  ;;  %v12825_v39 = vpop.f32.mrb[253].mxu0 }
 0x999   :  { %v12927_v24 = vpop.f32.mrb[17].mxu1  ;;  %v6671_v9 = vpop.f32.mrb[254].mxu0  ;;  %v7812_v22 = vsel %vm4192_vm4, %v17140_v34, -inf }
 0x99a   :  { %v7555_v11 = vpop.f32.mrb[18].mxu1  ;;  %v12826_v56 = vpop.f32.mrb[255].mxu0  ;;  %v7779_v31 = vsel %vm4192_vm4, %v17130_v12, -inf  ;;  %v7806_v9 = vsel %vm4192_vm4, %v17133_v41, -inf }
 0x99b   :  { %v12928_v51 = vpop.f32.mrb[19].mxu1  ;;  %7801 = vmax.xlane.f32.xlu0 %v7800_v13  ;;  %7780 = vmax.xlane.f32.xlu1 %v7779_v31  ;;  %v17144_v49 = vpop.permute.xlu0 %8425 }
 0x99c   :  { %v17150_v51 = vmul.f32 0.25, %v7344_v18 }
 0x99f   :  { %7807 = vmax.xlane.f32.xlu0 %v7806_v9  ;;  %v6772_v4 = vpop.f32.mrb[0].mxu0  ;;  %v17156_v9 = vmul.f32 0.25, %v7448_v54 }
 0x9a0   :  { %v17146_v39 = vpop.f32.mrb[20].mxu1  ;;  %v17148_v24 = vmul.f32 0.25, %v6772_v4  ;;  %v12837_v11 = vpop.f32.mrb[1].mxu0  ;;  %v7818_v4 = vsel %vm4192_vm4, %v17150_v51, -inf }
 0x9a1   :  { %v12939_v56 = vpop.f32.mrb[21].mxu1  ;;  %v6775_v25 = vpop.f32.mrb[2].mxu0 }
 0x9a2   :  { %v7659_v31 = vpop.f32.mrb[22].mxu1  ;;  %v12838_v13 = vpop.f32.mrb[3].mxu0  ;;  %v7785_v14 = vsel %vm4192_vm4, %v17148_v24, -inf }
 0x9a3   :  { %v12940_v2 = vpop.f32.mrb[23].mxu1  ;;  %7813 = vmax.xlane.f32.xlu0 %v7812_v22  ;;  %7786 = vmax.xlane.f32.xlu1 %v7785_v14  ;;  %v17160_v11 = vpop.permute.xlu0 %8523  ;;  %v17164_v13 = vmul.f32 0.25, %v7552_v5 }
 0x9a4   :  { %v7824_v2 = vsel %vm4192_vm4, %v17156_v9, -inf }
 0x9a5   :  { %v7830_v22 = vsel %vm4192_vm4, %v17164_v13, -inf }
 0x9a7   :  { %7819 = vmax.xlane.f32.xlu0 %v7818_v4  ;;  %v6876_v25 = vpop.f32.mrb[4].mxu0  ;;  %v17170_v54 = vpop.permute.xlu0 %8621 }
 0x9a8   :  { %v17162_v18 = vmul.f32 0.25, %v6876_v25  ;;  %v12849_v56 = vpop.f32.mrb[5].mxu0 }
 0x9a9   :  { %v6879_v31 = vpop.f32.mrb[6].mxu0 }
 0x9aa   :  { %v12850_v15 = vpop.f32.mrb[7].mxu0  ;;  %v7791_v14 = vsel %vm4192_vm4, %v17162_v18, -inf }
 0x9ab   :  { %7825 = vmax.xlane.f32.xlu0 %v7824_v2  ;;  %7792 = vmax.xlane.f32.xlu1 %v7791_v14  ;;  %v17178_v46 = vpop.permute.xlu0 %8719 }
 0x9af   :  { %7831 = vmax.xlane.f32.xlu0 %v7830_v22  ;;  %v6980_v4 = vpop.f32.mrb[8].mxu0  ;;  %v17182_v38 = vpop.permute.xlu0 %8817 }
 0x9b0   :  { %v17174_v25 = vmul.f32 0.25, %v6980_v4  ;;  %v12861_v5 = vpop.f32.mrb[9].mxu0  ;;  %19132 = vst [vmem:[#allocation79_spill] sm:$0xff] %v17182_v38 }
 0x9b1   :  { %v6983_v56 = vpop.f32.mrb[10].mxu0 }
 0x9b2   :  { %v12862_v15 = vpop.f32.mrb[11].mxu0  ;;  %v7797_v31 = vsel %vm4192_vm4, %v17174_v25, -inf }
 0x9b3   :  { %7798 = vmax.xlane.f32.xlu1 %v7797_v31  ;;  %v17186_v5 = vpop.permute.xlu0 %8915  ;;  %v17188_v15 = vpop.permute.xlu1 %8278 }
 0x9b4   :  { %19133 = vst [vmem:[#allocation45_spill] sm:$0xff] %v17186_v5 }
 0x9b7   :  { %v7084_v2 = vpop.f32.mrb[12].mxu0 }
 0x9b8   :  { %v17180_v14 = vmul.f32 0.25, %v7084_v2  ;;  %v12873_v27 = vpop.f32.mrb[13].mxu0 }
 0x9b9   :  { %v7087_v20 = vpop.f32.mrb[14].mxu0 }
 0x9ba   :  { %v12874_v22 = vpop.f32.mrb[15].mxu0  ;;  %v7803_v4 = vsel %vm4192_vm4, %v17180_v14, -inf  ;;  %v17194_v20 = vpop.permute.xlu0 %9013 }
 0x9bb   :  { %7804 = vmax.xlane.f32.xlu1 %v7803_v4  ;;  %19134 = vst [vmem:[#allocation83_spill] sm:$0xff] %v17194_v20  ;;  %v17196_v22 = vpop.permute.xlu1 %8376 }
 0x9bf   :  { %v7188_v56 = vpop.f32.mrb[16].mxu0 }
 0x9c0   :  { %v17190_v7 = vmul.f32 0.25, %v7188_v56  ;;  %v12885_v31 = vpop.f32.mrb[17].mxu0 }
 0x9c1   :  { %v7191_v8 = vpop.f32.mrb[18].mxu0  ;;  %v17202_v31 = vpop.permute.xlu0 %9111 }
 0x9c2   :  { %v12886_v2 = vpop.f32.mrb[19].mxu0  ;;  %v7809_v27 = vsel %vm4192_vm4, %v17190_v7, -inf  ;;  %19135 = vst [vmem:[#allocation48_spill] sm:$0xff] %v17202_v31  ;;  %v17204_v8 = vpop.permute.xlu1 %8474 }
 0x9c3   :  { %7810 = vmax.xlane.f32.xlu1 %v7809_v27 }
 0x9c5   :  { %v17208_v1 = vpop.permute.xlu0 %9209 }
 0x9c6   :  { %19136 = vst [vmem:[#allocation85_spill] sm:$0xff] %v17208_v1 }
 0x9c7   :  { %v7292_v29 = vpop.f32.mrb[20].mxu0 }
 0x9c8   :  { %v17198_v4 = vmul.f32 0.25, %v7292_v29  ;;  %v12897_v61 = vpop.f32.mrb[21].mxu0  ;;  %v17210_v29 = vpop.permute.xlu1 %8572 }
 0x9c9   :  { %v7295_v19 = vpop.f32.mrb[22].mxu0 }
 0x9ca   :  { %v12898_v36 = vpop.f32.mrb[23].mxu0  ;;  %v7815_v56 = vsel %vm4192_vm4, %v17198_v4, -inf  ;;  %v7748_v19 = vpop.xlane.xlu0 %7747 }
 0x9cb   :  { %7816 = vmax.xlane.f32.xlu1 %v7815_v56 }
 0x9cc   :  { %v17214_v62 = vpop.permute.xlu1 %8670 }
 0x9cd   :  { %19137 = vst [vmem:[#allocation110_spill] sm:$0xff] %v17214_v62 }
 0x9ce   :  { %v7754_v47 = vpop.xlane.xlu0 %7753 }
 0x9cf   :  { %v7396_v2 = vpop.f32.mrb[24].mxu0  ;;  %v7844_v31 = vsub.f32 %v17052_v43, %v7754_v47 }
 0x9d0   :  { %v17206_v27 = vmul.f32 0.25, %v7396_v2  ;;  %v12909_v55 = vpop.f32.mrb[25].mxu0  ;;  %v7842_v2 = vsub.f32 %v17048_v45, %v7748_v19  ;;  %v17227_v45 = vmul.f32 0.25, %v17146_v39 }
 0x9d1   :  { %v7399_v6 = vpop.f32.mrb[26].mxu0 }
 0x9d2   :  { %v12910_v61 = vpop.f32.mrb[27].mxu0  ;;  %v7821_v36 = vsel %vm4192_vm4, %v17206_v27, -inf  ;;  %v7836_v47 = vsel %vm4192_vm4, %v17227_v45, -inf }
 0x9d3   :  { %7822 = vmax.xlane.f32.xlu1 %v7821_v36  ;;  %v7874_v61 = vmul.f32 1.442695, %v7842_v2  ;;  %v17222_v36 = vpop.permute.xlu1 %8768 }
 0x9d4   :  { %19138 = vst [vmem:[#allocation47_spill] sm:$0xff] %v17222_v36 }
 0x9d5   :  { %13668 = vpow2.f32 %v7874_v61 }
 0x9d7   :  { %v7500_v60 = vpop.f32.mrb[28].mxu0  ;;  %v17231_v2 = vpop.permute.xlu1 %8866 }
 0x9d8   :  { %v17216_v56 = vmul.f32 0.25, %v7500_v60  ;;  %v12921_v37 = vpop.f32.mrb[29].mxu0  ;;  %19139 = vst [vmem:[#allocation88_spill] sm:$0xff] %v17231_v2 }
 0x9d9   :  { %v7503_v55 = vpop.f32.mrb[30].mxu0  ;;  %v7878_v37 = vmul.f32 1.442695, %v7844_v31 }
 0x9da   :  { %v12922_v1 = vpop.f32.mrb[31].mxu0  ;;  %v7827_v6 = vsel %vm4192_vm4, %v17216_v56, -inf }
 0x9db   :  { %7828 = vmax.xlane.f32.xlu1 %v7827_v6  ;;  %13670 = vpow2.f32 %v7878_v37  ;;  %v17237_v55 = vpop.permute.xlu1 %8964 }
 0x9dc   :  { %19140 = vst [vmem:[#allocation112_spill] sm:$0xff] %v17237_v55 }
 0x9df   :  { %v7604_v20 = vpop.f32.mrb[32].mxu0  ;;  %v17241_v61 = vpop.eup %13668 }
 0x9e0   :  { %v17224_v5 = vmul.f32 0.25, %v7604_v20  ;;  %v12933_v60 = vpop.f32.mrb[33].mxu0 }
 0x9e1   :  { %v7607_v62 = vpop.f32.mrb[34].mxu0  ;;  %v7938_v60 = vsel %vm4192_vm4, %v17241_v61, 0.0 }
 0x9e2   :  { %v12934_v1 = vpop.f32.mrb[35].mxu0  ;;  %v7833_v19 = vsel %vm4192_vm4, %v17224_v5, -inf }
 0x9e3   :  { %7834 = vmax.xlane.f32.xlu1 %v7833_v19  ;;  %v17247_v1 = vpop.permute.xlu1 %9062 }
 0x9e4   :  { %19141 = vst [vmem:[#allocation50_spill] sm:$0xff] %v17247_v1 }
 0x9e5   :  { %v17245_v37 = vpop.eup %13670 }
 0x9e6   :  { %v7944_v19 = vsel %vm4192_vm4, %v17245_v37, 0.0 }
 0x9e7   :  { %7837 = vmax.xlane.f32.xlu1 %v7836_v47  ;;  %v7708_v43 = vpop.f32.mrb[36].mxu0  ;;  %v17251_v47 = vpop.permute.xlu1 %9160 }
 0x9e8   :  { %v17235_v20 = vmul.f32 0.25, %v7708_v43  ;;  %v12945_v31 = vpop.f32.mrb[37].mxu0  ;;  %19142 = vst [vmem:[#allocation87_spill] sm:$0xff] %v17251_v47 }
 0x9e9   :  { %v7711_v62 = vpop.f32.mrb[38].mxu0 }
 0x9ea   :  { %v12946_v39 = vpop.f32.mrb[39].mxu0  ;;  %v7839_v6 = vsel %vm4192_vm4, %v17235_v20, -inf }
 0x9eb   :  { %7840 = vmax.xlane.f32.xlu0 %v7839_v6  ;;  %v17253_v43 = vpop.permute.xlu1 %9258 }
 0x9ec   :  { %19143 = vst [vmem:[#allocation115_spill] sm:$0xff] %v17253_v43 }
 0x9ef   :  { %7939 = vadd.xlane.f32.xlu0 %v7938_v60 }
 0x9f3   :  { %7945 = vadd.xlane.f32.xlu0 %v7944_v19 }
 0xa00   :  { %v7751_v31 = vpop.xlane.xlu1 %7750 }
 0xa01   :  { %v7843_v62 = vsub.f32 %v17066_v32, %v7751_v31 }
 0xa03   :  { %v7876_v39 = vmul.f32 1.442695, %v7843_v62 }
 0xa05   :  { %13672 = vpow2.f32 %v7876_v39 }
 0xa08   :  { %v7757_v6 = vpop.xlane.xlu0 %7756 }
 0xa09   :  { %9307 = vrot.lane.b32.xlu0 %v16579_v40, %s14010_s11 }
 0xa0c   :  { %v7760_v60 = vpop.xlane.xlu0 %7759 }
 0xa0d   :  { %v7846_v47 = vsub.f32 %v17076_v16, %v7760_v60 }
 0xa0f   :  { %v17258_v55 = vpop.eup %13672  ;;  %v7882_v43 = vmul.f32 1.442695, %v7846_v47 }
 0xa10   :  { %v7941_v1 = vsel %vm4192_vm4, %v17258_v55, 0.0  ;;  %v7766_v19 = vpop.xlane.xlu0 %7765  ;;  %v7763_v39 = vpop.xlane.xlu1 %7762 }
 0xa11   :  { %7942 = vadd.xlane.f32.xlu1 %v7941_v1  ;;  %v7848_v2 = vsub.f32 %v17080_v26, %v7766_v19  ;;  %13674 = vpow2.f32 %v7882_v43 }
 0xa13   :  { %v7886_v31 = vmul.f32 1.442695, %v7848_v2 }
 0xa14   :  { %v7772_v32 = vpop.xlane.xlu0 %7771 }
 0xa15   :  { %v7850_v62 = vsub.f32 %v17088_v0, %v7772_v32  ;;  %13676 = vpow2.f32 %v7886_v31 }
 0xa17   :  { %v7890_v40 = vmul.f32 1.442695, %v7850_v62 }
 0xa18   :  { %v7769_v36 = vpop.xlane.xlu1 %7768 }
 0xa19   :  { %13678 = vpow2.f32 %v7890_v40 }
 0xa1b   :  { %v17267_v38 = vpop.eup %13674 }
 0xa1c   :  { %v7950_v16 = vsel %vm4192_vm4, %v17267_v38, 0.0 }
 0xa1f   :  { %v17273_v26 = vpop.eup %13676 }
 0xa20   :  { %v7775_v1 = vpop.xlane.xlu1 %7774 }
 0xa22   :  { %9356 = vrot.lane.b32.xlu1 %v16590_v28, %s14010_s11  ;;  %v7956_v28 = vsel %vm4192_vm4, %v17273_v26, 0.0 }
 0xa23   :  { %v17280_v43 = vpop.eup %13678 }
 0xa26   :  { %9405 = vrot.lane.b32.xlu1 %v16617_v44, %s14010_s11  ;;  %v7962_v44 = vsel %vm4192_vm4, %v17280_v43, 0.0 }
 0xa28   :  { %v7781_v0 = vpop.xlane.xlu1 %7780  ;;  %7951 = vadd.xlane.f32.xlu0 %v7950_v16 }
 0xa29   :  { %v7853_v2 = vsub.f32 %v17130_v12, %v7781_v0  ;;  %v7778_v12 = vpop.xlane.xlu0 %7777 }
 0xa2a   :  { %9454 = vrot.lane.b32.xlu1 %v16626_v3, %s14010_s11  ;;  %v7845_v3 = vsub.f32 %v17072_v52, %v7757_v6 }
 0xa2b   :  { %v7896_v47 = vmul.f32 1.442695, %v7853_v2 }
 0xa2c   :  { %7957 = vadd.xlane.f32.xlu0 %v7956_v28  ;;  %v7847_v28 = vsub.f32 %v17086_v53, %v7763_v39  ;;  %v7851_v53 = vsub.f32 %v17114_v35, %v7775_v1 }
 0xa2d   :  { %13680 = vpow2.f32 %v7896_v47  ;;  %v7784_v0 = vpop.xlane.xlu0 %7783  ;;  %v7880_v47 = vmul.f32 1.442695, %v7845_v3 }
 0xa2e   :  { %v7854_v35 = vsub.f32 %v17101_v42, %v7784_v0 }
 0xa30   :  { %v7787_v60 = vpop.xlane.xlu1 %7786  ;;  %7963 = vadd.xlane.f32.xlu0 %v7962_v44  ;;  %v7884_v44 = vmul.f32 1.442695, %v7847_v28 }
 0xa31   :  { %v7855_v19 = vsub.f32 %v17148_v24, %v7787_v60  ;;  %v7849_v60 = vsub.f32 %v17098_v23, %v7769_v36  ;;  %v7790_v6 = vpop.xlane.xlu0 %7789  ;;  %v7892_v23 = vmul.f32 1.442695, %v7851_v53 }
 0xa33   :  { %v7900_v32 = vmul.f32 1.442695, %v7855_v19  ;;  %v7888_v3 = vmul.f32 1.442695, %v7849_v60  ;;  %v7856_v60 = vsub.f32 %v17108_v10, %v7790_v6 }
 0xa35   :  { %13682 = vpow2.f32 %v7900_v32  ;;  %v7796_v39 = vpop.xlane.xlu0 %7795  ;;  %v7902_v53 = vmul.f32 1.442695, %v7856_v60 }
 0xa37   :  { %v17285_v31 = vpop.eup %13680 }
 0xa38   :  { %v7793_v62 = vpop.xlane.xlu1 %7792  ;;  %v7971_v16 = vsel %vm4192_vm4, %v17285_v31, 0.0 }
 0xa39   :  { %v7857_v40 = vsub.f32 %v17162_v18, %v7793_v62  ;;  %7972 = vadd.xlane.f32.xlu0 %v7971_v16  ;;  %v7802_v1 = vpop.xlane.xlu0 %7801 }
 0xa3b   :  { %v7904_v2 = vmul.f32 1.442695, %v7857_v40  ;;  %v7852_v40 = vsub.f32 %v17094_v33, %v7778_v12 }
 0xa3d   :  { %13684 = vpow2.f32 %v7904_v2  ;;  %v7894_v28 = vmul.f32 1.442695, %v7852_v40  ;;  %v7858_v40 = vsub.f32 %v17117_v57, %v7796_v39 }
 0xa3e   :  { %13686 = vpow2.f32 %v7880_v47 }
 0xa3f   :  { %v17292_v24 = vpop.eup %13682  ;;  %13688 = vpow2.f32 %v7884_v44  ;;  %v7898_v44 = vmul.f32 1.442695, %v7854_v35 }
 0xa40   :  { %v7799_v52 = vpop.xlane.xlu1 %7798  ;;  %v7977_v19 = vsel %vm4192_vm4, %v17292_v24, 0.0 }
 0xa41   :  { %v7859_v18 = vsub.f32 %v17174_v25, %v7799_v52  ;;  %7978 = vadd.xlane.f32.xlu0 %v7977_v19 }
 0xa43   :  { %v7908_v32 = vmul.f32 1.442695, %v7859_v18 }
 0xa45   :  { %13690 = vpow2.f32 %v7908_v32  ;;  %v7808_v32 = vpop.xlane.xlu0 %7807 }
 0xa46   :  { %13692 = vpow2.f32 %v7888_v3 }
 0xa47   :  { %v17299_v62 = vpop.eup %13684  ;;  %13694 = vpow2.f32 %v7892_v23  ;;  %v7906_v23 = vmul.f32 1.442695, %v7858_v40 }
 0xa48   :  { %v7805_v36 = vpop.xlane.xlu1 %7804  ;;  %v7983_v16 = vsel %vm4192_vm4, %v17299_v62, 0.0  ;;  %v17305_v2 = vpop.eup %13686 }
 0xa49   :  { %v7861_v25 = vsub.f32 %v17180_v14, %v7805_v36  ;;  %7984 = vadd.xlane.f32.xlu0 %v7983_v16  ;;  %v7947_v33 = vsel %vm4192_vm4, %v17305_v2, 0.0  ;;  %v17310_v12 = vpop.eup %13688  ;;  %v7860_v36 = vsub.f32 %v17124_v30, %v7802_v1 }
 0xa4a   :  { %v7953_v0 = vsel %vm4192_vm4, %v17310_v12, 0.0 }
 0xa4b   :  { %v7912_v47 = vmul.f32 1.442695, %v7861_v25 }
 0xa4d   :  { %13696 = vpow2.f32 %v7912_v47  ;;  %v7814_v47 = vpop.xlane.xlu0 %7813 }
 0xa4e   :  { %7948 = vadd.xlane.f32.xlu1 %v7947_v33  ;;  %13698 = vpow2.f32 %v7894_v28  ;;  %v7910_v33 = vmul.f32 1.442695, %v7860_v36 }
 0xa4f   :  { %v17312_v14 = vpop.eup %13690  ;;  %13700 = vpow2.f32 %v7898_v44  ;;  %v7862_v44 = vsub.f32 %v17133_v41, %v7808_v32 }
 0xa50   :  { %v7811_v52 = vpop.xlane.xlu1 %7810  ;;  %v7989_v18 = vsel %vm4192_vm4, %v17312_v14, 0.0  ;;  %v17320_v19 = vpop.eup %13692 }
 0xa51   :  { %v7863_v42 = vsub.f32 %v17190_v7, %v7811_v52  ;;  %7990 = vadd.xlane.f32.xlu0 %v7989_v18  ;;  %v7959_v10 = vsel %vm4192_vm4, %v17320_v19, 0.0  ;;  %v17325_v6 = vpop.eup %13694  ;;  %v7820_v60 = vpop.xlane.xlu0 %7819  ;;  %v7914_v52 = vmul.f32 1.442695, %v7862_v44  ;;  %v7864_v18 = vsub.f32 %v17140_v34, %v7814_v47 }
 0xa52   :  { %7954 = vadd.xlane.f32.xlu1 %v7953_v0  ;;  %v7965_v39 = vsel %vm4192_vm4, %v17325_v6, 0.0 }
 0xa53   :  { %v7916_v3 = vmul.f32 1.442695, %v7863_v42  ;;  %v7918_v40 = vmul.f32 1.442695, %v7864_v18 }
 0xa55   :  { %13702 = vpow2.f32 %v7916_v3 }
 0xa56   :  { %7960 = vadd.xlane.f32.xlu1 %v7959_v10  ;;  %13704 = vpow2.f32 %v7902_v53  ;;  %v7866_v10 = vsub.f32 %v17150_v51, %v7820_v60 }
 0xa57   :  { %v17327_v7 = vpop.eup %13696  ;;  %13706 = vpow2.f32 %v7906_v23  ;;  %v7826_v23 = vpop.xlane.xlu0 %7825 }
 0xa58   :  { %v7817_v25 = vpop.xlane.xlu1 %7816  ;;  %v7995_v16 = vsel %vm4192_vm4, %v17327_v7, 0.0  ;;  %v17335_v28 = vpop.eup %13698 }
 0xa59   :  { %v7865_v57 = vsub.f32 %v17198_v4, %v7817_v25  ;;  %7996 = vadd.xlane.f32.xlu0 %v7995_v16  ;;  %v7968_v30 = vsel %vm4192_vm4, %v17335_v28, 0.0  ;;  %v17340_v1 = vpop.eup %13700  ;;  %v7922_v25 = vmul.f32 1.442695, %v7866_v10  ;;  %v7868_v16 = vsub.f32 %v17156_v9, %v7826_v23 }
 0xa5a   :  { %7966 = vadd.xlane.f32.xlu1 %v7965_v39  ;;  %v7974_v32 = vsel %vm4192_vm4, %v17340_v1, 0.0 }
 0xa5b   :  { %v7920_v35 = vmul.f32 1.442695, %v7865_v57  ;;  %v7926_v44 = vmul.f32 1.442695, %v7868_v16 }
 0xa5d   :  { %13708 = vpow2.f32 %v7920_v35 }
 0xa5e   :  { %7969 = vadd.xlane.f32.xlu1 %v7968_v30  ;;  %13710 = vpow2.f32 %v7910_v33 }
 0xa5f   :  { %v17342_v4 = vpop.eup %13702  ;;  %13712 = vpow2.f32 %v7914_v52 }
 0xa60   :  { %v7823_v42 = vpop.xlane.xlu1 %7822  ;;  %v8001_v0 = vsel %vm4192_vm4, %v17342_v4, 0.0  ;;  %v17350_v3 = vpop.eup %13704 }
 0xa61   :  { %v7867_v41 = vsub.f32 %v17206_v27, %v7823_v42  ;;  %8002 = vadd.xlane.f32.xlu0 %v8001_v0  ;;  %v7980_v34 = vsel %vm4192_vm4, %v17350_v3, 0.0  ;;  %v17355_v36 = vpop.eup %13706  ;;  %v7832_v42 = vpop.xlane.xlu0 %7831 }
 0xa62   :  { %7975 = vadd.xlane.f32.xlu1 %v7974_v32  ;;  %v7986_v39 = vsel %vm4192_vm4, %v17355_v36, 0.0 }
 0xa63   :  { %v7924_v53 = vmul.f32 1.442695, %v7867_v41 }
 0xa65   :  { %13714 = vpow2.f32 %v7924_v53 }
 0xa66   :  { %7981 = vadd.xlane.f32.xlu1 %v7980_v34  ;;  %13716 = vpow2.f32 %v7918_v40 }
 0xa67   :  { %v17357_v27 = vpop.eup %13708  ;;  %13718 = vpow2.f32 %v7922_v25 }
 0xa68   :  { %v7829_v47 = vpop.xlane.xlu1 %7828  ;;  %v8007_v57 = vsel %vm4192_vm4, %v17357_v27, 0.0  ;;  %v17365_v35 = vpop.eup %13710 }
 0xa69   :  { %v7869_v51 = vsub.f32 %v17216_v56, %v7829_v47  ;;  %8008 = vadd.xlane.f32.xlu0 %v8007_v57  ;;  %v7992_v9 = vsel %vm4192_vm4, %v17365_v35, 0.0  ;;  %v17369_v30 = vpop.eup %13712 }
 0xa6a   :  { %7987 = vadd.xlane.f32.xlu1 %v7986_v39  ;;  %v7998_v52 = vsel %vm4192_vm4, %v17369_v30, 0.0 }
 0xa6b   :  { %v7928_v33 = vmul.f32 1.442695, %v7869_v51 }
 0xa6d   :  { %13720 = vpow2.f32 %v7928_v33  ;;  %v8235_v33 = vsel %vm4580_vm3, %v17112_v21, 0  ;;  %v8333_v21 = vsel %vm4580_vm3, %v17128_v63, 0 }
 0xa6e   :  { %7993 = vadd.xlane.f32.xlu1 %v7992_v9  ;;  %13722 = vpow2.f32 %v7926_v44 }
 0xa6f   :  { %v17371_v60 = vpop.eup %13714 }
 0xa70   :  { %v8013_v56 = vsel %vm4192_vm4, %v17371_v60, 0.0  ;;  %v17377_v18 = vpop.eup %13716  ;;  %v7835_v9 = vpop.xlane.xlu1 %7834 }
 0xa71   :  { %8014 = vadd.xlane.f32.xlu0 %v8013_v56  ;;  %v8004_v0 = vsel %vm4192_vm4, %v17377_v18, 0.0  ;;  %v17381_v41 = vpop.eup %13718 }
 0xa72   :  { %7999 = vadd.xlane.f32.xlu1 %v7998_v52  ;;  %v8010_v10 = vsel %vm4192_vm4, %v17381_v41, 0.0  ;;  %v7870_v52 = vsub.f32 %v17164_v13, %v7832_v42  ;;  %v8284_v42 = vsel %vm4580_vm3, %v17188_v15, 0 }
 0xa76   :  { %8005 = vadd.xlane.f32.xlu1 %v8004_v0 }
 0xa77   :  { %v17383_v32 = vpop.eup %13720 }
 0xa78   :  { %v7841_v53 = vpop.xlane.xlu0 %7840  ;;  %v8019_v40 = vsel %vm4192_vm4, %v17383_v32, 0.0  ;;  %v17389_v23 = vpop.eup %13722 }
 0xa79   :  { %8020 = vadd.xlane.f32.xlu0 %v8019_v40  ;;  %v8016_v25 = vsel %vm4192_vm4, %v17389_v23, 0.0  ;;  %v7930_v40 = vmul.f32 1.442695, %v7870_v52  ;;  %v8529_v52 = vsel %vm4580_vm3, %v17160_v11, 0 }
 0xa7a   :  { %8011 = vadd.xlane.f32.xlu1 %v8010_v10 }
 0xa7c   :  { %v7940_v34 = vpop.xlane.xlu0 %7939 }
 0xa7d   :  { %13724 = vrcp.f32 %v7940_v34 }
 0xa7e   :  { %8017 = vadd.xlane.f32.xlu1 %v8016_v25 }
 0xa80   :  { %v7946_v16 = vpop.xlane.xlu0 %7945 }
 0xa81   :  { %13726 = vrcp.f32 %v7946_v16 }
 0xa87   :  { %v13725_v47 = vpop.eup %13724 }
 0xa88   :  { %v8066_v57 = vmul.f32 %v13725_v47, %v17241_v61 }
 0xa8a   :  { %v8098_v51 = vpack.c.bf16 %v8066_v57, %v8066_v57 }
 0xa8b   :  { %v13727_v39 = vpop.eup %13726 }
 0xa8c   :  { %12950 = vmatmul.mubr.msk.bf16.vlgmr.msra.gmra.mrb[24].mxu1 %vm4192_vm4, %v8098_v51  ;;  %v8068_v44 = vmul.f32 %v13727_v39, %v17245_v37  ;;  %v7838_v37 = vpop.xlane.xlu1 %7837 }
 0xa8d   :  { %12960 = vmatpush3.bf16.msra.mxu1 %v8235_v33  ;;  %12961 = vmatprep.mubr.msk.bf16.mxu1 %vm14009_vm1, %v18997_v50  ;;  %v7872_v10 = vsub.f32 %v17227_v45, %v7838_v37  ;;  %v8431_v37 = vsel %vm4580_vm3, %v17144_v49, 0 }
 0xa8e   :  { %12971 = vmatprep.subr.bf16.mxu1 %v18997_v50  ;;  %v8100_v61 = vpack.c.bf16 %v8068_v44, %v8068_v44 }
 0xa8f   :  { %9552 = vrot.lane.b32.xlu1 %v16656_v17, %s14010_s11  ;;  %9503 = vrot.lane.b32.xlu0 %v16644_v48, %s14010_s11  ;;  %v7871_v17 = vsub.f32 %v17224_v5, %v7835_v9  ;;  %v7873_v48 = vsub.f32 %v17235_v20, %v7841_v53  ;;  %v7934_v34 = vmul.f32 1.442695, %v7872_v10 }
 0xa91   :  { %v7932_v56 = vmul.f32 1.442695, %v7871_v17  ;;  %v7936_v63 = vmul.f32 1.442695, %v7873_v48 }
 0xa94   :  { %12962 = vmatmul.mubr.msk.bf16.vlgmr.msra.gmra.mrb[28].mxu1 %vm4192_vm4, %v8100_v61 }
 0xa95   :  { %12972 = vmatpush3.bf16.msra.mxu1 %v8333_v21  ;;  %12973 = vmatprep.mubr.msk.bf16.mxu1 %vm14009_vm1, %v18997_v50 }
 0xa96   :  { %12983 = vmatprep.subr.bf16.mxu1 %v18997_v50 }
 0xa9e   :  { %v7943_v0 = vpop.xlane.xlu1 %7942 }
 0xa9f   :  { %13728 = vrcp.f32 %v7943_v0  ;;  %v8627_v0 = vsel %vm4580_vm3, %v17170_v54, 0 }
 0xaa0   :  { %13730 = vpow2.f32 %v7932_v56 }
 0xaa1   :  { %13732 = vpow2.f32 %v7936_v63 }
 0xaa2   :  { %13734 = vpow2.f32 %v7930_v40 }
 0xaa3   :  { %13736 = vpow2.f32 %v7934_v34 }
 0xaa9   :  { %v13729_v25 = vpop.eup %13728 }
 0xaaa   :  { %v17415_v16 = vpop.eup %13730  ;;  %v8067_v5 = vmul.f32 %v13729_v25, %v17258_v55  ;;  %v17430_v55 = vpop.permute.xlu0 %9307 }
 0xaab   :  { %v8025_v13 = vsel %vm4192_vm4, %v17415_v16, 0.0  ;;  %v17420_v20 = vpop.eup %13732 }
 0xaac   :  { %v8099_v47 = vpack.c.bf16 %v8067_v5, %v8067_v5  ;;  %v17425_v45 = vpop.eup %13734  ;;  %v8031_v53 = vsel %vm4192_vm4, %v17420_v20, 0.0 }
 0xaad   :  { %v8022_v15 = vsel %vm4192_vm4, %v17425_v45, 0.0  ;;  %v17436_v57 = vpop.eup %13736 }
 0xaae   :  { %12956 = vmatmul.mubr.msk.bf16.vlgmr.msra.gmra.mrb[40].mxu0 %vm4192_vm4, %v8099_v47  ;;  %8026 = vadd.xlane.f32.xlu0 %v8025_v13  ;;  %v8028_v39 = vsel %vm4192_vm4, %v17436_v57, 0.0  ;;  %v8382_v47 = vsel %vm4580_vm3, %v17196_v22, 0  ;;  %v8480_v22 = vsel %vm4580_vm3, %v17204_v8, 0 }
 0xaaf   :  { %12966 = vmatpush3.bf16.msra.mxu0 %v8284_v42  ;;  %12967 = vmatprep.mubr.msk.bf16.mxu0 %vm14009_vm1, %v18997_v50 }
 0xab0   :  { %12977 = vmatprep.subr.bf16.mxu0 %v18997_v50 }
 0xab2   :  { %8032 = vadd.xlane.f32.xlu0 %v8031_v53 }
 0xab3   :  { %8023 = vadd.xlane.f32.xlu1 %v8022_v15 }
 0xab5   :  { %v7952_v51 = vpop.xlane.xlu0 %7951 }
 0xab6   :  { %13738 = vrcp.f32 %v7952_v51 }
 0xab7   :  { %8029 = vadd.xlane.f32.xlu1 %v8028_v39 }
 0xab9   :  { %v7958_v33 = vpop.xlane.xlu0 %7957 }
 0xaba   :  { %13740 = vrcp.f32 %v7958_v33 }
 0xabd   :  { %v7964_v44 = vpop.xlane.xlu0 %7963 }
 0xabe   :  { %13742 = vrcp.f32 %v7964_v44 }
 0xac0   :  { %v13739_v61 = vpop.eup %13738 }
 0xac1   :  { %v8070_v9 = vmul.f32 %v13739_v61, %v17267_v38  ;;  %v17452_v38 = vpop.permute.xlu1 %9356 }
 0xac3   :  { %v8102_v21 = vpack.c.bf16 %v8070_v9, %v8070_v9 }
 0xac4   :  { %v13741_v17 = vpop.eup %13740 }
 0xac5   :  { %12974 = vmatmul.mubr.msk.bf16.vlgmr.msra.gmra.mrb[32].mxu1 %vm4192_vm4, %v8102_v21  ;;  %v8072_v56 = vmul.f32 %v13741_v17, %v17273_v26  ;;  %v8725_v17 = vsel %vm4580_vm3, %v17178_v46, 0 }
 0xac6   :  { %12984 = vmatpush3.bf16.msra.mxu1 %v8431_v37  ;;  %12985 = vmatprep.mubr.msk.bf16.mxu1 %vm14009_vm1, %v18997_v50  ;;  %v7973_v51 = vpop.xlane.xlu0 %7972  ;;  %v8578_v37 = vsel %vm4580_vm3, %v17210_v29, 0 }
 0xac7   :  { %12995 = vmatprep.subr.bf16.mxu1 %v18997_v50  ;;  %v8104_v48 = vpack.c.bf16 %v8072_v56, %v8072_v56 }
 0xac8   :  { %9650 = vrot.lane.b32.xlu1 %v16753_v58, %s14010_s11  ;;  %9601 = vrot.lane.b32.xlu0 %v16689_v59, %s14010_s11  ;;  %v13743_v49 = vpop.eup %13742  ;;  %v17461_v58 = vpop.permute.xlu1 %9405 }
 0xac9   :  { %v8074_v26 = vmul.f32 %v13743_v49, %v17280_v43 }
 0xacb   :  { %v8106_v59 = vpack.c.bf16 %v8074_v26, %v8074_v26  ;;  %v19145_v26 = vld [vmem:[#allocation110_spill] sm:$0xff] }
 0xacc   :  { %v17468_v11 = vpop.permute.xlu1 %9454 }
 0xacd   :  { %12986 = vmatmul.mubr.msk.bf16.vlgmr.msra.gmra.mrb[36].mxu1 %vm4192_vm4, %v8104_v48 }
 0xace   :  { %12996 = vmatpush3.bf16.msra.mxu1 %v8529_v52  ;;  %12997 = vmatprep.mubr.msk.bf16.mxu1 %vm14009_vm1, %v18997_v50 }
 0xacf   :  { %13007 = vmatprep.subr.bf16.mxu1 %v18997_v50 }
 0xad5   :  { %12998 = vmatmul.mubr.msk.bf16.vlgmr.msra.gmra.mrb[40].mxu1 %vm4192_vm4, %v8106_v59  ;;  %v8676_v59 = vsel %vm4580_vm3, %v19145_v26, 0 }
 0xad6   :  { %13008 = vmatpush3.bf16.msra.mxu1 %v8627_v0  ;;  %13009 = vmatprep.mubr.msk.bf16.mxu1 %vm14009_vm1, %v18997_v50 }
 0xad7   :  { %13019 = vmatprep.subr.bf16.mxu1 %v18997_v50 }
 0xadb   :  { %v7949_v63 = vpop.xlane.xlu1 %7948 }
 0xadc   :  { %13744 = vrcp.f32 %v7949_v63 }
 0xadf   :  { %v7955_v43 = vpop.xlane.xlu1 %7954 }
 0xae0   :  { %13746 = vrcp.f32 %v7955_v43 }
 0xae3   :  { %v7961_v40 = vpop.xlane.xlu1 %7960 }
 0xae4   :  { %13748 = vrcp.f32 %v7961_v40 }
 0xae6   :  { %v13745_v10 = vpop.eup %13744 }
 0xae7   :  { %v8069_v34 = vmul.f32 %v13745_v10, %v17305_v2  ;;  %v7967_v25 = vpop.xlane.xlu1 %7966 }
 0xae9   :  { %v8101_v54 = vpack.c.bf16 %v8069_v34, %v8069_v34 }
 0xaea   :  { %v13747_v5 = vpop.eup %13746 }
 0xaeb   :  { %12968 = vmatmul.mubr.msk.bf16.vlgmr.msra.gmra.mrb[44].mxu0 %vm4192_vm4, %v8101_v54  ;;  %v7970_v13 = vpop.xlane.xlu1 %7969  ;;  %v8071_v42 = vmul.f32 %v13747_v5, %v17310_v12  ;;  %v19147_v5 = vld [vmem:[#allocation47_spill] sm:$0xff] }
 0xaec   :  { %12978 = vmatpush3.bf16.msra.mxu0 %v8382_v47  ;;  %13750 = vrcp.f32 %v7970_v13  ;;  %12979 = vmatprep.mubr.msk.bf16.mxu0 %vm14009_vm1, %v18997_v50  ;;  %v8774_v47 = vsel %vm4580_vm3, %v19147_v5, 0 }
 0xaed   :  { %12989 = vmatprep.subr.bf16.mxu0 %v18997_v50  ;;  %13752 = vrcp.f32 %v7967_v25  ;;  %v8103_v53 = vpack.c.bf16 %v8071_v42, %v8071_v42 }
 0xaee   :  { %v13749_v15 = vpop.eup %13748 }
 0xaef   :  { %v7976_v2 = vpop.xlane.xlu1 %7975  ;;  %v8073_v39 = vmul.f32 %v13749_v15, %v17320_v19  ;;  %v7979_v19 = vpop.xlane.xlu0 %7978 }
 0xaf0   :  { %13754 = vrcp.f32 %v7976_v2 }
 0xaf1   :  { %13756 = vrcp.f32 %v7973_v51  ;;  %v8105_v9 = vpack.c.bf16 %v8073_v39, %v8073_v39 }
 0xaf3   :  { %12980 = vmatmul.mubr.msk.bf16.vlgmr.msra.gmra.mrb[48].mxu0 %vm4192_vm4, %v8103_v53  ;;  %v7982_v12 = vpop.xlane.xlu1 %7981  ;;  %v7985_v0 = vpop.xlane.xlu0 %7984 }
 0xaf4   :  { %12990 = vmatpush3.bf16.msra.mxu0 %v8480_v22  ;;  %12991 = vmatprep.mubr.msk.bf16.mxu0 %vm14009_vm1, %v18997_v50  ;;  %13758 = vrcp.f32 %v7982_v12  ;;  %v19149_v12 = vld [vmem:[#allocation88_spill] sm:$0xff] }
 0xaf5   :  { %13001 = vmatprep.subr.bf16.mxu0 %v18997_v50  ;;  %13760 = vrcp.f32 %v7979_v19 }
 0xaf6   :  { %v13751_v33 = vpop.eup %13750 }
 0xaf7   :  { %v8076_v44 = vmul.f32 %v13751_v33, %v17335_v28  ;;  %v13753_v61 = vpop.eup %13752  ;;  %v7988_v48 = vpop.xlane.xlu1 %7987  ;;  %v8872_v33 = vsel %vm4580_vm3, %v19149_v12, 0 }
 0xaf8   :  { %v8075_v28 = vmul.f32 %v13753_v61, %v17325_v6  ;;  %13762 = vrcp.f32 %v7988_v48  ;;  %v19144_v6 = vld [vmem:[#allocation79_spill] sm:$0xff]  ;;  %v7991_v13 = vpop.xlane.xlu0 %7990 }
 0xaf9   :  { %v8108_v8 = vpack.c.bf16 %v8076_v44, %v8076_v44  ;;  %13764 = vrcp.f32 %v7985_v0 }
 0xafa   :  { %v13755_v21 = vpop.eup %13754  ;;  %v8107_v29 = vpack.c.bf16 %v8075_v28, %v8075_v28  ;;  %v19151_v28 = vld [vmem:[#allocation112_spill] sm:$0xff] }
 0xafb   :  { %12992 = vmatmul.mubr.msk.bf16.vlgmr.msra.gmra.mrb[52].mxu0 %vm4192_vm4, %v8105_v9  ;;  %13010 = vmatmul.mubr.msk.bf16.vlgmr.msra.gmra.mrb[44].mxu1 %vm4192_vm4, %v8108_v8  ;;  %v8078_v56 = vmul.f32 %v13755_v21, %v17340_v1  ;;  %v13757_v46 = vpop.eup %13756  ;;  %v8823_v1 = vsel %vm4580_vm3, %v19144_v6, 0  ;;  %v7994_v40 = vpop.xlane.xlu1 %7993 }
 0xafc   :  { %13002 = vmatpush3.bf16.msra.mxu0 %v8578_v37  ;;  %13020 = vmatpush3.bf16.msra.mxu1 %v8725_v17  ;;  %v8077_v63 = vmul.f32 %v13757_v46, %v17285_v31  ;;  %13766 = vrcp.f32 %v7994_v40  ;;  %v19146_v31 = vld [vmem:[#allocation45_spill] sm:$0xff]  ;;  %v7997_v44 = vpop.xlane.xlu0 %7996 }
 0xafd   :  { %13003 = vmatprep.mubr.msk.bf16.mxu0 %vm14009_vm1, %v18997_v50  ;;  %13013 = vmatprep.subr.bf16.mxu0 %v18997_v50  ;;  %v8110_v49 = vpack.c.bf16 %v8078_v56, %v8078_v56  ;;  %13768 = vrcp.f32 %v7991_v13  ;;  %v8970_v56 = vsel %vm4580_vm3, %v19151_v28, 0 }
 0xafe   :  { %13021 = vmatprep.mubr.msk.bf16.mxu1 %vm14009_vm1, %v18997_v50  ;;  %13031 = vmatprep.subr.bf16.mxu1 %v18997_v50  ;;  %v13759_v52 = vpop.eup %13758  ;;  %v8109_v34 = vpack.c.bf16 %v8077_v63, %v8077_v63 }
 0xaff   :  { %v8080_v43 = vmul.f32 %v13759_v52, %v17350_v3  ;;  %v13761_v10 = vpop.eup %13760  ;;  %v8921_v3 = vsel %vm4580_vm3, %v19146_v31, 0  ;;  %v8000_v53 = vpop.xlane.xlu1 %7999 }
 0xb00   :  { %v8079_v42 = vmul.f32 %v13761_v10, %v17292_v24  ;;  %13770 = vrcp.f32 %v8000_v53  ;;  %v19148_v24 = vld [vmem:[#allocation83_spill] sm:$0xff]  ;;  %v8003_v48 = vpop.xlane.xlu0 %8002 }
 0xb01   :  { %v8112_v25 = vpack.c.bf16 %v8080_v43, %v8080_v43  ;;  %13772 = vrcp.f32 %v7997_v44 }
 0xb02   :  { %v13763_v54 = vpop.eup %13762  ;;  %v8111_v22 = vpack.c.bf16 %v8079_v42, %v8079_v42 }
 0xb03   :  { %13004 = vmatmul.mubr.msk.bf16.vlgmr.msra.gmra.mrb[56].mxu0 %vm4192_vm4, %v8107_v29  ;;  %13022 = vmatmul.mubr.msk.bf16.vlgmr.msra.gmra.mrb[48].mxu1 %vm4192_vm4, %v8110_v49  ;;  %v8082_v2 = vmul.f32 %v13763_v54, %v17355_v36  ;;  %v13765_v15 = vpop.eup %13764  ;;  %v9019_v36 = vsel %vm4580_vm3, %v19148_v24, 0  ;;  %v8006_v8 = vpop.xlane.xlu1 %8005 }
 0xb04   :  { %13014 = vmatpush3.bf16.msra.mxu0 %v8676_v59  ;;  %13032 = vmatpush3.bf16.msra.mxu1 %v8823_v1  ;;  %v8081_v61 = vmul.f32 %v13765_v15, %v17299_v62  ;;  %13774 = vrcp.f32 %v8006_v8  ;;  %v19150_v62 = vld [vmem:[#allocation48_spill] sm:$0xff]  ;;  %v19153_v59 = vld [vmem:[#allocation50_spill] sm:$0xff]  ;;  %v8009_v63 = vpop.xlane.xlu0 %8008 }
 0xb05   :  { %13015 = vmatprep.mubr.msk.bf16.mxu0 %vm14009_vm1, %v18997_v50  ;;  %13025 = vmatprep.subr.bf16.mxu0 %v18997_v50  ;;  %v8114_v51 = vpack.c.bf16 %v8082_v2, %v8082_v2  ;;  %13776 = vrcp.f32 %v8003_v48  ;;  %v9068_v0 = vsel %vm4580_vm3, %v19153_v59, 0 }
 0xb06   :  { %13033 = vmatprep.mubr.msk.bf16.mxu1 %vm14009_vm1, %v18997_v50  ;;  %13043 = vmatprep.subr.bf16.mxu1 %v18997_v50  ;;  %v13767_v39 = vpop.eup %13766  ;;  %v8113_v17 = vpack.c.bf16 %v8081_v61, %v8081_v61 }
 0xb07   :  { %v8084_v9 = vmul.f32 %v13767_v39, %v17365_v35  ;;  %v13769_v21 = vpop.eup %13768  ;;  %v9117_v35 = vsel %vm4580_vm3, %v19150_v62, 0  ;;  %v8012_v49 = vpop.xlane.xlu1 %8011 }
 0xb08   :  { %v8083_v46 = vmul.f32 %v13769_v21, %v17312_v14  ;;  %13778 = vrcp.f32 %v8012_v49  ;;  %v19152_v14 = vld [vmem:[#allocation85_spill] sm:$0xff]  ;;  %v9460_v21 = vsel %vm4580_vm3, %v17468_v11, 0 }
 0xb09   :  { %v8116_v37 = vpack.c.bf16 %v8084_v9, %v8084_v9  ;;  %13780 = vrcp.f32 %v8009_v63 }
 0xb0a   :  { %v13771_v19 = vpop.eup %13770  ;;  %v8115_v6 = vpack.c.bf16 %v8083_v46, %v8083_v46 }
 0xb0b   :  { %13016 = vmatmul.mubr.msk.bf16.vlgmr.msra.gmra.mrb[60].mxu0 %vm4192_vm4, %v8109_v34  ;;  %13034 = vmatmul.mubr.msk.bf16.vlgmr.msra.gmra.mrb[52].mxu1 %vm4192_vm4, %v8112_v25  ;;  %v8086_v29 = vmul.f32 %v13771_v19, %v17369_v30  ;;  %v13773_v52 = vpop.eup %13772  ;;  %v9215_v30 = vsel %vm4580_vm3, %v19152_v14, 0  ;;  %v8018_v10 = vpop.xlane.xlu1 %8017 }
 0xb0c   :  { %13026 = vmatpush3.bf16.msra.mxu0 %v8774_v47  ;;  %13044 = vmatpush3.bf16.msra.mxu1 %v8921_v3  ;;  %v8085_v43 = vmul.f32 %v13773_v52, %v17327_v7  ;;  %13782 = vrcp.f32 %v8018_v10  ;;  %v19154_v7 = vld [vmem:[#allocation87_spill] sm:$0xff]  ;;  %v9313_v3 = vsel %vm4580_vm3, %v17430_v55, 0  ;;  %v8015_v47 = vpop.xlane.xlu0 %8014 }
 0xb0d   :  { %13027 = vmatprep.mubr.msk.bf16.mxu0 %vm14009_vm1, %v18997_v50  ;;  %13037 = vmatprep.subr.bf16.mxu0 %v18997_v50  ;;  %v8118_v1 = vpack.c.bf16 %v8086_v29, %v8086_v29  ;;  %13784 = vrcp.f32 %v8015_v47 }
 0xb0e   :  { %13045 = vmatprep.mubr.msk.bf16.mxu1 %vm14009_vm1, %v18997_v50  ;;  %13055 = vmatprep.subr.bf16.mxu1 %v18997_v50  ;;  %v13775_v26 = vpop.eup %13774  ;;  %v8117_v25 = vpack.c.bf16 %v8085_v43, %v8085_v43 }
 0xb0f   :  { %v8088_v40 = vmul.f32 %v13775_v26, %v17377_v18  ;;  %v13777_v34 = vpop.eup %13776  ;;  %v9166_v18 = vsel %vm4580_vm3, %v19154_v7, 0 }
 0xb10   :  { %v8087_v5 = vmul.f32 %v13777_v34, %v17342_v4  ;;  %v8021_v15 = vpop.xlane.xlu0 %8020  ;;  %v19155_v4 = vld [vmem:[#allocation115_spill] sm:$0xff] }
 0xb11   :  { %v8120_v54 = vpack.c.bf16 %v8088_v40, %v8088_v40  ;;  %13786 = vrcp.f32 %v8021_v15 }
 0xb12   :  { %v13779_v31 = vpop.eup %13778  ;;  %v8119_v42 = vpack.c.bf16 %v8087_v5, %v8087_v5 }
 0xb13   :  { %13028 = vmatmul.mubr.msk.bf16.vlgmr.msra.gmra.mrb[64].mxu0 %vm4192_vm4, %v8111_v22  ;;  %13046 = vmatmul.mubr.msk.bf16.vlgmr.msra.gmra.mrb[56].mxu1 %vm4192_vm4, %v8114_v51  ;;  %v8090_v13 = vmul.f32 %v13779_v31, %v17381_v41  ;;  %v13781_v55 = vpop.eup %13780  ;;  %v9264_v22 = vsel %vm4580_vm3, %v19155_v4, 0  ;;  %v9411_v41 = vsel %vm4580_vm3, %v17461_v58, 0 }
 0xb14   :  { %13038 = vmatpush3.bf16.msra.mxu0 %v8872_v33  ;;  %13056 = vmatpush3.bf16.msra.mxu1 %v9019_v36  ;;  %v8089_v51 = vmul.f32 %v13781_v55, %v17357_v27  ;;  %v9504_v58 = vpop.permute.xlu0 %9503  ;;  %v9362_v27 = vsel %vm4580_vm3, %v17452_v38, 0  ;;  %v9553_v33 = vpop.permute.xlu1 %9552 }
 0xb15   :  { %13039 = vmatprep.mubr.msk.bf16.mxu0 %vm14009_vm1, %v18997_v50  ;;  %13049 = vmatprep.subr.bf16.mxu0 %v18997_v50  ;;  %v8122_v2 = vpack.c.bf16 %v8090_v13, %v8090_v13  ;;  %v9558_v28 = vsel %vm4580_vm3, %v9553_v33, 0 }
 0xb16   :  { %13057 = vmatprep.mubr.msk.bf16.mxu1 %vm14009_vm1, %v18997_v50  ;;  %13067 = vmatprep.subr.bf16.mxu1 %v18997_v50  ;;  %v13783_v53 = vpop.eup %13782  ;;  %v8121_v24 = vpack.c.bf16 %v8089_v51, %v8089_v51 }
 0xb17   :  { %v8092_v39 = vmul.f32 %v13783_v53, %v17389_v23  ;;  %v13785_v12 = vpop.eup %13784  ;;  %v9509_v23 = vsel %vm4580_vm3, %v9504_v58, 0 }
 0xb18   :  { %v8091_v44 = vmul.f32 %v13785_v12, %v17371_v60 }
 0xb19   :  { %v8124_v36 = vpack.c.bf16 %v8092_v39, %v8092_v39 }
 0xb1a   :  { %v8123_v9 = vpack.c.bf16 %v8091_v44, %v8091_v44 }
 0xb1b   :  { %13040 = vmatmul.mubr.msk.bf16.vlgmr.msra.gmra.mrb[68].mxu0 %vm4192_vm4, %v8113_v17  ;;  %13058 = vmatmul.mubr.msk.bf16.vlgmr.msra.gmra.mrb[60].mxu1 %vm4192_vm4, %v8116_v37  ;;  %v13787_v8 = vpop.eup %13786 }
 0xb1c   :  { %13050 = vmatpush3.bf16.msra.mxu0 %v8970_v56  ;;  %13068 = vmatpush3.bf16.msra.mxu1 %v9117_v35  ;;  %v8093_v17 = vmul.f32 %v13787_v8, %v17383_v32 }
 0xb1d   :  { %13051 = vmatprep.mubr.msk.bf16.mxu0 %vm14009_vm1, %v18997_v50  ;;  %13061 = vmatprep.subr.bf16.mxu0 %v18997_v50 }
 0xb1e   :  { %13069 = vmatprep.mubr.msk.bf16.mxu1 %vm14009_vm1, %v18997_v50  ;;  %13079 = vmatprep.subr.bf16.mxu1 %v18997_v50  ;;  %v8125_v19 = vpack.c.bf16 %v8093_v17, %v8093_v17 }
 0xb23   :  { %13052 = vmatmul.mubr.msk.bf16.vlgmr.msra.gmra.mrb[72].mxu0 %vm4192_vm4, %v8115_v6  ;;  %13070 = vmatmul.mubr.msk.bf16.vlgmr.msra.gmra.mrb[64].mxu1 %vm4192_vm4, %v8118_v1 }
 0xb24   :  { %13062 = vmatpush3.bf16.msra.mxu0 %v9068_v0  ;;  %13080 = vmatpush3.bf16.msra.mxu1 %v9215_v30  ;;  %v19156_v30 = vmov 0  }
 0xb25   :  { %13063 = vmatprep.mubr.msk.bf16.mxu0 %vm14009_vm1, %v18997_v50  ;;  %13073 = vmatprep.subr.bf16.mxu0 %v18997_v50 }
 0xb26   :  { %13081 = vmatprep.mubr.msk.bf16.mxu1 %vm14009_vm1, %v18997_v50  ;;  %13091 = vmatprep.subr.bf16.mxu1 %v18997_v50 }
 0xb2b   :  { %13064 = vmatmul.mubr.msk.bf16.vlgmr.msra.gmra.mrb[76].mxu0 %vm4192_vm4, %v8117_v25  ;;  %13082 = vmatmul.mubr.msk.bf16.vlgmr.msra.gmra.mrb[68].mxu1 %vm4192_vm4, %v8120_v54 }
 0xb2c   :  { %13074 = vmatpush3.bf16.msra.mxu0 %v9166_v18  ;;  %13092 = vmatpush3.bf16.msra.mxu1 %v9313_v3 }
 0xb2d   :  { %13075 = vmatprep.mubr.msk.bf16.mxu0 %vm14009_vm1, %v18997_v50  ;;  %13085 = vmatprep.subr.bf16.mxu0 %v18997_v50 }
 0xb2e   :  { %13093 = vmatprep.mubr.msk.bf16.mxu1 %vm14009_vm1, %v18997_v50  ;;  %13103 = vmatprep.subr.bf16.mxu1 %v18997_v50 }
 0xb33   :  { %13076 = vmatmul.mubr.msk.bf16.vlgmr.msra.gmra.mrb[80].mxu0 %vm4192_vm4, %v8119_v42  ;;  %13094 = vmatmul.mubr.msk.bf16.vlgmr.msra.gmra.mrb[72].mxu1 %vm4192_vm4, %v8122_v2 }
 0xb34   :  { %13086 = vmatpush3.bf16.msra.mxu0 %v9264_v22  ;;  %13104 = vmatpush3.bf16.msra.mxu1 %v9411_v41  ;;  %v13332_v22 = vld [vmem:[%s18775_s12] sm:$0xff]   ;;  %v13333_v41 = vld [vmem:[%s18775_s12 + $0x8] sm:$0xff]  }
 0xb35   :  { %13087 = vmatprep.mubr.msk.bf16.mxu0 %vm14009_vm1, %v18997_v50  ;;  %13097 = vmatprep.subr.bf16.mxu0 %v18997_v50 }
 0xb36   :  { %13105 = vmatprep.mubr.msk.bf16.mxu1 %vm14009_vm1, %v18997_v50  ;;  %13115 = vmatprep.subr.bf16.mxu1 %v18997_v50 }
 0xb3b   :  { %13088 = vmatmul.mubr.msk.bf16.vlgmr.msra.gmra.mrb[84].mxu0 %vm4192_vm4, %v8121_v24  ;;  %13106 = vmatmul.mubr.msk.bf16.vlgmr.msra.gmra.mrb[76].mxu1 %vm4192_vm4, %v8124_v36  ;;  %v8027_v61 = vpop.xlane.xlu0 %8026 }
 0xb3c   :  { %13098 = vmatpush3.bf16.msra.mxu0 %v9362_v27  ;;  %13116 = vmatpush3.bf16.msra.mxu1 %v9509_v23  ;;  %13788 = vrcp.f32 %v8027_v61 }
 0xb3d   :  { %13099 = vmatprep.mubr.msk.bf16.mxu0 %vm14009_vm1, %v18997_v50  ;;  %13109 = vmatprep.subr.bf16.mxu0 %v18997_v50 }
 0xb3e   :  { %13117 = vmatprep.mubr.msk.bf16.mxu1 %vm14009_vm1, %v18997_v50  ;;  %13127 = vmatprep.subr.bf16.mxu1 %v18997_v50 }
 0xb3f   :  { %v8033_v37 = vpop.xlane.xlu0 %8032 }
 0xb40   :  { %v8024_v38 = vpop.xlane.xlu1 %8023 }
 0xb41   :  { %13790 = vrcp.f32 %v8024_v38 }
 0xb43   :  { %13100 = vmatmul.mubr.msk.bf16.vlgmr.msra.gmra.mrb[88].mxu0 %vm4192_vm4, %v8123_v9  ;;  %v9602_v56 = vpop.permute.xlu0 %9601 }
 0xb44   :  { %13110 = vmatpush3.bf16.msra.mxu0 %v9460_v21  ;;  %v8030_v60 = vpop.xlane.xlu1 %8029  ;;  %13111 = vmatprep.mubr.msk.bf16.mxu0 %vm14009_vm1, %v18997_v50  ;;  %v9607_v29 = vsel %vm4580_vm3, %v9602_v56, 0 }
 0xb45   :  { %13792 = vrcp.f32 %v8030_v60  ;;  %13121 = vmatprep.subr.bf16.mxu0 %v18997_v50 }
 0xb46   :  { %13794 = vrcp.f32 %v8033_v37  ;;  %v13789_v62 = vpop.eup %13788 }
 0xb47   :  { %v8095_v32 = vmul.f32 %v13789_v62, %v17415_v16 }
 0xb48   :  { %v9651_v49 = vpop.permute.xlu1 %9650 }
 0xb49   :  { %v8127_v52 = vpack.c.bf16 %v8095_v32, %v8095_v32  ;;  %v9656_v16 = vsel %vm4580_vm3, %v9651_v49, 0 }
 0xb4b   :  { %v13791_v35 = vpop.eup %13790  ;;  %13112 = vmatmul.mubr.msk.bf16.vlgmr.msra.gmra.mrb[92].mxu0 %vm4192_vm4, %v8125_v19 }
 0xb4c   :  { %v8094_v11 = vmul.f32 %v13791_v35, %v17425_v45  ;;  %13122 = vmatpush3.bf16.msra.mxu0 %v9558_v28  ;;  %13123 = vmatprep.mubr.msk.bf16.mxu0 %vm14009_vm1, %v18997_v50 }
 0xb4d   :  { %13133 = vmatprep.subr.bf16.mxu0 %v18997_v50 }
 0xb4e   :  { %v8126_v48 = vpack.c.bf16 %v8094_v11, %v8094_v11 }
 0xb4f   :  { %v13793_v46 = vpop.eup %13792 }
 0xb50   :  { %13118 = vmatmul.mubr.msk.bf16.vlgmr.msra.gmra.mrb[80].mxu1 %vm4192_vm4, %v8126_v48  ;;  %v13795_v45 = vpop.eup %13794  ;;  %v8096_v6 = vmul.f32 %v13793_v46, %v17436_v57 }
 0xb51   :  { %13128 = vmatpush3.bf16.msra.mxu1 %v9607_v29  ;;  %13129 = vmatprep.mubr.msk.bf16.mxu1 %vm14009_vm1, %v18997_v50  ;;  %v8097_v1 = vmul.f32 %v13795_v45, %v17420_v20 }
 0xb52   :  { %v8128_v26 = vpack.c.bf16 %v8096_v6, %v8096_v6  ;;  %13139 = vmatprep.subr.bf16.mxu1 %v13332_v22 }
 0xb53   :  { %13124 = vmatmul.mubr.msk.bf16.vlgmr.msra.gmra.mrb[96].mxu0 %vm4192_vm4, %v8127_v52  ;;  %v8129_v14 = vpack.c.bf16 %v8097_v1, %v8097_v1 }
 0xb54   :  { %13134 = vmatpush3.bf16.msra.mxu0 %v9656_v16  ;;  %13135 = vmatprep.mubr.msk.bf16.mxu0 %vm14009_vm1, %v18997_v50 }
 0xb58   :  { %13130 = vmatmul.mubr.msk.bf16.vlgmr.msra.gmra.mrb[84].mxu1 %vm4192_vm4, %v8128_v26 }
 0xb59   :  { %13140 = vmatpush3.bf16.msra.mxu1 %v13332_v22 }
 0xb5a   :  { %13141 = vmatprep.subr.bf16.mxu1 %v13333_v41 }
 0xb5b   :  { %13136 = vmatmul.mubr.msk.bf16.vlgmr.msra.gmra.mrb[100].mxu0 %vm4192_vm4, %v8129_v14 }
 0xb5c   :  { %10781 = vmatprep.mubr.bf16.mxu0 %v19156_v30 }
 0xb5d   :  { %13142 = vmatpush3.bf16.msra.mxu1 %v13333_v41 }
 0xb5f   :  { %v8173_v59 = vpop.f32.mrb[24].mxu1 }
 0xb60   :  { %v12951_v57 = vpop.f32.mrb[25].mxu1 }
 0xb61   :  { %v8176_v0 = vpop.f32.mrb[26].mxu1 }
 0xb62   :  { %v12952_v63 = vpop.f32.mrb[27].mxu1 }
 0xb67   :  { %v8271_v43 = vpop.f32.mrb[28].mxu1 }
 0xb68   :  { %v12963_v40 = vpop.f32.mrb[29].mxu1 }
 0xb69   :  { %v8274_v10 = vpop.f32.mrb[30].mxu1 }
 0xb6a   :  { %v12964_v34 = vpop.f32.mrb[31].mxu1 }
 0xb81   :  { %v8222_v25 = vpop.f32.mrb[40].mxu0 }
 0xb82   :  { %v13232_v50 = vpack.i.bf16 %v8222_v25, %v8173_v59  ;;  %v12957_v54 = vpop.f32.mrb[41].mxu0 }
 0xb83   :  { %v8225_v20 = vpop.f32.mrb[42].mxu0 }
 0xb84   :  { %13233 = vrot.lane.b32.xlu0 %v13232_v50, %s14011_s3  ;;  %v12958_v31 = vpop.f32.mrb[43].mxu0 }
 0xb98   :  { %v8369_v7 = vpop.f32.mrb[32].mxu1 }
 0xb99   :  { %v12975_v18 = vpop.f32.mrb[33].mxu1 }
 0xb9a   :  { %v8372_v3 = vpop.f32.mrb[34].mxu1 }
 0xb9b   :  { %v12976_v5 = vpop.f32.mrb[35].mxu1 }
 0xba0   :  { %v8467_v47 = vpop.f32.mrb[36].mxu1 }
 0xba1   :  { %v12987_v13 = vpop.f32.mrb[37].mxu1 }
 0xba2   :  { %v8470_v55 = vpop.f32.mrb[38].mxu1 }
 0xba3   :  { %v12988_v42 = vpop.f32.mrb[39].mxu1 }
 0xba8   :  { %v8565_v2 = vpop.f32.mrb[40].mxu1 }
 0xba9   :  { %v12999_v53 = vpop.f32.mrb[41].mxu1 }
 0xbaa   :  { %v8568_v15 = vpop.f32.mrb[42].mxu1 }
 0xbab   :  { %v13000_v4 = vpop.f32.mrb[43].mxu1 }
 0xbbe   :  { %v8320_v51 = vpop.f32.mrb[44].mxu0 }
 0xbbf   :  { %v13237_v39 = vpack.i.bf16 %v8320_v51, %v8271_v43  ;;  %v12969_v58 = vpop.f32.mrb[45].mxu0 }
 0xbc0   :  { %v8323_v24 = vpop.f32.mrb[46].mxu0 }
 0xbc1   :  { %13238 = vrot.lane.b32.xlu1 %v13237_v39, %s14011_s3  ;;  %v12970_v36 = vpop.f32.mrb[47].mxu0  ;;  %v19157_v39 = vld [vmem:[#allocation52_spill] sm:$0xff]  ;;  %v19158_v24 = vld [vmem:[#allocation105_spill] sm:$0xff] }
 0xbc6   :  { %v8418_v12 = vpop.f32.mrb[48].mxu0 }
 0xbc7   :  { %v13242_v27 = vpack.i.bf16 %v8418_v12, %v8369_v7  ;;  %v12981_v23 = vpop.f32.mrb[49].mxu0 }
 0xbc8   :  { %v8421_v33 = vpop.f32.mrb[50].mxu0 }
 0xbc9   :  { %13243 = vrot.lane.b32.xlu0 %v13242_v27, %s14011_s3  ;;  %v12982_v44 = vpop.f32.mrb[51].mxu0 }
 0xbce   :  { %v8516_v61 = vpop.f32.mrb[52].mxu0  ;;  %v8663_v38 = vpop.f32.mrb[44].mxu1 }
 0xbcf   :  { %v13247_v9 = vpack.i.bf16 %v8516_v61, %v8467_v47  ;;  %v12993_v8 = vpop.f32.mrb[53].mxu0  ;;  %v13011_v21 = vpop.f32.mrb[45].mxu1 }
 0xbd0   :  { %v8519_v60 = vpop.f32.mrb[54].mxu0  ;;  %v8666_v17 = vpop.f32.mrb[46].mxu1 }
 0xbd1   :  { %v13012_v37 = vpop.f32.mrb[47].mxu1  ;;  %13248 = vrot.lane.b32.xlu1 %v13247_v9, %s14011_s3  ;;  %v12994_v19 = vpop.f32.mrb[55].mxu0 }
 0xbd6   :  { %v8614_v62 = vpop.f32.mrb[56].mxu0  ;;  %v8761_v35 = vpop.f32.mrb[48].mxu1 }
 0xbd7   :  { %v13252_v28 = vpack.i.bf16 %v8614_v62, %v8565_v2  ;;  %v13005_v11 = vpop.f32.mrb[57].mxu0  ;;  %v13023_v32 = vpop.f32.mrb[49].mxu1 }
 0xbd8   :  { %v8617_v56 = vpop.f32.mrb[58].mxu0  ;;  %v8764_v48 = vpop.f32.mrb[50].mxu1 }
 0xbd9   :  { %v13024_v46 = vpop.f32.mrb[51].mxu1  ;;  %13253 = vrot.lane.b32.xlu0 %v13252_v28, %s14011_s3  ;;  %v13006_v29 = vpop.f32.mrb[59].mxu0 }
 0xbde   :  { %v8712_v49 = vpop.f32.mrb[60].mxu0  ;;  %v8859_v52 = vpop.f32.mrb[52].mxu1 }
 0xbdf   :  { %v13257_v45 = vpack.i.bf16 %v8712_v49, %v8663_v38  ;;  %v13017_v6 = vpop.f32.mrb[61].mxu0  ;;  %v13035_v16 = vpop.f32.mrb[53].mxu1 }
 0xbe0   :  { %v8715_v1 = vpop.f32.mrb[62].mxu0  ;;  %v8862_v26 = vpop.f32.mrb[54].mxu1 }
 0xbe1   :  { %v13036_v14 = vpop.f32.mrb[55].mxu1  ;;  %13258 = vrot.lane.b32.xlu1 %v13257_v45, %s14011_s3  ;;  %v13018_v59 = vpop.f32.mrb[63].mxu0 }
 0xbe6   :  { %v8810_v57 = vpop.f32.mrb[64].mxu0  ;;  %v8957_v0 = vpop.f32.mrb[56].mxu1 }
 0xbe7   :  { %v13262_v63 = vpack.i.bf16 %v8810_v57, %v8761_v35  ;;  %v13029_v43 = vpop.f32.mrb[65].mxu0  ;;  %v13047_v40 = vpop.f32.mrb[57].mxu1 }
 0xbe8   :  { %v8813_v10 = vpop.f32.mrb[66].mxu0  ;;  %v8960_v34 = vpop.f32.mrb[58].mxu1 }
 0xbe9   :  { %v13048_v25 = vpop.f32.mrb[59].mxu1  ;;  %13263 = vrot.lane.b32.xlu0 %v13262_v63, %s14011_s3  ;;  %v13030_v50 = vpop.f32.mrb[67].mxu0 }
 0xbee   :  { %v8908_v54 = vpop.f32.mrb[68].mxu0  ;;  %v9055_v20 = vpop.f32.mrb[60].mxu1 }
 0xbef   :  { %v13267_v31 = vpack.i.bf16 %v8908_v54, %v8859_v52  ;;  %v13041_v7 = vpop.f32.mrb[69].mxu0  ;;  %v13059_v18 = vpop.f32.mrb[61].mxu1 }
 0xbf0   :  { %v8911_v3 = vpop.f32.mrb[70].mxu0  ;;  %v9058_v5 = vpop.f32.mrb[62].mxu1 }
 0xbf1   :  { %v13060_v47 = vpop.f32.mrb[63].mxu1  ;;  %13268 = vrot.lane.b32.xlu1 %v13267_v31, %s14011_s3  ;;  %v13042_v13 = vpop.f32.mrb[71].mxu0 }
 0xbf6   :  { %v9153_v55 = vpop.f32.mrb[64].mxu1  ;;  %v13234_v42 = vpop.permute.xlu0 %13233 }
 0xbf7   :  { %v13236_v2 = vunpack.i.h.bf16 %v13234_v42  ;;  %v13235_v53 = vunpack.i.l.bf16 %v13234_v42  ;;  %v9006_v15 = vpop.f32.mrb[72].mxu0  ;;  %v13071_v4 = vpop.f32.mrb[65].mxu1 }
 0xbf8   :  { %v13272_v22 = vpack.i.bf16 %v9006_v15, %v8957_v0  ;;  %v13053_v41 = vpop.f32.mrb[73].mxu0  ;;  %v9156_v51 = vpop.f32.mrb[66].mxu1 }
 0xbf9   :  { %v9827_v58 = vsel %vm2687_vm2, %v19157_v39, %v13236_v2  ;;  %v9826_v36 = vsel %vm2687_vm2, %v19158_v24, %v13235_v53  ;;  %v9009_v12 = vpop.f32.mrb[74].mxu0  ;;  %v13072_v27 = vpop.f32.mrb[67].mxu1 }
 0xbfa   :  { %v9858_v23 = vpack.c.bf16 %v9827_v58, %v9826_v36  ;;  %13273 = vrot.lane.b32.xlu0 %v13272_v22, %s14011_s3  ;;  %v13054_v33 = vpop.f32.mrb[75].mxu0  ;;  %v19159_v36 = vld [vmem:[#allocation51_spill] sm:$0xff]  ;;  %v19160_v27 = vld [vmem:[#allocation44_spill] sm:$0xff] }
 0xbfc   :  { %13143 = vmatprep.mubr.msk.bf16.mxu1 %vm115_vm0, %v9858_v23 }
 0xbfe   :  { %v9104_v44 = vpop.f32.mrb[76].mxu0  ;;  %v9251_v61 = vpop.f32.mrb[68].mxu1 }
 0xbff   :  { %v13277_v38 = vpack.i.bf16 %v9104_v44, %v9055_v20  ;;  %v13065_v9 = vpop.f32.mrb[77].mxu0  ;;  %v13083_v8 = vpop.f32.mrb[69].mxu1 }
 0xc00   :  { %v9107_v21 = vpop.f32.mrb[78].mxu0  ;;  %v9254_v60 = vpop.f32.mrb[70].mxu1  ;;  %v19161_v9 = vld [vmem:[#allocation56_spill] sm:$0xff] }
 0xc01   :  { %v13084_v17 = vpop.f32.mrb[71].mxu1  ;;  %13278 = vrot.lane.b32.xlu1 %v13277_v38, %s14011_s3  ;;  %v13066_v37 = vpop.f32.mrb[79].mxu0  ;;  %v19162_v21 = vld [vmem:[#allocation41_spill] sm:$0xff] }
 0xc06   :  { %v9202_v19 = vpop.f32.mrb[80].mxu0  ;;  %v9349_v62 = vpop.f32.mrb[72].mxu1 }
 0xc07   :  { %v13282_v35 = vpack.i.bf16 %v9202_v19, %v9153_v55  ;;  %v13077_v28 = vpop.f32.mrb[81].mxu0  ;;  %v13095_v11 = vpop.f32.mrb[73].mxu1 }
 0xc08   :  { %v9205_v32 = vpop.f32.mrb[82].mxu0  ;;  %v9352_v56 = vpop.f32.mrb[74].mxu1  ;;  %v19164_v11 = vld [vmem:[#allocation55_spill] sm:$0xff] }
 0xc09   :  { %v13096_v48 = vpop.f32.mrb[75].mxu1  ;;  %13283 = vrot.lane.b32.xlu0 %v13282_v35, %s14011_s3  ;;  %v13078_v46 = vpop.f32.mrb[83].mxu0  ;;  %v19163_v35 = vld [vmem:[#allocation60_spill] sm:$0xff] }
 0xc0e   :  { %v9300_v29 = vpop.f32.mrb[84].mxu0  ;;  %v9447_v49 = vpop.f32.mrb[76].mxu1 }
 0xc0f   :  { %v13287_v52 = vpack.i.bf16 %v9300_v29, %v9251_v61  ;;  %v13089_v45 = vpop.f32.mrb[85].mxu0  ;;  %v13107_v6 = vpop.f32.mrb[77].mxu1 }
 0xc10   :  { %v9303_v16 = vpop.f32.mrb[86].mxu0  ;;  %v9450_v1 = vpop.f32.mrb[78].mxu1  ;;  %v19166_v45 = vld [vmem:[#allocation59_spill] sm:$0xff] }
 0xc11   :  { %v13108_v26 = vpop.f32.mrb[79].mxu1  ;;  %13288 = vrot.lane.b32.xlu1 %v13287_v52, %s14011_s3  ;;  %v13090_v14 = vpop.f32.mrb[87].mxu0 }
 0xc16   :  { %v9398_v59 = vpop.f32.mrb[88].mxu0 }
 0xc17   :  { %v13292_v57 = vpack.i.bf16 %v9398_v59, %v9349_v62  ;;  %v13101_v0 = vpop.f32.mrb[89].mxu0  ;;  %v19167_v59 = vld [vmem:[#allocation63_spill] sm:$0xff] }
 0xc18   :  { %v9401_v63 = vpop.f32.mrb[90].mxu0  ;;  %v19168_v0 = vld [vmem:[#allocation64_spill] sm:$0xff] }
 0xc19   :  { %13293 = vrot.lane.b32.xlu0 %v13292_v57, %s14011_s3  ;;  %v13102_v43 = vpop.f32.mrb[91].mxu0 }
 0xc1e   :  { %v9496_v40 = vpop.f32.mrb[92].mxu0 }
 0xc1f   :  { %v13297_v10 = vpack.i.bf16 %v9496_v40, %v9447_v49  ;;  %v13113_v34 = vpop.f32.mrb[93].mxu0  ;;  %v19165_v49 = vld [vmem:[#allocation118_spill] sm:$0xff] }
 0xc20   :  { %v9499_v25 = vpop.f32.mrb[94].mxu0 }
 0xc21   :  { %13298 = vrot.lane.b32.xlu1 %v13297_v10, %s14011_s3  ;;  %v13114_v50 = vpop.f32.mrb[95].mxu0  ;;  %v19169_v25 = vld [vmem:[#allocation66_spill] sm:$0xff] }
 0xc23   :  { %v9545_v54 = vpop.f32.mrb[80].mxu1 }
 0xc24   :  { %v13119_v20 = vpop.f32.mrb[81].mxu1 }
 0xc25   :  { %v9548_v31 = vpop.f32.mrb[82].mxu1 }
 0xc26   :  { %v13120_v7 = vpop.f32.mrb[83].mxu1  ;;  %v9594_v18 = vpop.f32.mrb[96].mxu0 }
 0xc27   :  { %v13302_v3 = vpack.i.bf16 %v9594_v18, %v9545_v54  ;;  %v13125_v5 = vpop.f32.mrb[97].mxu0  ;;  %v19170_v54 = vld [vmem:[#allocation67_spill] sm:$0xff] }
 0xc28   :  { %v9597_v47 = vpop.f32.mrb[98].mxu0  ;;  %v19171_v5 = vld [vmem:[#allocation103_spill] sm:$0xff] }
 0xc29   :  { %13303 = vrot.lane.b32.xlu0 %v13302_v3, %s14011_s3  ;;  %v13126_v13 = vpop.f32.mrb[99].mxu0 }
 0xc2a   :  { %v19172_v13 = vld [vmem:[#allocation68_spill] sm:$0xff] }
 0xc2b   :  { %v9643_v55 = vpop.f32.mrb[84].mxu1 }
 0xc2c   :  { %v13131_v42 = vpop.f32.mrb[85].mxu1 }
 0xc2d   :  { %v9646_v2 = vpop.f32.mrb[86].mxu1 }
 0xc2e   :  { %v13132_v53 = vpop.f32.mrb[87].mxu1  ;;  %v9692_v15 = vpop.f32.mrb[100].mxu0 }
 0xc2f   :  { %v13307_v4 = vpack.i.bf16 %v9692_v15, %v9643_v55  ;;  %v13137_v22 = vpop.f32.mrb[101].mxu0 }
 0xc30   :  { %v9695_v41 = vpop.f32.mrb[102].mxu0 }
 0xc31   :  { %13308 = vrot.lane.b32.xlu1 %v13307_v4, %s14011_s3  ;;  %v13138_v51 = vpop.f32.mrb[103].mxu0  ;;  %v19173_v4 = vld [vmem:[#allocation104_spill] sm:$0xff]  ;;  %v19174_v41 = vld [vmem:[#allocation69_spill] sm:$0xff] }
 0xc33   :  { %v13239_v39 = vpop.permute.xlu1 %13238 }
 0xc34   :  { %v13241_v58 = vunpack.i.h.bf16 %v13239_v39  ;;  %v13240_v24 = vunpack.i.l.bf16 %v13239_v39 }
 0xc36   :  { %v9829_v12 = vsel %vm2687_vm2, %v19159_v36, %v13241_v58  ;;  %v9828_v23 = vsel %vm2687_vm2, %v19160_v27, %v13240_v24 }
 0xc37   :  { %v9859_v33 = vpack.c.bf16 %v9829_v12, %v9828_v23  ;;  %v19175_v12 = vld [vmem:[#allocation107_spill] sm:$0xff]  ;;  %v19176_v23 = vld [vmem:[#allocation72_spill] sm:$0xff] }
 0xc39   :  { %13144 = vmatmul.mubr.msk.bf16.vlgmr.msra.gmra.mrb[88].mxu1 %vm115_vm0, %v9859_v33 }
 0xc3b   :  { %v13244_v44 = vpop.permute.xlu0 %13243 }
 0xc3c   :  { %v13246_v61 = vunpack.i.h.bf16 %v13244_v44  ;;  %v13245_v38 = vunpack.i.l.bf16 %v13244_v44 }
 0xc3e   :  { %v9831_v8 = vsel %vm2687_vm2, %v19161_v9, %v13246_v61  ;;  %v9830_v60 = vsel %vm2687_vm2, %v19162_v21, %v13245_v38 }
 0xc3f   :  { %v9860_v17 = vpack.c.bf16 %v9831_v8, %v9830_v60  ;;  %v19177_v8 = vld [vmem:[#allocation109_spill] sm:$0xff]  ;;  %v19178_v60 = vld [vmem:[#allocation71_spill] sm:$0xff] }
 0xc41   :  { %13147 = vmatprep.mubr.msk.bf16.mxu1 %vm115_vm0, %v9860_v17 }
 0xc43   :  { %v13249_v37 = vpop.permute.xlu1 %13248 }
 0xc44   :  { %v13251_v19 = vunpack.i.h.bf16 %v13249_v37  ;;  %v13250_v62 = vunpack.i.l.bf16 %v13249_v37 }
 0xc46   :  { %v9833_v28 = vsel %vm2687_vm2, %v19163_v35, %v13251_v19  ;;  %v9832_v32 = vsel %vm2687_vm2, %v19164_v11, %v13250_v62 }
 0xc47   :  { %v9861_v56 = vpack.c.bf16 %v9833_v28, %v9832_v32  ;;  %v19179_v28 = vld [vmem:[#allocation106_spill] sm:$0xff]  ;;  %v19180_v32 = vld [vmem:[#allocation76_spill] sm:$0xff] }
 0xc49   :  { %13148 = vmatmul.mubr.msk.bf16.gmra.mrb[92].mxu1 %vm115_vm0, %v9861_v56 }
 0xc4b   :  { %v13254_v48 = vpop.permute.xlu0 %13253 }
 0xc4c   :  { %v13256_v46 = vunpack.i.h.bf16 %v13254_v48  ;;  %v13255_v29 = vunpack.i.l.bf16 %v13254_v48 }
 0xc4e   :  { %v9835_v52 = vsel %vm2687_vm2, %v19165_v49, %v13256_v46  ;;  %v9834_v6 = vsel %vm2687_vm2, %v19166_v45, %v13255_v29 }
 0xc4f   :  { %v9862_v16 = vpack.c.bf16 %v9835_v52, %v9834_v6  ;;  %v19181_v52 = vld [vmem:[#allocation75_spill] sm:$0xff]  ;;  %v19182_v6 = vld [vmem:[#allocation42_spill] sm:$0xff] }
 0xc51   :  { %13151 = vmatprep.mubr.msk.bf16.mxu1 %vm115_vm0, %v9862_v16 }
 0xc53   :  { %v13259_v1 = vpop.permute.xlu1 %13258 }
 0xc54   :  { %v13261_v26 = vunpack.i.h.bf16 %v13259_v1  ;;  %v13260_v14 = vunpack.i.l.bf16 %v13259_v1 }
 0xc56   :  { %v9837_v57 = vsel %vm2687_vm2, %v19167_v59, %v13261_v26  ;;  %v9836_v63 = vsel %vm2687_vm2, %v19168_v0, %v13260_v14 }
 0xc57   :  { %v9863_v43 = vpack.c.bf16 %v9837_v57, %v9836_v63  ;;  %v19183_v57 = vld [vmem:[#allocation43_spill] sm:$0xff]  ;;  %v19184_v63 = vld [vmem:[#allocation108_spill] sm:$0xff] }
 0xc59   :  { %13152 = vmatmul.mubr.msk.bf16.gmra.mrb[96].mxu1 %vm115_vm0, %v9863_v43 }
 0xc5b   :  { %v13264_v40 = vpop.permute.xlu0 %13263 }
 0xc5c   :  { %v13266_v10 = vunpack.i.h.bf16 %v13264_v40  ;;  %v13265_v34 = vunpack.i.l.bf16 %v13264_v40 }
 0xc5e   :  { %v9839_v50 = vsel %vm2687_vm2, %v19169_v25, %v13266_v10  ;;  %v9838_v20 = vsel %vm2687_vm2, %v19170_v54, %v13265_v34 }
 0xc5f   :  { %v9864_v31 = vpack.c.bf16 %v9839_v50, %v9838_v20  ;;  %v19185_v50 = vld [vmem:[#allocation46_spill] sm:$0xff]  ;;  %v19186_v20 = vld [vmem:[#allocation80_spill] sm:$0xff] }
 0xc61   :  { %13155 = vmatprep.mubr.msk.bf16.mxu1 %vm115_vm0, %v9864_v31 }
 0xc63   :  { %v13269_v7 = vpop.permute.xlu1 %13268 }
 0xc64   :  { %v13271_v18 = vunpack.i.h.bf16 %v13269_v7  ;;  %v13270_v3 = vunpack.i.l.bf16 %v13269_v7 }
 0xc66   :  { %v9841_v47 = vsel %vm2687_vm2, %v19171_v5, %v13271_v18  ;;  %v9840_v55 = vsel %vm2687_vm2, %v19172_v13, %v13270_v3 }
 0xc67   :  { %v9865_v42 = vpack.c.bf16 %v9841_v47, %v9840_v55  ;;  %v19187_v47 = vld [vmem:[#allocation113_spill] sm:$0xff]  ;;  %v19188_v55 = vld [vmem:[#allocation111_spill] sm:$0xff] }
 0xc69   :  { %13156 = vmatmul.mubr.msk.bf16.gmra.mrb[100].mxu1 %vm115_vm0, %v9865_v42 }
 0xc6c   :  { %v13274_v2 = vpop.permute.xlu0 %13273 }
 0xc6d   :  { %v13276_v53 = vunpack.i.h.bf16 %v13274_v2  ;;  %v13275_v15 = vunpack.i.l.bf16 %v13274_v2 }
 0xc6f   :  { %v9843_v22 = vsel %vm2687_vm2, %v19173_v4, %v13276_v53  ;;  %v9842_v51 = vsel %vm2687_vm2, %v19174_v41, %v13275_v15  ;;  %v17743_v53 = vld [vmem:[%s18776_s13] ss:$0 sm:$0xff] }
 0xc70   :  { %v9866_v39 = vpack.c.bf16 %v9843_v22, %v9842_v51 }
 0xc72   :  { %13159 = vmatprep.mubr.msk.bf16.mxu1 %vm115_vm0, %v9866_v39 }
 0xc73   :  { %v13279_v58 = vpop.permute.xlu1 %13278 }
 0xc74   :  { %v13281_v24 = vunpack.i.h.bf16 %v13279_v58  ;;  %v13280_v36 = vunpack.i.l.bf16 %v13279_v58  ;;  %v19189_v58 = vld [vmem:[#allocation9_spill] sm:$0xff] }
 0xc76   :  { %v9845_v27 = vsel %vm2687_vm2, %v19175_v12, %v13281_v24  ;;  %v9844_v33 = vsel %vm2687_vm2, %v19176_v23, %v13280_v36  ;;  %v19190_v12 = vld [vmem:[#allocation11_spill] sm:$0xff] }
 0xc77   :  { %v9867_v44 = vpack.c.bf16 %v9845_v27, %v9844_v33  ;;  %v19191_v33 = vld [vmem:[#allocation10_spill] sm:$0xff] }
 0xc79   :  { %13160 = vmatmul.mubr.msk.bf16.gmra.mrb[104].mxu1 %vm115_vm0, %v9867_v44 }
 0xc7b   :  { %v13284_v61 = vpop.permute.xlu0 %13283 }
 0xc7c   :  { %v13286_v38 = vunpack.i.h.bf16 %v13284_v61  ;;  %v13285_v9 = vunpack.i.l.bf16 %v13284_v61 }
 0xc7e   :  { %v9847_v21 = vsel %vm2687_vm2, %v19177_v8, %v13286_v38  ;;  %v9846_v17 = vsel %vm2687_vm2, %v19178_v60, %v13285_v9  ;;  %v19192_v9 = vld [vmem:[#allocation12_spill] sm:$0xff] }
 0xc7f   :  { %v9868_v37 = vpack.c.bf16 %v9847_v21, %v9846_v17 }
 0xc81   :  { %13163 = vmatprep.mubr.msk.bf16.mxu1 %vm115_vm0, %v9868_v37 }
 0xc83   :  { %v13289_v19 = vpop.permute.xlu1 %13288 }
 0xc84   :  { %v13291_v62 = vunpack.i.h.bf16 %v13289_v19  ;;  %v13290_v35 = vunpack.i.l.bf16 %v13289_v19 }
 0xc86   :  { %v9849_v11 = vsel %vm2687_vm2, %v19179_v28, %v13291_v62  ;;  %v9848_v56 = vsel %vm2687_vm2, %v19180_v32, %v13290_v35 }
 0xc87   :  { %v9869_v48 = vpack.c.bf16 %v9849_v11, %v9848_v56  ;;  %v19193_v11 = vld [vmem:[#allocation13_spill] sm:$0xff] }
 0xc89   :  { %13164 = vmatmul.mubr.msk.bf16.gmra.mrb[108].mxu1 %vm115_vm0, %v9869_v48 }
 0xc8b   :  { %v13294_v46 = vpop.permute.xlu0 %13293 }
 0xc8c   :  { %v13296_v29 = vunpack.i.h.bf16 %v13294_v46  ;;  %v13295_v49 = vunpack.i.l.bf16 %v13294_v46  ;;  %v19194_v46 = vld [vmem:[#allocation15_spill] sm:$0xff] }
 0xc8e   :  { %v9851_v45 = vsel %vm2687_vm2, %v19181_v52, %v13296_v29  ;;  %v9850_v16 = vsel %vm2687_vm2, %v19182_v6, %v13295_v49  ;;  %v19195_v49 = vld [vmem:[#allocation14_spill] sm:$0xff]  ;;  %v19196_v6 = vld [vmem:[#allocation16_spill] sm:$0xff] }
 0xc8f   :  { %v9870_v1 = vpack.c.bf16 %v9851_v45, %v9850_v16 }
 0xc91   :  { %13167 = vmatprep.mubr.msk.bf16.mxu1 %vm115_vm0, %v9870_v1 }
 0xc93   :  { %v13299_v26 = vpop.permute.xlu1 %13298 }
 0xc94   :  { %v13301_v14 = vunpack.i.h.bf16 %v13299_v26  ;;  %v13300_v59 = vunpack.i.l.bf16 %v13299_v26 }
 0xc96   :  { %v9853_v0 = vsel %vm2687_vm2, %v19183_v57, %v13301_v14  ;;  %v9852_v43 = vsel %vm2687_vm2, %v19184_v63, %v13300_v59 }
 0xc97   :  { %v9871_v40 = vpack.c.bf16 %v9853_v0, %v9852_v43 }
 0xc99   :  { %13168 = vmatmul.mubr.msk.bf16.gmra.mrb[112].mxu1 %vm115_vm0, %v9871_v40 }
 0xc9b   :  { %v13304_v10 = vpop.permute.xlu0 %13303 }
 0xc9c   :  { %v13306_v34 = vunpack.i.h.bf16 %v13304_v10  ;;  %v13305_v25 = vunpack.i.l.bf16 %v13304_v10  ;;  %v19197_v10 = vld [vmem:[#allocation17_spill] sm:$0xff] }
 0xc9e   :  { %v9855_v54 = vsel %vm2687_vm2, %v19185_v50, %v13306_v34  ;;  %v9854_v31 = vsel %vm2687_vm2, %v19186_v20, %v13305_v25 }
 0xc9f   :  { %v9872_v7 = vpack.c.bf16 %v9855_v54, %v9854_v31  ;;  %v19198_v54 = vld [vmem:[#allocation19_spill] sm:$0xff]  ;;  %v19199_v31 = vld [vmem:[#allocation18_spill] sm:$0xff] }
 0xca1   :  { %13171 = vmatprep.mubr.msk.bf16.mxu1 %vm115_vm0, %v9872_v7 }
 0xca3   :  { %v13309_v18 = vpop.permute.xlu1 %13308 }
 0xca4   :  { %v13311_v3 = vunpack.i.h.bf16 %v13309_v18  ;;  %v13310_v5 = vunpack.i.l.bf16 %v13309_v18 }
 0xca6   :  { %v9857_v13 = vsel %vm2687_vm2, %v19187_v47, %v13311_v3  ;;  %v9856_v42 = vsel %vm2687_vm2, %v19188_v55, %v13310_v5  ;;  %v19200_v3 = vld [vmem:[#allocation20_spill] sm:$0xff] }
 0xca7   :  { %v9873_v2 = vpack.c.bf16 %v9857_v13, %v9856_v42 }
 0xca9   :  { %13172 = vmatmul.mubr.msk.bf16.gmra.mrb[116].mxu1 %vm115_vm0, %v9873_v2 }
 0xd0c   :  { %v13145_v15 = vpop.f32.mrb[88].mxu1 }
 0xd0d   :  { %v9979_v4 = vpop.f32.mrb[89].mxu1  ;;  %v9988_v22 = vadd.f32 %v13145_v15, %v17743_v53 }
 0xd0e   :  { %v9980_v41 = vadd.f32 %v17743_v53, %v9979_v4  ;;  %v13146_v51 = vpop.f32.mrb[90].mxu1 }
 0xd0f   :  { %v9982_v39 = vpop.f32.mrb[91].mxu1  ;;  %v17752_v27 = vadd.f32 %v9988_v22, %v19190_v12  ;;  %v9991_v23 = vadd.f32 %v13146_v51, %v17743_v53  ;;  %v19201_v51 = vld [vmem:[#allocation21_spill] sm:$0xff]  ;;  %v19202_v12 = vld [vmem:[#allocation23_spill] sm:$0xff] }
 0xd10   :  { %v17748_v24 = vadd.f32 %v9980_v41, %v19189_v58  ;;  %v9983_v36 = vadd.f32 %v17743_v53, %v9982_v39 }
 0xd11   :  { %v17763_v8 = vadd.f32 %v9991_v23, %v19192_v9  ;;  %v10146_v21 = vsel %vm115_vm0, %v17752_v27, 0.0  ;;  %v19205_v9 = vld [vmem:[#allocation24_spill] sm:$0xff] }
 0xd12   :  { %v17756_v44 = vadd.f32 %v9983_v36, %v19191_v33  ;;  %v10140_v61 = vsel %vm115_vm0, %v17748_v24, 0.0  ;;  %v19203_v33 = vld [vmem:[#allocation22_spill] sm:$0xff] }
 0xd13   :  { %10141 = vadd.xlane.f32.xlu0 %v10140_v61  ;;  %v10149_v60 = vsel %vm115_vm0, %v17763_v8, 0.0 }
 0xd14   :  { %v10143_v38 = vsel %vm115_vm0, %v17756_v44, 0.0 }
 0xd15   :  { %10144 = vadd.xlane.f32.xlu1 %v10143_v38 }
 0xd17   :  { %10147 = vadd.xlane.f32.xlu0 %v10146_v21 }
 0xd1b   :  { %10150 = vadd.xlane.f32.xlu0 %v10149_v60 }
 0xd1c   :  { %v13149_v17 = vpop.f32.mrb[92].mxu1 }
 0xd1d   :  { %v9995_v37 = vpop.f32.mrb[93].mxu1  ;;  %v10004_v19 = vadd.f32 %v13149_v17, %v17743_v53 }
 0xd1e   :  { %v9996_v62 = vadd.f32 %v17743_v53, %v9995_v37  ;;  %v13150_v35 = vpop.f32.mrb[94].mxu1 }
 0xd1f   :  { %v9998_v28 = vpop.f32.mrb[95].mxu1  ;;  %v10007_v56 = vadd.f32 %v13150_v35, %v17743_v53  ;;  %v17777_v29 = vadd.f32 %v10004_v19, %v19194_v46 }
 0xd20   :  { %v17772_v32 = vadd.f32 %v9996_v62, %v19193_v11  ;;  %v9999_v48 = vadd.f32 %v17743_v53, %v9998_v28 }
 0xd21   :  { %v17785_v16 = vadd.f32 %v10007_v56, %v19196_v6  ;;  %v10158_v26 = vsel %vm115_vm0, %v17777_v29, 0.0  ;;  %v19209_v6 = vld [vmem:[#allocation25_spill] sm:$0xff] }
 0xd22   :  { %v17780_v52 = vadd.f32 %v9999_v48, %v19195_v49  ;;  %v10152_v45 = vsel %vm115_vm0, %v17772_v32, 0.0  ;;  %v19207_v48 = vld [vmem:[#allocation27_spill] sm:$0xff] }
 0xd23   :  { %10153 = vadd.xlane.f32.xlu0 %v10152_v45  ;;  %v10161_v14 = vsel %vm115_vm0, %v17785_v16, 0.0 }
 0xd24   :  { %v10155_v1 = vsel %vm115_vm0, %v17780_v52, 0.0 }
 0xd25   :  { %10156 = vadd.xlane.f32.xlu1 %v10155_v1 }
 0xd27   :  { %10159 = vadd.xlane.f32.xlu0 %v10158_v26  ;;  %v19211_v26 = vld [vmem:[#allocation28_spill] sm:$0xff] }
 0xd29   :  { %10162 = vadd.xlane.f32.xlu1 %v10161_v14 }
 0xd2c   :  { %v13153_v59 = vpop.f32.mrb[96].mxu1 }
 0xd2d   :  { %v10011_v57 = vpop.f32.mrb[97].mxu1  ;;  %v10020_v0 = vadd.f32 %v13153_v59, %v17743_v53 }
 0xd2e   :  { %v10012_v63 = vadd.f32 %v17743_v53, %v10011_v57  ;;  %v13154_v43 = vpop.f32.mrb[98].mxu1  ;;  %v19213_v57 = vld [vmem:[#allocation26_spill] sm:$0xff] }
 0xd2f   :  { %v10014_v40 = vpop.f32.mrb[99].mxu1  ;;  %v10023_v25 = vadd.f32 %v13154_v43, %v17743_v53  ;;  %v17801_v20 = vadd.f32 %v10020_v0, %v19198_v54 }
 0xd30   :  { %v17796_v34 = vadd.f32 %v10012_v63, %v19197_v10  ;;  %v10015_v50 = vadd.f32 %v17743_v53, %v10014_v40 }
 0xd31   :  { %v17809_v5 = vadd.f32 %v10023_v25, %v19200_v3  ;;  %v10170_v13 = vsel %vm115_vm0, %v17801_v20, 0.0 }
 0xd32   :  { %v17804_v7 = vadd.f32 %v10015_v50, %v19199_v31  ;;  %v10164_v18 = vsel %vm115_vm0, %v17796_v34, 0.0 }
 0xd33   :  { %10165 = vadd.xlane.f32.xlu0 %v10164_v18  ;;  %v10173_v55 = vsel %vm115_vm0, %v17809_v5, 0.0 }
 0xd34   :  { %v10167_v47 = vsel %vm115_vm0, %v17804_v7, 0.0 }
 0xd35   :  { %10168 = vadd.xlane.f32.xlu1 %v10167_v47 }
 0xd37   :  { %10171 = vadd.xlane.f32.xlu0 %v10170_v13 }
 0xd39   :  { %10174 = vadd.xlane.f32.xlu1 %v10173_v55 }
 0xd3c   :  { %v13157_v42 = vpop.f32.mrb[100].mxu1 }
 0xd3d   :  { %v10027_v2 = vpop.f32.mrb[101].mxu1  ;;  %v10036_v15 = vadd.f32 %v13157_v42, %v17743_v53 }
 0xd3e   :  { %v10028_v4 = vadd.f32 %v17743_v53, %v10027_v2  ;;  %v13158_v22 = vpop.f32.mrb[102].mxu1 }
 0xd3f   :  { %v10030_v41 = vpop.f32.mrb[103].mxu1  ;;  %v10039_v58 = vadd.f32 %v13158_v22, %v17743_v53  ;;  %v17825_v23 = vadd.f32 %v10036_v15, %v19202_v12 }
 0xd40   :  { %v17820_v39 = vadd.f32 %v10028_v4, %v19201_v51  ;;  %v10031_v36 = vadd.f32 %v17743_v53, %v10030_v41 }
 0xd41   :  { %v17833_v21 = vadd.f32 %v10039_v58, %v19205_v9  ;;  %v10182_v17 = vsel %vm115_vm0, %v17825_v23, 0.0 }
 0xd42   :  { %v17828_v61 = vadd.f32 %v10031_v36, %v19203_v33  ;;  %v10176_v38 = vsel %vm115_vm0, %v17820_v39, 0.0 }
 0xd43   :  { %10177 = vadd.xlane.f32.xlu0 %v10176_v38  ;;  %19206 = vst [vmem:[#allocation91_spill] sm:$0xff] %v17833_v21  ;;  %v10185_v37 = vsel %vm115_vm0, %v17833_v21, 0.0 }
 0xd44   :  { %19204 = vst [vmem:[#allocation49_spill] sm:$0xff] %v17828_v61  ;;  %v10179_v60 = vsel %vm115_vm0, %v17828_v61, 0.0 }
 0xd45   :  { %10180 = vadd.xlane.f32.xlu1 %v10179_v60  ;;  %v19215_v60 = vld [vmem:[#allocation29_spill] sm:$0xff] }
 0xd47   :  { %10183 = vadd.xlane.f32.xlu0 %v10182_v17 }
 0xd49   :  { %10186 = vadd.xlane.f32.xlu1 %v10185_v37 }
 0xd4c   :  { %v13161_v19 = vpop.f32.mrb[104].mxu1 }
 0xd4d   :  { %v10043_v62 = vpop.f32.mrb[105].mxu1  ;;  %v10052_v35 = vadd.f32 %v13161_v19, %v17743_v53 }
 0xd4e   :  { %v10044_v28 = vadd.f32 %v17743_v53, %v10043_v62  ;;  %v13162_v11 = vpop.f32.mrb[106].mxu1 }
 0xd4f   :  { %v10046_v56 = vpop.f32.mrb[107].mxu1  ;;  %v10055_v49 = vadd.f32 %v13162_v11, %v17743_v53  ;;  %v17849_v1 = vadd.f32 %v10052_v35, %v19209_v6 }
 0xd50   :  { %v17844_v46 = vadd.f32 %v10044_v28, %v19207_v48  ;;  %v10047_v45 = vadd.f32 %v17743_v53, %v10046_v56  ;;  %v19217_v28 = vld [vmem:[#allocation30_spill] sm:$0xff] }
 0xd51   :  { %19210 = vst [vmem:[#allocation54_spill] sm:$0xff] %v17849_v1  ;;  %v17857_v0 = vadd.f32 %v10055_v49, %v19213_v57  ;;  %v10194_v43 = vsel %vm115_vm0, %v17849_v1, 0.0 }
 0xd52   :  { %19208 = vst [vmem:[#allocation117_spill] sm:$0xff] %v17844_v46  ;;  %v17852_v14 = vadd.f32 %v10047_v45, %v19211_v26  ;;  %v10188_v59 = vsel %vm115_vm0, %v17844_v46, 0.0 }
 0xd53   :  { %10189 = vadd.xlane.f32.xlu0 %v10188_v59  ;;  %19214 = vst [vmem:[#allocation53_spill] sm:$0xff] %v17857_v0  ;;  %v10197_v40 = vsel %vm115_vm0, %v17857_v0, 0.0 }
 0xd54   :  { %19212 = vst [vmem:[#allocation92_spill] sm:$0xff] %v17852_v14  ;;  %v10191_v63 = vsel %vm115_vm0, %v17852_v14, 0.0 }
 0xd55   :  { %10192 = vadd.xlane.f32.xlu1 %v10191_v63 }
 0xd57   :  { %10195 = vadd.xlane.f32.xlu0 %v10194_v43  ;;  %v19219_v43 = vld [vmem:[#allocation31_spill] sm:$0xff] }
 0xd59   :  { %10198 = vadd.xlane.f32.xlu1 %v10197_v40 }
 0xd5c   :  { %v13165_v10 = vpop.f32.mrb[108].mxu1 }
 0xd5d   :  { %v10059_v25 = vpop.f32.mrb[109].mxu1  ;;  %v10068_v49 = vadd.f32 %v13165_v10, %v17743_v53 }
 0xd5e   :  { %v13166_v50 = vpop.f32.mrb[110].mxu1  ;;  %v10060_v41 = vadd.f32 %v17743_v53, %v10059_v25  ;;  %v19221_v25 = vld [vmem:[#allocation32_spill] sm:$0xff] }
 0xd5f   :  { %v10062_v54 = vpop.f32.mrb[111].mxu1  ;;  %v10071_v59 = vadd.f32 %v13166_v50, %v17743_v53  ;;  %v17914_v40 = vadd.f32 %v10068_v49, %v19219_v43 }
 0xd60   :  { %v10063_v12 = vadd.f32 %v17743_v53, %v10062_v54  ;;  %v17888_v17 = vadd.f32 %v10060_v41, %v19215_v60 }
 0xd61   :  { %19220 = vst [vmem:[#allocation95_spill] sm:$0xff] %v17914_v40  ;;  %v17918_v54 = vadd.f32 %v10071_v59, %v19221_v25 }
 0xd62   :  { %19216 = vst [vmem:[#allocation96_spill] sm:$0xff] %v17888_v17  ;;  %v17897_v11 = vadd.f32 %v10063_v12, %v19217_v28  ;;  %v10200_v6 = vsel %vm115_vm0, %v17888_v17, 0.0  ;;  %v10206_v12 = vsel %vm115_vm0, %v17914_v40, 0.0 }
 0xd63   :  { %19222 = vst [vmem:[#allocation57_spill] sm:$0xff] %v17918_v54 }
 0xd64   :  { %19218 = vst [vmem:[#allocation58_spill] sm:$0xff] %v17897_v11  ;;  %v10203_v57 = vsel %vm115_vm0, %v17897_v11, 0.0 }
 0xd6c   :  { %v17865_v31 = vpop.f32.mrb[112].mxu1 }
 0xd6d   :  { %v10075_v18 = vpop.f32.mrb[113].mxu1  ;;  %v10084_v43 = vadd.f32 %v17865_v31, %v17743_v53 }
 0xd6e   :  { %v17867_v3 = vpop.f32.mrb[114].mxu1 }
 0xd6f   :  { %v10078_v47 = vpop.f32.mrb[115].mxu1 }
 0xd70   :  { %v10079_v60 = vadd.f32 %v17743_v53, %v10078_v47 }
 0xd7c   :  { %v17869_v13 = vpop.f32.mrb[116].mxu1 }
 0xd7d   :  { %v17871_v55 = vpop.f32.mrb[117].mxu1 }
 0xd7e   :  { %v17873_v42 = vpop.f32.mrb[118].mxu1 }
 0xd7f   :  { %v17875_v2 = vpop.f32.mrb[119].mxu1 }
 0xda0   :  { %v10142_v15 = vpop.xlane.xlu0 %10141 }
 0xda1   :  { %v10236_v4 = vmul.f32 0.03125, %v10142_v15 }
 0xda2   :  { %v10145_v22 = vpop.xlane.xlu1 %10144 }
 0xda3   :  { %v17879_v51 = vsub.f32 %v17748_v24, %v10236_v4  ;;  %v10237_v58 = vmul.f32 0.03125, %v10145_v22  ;;  %v10076_v22 = vadd.f32 %v17743_v53, %v10075_v18 }
 0xda4   :  { %v10148_v36 = vpop.xlane.xlu0 %10147 }
 0xda5   :  { %v17883_v33 = vsub.f32 %v17756_v44, %v10237_v58  ;;  %v10238_v38 = vmul.f32 0.03125, %v10148_v36  ;;  %v10300_v9 = vmul.f32 %v17879_v51, %v17879_v51 }
 0xda7   :  { %v17891_v37 = vsub.f32 %v17752_v27, %v10238_v38  ;;  %v10332_v19 = vsel %vm115_vm0, %v10300_v9, 0.0  ;;  %v10301_v62 = vmul.f32 %v17883_v33, %v17883_v33  ;;  %v10209_v9 = vsel %vm115_vm0, %v17918_v54, 0.0 }
 0xda8   :  { %10333 = vadd.xlane.f32.xlu0 %v10332_v19  ;;  %v10151_v35 = vpop.xlane.xlu0 %10150 }
 0xda9   :  { %v10239_v56 = vmul.f32 0.03125, %v10151_v35  ;;  %v10335_v48 = vsel %vm115_vm0, %v10301_v62, 0.0  ;;  %v10302_v26 = vmul.f32 %v17891_v37, %v17891_v37  ;;  %v19223_v35 = vld [vmem:[#allocation33_spill] sm:$0xff] }
 0xdaa   :  { %10336 = vadd.xlane.f32.xlu1 %v10335_v48  ;;  %v17936_v28 = vadd.f32 %v10076_v22, %v19223_v35  ;;  %v19225_v22 = vld [vmem:[#allocation35_spill] sm:$0xff] }
 0xdab   :  { %v17902_v45 = vsub.f32 %v17763_v8, %v10239_v56  ;;  %v10338_v10 = vsel %vm115_vm0, %v10302_v26, 0.0  ;;  %v19224_v26 = vld [vmem:[#allocation34_spill] sm:$0xff] }
 0xdac   :  { %10201 = vadd.xlane.f32.xlu0 %v10200_v6  ;;  %v17945_v59 = vadd.f32 %v10079_v60, %v19224_v26  ;;  %v10092_v60 = vadd.f32 %v17743_v53, %v17871_v55 }
 0xdad   :  { %v10303_v63 = vmul.f32 %v17902_v45, %v17902_v45 }
 0xdae   :  { %10204 = vadd.xlane.f32.xlu1 %v10203_v57 }
 0xdaf   :  { %v10341_v50 = vsel %vm115_vm0, %v10303_v63, 0.0 }
 0xdb0   :  { %10339 = vadd.xlane.f32.xlu0 %v10338_v10  ;;  %v10154_v15 = vpop.xlane.xlu0 %10153  ;;  %v10212_v10 = vsel %vm115_vm0, %v17936_v28, 0.0 }
 0xdb1   :  { %v10240_v4 = vmul.f32 0.03125, %v10154_v15  ;;  %v10087_v15 = vadd.f32 %v17867_v3, %v17743_v53 }
 0xdb2   :  { %10342 = vadd.xlane.f32.xlu1 %v10341_v50  ;;  %v10157_v41 = vpop.xlane.xlu1 %10156 }
 0xdb3   :  { %v17923_v58 = vsub.f32 %v17772_v32, %v10240_v4  ;;  %v10241_v36 = vmul.f32 0.03125, %v10157_v41  ;;  %v10215_v4 = vsel %vm115_vm0, %v17945_v59, 0.0  ;;  %v17964_v41 = vadd.f32 %v10084_v43, %v19225_v22  ;;  %v19227_v43 = vld [vmem:[#allocation37_spill] sm:$0xff] }
 0xdb4   :  { %10207 = vadd.xlane.f32.xlu0 %v10206_v12  ;;  %v10160_v38 = vpop.xlane.xlu0 %10159  ;;  %v13336_v22 = vld [vmem:[%s18779_s16 + $0x4] ss:$8 sps:$4 sm:$0xff]  }
 0xdb5   :  { %v17931_v19 = vsub.f32 %v17780_v52, %v10241_v36  ;;  %v10242_v18 = vmul.f32 0.03125, %v10160_v38  ;;  %v10304_v62 = vmul.f32 %v17923_v58, %v17923_v58  ;;  %v19226_v36 = vld [vmem:[#allocation36_spill] sm:$0xff]  ;;  %10749 = vmatprep.subr.bf16.mxu0 %v13336_v22 }
 0xdb6   :  { %10210 = vadd.xlane.f32.xlu1 %v10209_v9  ;;  %v10163_v56 = vpop.xlane.xlu1 %10162  ;;  %v17968_v12 = vadd.f32 %v10087_v15, %v19226_v36 }
 0xdb7   :  { %v17939_v48 = vsub.f32 %v17777_v29, %v10242_v18  ;;  %v10243_v49 = vmul.f32 0.03125, %v10163_v56  ;;  %v10344_v6 = vsel %vm115_vm0, %v10304_v62, 0.0  ;;  %v10305_v47 = vmul.f32 %v17931_v19, %v17931_v19 }
 0xdb8   :  { %10345 = vadd.xlane.f32.xlu0 %v10344_v6  ;;  %v10218_v56 = vsel %vm115_vm0, %v17964_v41, 0.0  ;;  %v10221_v6 = vsel %vm115_vm0, %v17968_v12, 0.0 }
 0xdb9   :  { %v17948_v57 = vsub.f32 %v17785_v16, %v10243_v49  ;;  %v10347_v63 = vsel %vm115_vm0, %v10305_v47, 0.0  ;;  %v10306_v25 = vmul.f32 %v17939_v48, %v17939_v48  ;;  %v10095_v47 = vadd.f32 %v17743_v53, %v17875_v2 }
 0xdba   :  { %10348 = vadd.xlane.f32.xlu1 %v10347_v63 }
 0xdbb   :  { %v10307_v50 = vmul.f32 %v17948_v57, %v17948_v57  ;;  %v10350_v31 = vsel %vm115_vm0, %v10306_v25, 0.0 }
 0xdbc   :  { %10213 = vadd.xlane.f32.xlu0 %v10212_v10  ;;  %v17988_v10 = vadd.f32 %v10092_v60, %v19227_v43  ;;  %v10100_v60 = vadd.f32 %v17869_v13, %v17743_v53 }
 0xdbd   :  { %v10353_v3 = vsel %vm115_vm0, %v10307_v50, 0.0 }
 0xdbe   :  { %10216 = vadd.xlane.f32.xlu1 %v10215_v4 }
 0xdc0   :  { %10351 = vadd.xlane.f32.xlu0 %v10350_v31  ;;  %v10166_v38 = vpop.xlane.xlu0 %10165  ;;  %v19228_v31 = vld [vmem:[#allocation38_spill] sm:$0xff] }
 0xdc1   :  { %v10244_v9 = vmul.f32 0.03125, %v10166_v38  ;;  %v18000_v36 = vadd.f32 %v10095_v47, %v19228_v31  ;;  %v13337_v47 = vld [vmem:[%s18779_s16 + $0x10] ss:$8 sps:$4 sm:$0xff]  }
 0xdc2   :  { %10354 = vadd.xlane.f32.xlu1 %v10353_v3  ;;  %v10169_v18 = vpop.xlane.xlu1 %10168  ;;  %v13334_v3 = vld [vmem:[%s18779_s16] ss:$8 sps:$4 sm:$0xff]  }
 0xdc3   :  { %v17974_v62 = vsub.f32 %v17796_v34, %v10244_v9  ;;  %v10245_v35 = vmul.f32 0.03125, %v10169_v18  ;;  %19229 = vst [vmem:[#allocation100_spill] sm:$0xff] %v18000_v36  ;;  %v10224_v18 = vsel %vm115_vm0, %v17988_v10, 0.0  ;;  %10750 = vmatpush1.bf16.msra.mxu0 %v13334_v3 }
 0xdc4   :  { %10219 = vadd.xlane.f32.xlu0 %v10218_v56  ;;  %v10172_v49 = vpop.xlane.xlu0 %10171  ;;  %v13339_v56 = vld [vmem:[%s18779_s16 + $0x14] ss:$8 sps:$4 sm:$0xff]  }
 0xdc5   :  { %v17983_v26 = vsub.f32 %v17804_v7, %v10245_v35  ;;  %v10246_v55 = vmul.f32 0.03125, %v10172_v49  ;;  %v10308_v63 = vmul.f32 %v17974_v62, %v17974_v62  ;;  %v10103_v49 = vadd.f32 %v17873_v42, %v17743_v53  ;;  %10751 = vmatprep.subr.bf16.mxu0 %v13339_v56  ;;  %v19231_v53 = vld [vmem:[#allocation40_spill] sm:$0xff] }
 0xdc6   :  { %10222 = vadd.xlane.f32.xlu1 %v10221_v6  ;;  %v10175_v25 = vpop.xlane.xlu1 %10174  ;;  %v10227_v6 = vsel %vm115_vm0, %v18000_v36, 0.0 }
 0xdc7   :  { %v17991_v15 = vsub.f32 %v17801_v20, %v10246_v55  ;;  %v10247_v4 = vmul.f32 0.03125, %v10175_v25  ;;  %v10356_v50 = vsel %vm115_vm0, %v10308_v63, 0.0  ;;  %v10309_v2 = vmul.f32 %v17983_v26, %v17983_v26  ;;  %v19230_v55 = vld [vmem:[#allocation39_spill] sm:$0xff]  ;;  %10752 = vmatpush1.bf16.msra.mxu0 %v13337_v47 }
 0xdc8   :  { %10357 = vadd.xlane.f32.xlu0 %v10356_v50  ;;  %v18028_v63 = vadd.f32 %v10100_v60, %v19230_v55  ;;  %v18032_v42 = vadd.f32 %v10103_v49, %v19231_v53 }
 0xdc9   :  { %v18003_v38 = vsub.f32 %v17809_v5, %v10247_v4  ;;  %v10359_v9 = vsel %vm115_vm0, %v10309_v2, 0.0  ;;  %v10310_v35 = vmul.f32 %v17991_v15, %v17991_v15 }
 0xdca   :  { %10360 = vadd.xlane.f32.xlu1 %v10359_v9  ;;  %v10230_v9 = vsel %vm115_vm0, %v18028_v63, 0.0 }
 0xdcb   :  { %v10311_v13 = vmul.f32 %v18003_v38, %v18003_v38  ;;  %v10362_v43 = vsel %vm115_vm0, %v10310_v35, 0.0  ;;  %v10233_v35 = vsel %vm115_vm0, %v18032_v42, 0.0 }
 0xdcc   :  { %10225 = vadd.xlane.f32.xlu0 %v10224_v18 }
 0xdcd   :  { %v10365_v50 = vsel %vm115_vm0, %v10311_v13, 0.0 }
 0xdce   :  { %10228 = vadd.xlane.f32.xlu1 %v10227_v6 }
 0xdd0   :  { %v10178_v25 = vpop.xlane.xlu0 %10177  ;;  %10363 = vadd.xlane.f32.xlu0 %v10362_v43 }
 0xdd1   :  { %v10248_v4 = vmul.f32 0.03125, %v10178_v25 }
 0xdd2   :  { %v10181_v2 = vpop.xlane.xlu1 %10180  ;;  %10366 = vadd.xlane.f32.xlu1 %v10365_v50 }
 0xdd3   :  { %v18036_v22 = vsub.f32 %v17820_v39, %v10248_v4  ;;  %v10249_v31 = vmul.f32 0.03125, %v10181_v2 }
 0xdd4   :  { %v10184_v3 = vpop.xlane.xlu0 %10183  ;;  %10231 = vadd.xlane.f32.xlu0 %v10230_v9 }
 0xdd5   :  { %v18041_v60 = vsub.f32 %v17828_v61, %v10249_v31  ;;  %v10250_v18 = vmul.f32 0.03125, %v10184_v3  ;;  %v10312_v56 = vmul.f32 %v18036_v22, %v18036_v22 }
 0xdd6   :  { %v10187_v49 = vpop.xlane.xlu1 %10186  ;;  %10234 = vadd.xlane.f32.xlu1 %v10233_v35 }
 0xdd7   :  { %v18048_v6 = vsub.f32 %v17825_v23, %v10250_v18  ;;  %v10251_v13 = vmul.f32 0.03125, %v10187_v49  ;;  %v10368_v47 = vsel %vm115_vm0, %v10312_v56, 0.0  ;;  %v10313_v55 = vmul.f32 %v18041_v60, %v18041_v60 }
 0xdd8   :  { %10369 = vadd.xlane.f32.xlu0 %v10368_v47 }
 0xdd9   :  { %v18054_v43 = vsub.f32 %v17833_v21, %v10251_v13  ;;  %v10371_v25 = vsel %vm115_vm0, %v10313_v55, 0.0  ;;  %v10314_v53 = vmul.f32 %v18048_v6, %v18048_v6 }
 0xdda   :  { %10372 = vadd.xlane.f32.xlu1 %v10371_v25 }
 0xddb   :  { %v10374_v4 = vsel %vm115_vm0, %v10314_v53, 0.0  ;;  %v10315_v50 = vmul.f32 %v18054_v43, %v18054_v43 }
 0xddc   :  { %10375 = vadd.xlane.f32.xlu0 %v10374_v4 }
 0xddd   :  { %v10377_v2 = vsel %vm115_vm0, %v10315_v50, 0.0 }
 0xdde   :  { %10378 = vadd.xlane.f32.xlu1 %v10377_v2 }
 0xde0   :  { %v10190_v31 = vpop.xlane.xlu0 %10189 }
 0xde1   :  { %v10252_v9 = vmul.f32 0.03125, %v10190_v31 }
 0xde2   :  { %v10193_v3 = vpop.xlane.xlu1 %10192 }
 0xde3   :  { %v18064_v18 = vsub.f32 %v17844_v46, %v10252_v9  ;;  %v10253_v35 = vmul.f32 0.03125, %v10193_v3 }
 0xde4   :  { %v10196_v56 = vpop.xlane.xlu0 %10195 }
 0xde5   :  { %v18067_v49 = vsub.f32 %v17852_v14, %v10253_v35  ;;  %v10254_v13 = vmul.f32 0.03125, %v10196_v56  ;;  %v10316_v47 = vmul.f32 %v18064_v18, %v18064_v18 }
 0xde6   :  { %v10199_v55 = vpop.xlane.xlu1 %10198 }
 0xde7   :  { %v18072_v25 = vsub.f32 %v17849_v1, %v10254_v13  ;;  %v10255_v53 = vmul.f32 0.03125, %v10199_v55  ;;  %v10380_v4 = vsel %vm115_vm0, %v10316_v47, 0.0  ;;  %v10317_v50 = vmul.f32 %v18067_v49, %v18067_v49 }
 0xde8   :  { %10381 = vadd.xlane.f32.xlu0 %v10380_v4 }
 0xde9   :  { %v18078_v2 = vsub.f32 %v17857_v0, %v10255_v53  ;;  %v10383_v31 = vsel %vm115_vm0, %v10317_v50, 0.0  ;;  %v10318_v9 = vmul.f32 %v18072_v25, %v18072_v25 }
 0xdea   :  { %10384 = vadd.xlane.f32.xlu1 %v10383_v31 }
 0xdeb   :  { %v10386_v3 = vsel %vm115_vm0, %v10318_v9, 0.0  ;;  %v10319_v35 = vmul.f32 %v18078_v2, %v18078_v2 }
 0xdec   :  { %10387 = vadd.xlane.f32.xlu0 %v10386_v3 }
 0xded   :  { %v10389_v56 = vsel %vm115_vm0, %v10319_v35, 0.0 }
 0xdee   :  { %10390 = vadd.xlane.f32.xlu1 %v10389_v56 }
 0xe35   :  { %v10334_v13 = vpop.xlane.xlu0 %10333 }
 0xe36   :  { %v10428_v47 = vmul.f32 0.03125, %v10334_v13 }
 0xe37   :  { %v10337_v55 = vpop.xlane.xlu1 %10336 }
 0xe38   :  { %v10460_v53 = vadd.f32 1e-05, %v10428_v47  ;;  %v10429_v4 = vmul.f32 0.03125, %v10337_v55 }
 0xe39   :  { %v10202_v14 = vpop.xlane.xlu0 %10201 }
 0xe3a   :  { %13796 = vrsqrt.f32 %v10460_v53  ;;  %v10461_v50 = vadd.f32 1e-05, %v10429_v4  ;;  %v10256_v0 = vmul.f32 0.03125, %v10202_v14 }
 0xe3b   :  { %v10205_v46 = vpop.xlane.xlu1 %10204 }
 0xe3c   :  { %13798 = vrsqrt.f32 %v10461_v50  ;;  %v18088_v31 = vsub.f32 %v17888_v17, %v10256_v0  ;;  %v10257_v9 = vmul.f32 0.03125, %v10205_v46 }
 0xe3d   :  { %v10340_v1 = vpop.xlane.xlu0 %10339 }
 0xe3e   :  { %v18091_v3 = vsub.f32 %v17897_v11, %v10257_v9  ;;  %v10430_v35 = vmul.f32 0.03125, %v10340_v1  ;;  %v10320_v56 = vmul.f32 %v18088_v31, %v18088_v31 }
 0xe3f   :  { %v10343_v13 = vpop.xlane.xlu1 %10342 }
 0xe40   :  { %v10462_v47 = vadd.f32 1e-05, %v10430_v35  ;;  %v10431_v55 = vmul.f32 0.03125, %v10343_v13  ;;  %v10392_v53 = vsel %vm115_vm0, %v10320_v56, 0.0  ;;  %v10321_v14 = vmul.f32 %v18091_v3, %v18091_v3  ;;  %v18102_v35 = vld [vmem:[%s18777_s14] ss:$0 sm:$0xff] }
 0xe41   :  { %v10208_v4 = vpop.xlane.xlu0 %10207  ;;  %10393 = vadd.xlane.f32.xlu0 %v10392_v53 }
 0xe42   :  { %13800 = vrsqrt.f32 %v10462_v47  ;;  %v10463_v46 = vadd.f32 1e-05, %v10431_v55  ;;  %v10258_v0 = vmul.f32 0.03125, %v10208_v4  ;;  %v10395_v50 = vsel %vm115_vm0, %v10321_v14, 0.0 }
 0xe43   :  { %v10211_v9 = vpop.xlane.xlu1 %10210  ;;  %10396 = vadd.xlane.f32.xlu1 %v10395_v50 }
 0xe44   :  { %v13797_v1 = vpop.eup %13796  ;;  %13802 = vrsqrt.f32 %v10463_v46  ;;  %v18105_v56 = vsub.f32 %v17914_v40, %v10258_v0  ;;  %v10259_v13 = vmul.f32 0.03125, %v10211_v9  ;;  %v18118_v0 = vld [vmem:[%s18778_s15] ss:$0 sm:$0xff] }
 0xe45   :  { %v10524_v53 = vmul.f32 %v13797_v1, %v17879_v51  ;;  %v10346_v47 = vpop.xlane.xlu0 %10345 }
 0xe46   :  { %v13799_v55 = vpop.eup %13798  ;;  %v18109_v4 = vsub.f32 %v17918_v54, %v10259_v13  ;;  %v10432_v14 = vmul.f32 0.03125, %v10346_v47  ;;  %v10322_v50 = vmul.f32 %v18105_v56, %v18105_v56 }
 0xe47   :  { %v10562_v11 = vmul.f32 %v18102_v35, %v10524_v53  ;;  %v10525_v17 = vmul.f32 %v13799_v55, %v17883_v33  ;;  %v10349_v46 = vpop.xlane.xlu1 %10348 }
 0xe48   :  { %v10464_v51 = vadd.f32 1e-05, %v10432_v14  ;;  %v10433_v9 = vmul.f32 0.03125, %v10349_v46  ;;  %v10398_v1 = vsel %vm115_vm0, %v10322_v50, 0.0  ;;  %v10323_v13 = vmul.f32 %v18109_v4, %v18109_v4 }
 0xe49   :  { %v10563_v47 = vmul.f32 %v18102_v35, %v10525_v17  ;;  %v10214_v54 = vpop.xlane.xlu0 %10213  ;;  %10399 = vadd.xlane.f32.xlu0 %v10398_v1  ;;  %v10600_v40 = vadd.f32 %v18118_v0, %v10562_v11 }
 0xe4a   :  { %13804 = vrsqrt.f32 %v10464_v51  ;;  %v10465_v53 = vadd.f32 1e-05, %v10433_v9  ;;  %v10260_v33 = vmul.f32 0.03125, %v10214_v54  ;;  %v10401_v55 = vsel %vm115_vm0, %v10323_v13, 0.0 }
 0xe4b   :  { %v10601_v61 = vadd.f32 %v18118_v0, %v10563_v47  ;;  %v10217_v14 = vpop.xlane.xlu1 %10216  ;;  %10402 = vadd.xlane.f32.xlu1 %v10401_v55 }
 0xe4c   :  { %v13801_v46 = vpop.eup %13800  ;;  %13806 = vrsqrt.f32 %v10465_v53  ;;  %v18128_v50 = vsub.f32 %v17936_v28, %v10260_v33  ;;  %v10261_v21 = vmul.f32 0.03125, %v10217_v14 }
 0xe4d   :  { %v10654_v17 = vpack.c.bf16 %v10601_v61, %v10600_v40  ;;  %v10526_v1 = vmul.f32 %v13801_v46, %v17891_v37  ;;  %v10352_v51 = vpop.xlane.xlu0 %10351 }
 0xe4e   :  { %v13803_v9 = vpop.eup %13802  ;;  %v18132_v54 = vsub.f32 %v17945_v59, %v10261_v21  ;;  %v10434_v13 = vmul.f32 0.03125, %v10352_v51  ;;  %v10324_v11 = vmul.f32 %v18128_v50, %v18128_v50 }
 0xe4f   :  { %v10564_v47 = vmul.f32 %v18102_v35, %v10526_v1  ;;  %v10527_v53 = vmul.f32 %v13803_v9, %v17902_v45  ;;  %11814 = vmatmul.mubr.msk.bf16.vlgmr.msra.gmra.mrb[104].mxu0 %vm115_vm0, %v10654_v17  ;;  %v10355_v33 = vpop.xlane.xlu1 %10354 }
 0xe50   :  { %v10466_v55 = vadd.f32 1e-05, %v10434_v13  ;;  %v10435_v61 = vmul.f32 0.03125, %v10355_v33  ;;  %v10404_v37 = vsel %vm115_vm0, %v10324_v11, 0.0  ;;  %v10325_v40 = vmul.f32 %v18132_v54, %v18132_v54  ;;  %10791 = vmatprep.mubr.bf16.mxu0 %v19156_v30 }
 0xe51   :  { %v10565_v21 = vmul.f32 %v18102_v35, %v10527_v53  ;;  %v10220_v14 = vpop.xlane.xlu0 %10219  ;;  %10405 = vadd.xlane.f32.xlu0 %v10404_v37  ;;  %v10602_v17 = vadd.f32 %v18118_v0, %v10564_v47 }
 0xe52   :  { %13808 = vrsqrt.f32 %v10466_v55  ;;  %v10467_v46 = vadd.f32 1e-05, %v10435_v61  ;;  %v10262_v1 = vmul.f32 0.03125, %v10220_v14  ;;  %v10407_v45 = vsel %vm115_vm0, %v10325_v40, 0.0 }
 0xe53   :  { %v10603_v51 = vadd.f32 %v18118_v0, %v10565_v21  ;;  %v10223_v9 = vpop.xlane.xlu1 %10222  ;;  %10408 = vadd.xlane.f32.xlu1 %v10407_v45 }
 0xe54   :  { %v13805_v13 = vpop.eup %13804  ;;  %13810 = vrsqrt.f32 %v10467_v46  ;;  %v18148_v11 = vsub.f32 %v17964_v41, %v10262_v1  ;;  %v10263_v33 = vmul.f32 0.03125, %v10223_v9 }
 0xe55   :  { %v10655_v53 = vpack.c.bf16 %v10603_v51, %v10602_v17  ;;  %v10528_v37 = vmul.f32 %v13805_v13, %v17923_v58  ;;  %v10358_v55 = vpop.xlane.xlu0 %10357 }
 0xe56   :  { %v13807_v61 = vpop.eup %13806  ;;  %v18152_v14 = vsub.f32 %v17968_v12, %v10263_v33  ;;  %v10436_v40 = vmul.f32 0.03125, %v10358_v55  ;;  %v10326_v47 = vmul.f32 %v18148_v11, %v18148_v11 }
 0xe57   :  { %v10566_v21 = vmul.f32 %v18102_v35, %v10528_v37  ;;  %v10529_v46 = vmul.f32 %v13807_v61, %v17931_v19  ;;  %11815 = vmatmul.mubr.msk.bf16.gmra.mrb[108].mxu0 %vm115_vm0, %v10655_v53  ;;  %v10361_v1 = vpop.xlane.xlu1 %10360 }
 0xe58   :  { %v10468_v45 = vadd.f32 1e-05, %v10436_v40  ;;  %v10437_v17 = vmul.f32 0.03125, %v10361_v1  ;;  %v10410_v58 = vsel %vm115_vm0, %v10326_v47, 0.0  ;;  %v10327_v51 = vmul.f32 %v18152_v14, %v18152_v14  ;;  %10801 = vmatprep.mubr.bf16.mxu0 %v19156_v30 }
 0xe59   :  { %v10567_v9 = vmul.f32 %v18102_v35, %v10529_v46  ;;  %10411 = vadd.xlane.f32.xlu0 %v10410_v58  ;;  %v10226_v13 = vpop.xlane.xlu0 %10225  ;;  %v10604_v53 = vadd.f32 %v18118_v0, %v10566_v21 }
 0xe5a   :  { %13812 = vrsqrt.f32 %v10468_v45  ;;  %v10469_v33 = vadd.f32 1e-05, %v10437_v17  ;;  %v10264_v37 = vmul.f32 0.03125, %v10226_v13  ;;  %v10413_v19 = vsel %vm115_vm0, %v10327_v51, 0.0 }
 0xe5b   :  { %v10605_v55 = vadd.f32 %v18118_v0, %v10567_v9  ;;  %10414 = vadd.xlane.f32.xlu1 %v10413_v19  ;;  %v10229_v61 = vpop.xlane.xlu1 %10228 }
 0xe5c   :  { %v13809_v40 = vpop.eup %13808  ;;  %13814 = vrsqrt.f32 %v10469_v33  ;;  %v18168_v47 = vsub.f32 %v17988_v10, %v10264_v37  ;;  %v10265_v1 = vmul.f32 0.03125, %v10229_v61 }
 0xe5d   :  { %v10656_v46 = vpack.c.bf16 %v10605_v55, %v10604_v53  ;;  %v10530_v58 = vmul.f32 %v13809_v40, %v17939_v48  ;;  %v10364_v45 = vpop.xlane.xlu0 %10363 }
 0xe5e   :  { %v13811_v17 = vpop.eup %13810  ;;  %v18172_v13 = vsub.f32 %v18000_v36, %v10265_v1  ;;  %v10438_v51 = vmul.f32 0.03125, %v10364_v45  ;;  %v10328_v21 = vmul.f32 %v18168_v47, %v18168_v47 }
 0xe5f   :  { %v10568_v9 = vmul.f32 %v18102_v35, %v10530_v58  ;;  %v10531_v33 = vmul.f32 %v13811_v17, %v17948_v57  ;;  %11816 = vmatmul.mubr.msk.bf16.gmra.mrb[112].mxu0 %vm115_vm0, %v10656_v46  ;;  %v10367_v37 = vpop.xlane.xlu1 %10366 }
 0xe60   :  { %v10470_v19 = vadd.f32 1e-05, %v10438_v51  ;;  %v10439_v53 = vmul.f32 0.03125, %v10367_v37  ;;  %v10416_v48 = vsel %vm115_vm0, %v10328_v21, 0.0  ;;  %v10329_v55 = vmul.f32 %v18172_v13, %v18172_v13  ;;  %10811 = vmatprep.mubr.bf16.mxu0 %v19156_v30 }
 0xe61   :  { %v10569_v61 = vmul.f32 %v18102_v35, %v10531_v33  ;;  %10417 = vadd.xlane.f32.xlu0 %v10416_v48  ;;  %v10232_v40 = vpop.xlane.xlu0 %10231  ;;  %v10606_v46 = vadd.f32 %v18118_v0, %v10568_v9 }
 0xe62   :  { %13816 = vrsqrt.f32 %v10470_v19  ;;  %v10471_v1 = vadd.f32 1e-05, %v10439_v53  ;;  %v10266_v58 = vmul.f32 0.03125, %v10232_v40  ;;  %v10419_v57 = vsel %vm115_vm0, %v10329_v55, 0.0 }
 0xe63   :  { %v10607_v45 = vadd.f32 %v18118_v0, %v10569_v61  ;;  %10420 = vadd.xlane.f32.xlu1 %v10419_v57  ;;  %v10235_v17 = vpop.xlane.xlu1 %10234 }
 0xe64   :  { %v13813_v51 = vpop.eup %13812  ;;  %13818 = vrsqrt.f32 %v10471_v1  ;;  %v18188_v21 = vsub.f32 %v18028_v63, %v10266_v58  ;;  %v10267_v37 = vmul.f32 0.03125, %v10235_v17 }
 0xe65   :  { %v10657_v33 = vpack.c.bf16 %v10607_v45, %v10606_v46  ;;  %v10532_v48 = vmul.f32 %v13813_v51, %v17974_v62  ;;  %v10370_v19 = vpop.xlane.xlu0 %10369 }
 0xe66   :  { %v13815_v53 = vpop.eup %13814  ;;  %v18192_v40 = vsub.f32 %v18032_v42, %v10267_v37  ;;  %v10440_v55 = vmul.f32 0.03125, %v10370_v19  ;;  %v10330_v9 = vmul.f32 %v18188_v21, %v18188_v21 }
 0xe67   :  { %v10570_v61 = vmul.f32 %v18102_v35, %v10532_v48  ;;  %v10533_v1 = vmul.f32 %v13815_v53, %v17983_v26  ;;  %11817 = vmatmul.mubr.msk.bf16.gmra.mrb[116].mxu0 %vm115_vm0, %v10657_v33  ;;  %v10373_v58 = vpop.xlane.xlu1 %10372 }
 0xe68   :  { %v10472_v57 = vadd.f32 1e-05, %v10440_v55  ;;  %v10441_v46 = vmul.f32 0.03125, %v10373_v58  ;;  %v10422_v62 = vsel %vm115_vm0, %v10330_v9, 0.0  ;;  %v10331_v45 = vmul.f32 %v18192_v40, %v18192_v40  ;;  %10821 = vmatprep.mubr.bf16.mxu0 %v19156_v30 }
 0xe69   :  { %v10571_v17 = vmul.f32 %v18102_v35, %v10533_v1  ;;  %10423 = vadd.xlane.f32.xlu0 %v10422_v62  ;;  %v10376_v51 = vpop.xlane.xlu0 %10375  ;;  %v10608_v33 = vadd.f32 %v18118_v0, %v10570_v61 }
 0xe6a   :  { %13820 = vrsqrt.f32 %v10472_v57  ;;  %v10473_v37 = vadd.f32 1e-05, %v10441_v46  ;;  %v10442_v48 = vmul.f32 0.03125, %v10376_v51  ;;  %v10425_v26 = vsel %vm115_vm0, %v10331_v45, 0.0 }
 0xe6b   :  { %v10609_v19 = vadd.f32 %v18118_v0, %v10571_v17  ;;  %10426 = vadd.xlane.f32.xlu1 %v10425_v26  ;;  %v10379_v53 = vpop.xlane.xlu1 %10378 }
 0xe6c   :  { %v13817_v55 = vpop.eup %13816  ;;  %13822 = vrsqrt.f32 %v10473_v37  ;;  %v10474_v9 = vadd.f32 1e-05, %v10442_v48  ;;  %v10443_v58 = vmul.f32 0.03125, %v10379_v53 }
 0xe6d   :  { %v10658_v36 = vpack.c.bf16 %v10609_v19, %v10608_v33  ;;  %v10534_v1 = vmul.f32 %v13817_v55, %v17991_v15 }
 0xe6e   :  { %v13819_v62 = vpop.eup %13818  ;;  %13824 = vrsqrt.f32 %v10474_v9  ;;  %v10475_v57 = vadd.f32 1e-05, %v10443_v58 }
 0xe6f   :  { %v10572_v46 = vmul.f32 %v18102_v35, %v10534_v1  ;;  %v10535_v45 = vmul.f32 %v13819_v62, %v18003_v38  ;;  %11818 = vmatmul.mubr.msk.bf16.gmra.mrb[120].mxu0 %vm115_vm0, %v10658_v36 }
 0xe70   :  { %13826 = vrsqrt.f32 %v10475_v57  ;;  %10831 = vmatprep.mubr.bf16.mxu0 %v19156_v30 }
 0xe71   :  { %v10573_v61 = vmul.f32 %v18102_v35, %v10535_v45  ;;  %v10610_v17 = vadd.f32 %v18118_v0, %v10572_v46 }
 0xe73   :  { %v10611_v51 = vadd.f32 %v18118_v0, %v10573_v61 }
 0xe74   :  { %v13821_v37 = vpop.eup %13820 }
 0xe75   :  { %v10659_v15 = vpack.c.bf16 %v10611_v51, %v10610_v17  ;;  %v10536_v48 = vmul.f32 %v13821_v37, %v18036_v22  ;;  %v10382_v26 = vpop.xlane.xlu0 %10381 }
 0xe76   :  { %v13823_v33 = vpop.eup %13822  ;;  %v10444_v19 = vmul.f32 0.03125, %v10382_v26 }
 0xe77   :  { %v10574_v38 = vmul.f32 %v18102_v35, %v10536_v48  ;;  %v10537_v36 = vmul.f32 %v13823_v33, %v18041_v60  ;;  %v10385_v53 = vpop.xlane.xlu1 %10384  ;;  %11819 = vmatmul.mubr.msk.bf16.gmra.mrb[124].mxu0 %vm115_vm0, %v10659_v15 }
 0xe78   :  { %v13825_v55 = vpop.eup %13824  ;;  %v10476_v9 = vadd.f32 1e-05, %v10444_v19  ;;  %v10445_v58 = vmul.f32 0.03125, %v10385_v53  ;;  %10841 = vmatprep.mubr.bf16.mxu0 %v19156_v30 }
 0xe79   :  { %v10575_v1 = vmul.f32 %v18102_v35, %v10537_v36  ;;  %v10388_v62 = vpop.xlane.xlu0 %10387  ;;  %v10612_v45 = vadd.f32 %v18118_v0, %v10574_v38  ;;  %v10538_v60 = vmul.f32 %v13825_v55, %v18048_v6 }
 0xe7a   :  { %v13827_v57 = vpop.eup %13826  ;;  %13828 = vrsqrt.f32 %v10476_v9  ;;  %v10477_v22 = vadd.f32 1e-05, %v10445_v58  ;;  %v10446_v46 = vmul.f32 0.03125, %v10388_v62 }
 0xe7b   :  { %v10613_v61 = vadd.f32 %v18118_v0, %v10575_v1  ;;  %v10539_v17 = vmul.f32 %v13827_v57, %v18054_v43  ;;  %v10391_v51 = vpop.xlane.xlu1 %10390  ;;  %v10576_v19 = vmul.f32 %v18102_v35, %v10538_v60 }
 0xe7c   :  { %13830 = vrsqrt.f32 %v10477_v22  ;;  %v10478_v37 = vadd.f32 1e-05, %v10446_v46  ;;  %v10447_v15 = vmul.f32 0.03125, %v10391_v51 }
 0xe7d   :  { %v10660_v48 = vpack.c.bf16 %v10613_v61, %v10612_v45  ;;  %v10577_v26 = vmul.f32 %v18102_v35, %v10539_v17  ;;  %v10614_v43 = vadd.f32 %v18118_v0, %v10576_v19  ;;  %v13346_v19 = vld [vmem:[%s18781_s18 + $0x30] sm:$0xff]  }
 0xe7e   :  { %13832 = vrsqrt.f32 %v10478_v37  ;;  %v10479_v33 = vadd.f32 1e-05, %v10447_v15  ;;  %v13342_v15 = vld [vmem:[%s18781_s18 + $0x10] sm:$0xff]  }
 0xe7f   :  { %11820 = vmatmul.mubr.msk.bf16.gmra.mrb[128].mxu0 %vm115_vm0, %v10660_v48  ;;  %v10615_v6 = vadd.f32 %v18118_v0, %v10577_v26  ;;  %v13343_v48 = vld [vmem:[%s18781_s18 + $0x18] sm:$0xff]   ;;  %v13344_v26 = vld [vmem:[%s18781_s18 + $0x20] sm:$0xff]  }
 0xe80   :  { %13834 = vrsqrt.f32 %v10479_v33  ;;  %10851 = vmatprep.mubr.bf16.mxu0 %v19156_v30  ;;  %v13345_v33 = vld [vmem:[%s18781_s18 + $0x28] sm:$0xff]  }
 0xe81   :  { %v10661_v36 = vpack.c.bf16 %v10615_v6, %v10614_v43  ;;  %v13347_v6 = vld [vmem:[%s18781_s18 + $0x38] sm:$0xff]  }
 0xe84   :  { %v13829_v38 = vpop.eup %13828 }
 0xe85   :  { %v10540_v53 = vmul.f32 %v13829_v38, %v18064_v18 }
 0xe86   :  { %v13831_v55 = vpop.eup %13830 }
 0xe87   :  { %v10578_v9 = vmul.f32 %v18102_v35, %v10540_v53  ;;  %v10541_v58 = vmul.f32 %v13831_v55, %v18067_v49  ;;  %11821 = vmatmul.mubr.msk.bf16.gmra.mrb[132].mxu0 %vm115_vm0, %v10661_v36 }
 0xe88   :  { %v13833_v1 = vpop.eup %13832  ;;  %10861 = vmatprep.mubr.bf16.mxu0 %v19156_v30 }
 0xe89   :  { %v10579_v62 = vmul.f32 %v18102_v35, %v10541_v58  ;;  %v10616_v22 = vadd.f32 %v18118_v0, %v10578_v9  ;;  %v10542_v45 = vmul.f32 %v13833_v1, %v18072_v25  ;;  %v13340_v25 = vld [vmem:[%s18781_s18] sm:$0xff]  }
 0xe8a   :  { %v13835_v57 = vpop.eup %13834  ;;  %13175 = vmatprep.subr.bf16.mxu1 %v13340_v25 }
 0xe8b   :  { %v10617_v46 = vadd.f32 %v18118_v0, %v10579_v62  ;;  %v10543_v18 = vmul.f32 %v13835_v57, %v18078_v2  ;;  %v10580_v49 = vmul.f32 %v18102_v35, %v10542_v45  ;;  %13176 = vmatpush3.bf16.msra.mxu1 %v13340_v25  ;;  %v13341_v2 = vld [vmem:[%s18781_s18 + $0x8] sm:$0xff]  }
 0xe8c   :  { %13177 = vmatprep.subr.bf16.mxu1 %v13341_v2 }
 0xe8d   :  { %v10662_v61 = vpack.c.bf16 %v10617_v46, %v10616_v22  ;;  %v10581_v60 = vmul.f32 %v18102_v35, %v10543_v18  ;;  %v10618_v51 = vadd.f32 %v18118_v0, %v10580_v49 }
 0xe8f   :  { %11822 = vmatmul.mubr.msk.bf16.gmra.mrb[136].mxu0 %vm115_vm0, %v10662_v61  ;;  %v10619_v17 = vadd.f32 %v18118_v0, %v10581_v60  ;;  %13178 = vmatpush3.bf16.msra.mxu1 %v13341_v2 }
 0xe90   :  { %10871 = vmatprep.mubr.bf16.mxu0 %v19156_v30  ;;  %13179 = vmatprep.subr.bf16.mxu1 %v13342_v15 }
 0xe91   :  { %v10663_v37 = vpack.c.bf16 %v10619_v17, %v10618_v51 }
 0xe93   :  { %13180 = vmatpush3.bf16.msra.mxu1 %v13342_v15 }
 0xe94   :  { %13181 = vmatprep.subr.bf16.mxu1 %v13343_v48 }
 0xe97   :  { %11823 = vmatmul.mubr.msk.bf16.gmra.mrb[140].mxu0 %vm115_vm0, %v10663_v37  ;;  %13182 = vmatpush3.bf16.msra.mxu1 %v13343_v48 }
 0xe98   :  { %10881 = vmatprep.mubr.bf16.mxu0 %v19156_v30  ;;  %13183 = vmatprep.subr.bf16.mxu1 %v13344_v26 }
 0xe9b   :  { %13184 = vmatpush3.bf16.msra.mxu1 %v13344_v26 }
 0xe9c   :  { %13185 = vmatprep.subr.bf16.mxu1 %v13345_v33 }
 0xe9f   :  { %13186 = vmatpush3.bf16.msra.mxu1 %v13345_v33 }
 0xea0   :  { %13187 = vmatprep.subr.bf16.mxu1 %v13346_v19 }
 0xea3   :  { %13188 = vmatpush3.bf16.msra.mxu1 %v13346_v19 }
 0xea4   :  { %13189 = vmatprep.subr.bf16.mxu1 %v13347_v6 }
 0xea7   :  { %13190 = vmatpush3.bf16.msra.mxu1 %v13347_v6 }
 0xece   :  { %v10394_v43 = vpop.xlane.xlu0 %10393 }
 0xecf   :  { %v10448_v38 = vmul.f32 0.03125, %v10394_v43 }
 0xed0   :  { %v10397_v36 = vpop.xlane.xlu1 %10396 }
 0xed1   :  { %v10480_v53 = vadd.f32 1e-05, %v10448_v38  ;;  %v10449_v55 = vmul.f32 0.03125, %v10397_v36 }
 0xed3   :  { %13836 = vrsqrt.f32 %v10480_v53  ;;  %v10481_v9 = vadd.f32 1e-05, %v10449_v55 }
 0xed5   :  { %13838 = vrsqrt.f32 %v10481_v9 }
 0xed6   :  { %v10400_v58 = vpop.xlane.xlu0 %10399 }
 0xed7   :  { %v10450_v1 = vmul.f32 0.03125, %v10400_v58 }
 0xed8   :  { %v10403_v62 = vpop.xlane.xlu1 %10402 }
 0xed9   :  { %v10482_v57 = vadd.f32 1e-05, %v10450_v1  ;;  %v10451_v22 = vmul.f32 0.03125, %v10403_v62 }
 0xedb   :  { %13840 = vrsqrt.f32 %v10482_v57  ;;  %v10483_v46 = vadd.f32 1e-05, %v10451_v22 }
 0xedd   :  { %v13837_v45 = vpop.eup %13836  ;;  %13842 = vrsqrt.f32 %v10483_v46 }
 0xede   :  { %v10544_v18 = vmul.f32 %v13837_v45, %v18088_v31  ;;  %v10406_v61 = vpop.xlane.xlu0 %10405 }
 0xedf   :  { %v13839_v60 = vpop.eup %13838  ;;  %v10452_v49 = vmul.f32 0.03125, %v10406_v61 }
 0xee0   :  { %v10582_v17 = vmul.f32 %v18102_v35, %v10544_v18  ;;  %v10545_v51 = vmul.f32 %v13839_v60, %v18091_v3  ;;  %v10409_v37 = vpop.xlane.xlu1 %10408 }
 0xee1   :  { %v10484_v25 = vadd.f32 1e-05, %v10452_v49  ;;  %v10453_v2 = vmul.f32 0.03125, %v10409_v37 }
 0xee2   :  { %v10583_v15 = vmul.f32 %v18102_v35, %v10545_v51  ;;  %v10620_v26 = vadd.f32 %v18118_v0, %v10582_v17 }
 0xee3   :  { %13844 = vrsqrt.f32 %v10484_v25  ;;  %v10485_v48 = vadd.f32 1e-05, %v10453_v2 }
 0xee4   :  { %v10621_v33 = vadd.f32 %v18118_v0, %v10583_v15 }
 0xee5   :  { %v13841_v19 = vpop.eup %13840  ;;  %13846 = vrsqrt.f32 %v10485_v48 }
 0xee6   :  { %v10664_v31 = vpack.c.bf16 %v10621_v33, %v10620_v26  ;;  %v10546_v6 = vmul.f32 %v13841_v19, %v18105_v56  ;;  %v10412_v43 = vpop.xlane.xlu0 %10411 }
 0xee7   :  { %v13843_v38 = vpop.eup %13842  ;;  %v10454_v36 = vmul.f32 0.03125, %v10412_v43 }
 0xee8   :  { %v10584_v3 = vmul.f32 %v18102_v35, %v10546_v6  ;;  %v10547_v53 = vmul.f32 %v13843_v38, %v18109_v4  ;;  %v10415_v55 = vpop.xlane.xlu1 %10414  ;;  %11824 = vmatmul.mubr.msk.bf16.gmra.mrb[144].mxu0 %vm115_vm0, %v10664_v31 }
 0xee9   :  { %v10486_v9 = vadd.f32 1e-05, %v10454_v36  ;;  %v10455_v58 = vmul.f32 0.03125, %v10415_v55  ;;  %10891 = vmatprep.mubr.bf16.mxu0 %v19156_v30 }
 0xeea   :  { %v10585_v1 = vmul.f32 %v18102_v35, %v10547_v53  ;;  %v10622_v56 = vadd.f32 %v18118_v0, %v10584_v3 }
 0xeeb   :  { %13848 = vrsqrt.f32 %v10486_v9  ;;  %v10487_v62 = vadd.f32 1e-05, %v10455_v58 }
 0xeec   :  { %v10623_v57 = vadd.f32 %v18118_v0, %v10585_v1 }
 0xeed   :  { %v13845_v22 = vpop.eup %13844  ;;  %13850 = vrsqrt.f32 %v10487_v62 }
 0xeee   :  { %v10665_v46 = vpack.c.bf16 %v10623_v57, %v10622_v56  ;;  %v10548_v4 = vmul.f32 %v13845_v22, %v18128_v50  ;;  %v10418_v45 = vpop.xlane.xlu0 %10417 }
 0xeef   :  { %v13847_v18 = vpop.eup %13846  ;;  %v10456_v61 = vmul.f32 0.03125, %v10418_v45 }
 0xef0   :  { %v10586_v60 = vmul.f32 %v18102_v35, %v10548_v4  ;;  %v10549_v49 = vmul.f32 %v13847_v18, %v18132_v54  ;;  %v10421_v17 = vpop.xlane.xlu1 %10420  ;;  %11825 = vmatmul.mubr.msk.bf16.gmra.mrb[148].mxu0 %vm115_vm0, %v10665_v46 }
 0xef1   :  { %v10488_v51 = vadd.f32 1e-05, %v10456_v61  ;;  %v10457_v37 = vmul.f32 0.03125, %v10421_v17  ;;  %10901 = vmatprep.mubr.bf16.mxu0 %v19156_v30 }
 0xef2   :  { %v10587_v25 = vmul.f32 %v18102_v35, %v10549_v49  ;;  %v10624_v50 = vadd.f32 %v18118_v0, %v10586_v60 }
 0xef3   :  { %13852 = vrsqrt.f32 %v10488_v51  ;;  %v10489_v2 = vadd.f32 1e-05, %v10457_v37 }
 0xef4   :  { %v10625_v15 = vadd.f32 %v18118_v0, %v10587_v25  ;;  %v19232_v25 = vld [vmem:[#allocation8_spill] sm:$0xff] }
 0xef5   :  { %v13849_v48 = vpop.eup %13848  ;;  %13854 = vrsqrt.f32 %v10489_v2  ;;  %v19233_v2 = vsub.s32 1, %v19232_v25 }
 0xef6   :  { %v10666_v26 = vpack.c.bf16 %v10625_v15, %v10624_v50  ;;  %v10550_v54 = vmul.f32 %v13849_v48, %v18148_v11  ;;  %v10424_v33 = vpop.xlane.xlu0 %10423 }
 0xef7   :  { %v13851_v19 = vpop.eup %13850  ;;  %v10458_v31 = vmul.f32 0.03125, %v10424_v33 }
 0xef8   :  { %v10588_v6 = vmul.f32 %v18102_v35, %v10550_v54  ;;  %v10551_v43 = vmul.f32 %v13851_v19, %v18152_v14  ;;  %v10427_v38 = vpop.xlane.xlu1 %10426  ;;  %11826 = vmatmul.mubr.msk.bf16.gmra.mrb[152].mxu0 %vm115_vm0, %v10666_v26 }
 0xef9   :  { %v10490_v36 = vadd.f32 1e-05, %v10458_v31  ;;  %v10459_v3 = vmul.f32 0.03125, %v10427_v38  ;;  %10911 = vmatprep.mubr.bf16.mxu0 %v19156_v30 }
 0xefa   :  { %v10589_v53 = vmul.f32 %v18102_v35, %v10551_v43  ;;  %v10626_v11 = vadd.f32 %v18118_v0, %v10588_v6 }
 0xefb   :  { %13856 = vrsqrt.f32 %v10490_v36  ;;  %v10491_v55 = vadd.f32 1e-05, %v10459_v3 }
 0xefc   :  { %v10627_v9 = vadd.f32 %v18118_v0, %v10589_v53 }
 0xefd   :  { %v13853_v58 = vpop.eup %13852  ;;  %13858 = vrsqrt.f32 %v10491_v55 }
 0xefe   :  { %v10667_v1 = vpack.c.bf16 %v10627_v9, %v10626_v11  ;;  %v10552_v14 = vmul.f32 %v13853_v58, %v18168_v47 }
 0xeff   :  { %v13855_v62 = vpop.eup %13854 }
 0xf00   :  { %v10590_v56 = vmul.f32 %v18102_v35, %v10552_v14  ;;  %v10553_v57 = vmul.f32 %v13855_v62, %v18172_v13  ;;  %11827 = vmatmul.mubr.msk.bf16.gmra.mrb[156].mxu0 %vm115_vm0, %v10667_v1 }
 0xf01   :  { %10921 = vmatprep.mubr.bf16.mxu0 %v19156_v30 }
 0xf02   :  { %v10591_v22 = vmul.f32 %v18102_v35, %v10553_v57  ;;  %v10628_v46 = vadd.f32 %v18118_v0, %v10590_v56 }
 0xf04   :  { %v10629_v4 = vadd.f32 %v18118_v0, %v10591_v22 }
 0xf05   :  { %v13857_v45 = vpop.eup %13856 }
 0xf06   :  { %v10668_v18 = vpack.c.bf16 %v10629_v4, %v10628_v46  ;;  %v10554_v61 = vmul.f32 %v13857_v45, %v18188_v21  ;;  %v10636_v21 = vld [vmem:[%s18780_s17] sm:$0x3] }
 0xf07   :  { %v13859_v47 = vpop.eup %13858 }
 0xf08   :  { %v10592_v60 = vmul.f32 %v18102_v35, %v10554_v61  ;;  %v10555_v49 = vmul.f32 %v13859_v47, %v18192_v40  ;;  %11828 = vmatmul.mubr.msk.bf16.gmra.mrb[160].mxu0 %vm115_vm0, %v10668_v18  ;;  %v18325_v40 = vrot.slane %v10636_v21, %v19233_v2 }
 0xf09   :  { %10931 = vmatprep.mubr.bf16.mxu0 %v19156_v30 }
 0xf0a   :  { %v10593_v13 = vmul.f32 %v18102_v35, %v10555_v49  ;;  %v10630_v17 = vadd.f32 %v18118_v0, %v10592_v60 }
 0xf0c   :  { %v10631_v51 = vadd.f32 %v18118_v0, %v10593_v13 }
 0xf0e   :  { %v10669_v37 = vpack.c.bf16 %v10631_v51, %v10630_v17 }
 0xf10   :  { %11829 = vmatmul.mubr.msk.bf16.gmra.mrb[164].mxu0 %vm115_vm0, %v10669_v37 }
 0xf22   :  { %v10783_v50 = vpop.f32.mrb[104].mxu0 }
 0xf23   :  { %v10785_v15 = vpop.f32.mrb[105].mxu0 }
 0xf24   :  { %v10786_v30 = vadd.f32 %v10785_v15, %v18325_v40  ;;  %v10787_v35 = vpop.f32.mrb[106].mxu0 }
 0xf25   :  { %v10789_v48 = vpop.f32.mrb[107].mxu0 }
 0xf26   :  { %v10974_v26 = vmul.f32 0.044715, %v10786_v30  ;;  %v10790_v0 = vadd.f32 %v10789_v48, %v18325_v40  ;;  %v19234_v48 = vsub.s32 0, %v19232_v25 }
 0xf28   :  { %v11006_v54 = vmul.f32 %v10974_v26, %v10786_v30  ;;  %v10975_v33 = vmul.f32 0.044715, %v10790_v0  ;;  %v18362_v26 = vrot.slane %v10636_v21, %v19234_v48 }
 0xf2a   :  { %v11038_v19 = vmul.f32 %v11006_v54, %v10786_v30  ;;  %v11007_v31 = vmul.f32 %v10975_v33, %v10790_v0  ;;  %v18329_v6 = vpop.f32.mrb[108].mxu0 }
 0xf2b   :  { %v10795_v43 = vpop.f32.mrb[109].mxu0 }
 0xf2c   :  { %v11070_v38 = vadd.f32 %v11038_v19, %v10786_v30  ;;  %v11039_v36 = vmul.f32 %v11007_v31, %v10790_v0  ;;  %v18332_v3 = vadd.f32 %v10795_v43, %v18325_v40  ;;  %v18334_v53 = vpop.f32.mrb[110].mxu0 }
 0xf2d   :  { %v10799_v55 = vpop.f32.mrb[111].mxu0 }
 0xf2e   :  { %v11071_v11 = vadd.f32 %v11039_v36, %v10790_v0  ;;  %v10976_v9 = vmul.f32 0.044715, %v18332_v3  ;;  %v18338_v58 = vadd.f32 %v10799_v55, %v18325_v40  ;;  %v11102_v1 = vmul.f32 0.7978846, %v11070_v38 }
 0xf30   :  { %v11008_v14 = vmul.f32 %v10976_v9, %v18332_v3  ;;  %v10977_v62 = vmul.f32 0.044715, %v18338_v58  ;;  %v11103_v56 = vmul.f32 0.7978846, %v11071_v11  ;;  %13860 = vtanh.f32 %v11102_v1 }
 0xf31   :  { %v10942_v1 = vmul.f32 0.5, %v10786_v30 }
 0xf32   :  { %v11040_v57 = vmul.f32 %v11008_v14, %v18332_v3  ;;  %v11009_v22 = vmul.f32 %v10977_v62, %v18338_v58  ;;  %v18344_v46 = vpop.f32.mrb[112].mxu0  ;;  %13862 = vtanh.f32 %v11103_v56  ;;  %v10943_v14 = vmul.f32 0.5, %v10790_v0 }
 0xf33   :  { %v10805_v4 = vpop.f32.mrb[113].mxu0  ;;  %v10784_v56 = vadd.f32 %v10783_v50, %v18362_v26 }
 0xf34   :  { %v11072_v45 = vadd.f32 %v11040_v57, %v18332_v3  ;;  %v11041_v18 = vmul.f32 %v11009_v22, %v18338_v58  ;;  %v18349_v61 = vadd.f32 %v10805_v4, %v18325_v40  ;;  %v18351_v47 = vpop.f32.mrb[114].mxu0 }
 0xf35   :  { %v10809_v60 = vpop.f32.mrb[115].mxu0 }
 0xf36   :  { %v11104_v49 = vmul.f32 0.7978846, %v11072_v45  ;;  %v11073_v13 = vadd.f32 %v11041_v18, %v18338_v58  ;;  %v10978_v17 = vmul.f32 0.044715, %v18349_v61  ;;  %v18356_v51 = vadd.f32 %v10809_v60, %v18325_v40 }
 0xf37   :  { %v10788_v45 = vadd.f32 %v10787_v35, %v18362_v26  ;;  %v10944_v35 = vmul.f32 0.5, %v18332_v3 }
 0xf38   :  { %13864 = vtanh.f32 %v11104_v49  ;;  %v11105_v37 = vmul.f32 0.7978846, %v11073_v13  ;;  %v11010_v2 = vmul.f32 %v10978_v17, %v18349_v61  ;;  %v10979_v15 = vmul.f32 0.044715, %v18356_v51 }
 0xf3a   :  { %13866 = vtanh.f32 %v11105_v37  ;;  %v11042_v54 = vmul.f32 %v11010_v2, %v18349_v61  ;;  %v11011_v33 = vmul.f32 %v10979_v15, %v18356_v51  ;;  %v18366_v19 = vpop.f32.mrb[116].mxu0  ;;  %v13861_v31 = vpop.eup %13860 }
 0xf3b   :  { %v10815_v43 = vpop.f32.mrb[117].mxu0  ;;  %v11166_v21 = vadd.f32 1.0, %v13861_v31 }
 0xf3c   :  { %v13863_v38 = vpop.eup %13862  ;;  %v11074_v36 = vadd.f32 %v11042_v54, %v18349_v61  ;;  %v11043_v55 = vmul.f32 %v11011_v33, %v18356_v51  ;;  %v18371_v11 = vadd.f32 %v10815_v43, %v18325_v40  ;;  %v18373_v25 = vpop.f32.mrb[118].mxu0 }
 0xf3d   :  { %v10819_v9 = vpop.f32.mrb[119].mxu0  ;;  %v11167_v62 = vadd.f32 1.0, %v13863_v38  ;;  %v11198_v18 = vmul.f32 %v11166_v21, %v10942_v1 }
 0xf3e   :  { %v11075_v57 = vadd.f32 %v11043_v55, %v18356_v51  ;;  %v10980_v22 = vmul.f32 0.044715, %v18371_v11  ;;  %v18379_v4 = vadd.f32 %v10819_v9, %v18325_v40  ;;  %v11106_v49 = vmul.f32 0.7978846, %v11074_v36 }
 0xf3f   :  { %v11199_v60 = vmul.f32 %v11167_v62, %v10943_v14  ;;  %v11230_v17 = vmul.f32 %v11198_v18, %v10784_v56  ;;  %v10794_v9 = vadd.f32 %v18329_v6, %v18362_v26  ;;  %v10945_v14 = vmul.f32 0.5, %v18338_v58 }
 0xf40   :  { %v11012_v13 = vmul.f32 %v10980_v22, %v18371_v11  ;;  %v10981_v30 = vmul.f32 0.044715, %v18379_v4  ;;  %v11107_v0 = vmul.f32 0.7978846, %v11075_v57  ;;  %13868 = vtanh.f32 %v11106_v49 }
 0xf41   :  { %v11231_v37 = vmul.f32 %v11199_v60, %v10788_v45  ;;  %v10798_v60 = vadd.f32 %v18334_v53, %v18362_v26 }
 0xf42   :  { %v13865_v50 = vpop.eup %13864  ;;  %v11044_v2 = vmul.f32 %v11012_v13, %v18371_v11  ;;  %v11013_v15 = vmul.f32 %v10981_v30, %v18379_v4  ;;  %v18386_v48 = vpop.f32.mrb[120].mxu0  ;;  %13870 = vtanh.f32 %v11107_v0 }
 0xf43   :  { %v11168_v54 = vadd.f32 1.0, %v13865_v50  ;;  %v10825_v33 = vpop.f32.mrb[121].mxu0  ;;  %v11262_v31 = vpack.c.bf16 %v11231_v37, %v11230_v17 }
 0xf44   :  { %v13867_v43 = vpop.eup %13866  ;;  %v11076_v38 = vadd.f32 %v11044_v2, %v18371_v11  ;;  %v11045_v36 = vmul.f32 %v11013_v15, %v18379_v4  ;;  %v18392_v55 = vadd.f32 %v10825_v33, %v18325_v40  ;;  %v18394_v21 = vpop.f32.mrb[122].mxu0 }
 0xf45   :  { %v11200_v1 = vmul.f32 %v11168_v54, %v10944_v35  ;;  %v11169_v3 = vadd.f32 1.0, %v13867_v43  ;;  %v10829_v62 = vpop.f32.mrb[123].mxu0  ;;  %13191 = vmatprep.mubr.bf16.mxu1 %v11262_v31 }
 0xf46   :  { %v11108_v56 = vmul.f32 0.7978846, %v11076_v38  ;;  %v11077_v57 = vadd.f32 %v11045_v36, %v18379_v4  ;;  %v10982_v22 = vmul.f32 0.044715, %v18392_v55  ;;  %v18402_v45 = vadd.f32 %v10829_v62, %v18325_v40 }
 0xf47   :  { %v11232_v18 = vmul.f32 %v11200_v1, %v10794_v9  ;;  %v11201_v49 = vmul.f32 %v11169_v3, %v10945_v14  ;;  %v10946_v36 = vmul.f32 0.5, %v18349_v61  ;;  %v10947_v9 = vmul.f32 0.5, %v18356_v51 }
 0xf48   :  { %13872 = vtanh.f32 %v11108_v56  ;;  %v11109_v6 = vmul.f32 0.7978846, %v11077_v57  ;;  %v11014_v58 = vmul.f32 %v10982_v22, %v18392_v55  ;;  %v10983_v13 = vmul.f32 0.044715, %v18402_v45 }
 0xf49   :  { %v11233_v30 = vmul.f32 %v11201_v49, %v10798_v60  ;;  %v10804_v14 = vadd.f32 %v18344_v46, %v18362_v26  ;;  %v10808_v57 = vadd.f32 %v18351_v47, %v18362_v26  ;;  %v10948_v47 = vmul.f32 0.5, %v18371_v11 }
 0xf4a   :  { %13874 = vtanh.f32 %v11109_v6  ;;  %v11046_v0 = vmul.f32 %v11014_v58, %v18392_v55  ;;  %v11015_v17 = vmul.f32 %v10983_v13, %v18402_v45  ;;  %v18410_v37 = vpop.f32.mrb[124].mxu0  ;;  %v13869_v50 = vpop.eup %13868 }
 0xf4b   :  { %v11263_v2 = vpack.c.bf16 %v11233_v30, %v11232_v18  ;;  %v10835_v15 = vpop.f32.mrb[125].mxu0  ;;  %v11170_v43 = vadd.f32 1.0, %v13869_v50 }
 0xf4c   :  { %v13871_v35 = vpop.eup %13870  ;;  %v11078_v53 = vadd.f32 %v11046_v0, %v18392_v55  ;;  %v11047_v54 = vmul.f32 %v11015_v17, %v18402_v45  ;;  %v18415_v33 = vadd.f32 %v10835_v15, %v18325_v40  ;;  %v18417_v31 = vpop.f32.mrb[126].mxu0 }
 0xf4d   :  { %v10839_v38 = vpop.f32.mrb[127].mxu0  ;;  %13192 = vmatmul.mubr.bf16.vlgmr.msra.gmra.mrb[120].mxu1 %v11263_v2  ;;  %v11171_v1 = vadd.f32 1.0, %v13871_v35  ;;  %v11202_v22 = vmul.f32 %v11170_v43, %v10946_v36 }
 0xf4e   :  { %v11079_v3 = vadd.f32 %v11047_v54, %v18402_v45  ;;  %v10984_v62 = vmul.f32 0.044715, %v18415_v33  ;;  %v18426_v56 = vadd.f32 %v10839_v38, %v18325_v40  ;;  %v11110_v60 = vmul.f32 0.7978846, %v11078_v53 }
 0xf4f   :  { %v11203_v18 = vmul.f32 %v11171_v1, %v10947_v9  ;;  %v11234_v6 = vmul.f32 %v11202_v22, %v10804_v14  ;;  %v10814_v38 = vadd.f32 %v18366_v19, %v18362_v26  ;;  %v10949_v9 = vmul.f32 0.5, %v18379_v4 }
 0xf50   :  { %v11016_v61 = vmul.f32 %v10984_v62, %v18415_v33  ;;  %v10985_v51 = vmul.f32 0.044715, %v18426_v56  ;;  %v11111_v49 = vmul.f32 0.7978846, %v11079_v3  ;;  %13876 = vtanh.f32 %v11110_v60 }
 0xf51   :  { %v11235_v46 = vmul.f32 %v11203_v18, %v10808_v57  ;;  %v10818_v18 = vadd.f32 %v18373_v25, %v18362_v26 }
 0xf52   :  { %v13873_v58 = vpop.eup %13872  ;;  %v11048_v13 = vmul.f32 %v11016_v61, %v18415_v33  ;;  %v11017_v30 = vmul.f32 %v10985_v51, %v18426_v56  ;;  %v18434_v0 = vpop.f32.mrb[128].mxu0  ;;  %13878 = vtanh.f32 %v11111_v49 }
 0xf53   :  { %v11172_v17 = vadd.f32 1.0, %v13873_v58  ;;  %v10845_v50 = vpop.f32.mrb[129].mxu0  ;;  %v11264_v2 = vpack.c.bf16 %v11235_v46, %v11234_v6 }
 0xf54   :  { %v13875_v15 = vpop.eup %13874  ;;  %v11080_v35 = vadd.f32 %v11048_v13, %v18415_v33  ;;  %v11049_v53 = vmul.f32 %v11017_v30, %v18426_v56  ;;  %v18440_v54 = vadd.f32 %v10845_v50, %v18325_v40  ;;  %v18442_v43 = vpop.f32.mrb[130].mxu0 }
 0xf55   :  { %v11204_v36 = vmul.f32 %v11172_v17, %v10948_v47  ;;  %v11173_v11 = vadd.f32 1.0, %v13875_v15  ;;  %v10849_v1 = vpop.f32.mrb[131].mxu0  ;;  %13195 = vmatprep.mubr.bf16.mxu1 %v11264_v2 }
 0xf56   :  { %v11112_v14 = vmul.f32 0.7978846, %v11080_v35  ;;  %v11081_v3 = vadd.f32 %v11049_v53, %v18426_v56  ;;  %v10986_v62 = vmul.f32 0.044715, %v18440_v54  ;;  %v18450_v57 = vadd.f32 %v10849_v1, %v18325_v40 }
 0xf57   :  { %v11236_v22 = vmul.f32 %v11204_v36, %v10814_v38  ;;  %v11205_v60 = vmul.f32 %v11173_v11, %v10949_v9  ;;  %v10950_v53 = vmul.f32 0.5, %v18392_v55  ;;  %v10951_v38 = vmul.f32 0.5, %v18402_v45 }
 0xf58   :  { %13880 = vtanh.f32 %v11112_v14  ;;  %v11113_v19 = vmul.f32 0.7978846, %v11081_v3  ;;  %v11018_v4 = vmul.f32 %v10986_v62, %v18440_v54  ;;  %v10987_v61 = vmul.f32 0.044715, %v18450_v57 }
 0xf59   :  { %v11237_v51 = vmul.f32 %v11205_v60, %v10818_v18  ;;  %v10824_v9 = vadd.f32 %v18386_v48, %v18362_v26  ;;  %v10828_v3 = vadd.f32 %v18394_v21, %v18362_v26  ;;  %v10952_v21 = vmul.f32 0.5, %v18415_v33 }
 0xf5a   :  { %13882 = vtanh.f32 %v11113_v19  ;;  %v11050_v49 = vmul.f32 %v11018_v4, %v18440_v54  ;;  %v11019_v6 = vmul.f32 %v10987_v61, %v18450_v57  ;;  %v18458_v46 = vpop.f32.mrb[132].mxu0  ;;  %v13877_v58 = vpop.eup %13876 }
 0xf5b   :  { %v11265_v13 = vpack.c.bf16 %v11237_v51, %v11236_v22  ;;  %v10855_v30 = vpop.f32.mrb[133].mxu0  ;;  %v11174_v15 = vadd.f32 1.0, %v13877_v58 }
 0xf5c   :  { %v13879_v47 = vpop.eup %13878  ;;  %v11082_v25 = vadd.f32 %v11050_v49, %v18440_v54  ;;  %v11051_v17 = vmul.f32 %v11019_v6, %v18450_v57  ;;  %v18463_v50 = vadd.f32 %v10855_v30, %v18325_v40  ;;  %v18465_v2 = vpop.f32.mrb[134].mxu0 }
 0xf5d   :  { %v10859_v35 = vpop.f32.mrb[135].mxu0  ;;  %13196 = vmatmul.mubr.bf16.gmra.mrb[124].mxu1 %v11265_v13  ;;  %v11175_v36 = vadd.f32 1.0, %v13879_v47  ;;  %v11206_v62 = vmul.f32 %v11174_v15, %v10950_v53 }
 0xf5e   :  { %v11083_v11 = vadd.f32 %v11051_v17, %v18450_v57  ;;  %v10988_v1 = vmul.f32 0.044715, %v18463_v50  ;;  %v18474_v14 = vadd.f32 %v10859_v35, %v18325_v40  ;;  %v11114_v18 = vmul.f32 0.7978846, %v11082_v25 }
 0xf5f   :  { %v11207_v22 = vmul.f32 %v11175_v36, %v10951_v38  ;;  %v11238_v19 = vmul.f32 %v11206_v62, %v10824_v9  ;;  %v10834_v35 = vadd.f32 %v18410_v37, %v18362_v26  ;;  %v10953_v38 = vmul.f32 0.5, %v18426_v56 }
 0xf60   :  { %v11020_v55 = vmul.f32 %v10988_v1, %v18463_v50  ;;  %v10989_v45 = vmul.f32 0.044715, %v18474_v14  ;;  %v11115_v60 = vmul.f32 0.7978846, %v11083_v11  ;;  %13884 = vtanh.f32 %v11114_v18 }
 0xf61   :  { %v11239_v48 = vmul.f32 %v11207_v22, %v10828_v3  ;;  %v10838_v22 = vadd.f32 %v18417_v31, %v18362_v26 }
 0xf62   :  { %v13881_v4 = vpop.eup %13880  ;;  %v11052_v61 = vmul.f32 %v11020_v55, %v18463_v50  ;;  %v11021_v51 = vmul.f32 %v10989_v45, %v18474_v14  ;;  %v18482_v49 = vpop.f32.mrb[136].mxu0  ;;  %13886 = vtanh.f32 %v11115_v60 }
 0xf63   :  { %v11176_v6 = vadd.f32 1.0, %v13881_v4  ;;  %v10865_v58 = vpop.f32.mrb[137].mxu0  ;;  %v11266_v13 = vpack.c.bf16 %v11239_v48, %v11238_v19 }
 0xf64   :  { %v13883_v30 = vpop.eup %13882  ;;  %v11084_v47 = vadd.f32 %v11052_v61, %v18463_v50  ;;  %v11053_v25 = vmul.f32 %v11021_v51, %v18474_v14  ;;  %v18488_v17 = vadd.f32 %v10865_v58, %v18325_v40  ;;  %v18490_v15 = vpop.f32.mrb[138].mxu0 }
 0xf65   :  { %v11208_v53 = vmul.f32 %v11176_v6, %v10952_v21  ;;  %v11177_v33 = vadd.f32 1.0, %v13883_v30  ;;  %v10869_v36 = vpop.f32.mrb[139].mxu0  ;;  %13199 = vmatprep.mubr.bf16.mxu1 %v11266_v13 }
 0xf66   :  { %v11116_v9 = vmul.f32 0.7978846, %v11084_v47  ;;  %v11085_v11 = vadd.f32 %v11053_v25, %v18474_v14  ;;  %v10990_v1 = vmul.f32 0.044715, %v18488_v17  ;;  %v18498_v3 = vadd.f32 %v10869_v36, %v18325_v40 }
 0xf67   :  { %v11240_v62 = vmul.f32 %v11208_v53, %v10834_v35  ;;  %v11209_v18 = vmul.f32 %v11177_v33, %v10953_v38  ;;  %v10954_v25 = vmul.f32 0.5, %v18440_v54  ;;  %v10955_v35 = vmul.f32 0.5, %v18450_v57 }
 0xf68   :  { %13888 = vtanh.f32 %v11116_v9  ;;  %v11117_v37 = vmul.f32 0.7978846, %v11085_v11  ;;  %v11022_v56 = vmul.f32 %v10990_v1, %v18488_v17  ;;  %v10991_v55 = vmul.f32 0.044715, %v18498_v3 }
 0xf69   :  { %v11241_v45 = vmul.f32 %v11209_v18, %v10838_v22  ;;  %v10844_v38 = vadd.f32 %v18434_v0, %v18362_v26  ;;  %v10848_v11 = vadd.f32 %v18442_v43, %v18362_v26 }
 0xf6a   :  { %13890 = vtanh.f32 %v11117_v37  ;;  %v11054_v60 = vmul.f32 %v11022_v56, %v18488_v17  ;;  %v11023_v19 = vmul.f32 %v10991_v55, %v18498_v3  ;;  %v18506_v48 = vpop.f32.mrb[140].mxu0  ;;  %v13885_v4 = vpop.eup %13884 }
 0xf6b   :  { %v11267_v61 = vpack.c.bf16 %v11241_v45, %v11240_v62  ;;  %v10875_v51 = vpop.f32.mrb[141].mxu0  ;;  %v11178_v30 = vadd.f32 1.0, %v13885_v4 }
 0xf6c   :  { %v13887_v21 = vpop.eup %13886  ;;  %v11086_v31 = vadd.f32 %v11054_v60, %v18488_v17  ;;  %v11055_v6 = vmul.f32 %v11023_v19, %v18498_v3  ;;  %v10876_v58 = vadd.f32 %v10875_v51, %v18325_v40  ;;  %v18511_v13 = vpop.f32.mrb[142].mxu0  ;;  %v10956_v60 = vmul.f32 0.5, %v18463_v50 }
 0xf6d   :  { %v10879_v47 = vpop.f32.mrb[143].mxu0  ;;  %13200 = vmatmul.mubr.bf16.gmra.mrb[128].mxu1 %v11267_v61  ;;  %v11179_v53 = vadd.f32 1.0, %v13887_v21  ;;  %v11210_v1 = vmul.f32 %v11178_v30, %v10954_v25  ;;  %v10854_v21 = vadd.f32 %v18458_v46, %v18362_v26  ;;  %v10958_v46 = vmul.f32 0.5, %v18488_v17 }
 0xf6e   :  { %v11087_v33 = vadd.f32 %v11055_v6, %v18498_v3  ;;  %v10992_v36 = vmul.f32 0.044715, %v10876_v58  ;;  %v10880_v9 = vadd.f32 %v10879_v47, %v18325_v40  ;;  %v11118_v22 = vmul.f32 0.7978846, %v11086_v31 }
 0xf6f   :  { %v11211_v62 = vmul.f32 %v11179_v53, %v10955_v35  ;;  %v11242_v56 = vmul.f32 %v11210_v1, %v10844_v38  ;;  %v10957_v6 = vmul.f32 0.5, %v18474_v14  ;;  %v10858_v53 = vadd.f32 %v18465_v2, %v18362_v26 }
 0xf70   :  { %v11024_v18 = vmul.f32 %v10992_v36, %v10876_v58  ;;  %v10993_v37 = vmul.f32 0.044715, %v10880_v9  ;;  %v11119_v54 = vmul.f32 0.7978846, %v11087_v33  ;;  %13892 = vtanh.f32 %v11118_v22 }
 0xf71   :  { %v11243_v57 = vmul.f32 %v11211_v62, %v10848_v11  ;;  %v10959_v14 = vmul.f32 0.5, %v18498_v3  ;;  %v10868_v2 = vadd.f32 %v18490_v15, %v18362_v26 }
 0xf72   :  { %v13889_v55 = vpop.eup %13888  ;;  %v11056_v45 = vmul.f32 %v11024_v18, %v10876_v58  ;;  %v11025_v0 = vmul.f32 %v10993_v37, %v10880_v9  ;;  %13894 = vtanh.f32 %v11119_v54  ;;  %v10864_v18 = vadd.f32 %v18482_v49, %v18362_v26 }
 0xf73   :  { %v11180_v19 = vadd.f32 1.0, %v13889_v55  ;;  %v11268_v4 = vpack.c.bf16 %v11243_v57, %v11242_v56 }
 0xf74   :  { %v13891_v61 = vpop.eup %13890  ;;  %v11088_v51 = vadd.f32 %v11056_v45, %v10876_v58  ;;  %v11057_v43 = vmul.f32 %v11025_v0, %v10880_v9  ;;  %v10960_v45 = vmul.f32 0.5, %v10876_v58 }
 0xf75   :  { %v11212_v31 = vmul.f32 %v11180_v19, %v10956_v60  ;;  %v11181_v30 = vadd.f32 1.0, %v13891_v61  ;;  %13203 = vmatprep.mubr.bf16.mxu1 %v11268_v4  ;;  %v10874_v19 = vadd.f32 %v18506_v48, %v18362_v26  ;;  %v10961_v4 = vmul.f32 0.5, %v10880_v9 }
 0xf76   :  { %v11120_v47 = vmul.f32 0.7978846, %v11088_v51  ;;  %v11089_v25 = vadd.f32 %v11057_v43, %v10880_v9  ;;  %v10878_v51 = vadd.f32 %v18511_v13, %v18362_v26 }
 0xf77   :  { %v11244_v35 = vmul.f32 %v11212_v31, %v10854_v21  ;;  %v11213_v50 = vmul.f32 %v11181_v30, %v10957_v6 }
 0xf78   :  { %13896 = vtanh.f32 %v11120_v47  ;;  %v11121_v38 = vmul.f32 0.7978846, %v11089_v25 }
 0xf79   :  { %v11245_v33 = vmul.f32 %v11213_v50, %v10858_v53 }
 0xf7a   :  { %13898 = vtanh.f32 %v11121_v38  ;;  %v13893_v36 = vpop.eup %13892 }
 0xf7b   :  { %v11269_v11 = vpack.c.bf16 %v11245_v33, %v11244_v35  ;;  %v11182_v62 = vadd.f32 1.0, %v13893_v36 }
 0xf7c   :  { %v13895_v1 = vpop.eup %13894 }
 0xf7d   :  { %13204 = vmatmul.mubr.bf16.gmra.mrb[132].mxu1 %v11269_v11  ;;  %v11183_v22 = vadd.f32 1.0, %v13895_v1  ;;  %v11214_v37 = vmul.f32 %v11182_v62, %v10958_v46 }
 0xf7f   :  { %v11215_v54 = vmul.f32 %v11183_v22, %v10959_v14  ;;  %v11246_v56 = vmul.f32 %v11214_v37, %v10864_v18 }
 0xf81   :  { %v11247_v57 = vmul.f32 %v11215_v54, %v10868_v2 }
 0xf82   :  { %v13897_v55 = vpop.eup %13896 }
 0xf83   :  { %v11184_v0 = vadd.f32 1.0, %v13897_v55  ;;  %v11270_v60 = vpack.c.bf16 %v11247_v57, %v11246_v56 }
 0xf84   :  { %v13899_v17 = vpop.eup %13898 }
 0xf85   :  { %v11216_v3 = vmul.f32 %v11184_v0, %v10960_v45  ;;  %v11185_v61 = vadd.f32 1.0, %v13899_v17  ;;  %13207 = vmatprep.mubr.bf16.mxu1 %v11270_v60 }
 0xf87   :  { %v11248_v49 = vmul.f32 %v11216_v3, %v10874_v19  ;;  %v11217_v15 = vmul.f32 %v11185_v61, %v10961_v4 }
 0xf89   :  { %v11249_v43 = vmul.f32 %v11217_v15, %v10878_v51 }
 0xf8b   :  { %v11271_v21 = vpack.c.bf16 %v11249_v43, %v11248_v49 }
 0xf8d   :  { %13208 = vmatmul.mubr.bf16.gmra.mrb[136].mxu1 %v11271_v21 }
 0xfbb   :  { %v10883_v31 = vpop.f32.mrb[144].mxu0 }
 0xfbc   :  { %v10885_v58 = vpop.f32.mrb[145].mxu0 }
 0xfbd   :  { %v10886_v6 = vadd.f32 %v10885_v58, %v18325_v40  ;;  %v10887_v30 = vpop.f32.mrb[146].mxu0 }
 0xfbe   :  { %v10889_v47 = vpop.f32.mrb[147].mxu0 }
 0xfbf   :  { %v10994_v25 = vmul.f32 0.044715, %v10886_v6  ;;  %v10890_v48 = vadd.f32 %v10889_v47, %v18325_v40 }
 0xfc1   :  { %v11026_v9 = vmul.f32 %v10994_v25, %v10886_v6  ;;  %v10995_v35 = vmul.f32 0.044715, %v10890_v48 }
 0xfc3   :  { %v11058_v53 = vmul.f32 %v11026_v9, %v10886_v6  ;;  %v11027_v50 = vmul.f32 %v10995_v35, %v10890_v48  ;;  %v18539_v38 = vpop.f32.mrb[148].mxu0 }
 0xfc4   :  { %v10895_v13 = vpop.f32.mrb[149].mxu0 }
 0xfc5   :  { %v11090_v33 = vadd.f32 %v11058_v53, %v10886_v6  ;;  %v11059_v36 = vmul.f32 %v11027_v50, %v10890_v48  ;;  %v18542_v11 = vadd.f32 %v10895_v13, %v18325_v40  ;;  %v18544_v1 = vpop.f32.mrb[150].mxu0 }
 0xfc6   :  { %v10899_v46 = vpop.f32.mrb[151].mxu0 }
 0xfc7   :  { %v11091_v62 = vadd.f32 %v11059_v36, %v10890_v48  ;;  %v10996_v14 = vmul.f32 0.044715, %v18542_v11  ;;  %v18548_v22 = vadd.f32 %v10899_v46, %v18325_v40  ;;  %v11122_v18 = vmul.f32 0.7978846, %v11090_v33 }
 0xfc9   :  { %v11028_v37 = vmul.f32 %v10996_v14, %v18542_v11  ;;  %v10997_v2 = vmul.f32 0.044715, %v18548_v22  ;;  %v11123_v54 = vmul.f32 0.7978846, %v11091_v62  ;;  %13900 = vtanh.f32 %v11122_v18 }
 0xfca   :  { %v10962_v14 = vmul.f32 0.5, %v10886_v6  ;;  %v10963_v18 = vmul.f32 0.5, %v10890_v48 }
 0xfcb   :  { %v11060_v56 = vmul.f32 %v11028_v37, %v18542_v11  ;;  %v11029_v57 = vmul.f32 %v10997_v2, %v18548_v22  ;;  %v18554_v55 = vpop.f32.mrb[152].mxu0  ;;  %13902 = vtanh.f32 %v11123_v54  ;;  %v10884_v2 = vadd.f32 %v10883_v31, %v18362_v26 }
 0xfcc   :  { %v10905_v45 = vpop.f32.mrb[153].mxu0 }
 0xfcd   :  { %v11092_v0 = vadd.f32 %v11060_v56, %v18542_v11  ;;  %v11061_v60 = vmul.f32 %v11029_v57, %v18548_v22  ;;  %v18559_v17 = vadd.f32 %v10905_v45, %v18325_v40  ;;  %v18561_v19 = vpop.f32.mrb[154].mxu0  ;;  %v10888_v45 = vadd.f32 %v10887_v30, %v18362_v26 }
 0xfce   :  { %v10909_v3 = vpop.f32.mrb[155].mxu0  ;;  %v10964_v30 = vmul.f32 0.5, %v18542_v11 }
 0xfcf   :  { %v11124_v4 = vmul.f32 0.7978846, %v11092_v0  ;;  %v11093_v61 = vadd.f32 %v11061_v60, %v18548_v22  ;;  %v10998_v49 = vmul.f32 0.044715, %v18559_v17  ;;  %v18566_v51 = vadd.f32 %v10909_v3, %v18325_v40 }
 0xfd1   :  { %13904 = vtanh.f32 %v11124_v4  ;;  %v11125_v15 = vmul.f32 0.7978846, %v11093_v61  ;;  %v11030_v43 = vmul.f32 %v10998_v49, %v18559_v17  ;;  %v10999_v21 = vmul.f32 0.044715, %v18566_v51 }
 0xfd3   :  { %13906 = vtanh.f32 %v11125_v15  ;;  %v11062_v58 = vmul.f32 %v11030_v43, %v18559_v17  ;;  %v11031_v47 = vmul.f32 %v10999_v21, %v18566_v51  ;;  %v18572_v25 = vpop.f32.mrb[156].mxu0  ;;  %v13901_v9 = vpop.eup %13900 }
 0xfd4   :  { %v10915_v35 = vpop.f32.mrb[157].mxu0  ;;  %v11186_v46 = vadd.f32 1.0, %v13901_v9 }
 0xfd5   :  { %v13903_v53 = vpop.eup %13902  ;;  %v11094_v50 = vadd.f32 %v11062_v58, %v18559_v17  ;;  %v11063_v13 = vmul.f32 %v11031_v47, %v18566_v51  ;;  %v18577_v33 = vadd.f32 %v10915_v35, %v18325_v40  ;;  %v18579_v36 = vpop.f32.mrb[158].mxu0 }
 0xfd6   :  { %v10919_v62 = vpop.f32.mrb[159].mxu0  ;;  %v11187_v37 = vadd.f32 1.0, %v13903_v53  ;;  %v11218_v0 = vmul.f32 %v11186_v46, %v10962_v14 }
 0xfd7   :  { %v11095_v54 = vadd.f32 %v11063_v13, %v18566_v51  ;;  %v11000_v56 = vmul.f32 0.044715, %v18577_v33  ;;  %v18585_v57 = vadd.f32 %v10919_v62, %v18325_v40  ;;  %v11126_v3 = vmul.f32 0.7978846, %v11094_v50 }
 0xfd8   :  { %v11219_v60 = vmul.f32 %v11187_v37, %v10963_v18  ;;  %v11250_v61 = vmul.f32 %v11218_v0, %v10884_v2  ;;  %v10894_v62 = vadd.f32 %v18539_v38, %v18362_v26  ;;  %v10965_v18 = vmul.f32 0.5, %v18548_v22 }
 0xfd9   :  { %v11032_v4 = vmul.f32 %v11000_v56, %v18577_v33  ;;  %v11001_v6 = vmul.f32 0.044715, %v18585_v57  ;;  %v11127_v48 = vmul.f32 0.7978846, %v11095_v54  ;;  %13908 = vtanh.f32 %v11126_v3 }
 0xfda   :  { %v11251_v49 = vmul.f32 %v11219_v60, %v10888_v45  ;;  %v10898_v60 = vadd.f32 %v18544_v1, %v18362_v26 }
 0xfdb   :  { %v13905_v31 = vpop.eup %13904  ;;  %v11064_v15 = vmul.f32 %v11032_v4, %v18577_v33  ;;  %v11033_v43 = vmul.f32 %v11001_v6, %v18585_v57  ;;  %v18592_v21 = vpop.f32.mrb[160].mxu0  ;;  %13910 = vtanh.f32 %v11127_v48 }
 0xfdc   :  { %v11188_v58 = vadd.f32 1.0, %v13905_v31  ;;  %v10925_v47 = vpop.f32.mrb[161].mxu0  ;;  %v11272_v9 = vpack.c.bf16 %v11251_v49, %v11250_v61 }
 0xfdd   :  { %v13907_v35 = vpop.eup %13906  ;;  %v11096_v53 = vadd.f32 %v11064_v15, %v18577_v33  ;;  %v11065_v50 = vmul.f32 %v11033_v43, %v18585_v57  ;;  %v18598_v13 = vadd.f32 %v10925_v47, %v18325_v40  ;;  %v18600_v46 = vpop.f32.mrb[162].mxu0 }
 0xfde   :  { %v11220_v14 = vmul.f32 %v11188_v58, %v10964_v30  ;;  %v11189_v11 = vadd.f32 1.0, %v13907_v35  ;;  %v10929_v37 = vpop.f32.mrb[163].mxu0  ;;  %13211 = vmatprep.mubr.bf16.mxu1 %v11272_v9 }
 0xfdf   :  { %v11128_v2 = vmul.f32 0.7978846, %v11096_v53  ;;  %v11097_v54 = vadd.f32 %v11065_v50, %v18585_v57  ;;  %v11002_v56 = vmul.f32 0.044715, %v18598_v13  ;;  %v18608_v45 = vadd.f32 %v10929_v37, %v18325_v40 }
 0xfe0   :  { %v11252_v0 = vmul.f32 %v11220_v14, %v10894_v62  ;;  %v11221_v3 = vmul.f32 %v11189_v11, %v10965_v18  ;;  %v10966_v50 = vmul.f32 0.5, %v18559_v17  ;;  %v10967_v62 = vmul.f32 0.5, %v18566_v51 }
 0xfe1   :  { %13912 = vtanh.f32 %v11128_v2  ;;  %v11129_v38 = vmul.f32 0.7978846, %v11097_v54  ;;  %v11034_v22 = vmul.f32 %v11002_v56, %v18598_v13  ;;  %v11003_v4 = vmul.f32 0.044715, %v18608_v45 }
 0xfe2   :  { %v11253_v6 = vmul.f32 %v11221_v3, %v10898_v60  ;;  %v10904_v18 = vadd.f32 %v18554_v55, %v18362_v26  ;;  %v10908_v54 = vadd.f32 %v18561_v19, %v18362_v26 }
 0xfe3   :  { %13914 = vtanh.f32 %v11129_v38  ;;  %v11066_v48 = vmul.f32 %v11034_v22, %v18598_v13  ;;  %v11035_v61 = vmul.f32 %v11003_v4, %v18608_v45  ;;  %v18616_v49 = vpop.f32.mrb[164].mxu0  ;;  %v13909_v31 = vpop.eup %13908 }
 0xfe4   :  { %v11273_v15 = vpack.c.bf16 %v11253_v6, %v11252_v0  ;;  %v10935_v43 = vpop.f32.mrb[165].mxu0  ;;  %v11190_v35 = vadd.f32 1.0, %v13909_v31 }
 0xfe5   :  { %v13911_v30 = vpop.eup %13910  ;;  %v11098_v1 = vadd.f32 %v11066_v48, %v18598_v13  ;;  %v11067_v58 = vmul.f32 %v11035_v61, %v18608_v45  ;;  %v10936_v47 = vadd.f32 %v10935_v43, %v18325_v40  ;;  %v18621_v9 = vpop.f32.mrb[166].mxu0  ;;  %v10968_v48 = vmul.f32 0.5, %v18577_v33 }
 0xfe6   :  { %v10939_v53 = vpop.f32.mrb[167].mxu0  ;;  %13212 = vmatmul.mubr.bf16.gmra.mrb[140].mxu1 %v11273_v15  ;;  %v11191_v14 = vadd.f32 1.0, %v13911_v30  ;;  %v11222_v56 = vmul.f32 %v11190_v35, %v10966_v50  ;;  %v10914_v43 = vadd.f32 %v18572_v25, %v18362_v26  ;;  %v10970_v25 = vmul.f32 0.5, %v18598_v13 }
 0xfe7   :  { %v11099_v11 = vadd.f32 %v11067_v58, %v18608_v45  ;;  %v11004_v37 = vmul.f32 0.044715, %v10936_v47  ;;  %v10940_v2 = vadd.f32 %v10939_v53, %v18325_v40  ;;  %v11130_v60 = vmul.f32 0.7978846, %v11098_v1 }
 0xfe8   :  { %v11223_v0 = vmul.f32 %v11191_v14, %v10967_v62  ;;  %v11254_v22 = vmul.f32 %v11222_v56, %v10904_v18  ;;  %v10969_v1 = vmul.f32 0.5, %v18585_v57  ;;  %v10918_v62 = vadd.f32 %v18579_v36, %v18362_v26 }
 0xfe9   :  { %v11036_v3 = vmul.f32 %v11004_v37, %v10936_v47  ;;  %v11005_v38 = vmul.f32 0.044715, %v10940_v2  ;;  %v11131_v17 = vmul.f32 0.7978846, %v11099_v11  ;;  %13916 = vtanh.f32 %v11130_v60 }
 0xfea   :  { %v11255_v51 = vmul.f32 %v11223_v0, %v10908_v54  ;;  %v10971_v57 = vmul.f32 0.5, %v18608_v45  ;;  %v10924_v60 = vadd.f32 %v18592_v21, %v18362_v26  ;;  %v10928_v36 = vadd.f32 %v18600_v46, %v18362_v26 }
 0xfeb   :  { %v13913_v4 = vpop.eup %13912  ;;  %v11068_v6 = vmul.f32 %v11036_v3, %v10936_v47  ;;  %v11037_v55 = vmul.f32 %v11005_v38, %v10940_v2  ;;  %13918 = vtanh.f32 %v11131_v17 }
 0xfec   :  { %v11192_v61 = vadd.f32 1.0, %v13913_v4  ;;  %v11274_v40 = vpack.c.bf16 %v11255_v51, %v11254_v22  ;;  %v10972_v4 = vmul.f32 0.5, %v10936_v47 }
 0xfed   :  { %v13915_v31 = vpop.eup %13914  ;;  %v11100_v15 = vadd.f32 %v11068_v6, %v10936_v47  ;;  %v11069_v19 = vmul.f32 %v11037_v55, %v10940_v2  ;;  %v18650_v47 = vld [vmem:[%s18782_s19] ss:$0 sm:$0xff]  ;;  %s14012_s19 = smov [#allocation5]  }
 0xfee   :  { %v11224_v30 = vmul.f32 %v11192_v61, %v10968_v48  ;;  %v11193_v58 = vadd.f32 1.0, %v13915_v31  ;;  %13215 = vmatprep.mubr.bf16.mxu1 %v11274_v40  ;;  %v10934_v48 = vadd.f32 %v18616_v49, %v18362_v26  ;;  %v10973_v61 = vmul.f32 0.5, %v10940_v2  ;;  %s11562_s23 = sshll.u32 %s14012_s19, 4  ;;  %s11563_s23 = int_to_ptr.vmem [resolvable:$true] %s11562_s23 }
 0xfef   :  { %v11132_v35 = vmul.f32 0.7978846, %v11100_v15  ;;  %v11101_v53 = vadd.f32 %v11069_v19, %v10940_v2  ;;  %v10938_v31 = vadd.f32 %v18621_v9, %v18362_v26  ;;  %s13978_s9 = scalar_lea.vmem %s11563_s23, 4096  ;;  %p13983_p9 = scmp.lt.s32.totalorder %s11563_s23, %s11563_s23 }
 0xff0   :  { %v11256_v50 = vmul.f32 %v11224_v30, %v10914_v43  ;;  %v11225_v33 = vmul.f32 %v11193_v58, %v10969_v1  ;;  %p13979_p8 = scmp.ne.s32.totalorder %s11563_s23, %s13978_s9  ;;  %p13984_p10 = scmp.lt.s32.totalorder %s13978_s9, %s13978_s9 }
 0xff1   :  { %13920 = vtanh.f32 %v11132_v35  ;;  %v11133_v14 = vmul.f32 0.7978846, %v11101_v53 }
 0xff2   :  { %v11257_v18 = vmul.f32 %v11225_v33, %v10918_v62  ;;  %p13985_p11 = por %p13984_p10, %p13983_p9 }
 0xff3   :  { %13922 = vtanh.f32 %v11133_v14  ;;  %v13917_v11 = vpop.eup %13916 }
 0xff4   :  { %v11275_v37 = vpack.c.bf16 %v11257_v18, %v11256_v50  ;;  %v11194_v56 = vadd.f32 1.0, %v13917_v11  ;;  %p13986_p12 = pnand %p13985_p11, %p13979_p8 }
 0xff5   :  { %v13919_v54 = vpop.eup %13918 }
 0xff6   :  { %13216 = vmatmul.mubr.bf16.gmra.mrb[144].mxu1 %v11275_v37  ;;  %v11195_v0 = vadd.f32 1.0, %v13919_v54  ;;  %v11226_v3 = vmul.f32 %v11194_v56, %v10970_v25 }
 0xff8   :  { %v11227_v38 = vmul.f32 %v11195_v0, %v10971_v57  ;;  %v11258_v17 = vmul.f32 %v11226_v3, %v10924_v60 }
 0xffa   :  { %v11259_v22 = vmul.f32 %v11227_v38, %v10928_v36 }
 0xffb   :  { %v13921_v51 = vpop.eup %13920 }
 0xffc   :  { %v11196_v6 = vadd.f32 1.0, %v13921_v51  ;;  %v11276_v55 = vpack.c.bf16 %v11259_v22, %v11258_v17 }
 0xffd   :  { %v13923_v13 = vpop.eup %13922 }
 0xffe   :  { %v11228_v45 = vmul.f32 %v11196_v6, %v10972_v4  ;;  %v11197_v40 = vadd.f32 1.0, %v13923_v13  ;;  %13219 = vmatprep.mubr.bf16.mxu1 %v11276_v55 }
0x1000   :  { %v11260_v21 = vmul.f32 %v11228_v45, %v10934_v48  ;;  %v11229_v46 = vmul.f32 %v11197_v40, %v10973_v61  ;;  %v19235_v45 = vld [vmem:[#allocation91_spill] sm:$0xff]  ;;  %v19236_v40 = vld [vmem:[#allocation49_spill] sm:$0xff] }
0x1002   :  { %v11261_v15 = vmul.f32 %v11229_v46, %v10938_v31 }
0x1004   :  { %v11277_v19 = vpack.c.bf16 %v11261_v15, %v11260_v21 }
0x1006   :  { %13220 = vmatmul.mubr.bf16.gmra.mrb[148].mxu1 %v11277_v19  ;;  %v19237_v19 = vld [vmem:[#allocation54_spill] sm:$0xff] }
0x1020   :  { %v13193_v43 = vpop.f32.mrb[120].mxu1 }
0x1021   :  { %v11375_v49 = vadd.f32 %v13193_v43, %v18650_v47  ;;  %v11366_v30 = vpop.f32.mrb[121].mxu1 }
0x1022   :  { %v11367_v2 = vadd.f32 %v18650_v47, %v11366_v30  ;;  %v13194_v1 = vpop.f32.mrb[122].mxu1 }
0x1023   :  { %v11495_v58 = vadd.f32 %v11375_v49, %v17752_v27  ;;  %v11378_v26 = vadd.f32 %v13194_v1, %v18650_v47  ;;  %v11369_v9 = vpop.f32.mrb[123].mxu1 }
0x1024   :  { %v11493_v35 = vadd.f32 %v11367_v2, %v17748_v24  ;;  %v11370_v53 = vadd.f32 %v18650_v47, %v11369_v9  ;;  %v19238_v2 = vld [vmem:[#allocation117_spill] sm:$0xff] }
0x1025   :  { %11527 = vst.msk [vmem:[#allocation5 + $0x10] sm:$0xff] %vm115_vm0, %v11495_v58  ;;  %v11496_v50 = vadd.f32 %v11378_v26, %v17763_v8  ;;  %v19239_v26 = vld [vmem:[#allocation53_spill] sm:$0xff] }
0x1026   :  { %11525 = vst.msk [vmem:[#allocation5] sm:$0xff] %vm115_vm0, %v11493_v35  ;;  %v11494_v62 = vadd.f32 %v11370_v53, %v17756_v44  ;;  %v19240_v35 = vld [vmem:[#allocation92_spill] sm:$0xff] }
0x1027   :  { %11528 = vst.msk [vmem:[#allocation5 + $0x18] sm:$0xff] %vm115_vm0, %v11496_v50 }
0x1028   :  { %11526 = vst.msk [vmem:[#allocation5 + $0x8] sm:$0xff] %vm115_vm0, %v11494_v62 }
0x1030   :  { %v13197_v27 = vpop.f32.mrb[124].mxu1 }
0x1031   :  { %v11391_v33 = vadd.f32 %v13197_v27, %v18650_v47  ;;  %v11382_v14 = vpop.f32.mrb[125].mxu1 }
0x1032   :  { %v11383_v24 = vadd.f32 %v18650_v47, %v11382_v14  ;;  %v13198_v18 = vpop.f32.mrb[126].mxu1 }
0x1033   :  { %v11499_v11 = vadd.f32 %v11391_v33, %v17777_v29  ;;  %v11394_v37 = vadd.f32 %v13198_v18, %v18650_v47  ;;  %v11385_v8 = vpop.f32.mrb[127].mxu1 }
0x1034   :  { %v11497_v54 = vadd.f32 %v11383_v24, %v17772_v32  ;;  %v11386_v44 = vadd.f32 %v18650_v47, %v11385_v8  ;;  %v19241_v24 = vld [vmem:[#allocation95_spill] sm:$0xff]  ;;  %v19242_v8 = vld [vmem:[#allocation96_spill] sm:$0xff] }
0x1035   :  { %11531 = vst.msk [vmem:[#allocation5 + $0x30] sm:$0xff] %vm115_vm0, %v11499_v11  ;;  %v11500_v25 = vadd.f32 %v11394_v37, %v17785_v16 }
0x1036   :  { %11529 = vst.msk [vmem:[#allocation5 + $0x20] sm:$0xff] %vm115_vm0, %v11497_v54  ;;  %v11498_v56 = vadd.f32 %v11386_v44, %v17780_v52 }
0x1037   :  { %11532 = vst.msk [vmem:[#allocation5 + $0x38] sm:$0xff] %vm115_vm0, %v11500_v25  ;;  %v19243_v25 = vld [vmem:[#allocation57_spill] sm:$0xff] }
0x1038   :  { %11530 = vst.msk [vmem:[#allocation5 + $0x28] sm:$0xff] %vm115_vm0, %v11498_v56 }
0x1040   :  { %v13201_v29 = vpop.f32.mrb[128].mxu1 }
0x1041   :  { %v11407_v57 = vadd.f32 %v13201_v29, %v18650_v47  ;;  %v11398_v0 = vpop.f32.mrb[129].mxu1  ;;  %v19244_v29 = vld [vmem:[#allocation58_spill] sm:$0xff] }
0x1042   :  { %v11399_v32 = vadd.f32 %v18650_v47, %v11398_v0  ;;  %v13202_v60 = vpop.f32.mrb[130].mxu1 }
0x1043   :  { %v11503_v3 = vadd.f32 %v11407_v57, %v17801_v20  ;;  %v11410_v36 = vadd.f32 %v13202_v60, %v18650_v47  ;;  %v11401_v16 = vpop.f32.mrb[131].mxu1 }
0x1044   :  { %v11501_v38 = vadd.f32 %v11399_v32, %v17796_v34  ;;  %v11402_v52 = vadd.f32 %v18650_v47, %v11401_v16 }
0x1045   :  { %11535 = vst.msk [vmem:[#allocation5 + $0x50] sm:$0xff] %vm115_vm0, %v11503_v3  ;;  %v11504_v17 = vadd.f32 %v11410_v36, %v17809_v5 }
0x1046   :  { %11533 = vst.msk [vmem:[#allocation5 + $0x40] sm:$0xff] %vm115_vm0, %v11501_v38  ;;  %v11502_v22 = vadd.f32 %v11402_v52, %v17804_v7 }
0x1047   :  { %11536 = vst.msk [vmem:[#allocation5 + $0x58] sm:$0xff] %vm115_vm0, %v11504_v17 }
0x1048   :  { %11534 = vst.msk [vmem:[#allocation5 + $0x48] sm:$0xff] %vm115_vm0, %v11502_v22 }
0x1050   :  { %v13205_v20 = vpop.f32.mrb[132].mxu1 }
0x1051   :  { %v11423_v51 = vadd.f32 %v13205_v20, %v18650_v47  ;;  %v11414_v4 = vpop.f32.mrb[133].mxu1 }
0x1052   :  { %v11415_v34 = vadd.f32 %v18650_v47, %v11414_v4  ;;  %v13206_v6 = vpop.f32.mrb[134].mxu1 }
0x1053   :  { %v11507_v55 = vadd.f32 %v11423_v51, %v17825_v23  ;;  %v11426_v13 = vadd.f32 %v13206_v6, %v18650_v47  ;;  %v11417_v5 = vpop.f32.mrb[135].mxu1 }
0x1054   :  { %v11505_v48 = vadd.f32 %v11415_v34, %v17820_v39  ;;  %v11418_v7 = vadd.f32 %v18650_v47, %v11417_v5 }
0x1055   :  { %11539 = vst.msk [vmem:[#allocation5 + $0x70] sm:$0xff] %vm115_vm0, %v11507_v55  ;;  %v11508_v61 = vadd.f32 %v11426_v13, %v19235_v45 }
0x1056   :  { %11537 = vst.msk [vmem:[#allocation5 + $0x60] sm:$0xff] %vm115_vm0, %v11505_v48  ;;  %v11506_v21 = vadd.f32 %v11418_v7, %v19236_v40  ;;  %v19245_v7 = vld [vmem:[#allocation100_spill] sm:$0xff] }
0x1057   :  { %11540 = vst.msk [vmem:[#allocation5 + $0x78] sm:$0xff] %vm115_vm0, %v11508_v61 }
0x1058   :  { %11538 = vst.msk [vmem:[#allocation5 + $0x68] sm:$0xff] %vm115_vm0, %v11506_v21 }
0x1060   :  { %v13209_v23 = vpop.f32.mrb[136].mxu1 }
0x1061   :  { %v11439_v31 = vadd.f32 %v13209_v23, %v18650_v47  ;;  %v11430_v46 = vpop.f32.mrb[137].mxu1 }
0x1062   :  { %v11431_v39 = vadd.f32 %v18650_v47, %v11430_v46  ;;  %v13210_v15 = vpop.f32.mrb[138].mxu1 }
0x1063   :  { %v11511_v43 = vadd.f32 %v11439_v31, %v19237_v19  ;;  %v11442_v49 = vadd.f32 %v13210_v15, %v18650_v47  ;;  %v11433_v30 = vpop.f32.mrb[139].mxu1 }
0x1064   :  { %v11509_v1 = vadd.f32 %v11431_v39, %v19238_v2  ;;  %v11434_v58 = vadd.f32 %v18650_v47, %v11433_v30 }
0x1065   :  { %11543 = vst.msk [vmem:[#allocation5 + $0x90] sm:$0xff] %vm115_vm0, %v11511_v43  ;;  %v11512_v9 = vadd.f32 %v11442_v49, %v19239_v26 }
0x1066   :  { %11541 = vst.msk [vmem:[#allocation5 + $0x80] sm:$0xff] %vm115_vm0, %v11509_v1  ;;  %v11510_v53 = vadd.f32 %v11434_v58, %v19240_v35 }
0x1067   :  { %11544 = vst.msk [vmem:[#allocation5 + $0x98] sm:$0xff] %vm115_vm0, %v11512_v9 }
0x1068   :  { %11542 = vst.msk [vmem:[#allocation5 + $0x88] sm:$0xff] %vm115_vm0, %v11510_v53 }
0x10b9   :  { %v13213_v50 = vpop.f32.mrb[140].mxu1 }
0x10ba   :  { %v11455_v62 = vadd.f32 %v13213_v50, %v18650_v47  ;;  %v11446_v27 = vpop.f32.mrb[141].mxu1 }
0x10bb   :  { %v11447_v33 = vadd.f32 %v18650_v47, %v11446_v27  ;;  %v13214_v14 = vpop.f32.mrb[142].mxu1 }
0x10bc   :  { %v11515_v18 = vadd.f32 %v11455_v62, %v19241_v24  ;;  %v11458_v11 = vadd.f32 %v13214_v14, %v18650_v47  ;;  %v11449_v37 = vpop.f32.mrb[143].mxu1 }
0x10bd   :  { %v11513_v54 = vadd.f32 %v11447_v33, %v19242_v8  ;;  %v11450_v44 = vadd.f32 %v18650_v47, %v11449_v37 }
0x10be   :  { %11547 = vst.msk [vmem:[#allocation5 + $0xb0] sm:$0xff] %vm115_vm0, %v11515_v18  ;;  %v11516_v56 = vadd.f32 %v11458_v11, %v19243_v25 }
0x10bf   :  { %11545 = vst.msk [vmem:[#allocation5 + $0xa0] sm:$0xff] %vm115_vm0, %v11513_v54  ;;  %v11514_v57 = vadd.f32 %v11450_v44, %v19244_v29 }
0x10c0   :  { %11548 = vst.msk [vmem:[#allocation5 + $0xb8] sm:$0xff] %vm115_vm0, %v11516_v56 }
0x10c1   :  { %11546 = vst.msk [vmem:[#allocation5 + $0xa8] sm:$0xff] %vm115_vm0, %v11514_v57 }
0x10c9   :  { %v13217_v0 = vpop.f32.mrb[144].mxu1 }
0x10ca   :  { %v11471_v32 = vadd.f32 %v13217_v0, %v18650_v47  ;;  %v11462_v60 = vpop.f32.mrb[145].mxu1 }
0x10cb   :  { %v11463_v3 = vadd.f32 %v18650_v47, %v11462_v60  ;;  %v13218_v36 = vpop.f32.mrb[146].mxu1 }
0x10cc   :  { %v11519_v16 = vadd.f32 %v11471_v32, %v17964_v41  ;;  %v11474_v38 = vadd.f32 %v13218_v36, %v18650_v47  ;;  %v11465_v52 = vpop.f32.mrb[147].mxu1 }
0x10cd   :  { %v11517_v17 = vadd.f32 %v11463_v3, %v17936_v28  ;;  %v11466_v22 = vadd.f32 %v18650_v47, %v11465_v52 }
0x10ce   :  { %11551 = vst.msk [vmem:[#allocation5 + $0xd0] sm:$0xff] %vm115_vm0, %v11519_v16  ;;  %v11520_v20 = vadd.f32 %v11474_v38, %v17968_v12 }
0x10cf   :  { %11549 = vst.msk [vmem:[#allocation5 + $0xc0] sm:$0xff] %vm115_vm0, %v11517_v17  ;;  %v11518_v51 = vadd.f32 %v11466_v22, %v17945_v59 }
0x10d0   :  { %11552 = vst.msk [vmem:[#allocation5 + $0xd8] sm:$0xff] %vm115_vm0, %v11520_v20 }
0x10d1   :  { %11550 = vst.msk [vmem:[#allocation5 + $0xc8] sm:$0xff] %vm115_vm0, %v11518_v51 }
0x10d9   :  { %v13221_v41 = vpop.f32.mrb[148].mxu1 }
0x10da   :  { %v11487_v4 = vadd.f32 %v13221_v41, %v18650_v47  ;;  %v11478_v34 = vpop.f32.mrb[149].mxu1 }
0x10db   :  { %v11479_v28 = vadd.f32 %v18650_v47, %v11478_v34  ;;  %v13222_v6 = vpop.f32.mrb[150].mxu1 }
0x10dc   :  { %v11523_v55 = vadd.f32 %v11487_v4, %v18028_v63  ;;  %v11490_v13 = vadd.f32 %v13222_v6, %v18650_v47  ;;  %v11481_v12 = vpop.f32.mrb[151].mxu1 }
0x10dd   :  { %v11521_v59 = vadd.f32 %v11479_v28, %v17988_v10  ;;  %v11482_v5 = vadd.f32 %v18650_v47, %v11481_v12 }
0x10de   :  { %11555 = vst.msk [vmem:[#allocation5 + $0xf0] sm:$0xff] %vm115_vm0, %v11523_v55  ;;  %v11524_v48 = vadd.f32 %v11490_v13, %v18032_v42 }
0x10df   :  { %11553 = vst.msk [vmem:[#allocation5 + $0xe0] sm:$0xff] %vm115_vm0, %v11521_v59  ;;  %v11522_v45 = vadd.f32 %v11482_v5, %v19245_v7 }
0x10e0   :  { %11556 = vst.msk [vmem:[#allocation5 + $0xf8] sm:$0xff] %vm115_vm0, %v11524_v48 }
0x10e1   :  { %11554 = vst.msk [vmem:[#allocation5 + $0xe8] sm:$0xff] %vm115_vm0, %v11522_v45 }
0x10e2   :  { %13989 = shalt.err (!%p13986_p12)
}
0x10e3   :  { %s13990_s24 = scalar_lea.hbm %s18783_s20, 4096 }
0x10e4   :  { %p13991_p13 = scmp.ne.s32.totalorder %s18783_s20, %s13990_s24  ;;  %p13994_p0 = scmp.lt.u32.totalorder %s13990_s24, %s18783_s20 }
0x10e6   :  { %p13996_p1 = pnand %p13994_p0, %p13991_p13 }
0x10e8   :  { %13999 = shalt.err (!%p13996_p1)
}
0x10e9   :  { %11568 = dma.vmem_to_hbm [thread:$0]  %s11563_s23, 4096, %s18783_s20, [#allocation4], %s14005_s29, %s14005_s29, %s14006_s30  }
0x10ea   :  { %14002 = dma.done.wait [#allocation4], 4096  }
0x10eb   :  { %14003 = vsyncadd [#allocation4], 4294963200 }
0x10ec   :  { %11572 = vsyncpa [#allocation3], 1 }
0x10ed   :  { %11573 = vsyncpa [#allocation4], 1 }

</bundles_post_ra>
